<compile_context>
chip_gen: v7x
topology: tpu7x:2x2x1
jax: 0.10.0
libtpu: 0.0.40
codegen_flags: <defaults>
</compile_context>

<pallas_src>
import functools

import jax
import jax.numpy as jnp
from jax.experimental import pallas as pl
from jax.experimental.pallas import tpu as pltpu


# ----------------------------- Pallas kernel -----------------------------

def _lc2d_kernel(patch_ref, w_ref, b_ref, out_ref, *, k_chunk, o_chunk):
    # patch_ref: (B, K, P)  bf16  -- full patch tensor (same block every step)
    # w_ref:     (OT, K, P) bf16  -- this grid step's slice of out_channels
    # b_ref:     (OT, P)    f32
    # out_ref:   (B, OT, P) f32
    n_batch, k_total, _ = patch_ref.shape
    o_total = w_ref.shape[0]

    # TODO(synk): for large batch, switch the static `for b` loops to
    # lax.fori_loop(..., unroll=True) or vectorize the accumulator over B.
    for o0 in range(0, o_total, o_chunk):
        oc = min(o_chunk, o_total - o0)
        # Seed the accumulators with the bias -- saves a separate add pass.
        acc = [b_ref[o0:o0 + oc, :] for _ in range(n_batch)]      # each (oc, P) f32
        k0 = 0
        while k0 < k_total:
            kc = min(k_chunk, k_total - k0)
            # One bf16->f32 cast per weight chunk, reused for every batch row.
            wk = w_ref[o0:o0 + oc, k0:k0 + kc, :].astype(jnp.float32)   # (oc, kc, P)
            for b in range(n_batch):
                pk = patch_ref[b, k0:k0 + kc, :].astype(jnp.float32)    # (kc, P)
                # out[b, o, p] += sum_k patch[b, k, p] * w[o, k, p]
                acc[b] = acc[b] + jnp.sum(pk[None, :, :] * wk, axis=1)  # (oc, P)
            k0 += kc
        for b in range(n_batch):
            out_ref[b, o0:o0 + oc, :] = acc[b].astype(out_ref.dtype)


def _lc2d_pallas(patches, weights, bias, *, o_tile, o_chunk, k_chunk):
    """patches: (B,K,P) bf16, weights: (O,K,P) bf16, bias: (O,P) f32 -> (B,O,P) f32."""
    B, K, P = patches.shape
    O = weights.shape[0]
    assert O % o_tile == 0

    kernel = functools.partial(_lc2d_kernel, k_chunk=k_chunk, o_chunk=o_chunk)
    # NOTE: vmem_limit_bytes intentionally NOT set -- the per-step working set
    # (patch block + double-buffered weight/bias/out tiles) is ~1 MiB, well
    # under every generation's default scoped-VMEM limit.
    # TODO(synk): when P grows, add a 128-aligned P grid axis (pad the ragged
    # tail) before growing o_tile, and re-derive tiling against v7x's 64 MiB
    # physical VMEM.
    return pl.pallas_call(
        kernel,
        out_shape=jax.ShapeDtypeStruct((B, O, P), jnp.float32),
        grid_spec=pltpu.PrefetchScalarGridSpec(
            num_scalar_prefetch=0,
            grid=(O // o_tile,),
            in_specs=[
                pl.BlockSpec((B, K, P), lambda o: (0, 0, 0)),
                pl.BlockSpec((o_tile, K, P), lambda o: (o, 0, 0)),
                pl.BlockSpec((o_tile, P), lambda o: (o, 0)),
            ],
            out_specs=pl.BlockSpec((B, o_tile, P), lambda o: (0, o, 0)),
        ),
        compiler_params=pltpu.CompilerParams(
            dimension_semantics=("parallel",),
        ),
    )(patches, weights, bias)


# --------------------------- jitted forward glue ---------------------------

def _lc2d_apply(weights_bf16, bias, x, *, receptive_field_shape, stride, ry, rx,
                o_tile, o_chunk, k_chunk):
    B = x.shape[0]
    O, K, P = weights_bf16.shape
    kh, kw = receptive_field_shape
    # Single-op im2col; x is cast to bf16 first so the only inflated copy of
    # the input is already half-width.  The identity-kernel conv copies values
    # exactly, so this equals quantizing the inputs.
    # TODO(synk): for very large H,W, DMA kh-row strips of x inside the kernel
    # (memory_space=pl.ANY + make_async_copy, double-buffered per P-tile)
    # instead of materializing the kh*kw-times inflated (B, K, P) tensor in HBM.
    patches = jax.lax.conv_general_dilated_patches(
        x.astype(jnp.bfloat16),
        filter_shape=(kh, kw),
        window_strides=(stride, stride),
        padding="VALID",
    )                                             # (B, C*kh*kw, Hy, Hx)
    assert patches.shape[1] == K
    assert patches.shape[2] == ry and patches.shape[3] == rx
    patches = patches.reshape(B, K, P)            # P on lanes, no transpose
    out = _lc2d_pallas(patches, weights_bf16, bias,
                       o_tile=o_tile, o_chunk=o_chunk, k_chunk=k_chunk)
    return out.reshape(B, O, ry, rx)              # free reshape, final layout


def _tensorcores_per_device():
    """Best-effort TensorCore count addressable by one pallas_call."""
    try:
        kind = jax.devices()[0].device_kind.lower()
    except Exception:
        return 1
    # v2/v3 expose one core per device; v5e ("v5 lite") / v6e (trillium) have a
    # single TensorCore per chip.
    if any(tag in kind for tag in ("lite", "v5e", "v6e", "v2", "v3")):
        return 1
    # v4 / v5p megacore and v7x expose two TensorCores behind one device.
    return 2


# ------------------------- module-equivalent wrapper -------------------------

class LocallyConnected2D:
    def __init__(self, key, in_shape=(1, 28, 28), out_channels=16,
                 receptive_field_shape=(5, 5), stride=1):
        self.stride = stride
        self.in_channels = in_shape[0]
        self.out_channels = out_channels
        self.in_shape = in_shape
        self.receptive_field_shape = receptive_field_shape

        # Same (quirky) formula as the torch module: y-count from in_shape[-1],
        # x-count from in_shape[-2].
        # TODO(synk): non-square inputs/kernels assert-fail later (shape check
        # vs. conv output) rather than reproducing the torch module's behavior.
        n_ry = (in_shape[-1] - receptive_field_shape[0]) / stride + 1
        n_rx = (in_shape[-2] - receptive_field_shape[1]) / stride + 1
        assert int(n_ry) == n_ry and int(n_rx) == n_rx, "invalid shape combo"
        self.receptive_fields_y = int(n_ry)
        self.receptive_fields_x = int(n_rx)
        self.out_shape = (out_channels, self.receptive_fields_y, self.receptive_fields_x)

        P = self.receptive_fields_y * self.receptive_fields_x
        K = self.in_channels * receptive_field_shape[0] * receptive_field_shape[1]
        O = out_channels

        # Deterministic init mimicking nn.Linear default: U(-1/sqrt(K), 1/sqrt(K)).
        # weights[o, k, p] == W_p[o, k]  (per-position Linear weight), bias[o, p].
        kw_, kb_ = jax.random.split(key)
        bound = 1.0 / jnp.sqrt(jnp.float32(K))
        self.weights = jax.random.uniform(kw_, (O, K, P), jnp.float32, -bound, bound)
        self.bias = jax.random.uniform(kb_, (O, P), jnp.float32, -bound, bound)
        # Pre-cast ONCE at init (perf review): avoids an extra f32 pass over the
        # largest tensor inside every jitted forward call.
        self.weights_bf16 = self.weights.astype(jnp.bfloat16)

        # Generation-aware grid: one grid step per TensorCore.
        n_cores = _tensorcores_per_device()
        if n_cores >= 2 and O % 2 == 0 and O > 1:
            o_tile = O // 2          # one O-slice per TensorCore (megacore / v7x)
        else:
            o_tile = O               # single step on single-TC chips (v5e/v6e)
        o_chunk = min(8, o_tile)     # keeps f32 chunk temps within the vreg file
        k_chunk = 8                  # f32 sublane-sized contraction chunks

        self._forward = jax.jit(functools.partial(
            _lc2d_apply,
            receptive_field_shape=receptive_field_shape,
            stride=stride,
            ry=self.receptive_fields_y,
            rx=self.receptive_fields_x,
            o_tile=o_tile, o_chunk=o_chunk, k_chunk=k_chunk))

    def __call__(self, x):
        return self._forward(self.weights_bf16, self.bias, x)

    # Pure-JAX reference using the torch-style explicit slicing loop.
    # Inputs get the same bf16 rounding as the kernel path; accumulation in f32,
    # so kernel-vs-reference differences are only f32 summation-order noise.
    def reference(self, x):
        kh, kw = self.receptive_field_shape
        s = self.stride
        B = x.shape[0]
        xq = x.astype(jnp.bfloat16).astype(jnp.float32)
        wq = self.weights.astype(jnp.bfloat16).astype(jnp.float32)   # (O, K, P)
        outs = []
        for iy in range(self.receptive_fields_y):
            for ix in range(self.receptive_fields_x):
                p = iy * self.receptive_fields_x + ix
                rf = xq[:, :, iy * s:iy * s + kh, ix * s:ix * s + kw].reshape(B, -1)
                o = jnp.einsum("bk,ok->bo", rf, wq[:, :, p],
                               precision=jax.lax.Precision.HIGHEST) + self.bias[:, p]
                outs.append(o)
        out = jnp.stack(outs, axis=0)            # (P, B, O)  (torch.stack order)
        out = jnp.transpose(out, (1, 2, 0))      # (B, O, P)  (torch permute(1,2,0))
        return out.reshape(B, self.out_channels,
                           self.receptive_fields_y, self.receptive_fields_x)


# ----------------------------------- main -----------------------------------

if __name__ == "__main__":
    key = jax.random.PRNGKey(0)
    k_param, k_x = jax.random.split(key)

    # Small shapes: B=2, C=4, H=W=16, 5x5 receptive field, stride 1 -> 12x12 positions
    in_shape = (4, 16, 16)
    module = LocallyConnected2D(k_param, in_shape=in_shape, out_channels=16,
                                receptive_field_shape=(5, 5), stride=1)

    x = jax.random.normal(k_x, (2,) + in_shape, dtype=jnp.float32)

    y = jax.block_until_ready(module(x))
    assert y.shape == (2, 16, 12, 12), y.shape

    y_ref = jax.block_until_ready(module.reference(x))
    err = float(jnp.max(jnp.abs(y - y_ref)))
    assert jnp.allclose(y, y_ref, atol=1e-3, rtol=1e-3), f"mismatch vs reference: {err}"

    print("KERNEL_OK")
</pallas_src>

<mosaic_0001>
module attributes {stable_mosaic.version = 11 : i64} {
  func.func @_lc2d_kernel(%arg0: i32, %arg1: memref<2x100x144xbf16, #tpu.memory_space<vmem>>, %arg2: memref<8x100x144xbf16, #tpu.memory_space<vmem>>, %arg3: memref<8x144xf32, #tpu.memory_space<vmem>>, %arg4: memref<2x8x144xf32, #tpu.memory_space<vmem>>) attributes {dimension_semantics = [#tpu.dimension_semantics<parallel>], iteration_bounds = array<i64: 2>, scalar_prefetch = 0 : i64, scratch_operands = 0 : i64, tpu.core_type = #tpu.core_type<tc>, window_params = [{pipeline_mode = #tpu.pipeline_mode<synchronous>, transform_indices = @transform_0, window_bounds = array<i64: 2, 100, 144>}, {transform_indices = @transform_1, window_bounds = array<i64: 8, 100, 144>}, {transform_indices = @transform_2, window_bounds = array<i64: 8, 144>}, {transform_indices = @transform_3, window_bounds = array<i64: 2, 8, 144>}]} {
    %c0 = arith.constant 0 : index
    %c0_0 = arith.constant 0 : index
    %0 = vector.load %arg3[%c0, %c0_0] : memref<8x144xf32, #tpu.memory_space<vmem>>, vector<8x144xf32>
    %c0_1 = arith.constant 0 : index
    %c0_2 = arith.constant 0 : index
    %1 = vector.load %arg3[%c0_1, %c0_2] : memref<8x144xf32, #tpu.memory_space<vmem>>, vector<8x144xf32>
    %c0_3 = arith.constant 0 : index
    %c0_4 = arith.constant 0 : index
    %c0_5 = arith.constant 0 : index
    %2 = vector.load %arg2[%c0_3, %c0_4, %c0_5] : memref<8x100x144xbf16, #tpu.memory_space<vmem>>, vector<8x8x144xbf16>
    %3 = arith.extf %2 : vector<8x8x144xbf16> to vector<8x8x144xf32>
    %c0_6 = arith.constant 0 : index
    %c0_7 = arith.constant 0 : index
    %c0_8 = arith.constant 0 : index
    %4 = vector.load %arg1[%c0_6, %c0_7, %c0_8] : memref<2x100x144xbf16, #tpu.memory_space<vmem>>, vector<1x8x144xbf16>
    %5 = vector.shape_cast %4 : vector<1x8x144xbf16> to vector<8x144xbf16>
    %6 = arith.extf %5 : vector<8x144xbf16> to vector<8x144xf32>
    %7 = vector.shape_cast %6 : vector<8x144xf32> to vector<1x8x144xf32>
    %8 = vector.broadcast %7 : vector<1x8x144xf32> to vector<8x8x144xf32>
    %9 = arith.mulf %8, %3 : vector<8x8x144xf32>
    %cst = arith.constant dense<0.000000e+00> : vector<8x144xf32>
    %10 = vector.multi_reduction <add>, %9, %cst [1] : vector<8x8x144xf32> to vector<8x144xf32>
    %11 = arith.addf %0, %10 : vector<8x144xf32>
    %c1 = arith.constant 1 : index
    %c0_9 = arith.constant 0 : index
    %c0_10 = arith.constant 0 : index
    %12 = vector.load %arg1[%c1, %c0_9, %c0_10] : memref<2x100x144xbf16, #tpu.memory_space<vmem>>, vector<1x8x144xbf16>
    %13 = vector.shape_cast %12 : vector<1x8x144xbf16> to vector<8x144xbf16>
    %14 = arith.extf %13 : vector<8x144xbf16> to vector<8x144xf32>
    %15 = vector.shape_cast %14 : vector<8x144xf32> to vector<1x8x144xf32>
    %16 = vector.broadcast %15 : vector<1x8x144xf32> to vector<8x8x144xf32>
    %17 = arith.mulf %16, %3 : vector<8x8x144xf32>
    %cst_11 = arith.constant dense<0.000000e+00> : vector<8x144xf32>
    %18 = vector.multi_reduction <add>, %17, %cst_11 [1] : vector<8x8x144xf32> to vector<8x144xf32>
    %19 = arith.addf %1, %18 : vector<8x144xf32>
    %c0_12 = arith.constant 0 : index
    %c8 = arith.constant 8 : index
    %c0_13 = arith.constant 0 : index
    %20 = vector.load %arg2[%c0_12, %c8, %c0_13] : memref<8x100x144xbf16, #tpu.memory_space<vmem>>, vector<8x8x144xbf16>
    %21 = arith.extf %20 : vector<8x8x144xbf16> to vector<8x8x144xf32>
    %c0_14 = arith.constant 0 : index
    %c8_15 = arith.constant 8 : index
    %c0_16 = arith.constant 0 : index
    %22 = vector.load %arg1[%c0_14, %c8_15, %c0_16] : memref<2x100x144xbf16, #tpu.memory_space<vmem>>, vector<1x8x144xbf16>
    %23 = vector.shape_cast %22 : vector<1x8x144xbf16> to vector<8x144xbf16>
    %24 = arith.extf %23 : vector<8x144xbf16> to vector<8x144xf32>
    %25 = vector.shape_cast %24 : vector<8x144xf32> to vector<1x8x144xf32>
    %26 = vector.broadcast %25 : vector<1x8x144xf32> to vector<8x8x144xf32>
    %27 = arith.mulf %26, %21 : vector<8x8x144xf32>
    %cst_17 = arith.constant dense<0.000000e+00> : vector<8x144xf32>
    %28 = vector.multi_reduction <add>, %27, %cst_17 [1] : vector<8x8x144xf32> to vector<8x144xf32>
    %29 = arith.addf %11, %28 : vector<8x144xf32>
    %c1_18 = arith.constant 1 : index
    %c8_19 = arith.constant 8 : index
    %c0_20 = arith.constant 0 : index
    %30 = vector.load %arg1[%c1_18, %c8_19, %c0_20] : memref<2x100x144xbf16, #tpu.memory_space<vmem>>, vector<1x8x144xbf16>
    %31 = vector.shape_cast %30 : vector<1x8x144xbf16> to vector<8x144xbf16>
    %32 = arith.extf %31 : vector<8x144xbf16> to vector<8x144xf32>
    %33 = vector.shape_cast %32 : vector<8x144xf32> to vector<1x8x144xf32>
    %34 = vector.broadcast %33 : vector<1x8x144xf32> to vector<8x8x144xf32>
    %35 = arith.mulf %34, %21 : vector<8x8x144xf32>
    %cst_21 = arith.constant dense<0.000000e+00> : vector<8x144xf32>
    %36 = vector.multi_reduction <add>, %35, %cst_21 [1] : vector<8x8x144xf32> to vector<8x144xf32>
    %37 = arith.addf %19, %36 : vector<8x144xf32>
    %c0_22 = arith.constant 0 : index
    %c16 = arith.constant 16 : index
    %c0_23 = arith.constant 0 : index
    %38 = vector.load %arg2[%c0_22, %c16, %c0_23] : memref<8x100x144xbf16, #tpu.memory_space<vmem>>, vector<8x8x144xbf16>
    %39 = arith.extf %38 : vector<8x8x144xbf16> to vector<8x8x144xf32>
    %c0_24 = arith.constant 0 : index
    %c16_25 = arith.constant 16 : index
    %c0_26 = arith.constant 0 : index
    %40 = vector.load %arg1[%c0_24, %c16_25, %c0_26] : memref<2x100x144xbf16, #tpu.memory_space<vmem>>, vector<1x8x144xbf16>
    %41 = vector.shape_cast %40 : vector<1x8x144xbf16> to vector<8x144xbf16>
    %42 = arith.extf %41 : vector<8x144xbf16> to vector<8x144xf32>
    %43 = vector.shape_cast %42 : vector<8x144xf32> to vector<1x8x144xf32>
    %44 = vector.broadcast %43 : vector<1x8x144xf32> to vector<8x8x144xf32>
    %45 = arith.mulf %44, %39 : vector<8x8x144xf32>
    %cst_27 = arith.constant dense<0.000000e+00> : vector<8x144xf32>
    %46 = vector.multi_reduction <add>, %45, %cst_27 [1] : vector<8x8x144xf32> to vector<8x144xf32>
    %47 = arith.addf %29, %46 : vector<8x144xf32>
    %c1_28 = arith.constant 1 : index
    %c16_29 = arith.constant 16 : index
    %c0_30 = arith.constant 0 : index
    %48 = vector.load %arg1[%c1_28, %c16_29, %c0_30] : memref<2x100x144xbf16, #tpu.memory_space<vmem>>, vector<1x8x144xbf16>
    %49 = vector.shape_cast %48 : vector<1x8x144xbf16> to vector<8x144xbf16>
    %50 = arith.extf %49 : vector<8x144xbf16> to vector<8x144xf32>
    %51 = vector.shape_cast %50 : vector<8x144xf32> to vector<1x8x144xf32>
    %52 = vector.broadcast %51 : vector<1x8x144xf32> to vector<8x8x144xf32>
    %53 = arith.mulf %52, %39 : vector<8x8x144xf32>
    %cst_31 = arith.constant dense<0.000000e+00> : vector<8x144xf32>
    %54 = vector.multi_reduction <add>, %53, %cst_31 [1] : vector<8x8x144xf32> to vector<8x144xf32>
    %55 = arith.addf %37, %54 : vector<8x144xf32>
    %c0_32 = arith.constant 0 : index
    %c24 = arith.constant 24 : index
    %c0_33 = arith.constant 0 : index
    %56 = vector.load %arg2[%c0_32, %c24, %c0_33] : memref<8x100x144xbf16, #tpu.memory_space<vmem>>, vector<8x8x144xbf16>
    %57 = arith.extf %56 : vector<8x8x144xbf16> to vector<8x8x144xf32>
    %c0_34 = arith.constant 0 : index
    %c24_35 = arith.constant 24 : index
    %c0_36 = arith.constant 0 : index
    %58 = vector.load %arg1[%c0_34, %c24_35, %c0_36] : memref<2x100x144xbf16, #tpu.memory_space<vmem>>, vector<1x8x144xbf16>
    %59 = vector.shape_cast %58 : vector<1x8x144xbf16> to vector<8x144xbf16>
    %60 = arith.extf %59 : vector<8x144xbf16> to vector<8x144xf32>
    %61 = vector.shape_cast %60 : vector<8x144xf32> to vector<1x8x144xf32>
    %62 = vector.broadcast %61 : vector<1x8x144xf32> to vector<8x8x144xf32>
    %63 = arith.mulf %62, %57 : vector<8x8x144xf32>
    %cst_37 = arith.constant dense<0.000000e+00> : vector<8x144xf32>
    %64 = vector.multi_reduction <add>, %63, %cst_37 [1] : vector<8x8x144xf32> to vector<8x144xf32>
    %65 = arith.addf %47, %64 : vector<8x144xf32>
    %c1_38 = arith.constant 1 : index
    %c24_39 = arith.constant 24 : index
    %c0_40 = arith.constant 0 : index
    %66 = vector.load %arg1[%c1_38, %c24_39, %c0_40] : memref<2x100x144xbf16, #tpu.memory_space<vmem>>, vector<1x8x144xbf16>
    %67 = vector.shape_cast %66 : vector<1x8x144xbf16> to vector<8x144xbf16>
    %68 = arith.extf %67 : vector<8x144xbf16> to vector<8x144xf32>
    %69 = vector.shape_cast %68 : vector<8x144xf32> to vector<1x8x144xf32>
    %70 = vector.broadcast %69 : vector<1x8x144xf32> to vector<8x8x144xf32>
    %71 = arith.mulf %70, %57 : vector<8x8x144xf32>
    %cst_41 = arith.constant dense<0.000000e+00> : vector<8x144xf32>
    %72 = vector.multi_reduction <add>, %71, %cst_41 [1] : vector<8x8x144xf32> to vector<8x144xf32>
    %73 = arith.addf %55, %72 : vector<8x144xf32>
    %c0_42 = arith.constant 0 : index
    %c32 = arith.constant 32 : index
    %c0_43 = arith.constant 0 : index
    %74 = vector.load %arg2[%c0_42, %c32, %c0_43] : memref<8x100x144xbf16, #tpu.memory_space<vmem>>, vector<8x8x144xbf16>
    %75 = arith.extf %74 : vector<8x8x144xbf16> to vector<8x8x144xf32>
    %c0_44 = arith.constant 0 : index
    %c32_45 = arith.constant 32 : index
    %c0_46 = arith.constant 0 : index
    %76 = vector.load %arg1[%c0_44, %c32_45, %c0_46] : memref<2x100x144xbf16, #tpu.memory_space<vmem>>, vector<1x8x144xbf16>
    %77 = vector.shape_cast %76 : vector<1x8x144xbf16> to vector<8x144xbf16>
    %78 = arith.extf %77 : vector<8x144xbf16> to vector<8x144xf32>
    %79 = vector.shape_cast %78 : vector<8x144xf32> to vector<1x8x144xf32>
    %80 = vector.broadcast %79 : vector<1x8x144xf32> to vector<8x8x144xf32>
    %81 = arith.mulf %80, %75 : vector<8x8x144xf32>
    %cst_47 = arith.constant dense<0.000000e+00> : vector<8x144xf32>
    %82 = vector.multi_reduction <add>, %81, %cst_47 [1] : vector<8x8x144xf32> to vector<8x144xf32>
    %83 = arith.addf %65, %82 : vector<8x144xf32>
    %c1_48 = arith.constant 1 : index
    %c32_49 = arith.constant 32 : index
    %c0_50 = arith.constant 0 : index
    %84 = vector.load %arg1[%c1_48, %c32_49, %c0_50] : memref<2x100x144xbf16, #tpu.memory_space<vmem>>, vector<1x8x144xbf16>
    %85 = vector.shape_cast %84 : vector<1x8x144xbf16> to vector<8x144xbf16>
    %86 = arith.extf %85 : vector<8x144xbf16> to vector<8x144xf32>
    %87 = vector.shape_cast %86 : vector<8x144xf32> to vector<1x8x144xf32>
    %88 = vector.broadcast %87 : vector<1x8x144xf32> to vector<8x8x144xf32>
    %89 = arith.mulf %88, %75 : vector<8x8x144xf32>
    %cst_51 = arith.constant dense<0.000000e+00> : vector<8x144xf32>
    %90 = vector.multi_reduction <add>, %89, %cst_51 [1] : vector<8x8x144xf32> to vector<8x144xf32>
    %91 = arith.addf %73, %90 : vector<8x144xf32>
    %c0_52 = arith.constant 0 : index
    %c40 = arith.constant 40 : index
    %c0_53 = arith.constant 0 : index
    %92 = vector.load %arg2[%c0_52, %c40, %c0_53] : memref<8x100x144xbf16, #tpu.memory_space<vmem>>, vector<8x8x144xbf16>
    %93 = arith.extf %92 : vector<8x8x144xbf16> to vector<8x8x144xf32>
    %c0_54 = arith.constant 0 : index
    %c40_55 = arith.constant 40 : index
    %c0_56 = arith.constant 0 : index
    %94 = vector.load %arg1[%c0_54, %c40_55, %c0_56] : memref<2x100x144xbf16, #tpu.memory_space<vmem>>, vector<1x8x144xbf16>
    %95 = vector.shape_cast %94 : vector<1x8x144xbf16> to vector<8x144xbf16>
    %96 = arith.extf %95 : vector<8x144xbf16> to vector<8x144xf32>
    %97 = vector.shape_cast %96 : vector<8x144xf32> to vector<1x8x144xf32>
    %98 = vector.broadcast %97 : vector<1x8x144xf32> to vector<8x8x144xf32>
    %99 = arith.mulf %98, %93 : vector<8x8x144xf32>
    %cst_57 = arith.constant dense<0.000000e+00> : vector<8x144xf32>
    %100 = vector.multi_reduction <add>, %99, %cst_57 [1] : vector<8x8x144xf32> to vector<8x144xf32>
    %101 = arith.addf %83, %100 : vector<8x144xf32>
    %c1_58 = arith.constant 1 : index
    %c40_59 = arith.constant 40 : index
    %c0_60 = arith.constant 0 : index
    %102 = vector.load %arg1[%c1_58, %c40_59, %c0_60] : memref<2x100x144xbf16, #tpu.memory_space<vmem>>, vector<1x8x144xbf16>
    %103 = vector.shape_cast %102 : vector<1x8x144xbf16> to vector<8x144xbf16>
    %104 = arith.extf %103 : vector<8x144xbf16> to vector<8x144xf32>
    %105 = vector.shape_cast %104 : vector<8x144xf32> to vector<1x8x144xf32>
    %106 = vector.broadcast %105 : vector<1x8x144xf32> to vector<8x8x144xf32>
    %107 = arith.mulf %106, %93 : vector<8x8x144xf32>
    %cst_61 = arith.constant dense<0.000000e+00> : vector<8x144xf32>
    %108 = vector.multi_reduction <add>, %107, %cst_61 [1] : vector<8x8x144xf32> to vector<8x144xf32>
    %109 = arith.addf %91, %108 : vector<8x144xf32>
    %c0_62 = arith.constant 0 : index
    %c48 = arith.constant 48 : index
    %c0_63 = arith.constant 0 : index
    %110 = vector.load %arg2[%c0_62, %c48, %c0_63] : memref<8x100x144xbf16, #tpu.memory_space<vmem>>, vector<8x8x144xbf16>
    %111 = arith.extf %110 : vector<8x8x144xbf16> to vector<8x8x144xf32>
    %c0_64 = arith.constant 0 : index
    %c48_65 = arith.constant 48 : index
    %c0_66 = arith.constant 0 : index
    %112 = vector.load %arg1[%c0_64, %c48_65, %c0_66] : memref<2x100x144xbf16, #tpu.memory_space<vmem>>, vector<1x8x144xbf16>
    %113 = vector.shape_cast %112 : vector<1x8x144xbf16> to vector<8x144xbf16>
    %114 = arith.extf %113 : vector<8x144xbf16> to vector<8x144xf32>
    %115 = vector.shape_cast %114 : vector<8x144xf32> to vector<1x8x144xf32>
    %116 = vector.broadcast %115 : vector<1x8x144xf32> to vector<8x8x144xf32>
    %117 = arith.mulf %116, %111 : vector<8x8x144xf32>
    %cst_67 = arith.constant dense<0.000000e+00> : vector<8x144xf32>
    %118 = vector.multi_reduction <add>, %117, %cst_67 [1] : vector<8x8x144xf32> to vector<8x144xf32>
    %119 = arith.addf %101, %118 : vector<8x144xf32>
    %c1_68 = arith.constant 1 : index
    %c48_69 = arith.constant 48 : index
    %c0_70 = arith.constant 0 : index
    %120 = vector.load %arg1[%c1_68, %c48_69, %c0_70] : memref<2x100x144xbf16, #tpu.memory_space<vmem>>, vector<1x8x144xbf16>
    %121 = vector.shape_cast %120 : vector<1x8x144xbf16> to vector<8x144xbf16>
    %122 = arith.extf %121 : vector<8x144xbf16> to vector<8x144xf32>
    %123 = vector.shape_cast %122 : vector<8x144xf32> to vector<1x8x144xf32>
    %124 = vector.broadcast %123 : vector<1x8x144xf32> to vector<8x8x144xf32>
    %125 = arith.mulf %124, %111 : vector<8x8x144xf32>
    %cst_71 = arith.constant dense<0.000000e+00> : vector<8x144xf32>
    %126 = vector.multi_reduction <add>, %125, %cst_71 [1] : vector<8x8x144xf32> to vector<8x144xf32>
    %127 = arith.addf %109, %126 : vector<8x144xf32>
    %c0_72 = arith.constant 0 : index
    %c56 = arith.constant 56 : index
    %c0_73 = arith.constant 0 : index
    %128 = vector.load %arg2[%c0_72, %c56, %c0_73] : memref<8x100x144xbf16, #tpu.memory_space<vmem>>, vector<8x8x144xbf16>
    %129 = arith.extf %128 : vector<8x8x144xbf16> to vector<8x8x144xf32>
    %c0_74 = arith.constant 0 : index
    %c56_75 = arith.constant 56 : index
    %c0_76 = arith.constant 0 : index
    %130 = vector.load %arg1[%c0_74, %c56_75, %c0_76] : memref<2x100x144xbf16, #tpu.memory_space<vmem>>, vector<1x8x144xbf16>
    %131 = vector.shape_cast %130 : vector<1x8x144xbf16> to vector<8x144xbf16>
    %132 = arith.extf %131 : vector<8x144xbf16> to vector<8x144xf32>
    %133 = vector.shape_cast %132 : vector<8x144xf32> to vector<1x8x144xf32>
    %134 = vector.broadcast %133 : vector<1x8x144xf32> to vector<8x8x144xf32>
    %135 = arith.mulf %134, %129 : vector<8x8x144xf32>
    %cst_77 = arith.constant dense<0.000000e+00> : vector<8x144xf32>
    %136 = vector.multi_reduction <add>, %135, %cst_77 [1] : vector<8x8x144xf32> to vector<8x144xf32>
    %137 = arith.addf %119, %136 : vector<8x144xf32>
    %c1_78 = arith.constant 1 : index
    %c56_79 = arith.constant 56 : index
    %c0_80 = arith.constant 0 : index
    %138 = vector.load %arg1[%c1_78, %c56_79, %c0_80] : memref<2x100x144xbf16, #tpu.memory_space<vmem>>, vector<1x8x144xbf16>
    %139 = vector.shape_cast %138 : vector<1x8x144xbf16> to vector<8x144xbf16>
    %140 = arith.extf %139 : vector<8x144xbf16> to vector<8x144xf32>
    %141 = vector.shape_cast %140 : vector<8x144xf32> to vector<1x8x144xf32>
    %142 = vector.broadcast %141 : vector<1x8x144xf32> to vector<8x8x144xf32>
    %143 = arith.mulf %142, %129 : vector<8x8x144xf32>
    %cst_81 = arith.constant dense<0.000000e+00> : vector<8x144xf32>
    %144 = vector.multi_reduction <add>, %143, %cst_81 [1] : vector<8x8x144xf32> to vector<8x144xf32>
    %145 = arith.addf %127, %144 : vector<8x144xf32>
    %c0_82 = arith.constant 0 : index
    %c64 = arith.constant 64 : index
    %c0_83 = arith.constant 0 : index
    %146 = vector.load %arg2[%c0_82, %c64, %c0_83] : memref<8x100x144xbf16, #tpu.memory_space<vmem>>, vector<8x8x144xbf16>
    %147 = arith.extf %146 : vector<8x8x144xbf16> to vector<8x8x144xf32>
    %c0_84 = arith.constant 0 : index
    %c64_85 = arith.constant 64 : index
    %c0_86 = arith.constant 0 : index
    %148 = vector.load %arg1[%c0_84, %c64_85, %c0_86] : memref<2x100x144xbf16, #tpu.memory_space<vmem>>, vector<1x8x144xbf16>
    %149 = vector.shape_cast %148 : vector<1x8x144xbf16> to vector<8x144xbf16>
    %150 = arith.extf %149 : vector<8x144xbf16> to vector<8x144xf32>
    %151 = vector.shape_cast %150 : vector<8x144xf32> to vector<1x8x144xf32>
    %152 = vector.broadcast %151 : vector<1x8x144xf32> to vector<8x8x144xf32>
    %153 = arith.mulf %152, %147 : vector<8x8x144xf32>
    %cst_87 = arith.constant dense<0.000000e+00> : vector<8x144xf32>
    %154 = vector.multi_reduction <add>, %153, %cst_87 [1] : vector<8x8x144xf32> to vector<8x144xf32>
    %155 = arith.addf %137, %154 : vector<8x144xf32>
    %c1_88 = arith.constant 1 : index
    %c64_89 = arith.constant 64 : index
    %c0_90 = arith.constant 0 : index
    %156 = vector.load %arg1[%c1_88, %c64_89, %c0_90] : memref<2x100x144xbf16, #tpu.memory_space<vmem>>, vector<1x8x144xbf16>
    %157 = vector.shape_cast %156 : vector<1x8x144xbf16> to vector<8x144xbf16>
    %158 = arith.extf %157 : vector<8x144xbf16> to vector<8x144xf32>
    %159 = vector.shape_cast %158 : vector<8x144xf32> to vector<1x8x144xf32>
    %160 = vector.broadcast %159 : vector<1x8x144xf32> to vector<8x8x144xf32>
    %161 = arith.mulf %160, %147 : vector<8x8x144xf32>
    %cst_91 = arith.constant dense<0.000000e+00> : vector<8x144xf32>
    %162 = vector.multi_reduction <add>, %161, %cst_91 [1] : vector<8x8x144xf32> to vector<8x144xf32>
    %163 = arith.addf %145, %162 : vector<8x144xf32>
    %c0_92 = arith.constant 0 : index
    %c72 = arith.constant 72 : index
    %c0_93 = arith.constant 0 : index
    %164 = vector.load %arg2[%c0_92, %c72, %c0_93] : memref<8x100x144xbf16, #tpu.memory_space<vmem>>, vector<8x8x144xbf16>
    %165 = arith.extf %164 : vector<8x8x144xbf16> to vector<8x8x144xf32>
    %c0_94 = arith.constant 0 : index
    %c72_95 = arith.constant 72 : index
    %c0_96 = arith.constant 0 : index
    %166 = vector.load %arg1[%c0_94, %c72_95, %c0_96] : memref<2x100x144xbf16, #tpu.memory_space<vmem>>, vector<1x8x144xbf16>
    %167 = vector.shape_cast %166 : vector<1x8x144xbf16> to vector<8x144xbf16>
    %168 = arith.extf %167 : vector<8x144xbf16> to vector<8x144xf32>
    %169 = vector.shape_cast %168 : vector<8x144xf32> to vector<1x8x144xf32>
    %170 = vector.broadcast %169 : vector<1x8x144xf32> to vector<8x8x144xf32>
    %171 = arith.mulf %170, %165 : vector<8x8x144xf32>
    %cst_97 = arith.constant dense<0.000000e+00> : vector<8x144xf32>
    %172 = vector.multi_reduction <add>, %171, %cst_97 [1] : vector<8x8x144xf32> to vector<8x144xf32>
    %173 = arith.addf %155, %172 : vector<8x144xf32>
    %c1_98 = arith.constant 1 : index
    %c72_99 = arith.constant 72 : index
    %c0_100 = arith.constant 0 : index
    %174 = vector.load %arg1[%c1_98, %c72_99, %c0_100] : memref<2x100x144xbf16, #tpu.memory_space<vmem>>, vector<1x8x144xbf16>
    %175 = vector.shape_cast %174 : vector<1x8x144xbf16> to vector<8x144xbf16>
    %176 = arith.extf %175 : vector<8x144xbf16> to vector<8x144xf32>
    %177 = vector.shape_cast %176 : vector<8x144xf32> to vector<1x8x144xf32>
    %178 = vector.broadcast %177 : vector<1x8x144xf32> to vector<8x8x144xf32>
    %179 = arith.mulf %178, %165 : vector<8x8x144xf32>
    %cst_101 = arith.constant dense<0.000000e+00> : vector<8x144xf32>
    %180 = vector.multi_reduction <add>, %179, %cst_101 [1] : vector<8x8x144xf32> to vector<8x144xf32>
    %181 = arith.addf %163, %180 : vector<8x144xf32>
    %c0_102 = arith.constant 0 : index
    %c80 = arith.constant 80 : index
    %c0_103 = arith.constant 0 : index
    %182 = vector.load %arg2[%c0_102, %c80, %c0_103] : memref<8x100x144xbf16, #tpu.memory_space<vmem>>, vector<8x8x144xbf16>
    %183 = arith.extf %182 : vector<8x8x144xbf16> to vector<8x8x144xf32>
    %c0_104 = arith.constant 0 : index
    %c80_105 = arith.constant 80 : index
    %c0_106 = arith.constant 0 : index
    %184 = vector.load %arg1[%c0_104, %c80_105, %c0_106] : memref<2x100x144xbf16, #tpu.memory_space<vmem>>, vector<1x8x144xbf16>
    %185 = vector.shape_cast %184 : vector<1x8x144xbf16> to vector<8x144xbf16>
    %186 = arith.extf %185 : vector<8x144xbf16> to vector<8x144xf32>
    %187 = vector.shape_cast %186 : vector<8x144xf32> to vector<1x8x144xf32>
    %188 = vector.broadcast %187 : vector<1x8x144xf32> to vector<8x8x144xf32>
    %189 = arith.mulf %188, %183 : vector<8x8x144xf32>
    %cst_107 = arith.constant dense<0.000000e+00> : vector<8x144xf32>
    %190 = vector.multi_reduction <add>, %189, %cst_107 [1] : vector<8x8x144xf32> to vector<8x144xf32>
    %191 = arith.addf %173, %190 : vector<8x144xf32>
    %c1_108 = arith.constant 1 : index
    %c80_109 = arith.constant 80 : index
    %c0_110 = arith.constant 0 : index
    %192 = vector.load %arg1[%c1_108, %c80_109, %c0_110] : memref<2x100x144xbf16, #tpu.memory_space<vmem>>, vector<1x8x144xbf16>
    %193 = vector.shape_cast %192 : vector<1x8x144xbf16> to vector<8x144xbf16>
    %194 = arith.extf %193 : vector<8x144xbf16> to vector<8x144xf32>
    %195 = vector.shape_cast %194 : vector<8x144xf32> to vector<1x8x144xf32>
    %196 = vector.broadcast %195 : vector<1x8x144xf32> to vector<8x8x144xf32>
    %197 = arith.mulf %196, %183 : vector<8x8x144xf32>
    %cst_111 = arith.constant dense<0.000000e+00> : vector<8x144xf32>
    %198 = vector.multi_reduction <add>, %197, %cst_111 [1] : vector<8x8x144xf32> to vector<8x144xf32>
    %199 = arith.addf %181, %198 : vector<8x144xf32>
    %c0_112 = arith.constant 0 : index
    %c88 = arith.constant 88 : index
    %c0_113 = arith.constant 0 : index
    %200 = vector.load %arg2[%c0_112, %c88, %c0_113] : memref<8x100x144xbf16, #tpu.memory_space<vmem>>, vector<8x8x144xbf16>
    %201 = arith.extf %200 : vector<8x8x144xbf16> to vector<8x8x144xf32>
    %c0_114 = arith.constant 0 : index
    %c88_115 = arith.constant 88 : index
    %c0_116 = arith.constant 0 : index
    %202 = vector.load %arg1[%c0_114, %c88_115, %c0_116] : memref<2x100x144xbf16, #tpu.memory_space<vmem>>, vector<1x8x144xbf16>
    %203 = vector.shape_cast %202 : vector<1x8x144xbf16> to vector<8x144xbf16>
    %204 = arith.extf %203 : vector<8x144xbf16> to vector<8x144xf32>
    %205 = vector.shape_cast %204 : vector<8x144xf32> to vector<1x8x144xf32>
    %206 = vector.broadcast %205 : vector<1x8x144xf32> to vector<8x8x144xf32>
    %207 = arith.mulf %206, %201 : vector<8x8x144xf32>
    %cst_117 = arith.constant dense<0.000000e+00> : vector<8x144xf32>
    %208 = vector.multi_reduction <add>, %207, %cst_117 [1] : vector<8x8x144xf32> to vector<8x144xf32>
    %209 = arith.addf %191, %208 : vector<8x144xf32>
    %c1_118 = arith.constant 1 : index
    %c88_119 = arith.constant 88 : index
    %c0_120 = arith.constant 0 : index
    %210 = vector.load %arg1[%c1_118, %c88_119, %c0_120] : memref<2x100x144xbf16, #tpu.memory_space<vmem>>, vector<1x8x144xbf16>
    %211 = vector.shape_cast %210 : vector<1x8x144xbf16> to vector<8x144xbf16>
    %212 = arith.extf %211 : vector<8x144xbf16> to vector<8x144xf32>
    %213 = vector.shape_cast %212 : vector<8x144xf32> to vector<1x8x144xf32>
    %214 = vector.broadcast %213 : vector<1x8x144xf32> to vector<8x8x144xf32>
    %215 = arith.mulf %214, %201 : vector<8x8x144xf32>
    %cst_121 = arith.constant dense<0.000000e+00> : vector<8x144xf32>
    %216 = vector.multi_reduction <add>, %215, %cst_121 [1] : vector<8x8x144xf32> to vector<8x144xf32>
    %217 = arith.addf %199, %216 : vector<8x144xf32>
    %c0_122 = arith.constant 0 : index
    %c96 = arith.constant 96 : index
    %c0_123 = arith.constant 0 : index
    %218 = vector.load %arg2[%c0_122, %c96, %c0_123] : memref<8x100x144xbf16, #tpu.memory_space<vmem>>, vector<8x4x144xbf16>
    %219 = arith.extf %218 : vector<8x4x144xbf16> to vector<8x4x144xf32>
    %c0_124 = arith.constant 0 : index
    %c96_125 = arith.constant 96 : index
    %c0_126 = arith.constant 0 : index
    %220 = vector.load %arg1[%c0_124, %c96_125, %c0_126] : memref<2x100x144xbf16, #tpu.memory_space<vmem>>, vector<1x4x144xbf16>
    %221 = vector.shape_cast %220 : vector<1x4x144xbf16> to vector<4x144xbf16>
    %222 = arith.extf %221 : vector<4x144xbf16> to vector<4x144xf32>
    %223 = vector.shape_cast %222 : vector<4x144xf32> to vector<1x4x144xf32>
    %224 = vector.broadcast %223 : vector<1x4x144xf32> to vector<8x4x144xf32>
    %225 = arith.mulf %224, %219 : vector<8x4x144xf32>
    %cst_127 = arith.constant dense<0.000000e+00> : vector<8x144xf32>
    %226 = vector.multi_reduction <add>, %225, %cst_127 [1] : vector<8x4x144xf32> to vector<8x144xf32>
    %227 = arith.addf %209, %226 : vector<8x144xf32>
    %c1_128 = arith.constant 1 : index
    %c96_129 = arith.constant 96 : index
    %c0_130 = arith.constant 0 : index
    %228 = vector.load %arg1[%c1_128, %c96_129, %c0_130] : memref<2x100x144xbf16, #tpu.memory_space<vmem>>, vector<1x4x144xbf16>
    %229 = vector.shape_cast %228 : vector<1x4x144xbf16> to vector<4x144xbf16>
    %230 = arith.extf %229 : vector<4x144xbf16> to vector<4x144xf32>
    %231 = vector.shape_cast %230 : vector<4x144xf32> to vector<1x4x144xf32>
    %232 = vector.broadcast %231 : vector<1x4x144xf32> to vector<8x4x144xf32>
    %233 = arith.mulf %232, %219 : vector<8x4x144xf32>
    %cst_131 = arith.constant dense<0.000000e+00> : vector<8x144xf32>
    %234 = vector.multi_reduction <add>, %233, %cst_131 [1] : vector<8x4x144xf32> to vector<8x144xf32>
    %235 = arith.addf %217, %234 : vector<8x144xf32>
    %c0_132 = arith.constant 0 : index
    %c0_133 = arith.constant 0 : index
    %c0_134 = arith.constant 0 : index
    %236 = vector.load %arg4[%c0_132, %c0_133, %c0_134] : memref<2x8x144xf32, #tpu.memory_space<vmem>>, vector<1x8x144xf32>
    %237 = vector.shape_cast %236 : vector<1x8x144xf32> to vector<8x144xf32>
    %238 = vector.shape_cast %227 : vector<8x144xf32> to vector<1x8x144xf32>
    tpu.vector_store %arg4[%c0_132, %c0_133, %c0_134], %238 {strides = array<i32>} : memref<2x8x144xf32, #tpu.memory_space<vmem>>, vector<1x8x144xf32>,
    %c1_135 = arith.constant 1 : index
    %c0_136 = arith.constant 0 : index
    %c0_137 = arith.constant 0 : index
    %239 = vector.load %arg4[%c1_135, %c0_136, %c0_137] : memref<2x8x144xf32, #tpu.memory_space<vmem>>, vector<1x8x144xf32>
    %240 = vector.shape_cast %239 : vector<1x8x144xf32> to vector<8x144xf32>
    %241 = vector.shape_cast %235 : vector<8x144xf32> to vector<1x8x144xf32>
    tpu.vector_store %arg4[%c1_135, %c0_136, %c0_137], %241 {strides = array<i32>} : memref<2x8x144xf32, #tpu.memory_space<vmem>>, vector<1x8x144xf32>,
    return
  }
  func.func @transform_0(%arg0: i32) -> (i32, i32, i32) {
    %c0_i32 = arith.constant 0 : i32
    %c0_i32_0 = arith.constant 0 : i32
    %c0_i32_1 = arith.constant 0 : i32
    %c0_i32_2 = arith.constant 0 : i32
    return %c0_i32, %c0_i32_0, %c0_i32_1 : i32, i32, i32
  }
  func.func @transform_1(%arg0: i32) -> (i32, i32, i32) {
    %c0_i32 = arith.constant 0 : i32
    %c0_i32_0 = arith.constant 0 : i32
    %c0_i32_1 = arith.constant 0 : i32
    return %arg0, %c0_i32, %c0_i32_0 : i32, i32, i32
  }
  func.func @transform_2(%arg0: i32) -> (i32, i32) {
    %c0_i32 = arith.constant 0 : i32
    %c0_i32_0 = arith.constant 0 : i32
    return %arg0, %c0_i32 : i32, i32
  }
  func.func @transform_3(%arg0: i32) -> (i32, i32, i32) {
    %c0_i32 = arith.constant 0 : i32
    %c0_i32_0 = arith.constant 0 : i32
    %c0_i32_1 = arith.constant 0 : i32
    return %c0_i32, %arg0, %c0_i32_0 : i32, i32, i32
  }
}

</mosaic_0001>

<bundles_post_ra>
// kernel: _lc2d_apply.1
= control target key start
LH: loop header
LB: loop body
LE: loop exit
PB: predicated region body
PF: predicated region fallthrough
CT: control target
= control target key end

     0   :  { %s4814_s12 = smov 0   ;;  %s4816_s13 = smov 0   ;;  %s8142_s0 = inlined_call_operand.vmem [shape: bf16[2,100,144], index: 0, kind: input, shape index: {}]   ;;  %s8143_s1 = inlined_call_operand.vmem [shape: bf16[16,100,144], index: 1, kind: input, shape index: {}]   ;;  %s8144_s2 = inlined_call_operand.vmem [shape: f32[16,144], index: 2, kind: input, shape index: {}]   ;;  %s8145_s3 = inlined_call_operand.vmem [shape: f32[2,16,144], index: 3, kind: output, shape index: {}]  }
   0x1   :  { %s4818_s14 = smov 0  }
   0x2 LB: > { %s4827_s15 = sadd.s32 4294967295, %s4792_s14   ;;  %s4829_s16 = sadd.s32 1, %s4792_s14   ;;  %s4792_s14 = sphi %s4818_s14, %s8467_s14   ;;  %s4788_s13 = sphi %s4816_s13, %s8466_s13   ;;  %s4784_s12 = sphi %s4814_s12, %s8465_s12  }
   0x3   : > { %s90_s17 = ssub.s32 %s4792_s14, %s4829_s16  ;;  %s93_s18 = sadd.s32 1, %s4788_s13 }
   0x4   : > { %p91_p0 = scmp.eq.s32.totalorder %s90_s17, 0  ;;  %p103_p1 = scmp.ne.s32.totalorder %s4788_s13, %s4784_s12 }
   0x5   : > { %p104_p2 = scmp.eq.s32.totalorder %s4827_s15, 1  ;;  %p4717_p3 = scmp.ge.s32.totalorder %s4792_s14, 1 }
   0x6   : > { %s4837_s19 = scalar_select %p91_p0, %s4788_s13, %s93_s18  }
   0x7   : > { %p4839_p4 = por %p104_p2, %p103_p1  ;;  %p149_p5 = scmp.lt.s32.totalorder %s4792_s14, 3 }
   0x9   : > { %p150_p6 = pnand %p4717_p3, %p149_p5 }
   0xb   : > { %153 = sbr.rel (%p150_p6) target bundleno = 1030 (0x406), region = 32 }
  0x12   : > { %s4719_s21 = sshll.u32 %s4827_s15, 3  ;;  %v216_v0 = vld [vmem:[%s8142_s0] sm:$0xff]  ;;  %v4858_v2 = vld [vmem:[%s8142_s0 + $0x68] sm:$0xff]  ;;  %vm241_vm0 = vcmask 130048   ;;  %vm356_vm1 = vcmask 1041409   ;;  %vm358_vm2 = vcmask 1042434  }
  0x13   : > { %p179_p7 = scmp.lt.s32.totalorder %s4719_s21, 15  ;;  %v4871_v8 = vunpack.c.l.bf16 %v216_v0  ;;  %v4873_v9 = vunpack.c.h.bf16 %v216_v0  ;;  %v4894_v20 = vunpack.c.l.bf16 %v4858_v2  ;;  %vm360_vm3 = vcmask 1043459   ;;  %p185_p8 = scmp.lt.s32.totalorder %s4827_s15, 1 }
  0x14   : > { %vm362_vm4 = vcmask 1044484   ;;  %vm364_vm5 = vcmask 1045509   ;;  %vm366_vm6 = vcmask 1046534   ;;  %vm368_vm7 = vcmask 1047559   ;;  %s4744_s23 = sshll.u32 (%p4839_p4), %s4827_s15, 4 }
  0x15   : > { %s8469_s21 = smov (!%p179_p7, %s4719_s21), 15  ;;  %vm4300_vm8 = vcmask 1043456   ;;  %vm4308_vm9 = vcmask 125952   ;;  %s4627_s26 = scalar_lea.vmem (%p4839_p4), %s8145_s3, %s4744_s23 }
  0x16   : > { %s4745_s22 = smul.u32 104, %s8469_s21  ;;  %s175_s21 = sand.u32 1, %s4784_s12  }
  0x17   : > { %s5076_s7 = scalar_select %p185_p8, %s4827_s15, 1 }
  0x18   : > { %s4850_s27 = scalar_lea.vmem %s8143_s1, %s4745_s22  ;;  %s4718_s12 = sshll.u32 %s175_s21, 5 }
  0x19   : > { %v4853_v1 = vld [vmem:[%s4850_s27] sm:$0xff]  ;;  %v4861_v3 = vld [vmem:[%s4850_s27 + $0x68] sm:$0xff]  ;;  %v4864_v4 = vld [vmem:[%s4850_s27 + $0xd0] sm:$0xff]  ;;  %s4743_s8 = sshll.u32 %s5076_s7, 4  ;;  %s8062_s22 = scalar_lea.vmem [#allocation2], %s4718_s12 }
  0x1a   : > { %v4867_v5 = vld [vmem:[%s4850_s27 + $0x138] sm:$0xff]  ;;  %v200_v6 = vunpack.c.l.bf16 %v4853_v1  ;;  %v201_v7 = vunpack.c.h.bf16 %v4853_v1  ;;  %v4876_v10 = vld [vmem:[%s4850_s27 + $0x1a0] sm:$0xff]  ;;  %v4879_v11 = vld [vmem:[%s4850_s27 + $0x208] sm:$0xff]  ;;  %v202_v13 = vunpack.c.l.bf16 %v4861_v3  ;;  %v203_v14 = vunpack.c.h.bf16 %v4861_v3  ;;  %s5084_s11 = scalar_lea.vmem %s8144_s2, %s4743_s8 }
  0x1b   : > { %v4882_v12 = vld [vmem:[%s4850_s27 + $0x270] sm:$0xff]  ;;  %v204_v15 = vunpack.c.l.bf16 %v4864_v4  ;;  %v4888_v16 = vld [vmem:[%s4850_s27 + $0x2d8] sm:$0xff]  ;;  %v205_v17 = vunpack.c.h.bf16 %v4864_v4  ;;  %v206_v18 = vunpack.c.l.bf16 %v4867_v5  ;;  %v207_v19 = vunpack.c.h.bf16 %v4867_v5 }
  0x1c   : > { %v208_v21 = vunpack.c.l.bf16 %v4876_v10  ;;  %v209_v22 = vunpack.c.h.bf16 %v4876_v10  ;;  %v210_v23 = vunpack.c.l.bf16 %v4879_v11  ;;  %v211_v24 = vunpack.c.h.bf16 %v4879_v11 }
  0x1d   : > { %v8147_v25 = vunpack.c.l.bf16 %v4882_v12  ;;  %v8146_v26 = vunpack.c.h.bf16 %v4882_v12  ;;  %v219_v27 = vmul.f32 %v4871_v8, %v200_v6  ;;  %v220_v28 = vmul.f32 %v4873_v9, %v201_v7 }
  0x1e   : > { %v8149_v29 = vunpack.c.l.bf16 %v4888_v16  ;;  %v221_v30 = vmul.f32 %v4871_v8, %v202_v13  ;;  %v222_v31 = vmul.f32 %v4873_v9, %v203_v14  ;;  %v223_v32 = vmul.f32 %v4871_v8, %v204_v15 }
  0x1f   : > { %v8148_v33 = vunpack.c.h.bf16 %v4888_v16  ;;  %v224_v34 = vmul.f32 %v4873_v9, %v205_v17  ;;  %v225_v35 = vmul.f32 %v4871_v8, %v206_v18  ;;  %v226_v36 = vmul.f32 %v4873_v9, %v207_v19 }
  0x20   : > { %v227_v37 = vmul.f32 %v4871_v8, %v208_v21  ;;  %v228_v38 = vmul.f32 %v4873_v9, %v209_v22  ;;  %v4937_v39 = vmul.f32 %v4871_v8, %v210_v23  ;;  %v230_v40 = vmul.f32 %v4873_v9, %v211_v24 }
  0x21   : > { %v4945_v41 = vmul.f32 %v4871_v8, %v8147_v25  ;;  %v4950_v42 = vmul.f32 %v4873_v9, %v8146_v26  ;;  %v235_v43 = vrot.slane %v219_v27, 4  ;;  %v242_v44 = vsel %vm241_vm0, %v220_v28, 0.0 }
  0x22   : > { %v243_v45 = vrot.slane %v242_v44, 4  ;;  %v249_v46 = vrot.slane %v221_v30, 4  ;;  %v255_v47 = vsel %vm241_vm0, %v222_v31, 0.0  ;;  %v262_v48 = vrot.slane %v223_v32, 4 }
  0x23   : > { %v236_v49 = vadd.f32 %v235_v43, %v219_v27  ;;  %v256_v50 = vrot.slane %v255_v47, 4  ;;  %v268_v51 = vsel %vm241_vm0, %v224_v34, 0.0  ;;  %v275_v52 = vrot.slane %v225_v35, 4 }
  0x24   : > { %v244_v53 = vadd.f32 %v243_v45, %v242_v44  ;;  %v250_v54 = vadd.f32 %v249_v46, %v221_v30  ;;  %v263_v55 = vadd.f32 %v262_v48, %v223_v32  ;;  %v269_v56 = vrot.slane %v268_v51, 4 }
  0x25   : > { %v237_v57 = vrot.slane %v236_v49, 2  ;;  %v257_v58 = vadd.f32 %v256_v50, %v255_v47  ;;  %v276_v59 = vadd.f32 %v275_v52, %v225_v35  ;;  %v281_v60 = vsel %vm241_vm0, %v226_v36, 0.0 }
  0x26   : > { %v245_v61 = vrot.slane %v244_v53, 2  ;;  %v251_v62 = vrot.slane %v250_v54, 2  ;;  %v264_v63 = vrot.slane %v263_v55, 2  ;;  %v270_v0 = vadd.f32 %v269_v56, %v268_v51 }
  0x27   : > { %v238_v28 = vadd.f32 %v237_v57, %v236_v49  ;;  %v258_v31 = vrot.slane %v257_v58, 2  ;;  %v277_v27 = vrot.slane %v276_v59, 2  ;;  %v282_v43 = vrot.slane %v281_v60, 4 }
  0x28   : > { %v246_v26 = vadd.f32 %v245_v61, %v244_v53  ;;  %v252_v34 = vadd.f32 %v251_v62, %v250_v54  ;;  %v265_v25 = vadd.f32 %v264_v63, %v263_v55  ;;  %v271_v44 = vrot.slane %v270_v0, 2 }
  0x29   : > { %v239_v30 = vrot.slane %v238_v28, 1  ;;  %v259_v32 = vadd.f32 %v258_v31, %v257_v58  ;;  %v278_v45 = vadd.f32 %v277_v27, %v276_v59  ;;  %v283_v46 = vadd.f32 %v282_v43, %v281_v60 }
  0x2a   : > { %v247_v47 = vrot.slane %v246_v26, 1  ;;  %v253_v35 = vrot.slane %v252_v34, 1  ;;  %v266_v48 = vrot.slane %v265_v25, 1  ;;  %v272_v36 = vadd.f32 %v271_v44, %v270_v0 }
  0x2b   : > { %v233_v50 = vmul.f32 %v4871_v8, %v8149_v29  ;;  %v260_v49 = vrot.slane %v259_v32, 1  ;;  %v279_v51 = vrot.slane %v278_v45, 1  ;;  %v284_v52 = vrot.slane %v283_v46, 2 }
  0x2c   : > { %v234_v53 = vmul.f32 %v4873_v9, %v8148_v33  ;;  %v240_v54 = vadd.f32 %v239_v30, %v238_v28  ;;  %v4962_v55 = vadd.f32 %v247_v47, %v246_v26  ;;  %v254_v56 = vadd.f32 %v253_v35, %v252_v34 }
  0x2d   : > { %v267_v57 = vadd.f32 %v266_v48, %v265_v25  ;;  %v273_v58 = vrot.slane %v272_v36, 1  ;;  %v285_v59 = vadd.f32 %v284_v52, %v283_v46  ;;  %v288_v60 = vrot.slane %v227_v37, 4 }
  0x2e   : > { %v261_v61 = vadd.f32 %v260_v49, %v259_v32  ;;  %v294_v62 = vsel %vm241_vm0, %v228_v38, 0.0  ;;  %v301_v8 = vrot.slane %v4937_v39, 4  ;;  %v307_v63 = vsel %vm241_vm0, %v230_v40, 0.0 }
  0x2f   : > { %v280_v0 = vadd.f32 %v279_v51, %v278_v45  ;;  %v289_v31 = vadd.f32 %v288_v60, %v227_v37  ;;  %v295_v27 = vrot.slane %v294_v62, 4  ;;  %v308_v9 = vrot.slane %v307_v63, 4 }
  0x30   : > { %v302_v26 = vadd.f32 %v301_v8, %v4937_v39  ;;  %v314_v25 = vrot.slane %v4945_v41, 4  ;;  %v320_v28 = vsel %vm241_vm0, %v4950_v42, 0.0  ;;  %v327_v43 = vrot.slane %v233_v50, 4 }
  0x31   : > { %v286_v38 = vrot.slane %v285_v59, 1  ;;  %v290_v34 = vrot.slane %v289_v31, 2  ;;  %v296_v44 = vadd.f32 %v295_v27, %v294_v62  ;;  %v309_v30 = vadd.f32 %v308_v9, %v307_v63 }
  0x32   : > { %v303_v40 = vrot.slane %v302_v26, 2  ;;  %v315_v37 = vadd.f32 %v314_v25, %v4945_v41  ;;  %v321_v32 = vrot.slane %v320_v28, 4  ;;  %v328_v45 = vadd.f32 %v327_v43, %v233_v50 }
  0x33   : > { %v291_v46 = vadd.f32 %v290_v34, %v289_v31  ;;  %v297_v39 = vrot.slane %v296_v44, 2  ;;  %v310_v47 = vrot.slane %v309_v30, 2  ;;  %v333_v35 = vsel %vm241_vm0, %v234_v53, 0.0 }
  0x34   : > { %v304_v42 = vadd.f32 %v303_v40, %v302_v26  ;;  %v316_v48 = vrot.slane %v315_v37, 2  ;;  %v322_v49 = vadd.f32 %v321_v32, %v320_v28  ;;  %v329_v51 = vrot.slane %v328_v45, 2 }
  0x35   : > { %v292_v52 = vrot.slane %v291_v46, 1  ;;  %v298_v60 = vadd.f32 %v297_v39, %v296_v44  ;;  %v311_v62 = vadd.f32 %v310_v47, %v309_v30  ;;  %v334_v8 = vrot.slane %v333_v35, 4 }
  0x36   : > { %v305_v63 = vrot.slane %v304_v42, 1  ;;  %v317_v27 = vadd.f32 %v316_v48, %v315_v37  ;;  %v323_v41 = vrot.slane %v322_v49, 2  ;;  %v330_v9 = vadd.f32 %v329_v51, %v328_v45  ;;  %v563_v45 = vld [vmem:[%s8142_s0 + $0x8] sm:$0xff] }
  0x37   : > { %v274_v50 = vadd.f32 %v273_v58, %v272_v36  ;;  %v287_v25 = vadd.f32 %v286_v38, %v285_v59  ;;  %v299_v31 = vrot.slane %v298_v60, 1  ;;  %v335_v43 = vadd.f32 %v334_v8, %v333_v35 }
  0x38   : > { %v293_v34 = vadd.f32 %v292_v52, %v291_v46  ;;  %v312_v33 = vrot.slane %v311_v62, 1  ;;  %v318_v53 = vrot.slane %v317_v27, 1  ;;  %v324_v29 = vadd.f32 %v323_v41, %v322_v49 }
  0x39   : > { %v306_v26 = vadd.f32 %v305_v63, %v304_v42  ;;  %v331_v40 = vrot.slane %v330_v9, 1  ;;  %v336_v28 = vrot.slane %v335_v43, 2  ;;  %v357_v32 = vsel %vm356_vm1, %v254_v56, %v240_v54 }
  0x3a   : > { %v300_v44 = vadd.f32 %v299_v31, %v298_v60  ;;  %v319_v30 = vadd.f32 %v318_v53, %v317_v27  ;;  %v359_v39 = vsel %vm358_vm2, %v267_v57, %v357_v32  ;;  %v4976_v37 = vunpack.c.h.bf16 %v4858_v2  ;;  %v4989_v2 = vld [vmem:[%s8142_s0 + $0x70] sm:$0xff] }
  0x3b   : > { %v325_v36 = vrot.slane %v324_v29, 1  ;;  %v337_v58 = vadd.f32 %v336_v28, %v335_v43  ;;  %v361_v59 = vsel %vm360_vm3, %v280_v0, %v359_v39  ;;  %v370_v38 = vsel %vm356_vm1, %v261_v61, %v4962_v55 }
  0x3c   : > { %v313_v46 = vadd.f32 %v312_v33, %v311_v62  ;;  %v363_v54 = vsel %vm362_vm4, %v293_v34, %v361_v59  ;;  %v371_v56 = vsel %vm358_vm2, %v274_v50, %v370_v38  ;;  %v332_v57 = vadd.f32 %v331_v40, %v330_v9 }
  0x3d   : > { %v338_v0 = vrot.slane %v337_v58, 1  ;;  %v365_v47 = vsel %vm364_vm5, %v306_v26, %v363_v54  ;;  %v372_v55 = vsel %vm360_vm3, %v287_v25, %v371_v56  ;;  %v4995_v35 = vunpack.c.l.bf16 %v563_v45 }
  0x3e   : > { %v367_v61 = vsel %vm366_vm6, %v319_v30, %v365_v47  ;;  %v373_v33 = vsel %vm362_vm4, %v300_v44, %v372_v55  ;;  %v4997_v42 = vunpack.c.h.bf16 %v563_v45  ;;  %v4999_v48 = vadd.f32 %v325_v36, %v324_v29 }
  0x3f   : > { %v385_v49 = vmul.f32 %v4894_v20, %v200_v6  ;;  %v386_v51 = vmul.f32 %v4976_v37, %v201_v7  ;;  %v5008_v52 = vunpack.c.l.bf16 %v4989_v2  ;;  %v5010_v60 = vadd.f32 %v338_v0, %v337_v58 }
  0x40   : > { %v387_v62 = vmul.f32 %v4894_v20, %v202_v13  ;;  %v388_v29 = vmul.f32 %v4976_v37, %v203_v14  ;;  %v389_v6 = vmul.f32 %v4894_v20, %v204_v15  ;;  %v5022_v1 = vsel %vm368_vm7, %v332_v57, %v367_v61 }
  0x41   : > { %v5025_v7 = vsel %vm364_vm5, %v313_v46, %v373_v33  ;;  %v390_v8 = vmul.f32 %v4976_v37, %v205_v17  ;;  %v391_v3 = vmul.f32 %v4894_v20, %v206_v18  ;;  %v392_v13 = vmul.f32 %v4976_v37, %v207_v19 }
  0x42   : > { %v393_v14 = vmul.f32 %v4894_v20, %v208_v21  ;;  %v394_v15 = vmul.f32 %v4976_v37, %v209_v22  ;;  %v395_v4 = vmul.f32 %v4894_v20, %v210_v23  ;;  %v396_v17 = vmul.f32 %v4976_v37, %v211_v24 }
  0x43   : > { %v8305_v5 = vunpack.c.l.bf16 %v4882_v12  ;;  %v401_v19 = vrot.slane %v385_v49, 4  ;;  %v407_v21 = vsel %vm241_vm0, %v386_v51, 0.0  ;;  %v414_v10 = vrot.slane %v387_v62, 4 }
  0x44   : > { %v408_v63 = vrot.slane %v407_v21, 4  ;;  %v420_v22 = vsel %vm241_vm0, %v388_v29, 0.0  ;;  %v427_v27 = vrot.slane %v389_v6, 4  ;;  %v433_v23 = vsel %vm241_vm0, %v390_v8, 0.0 }
  0x45   : > { %v5051_v18 = vmul.f32 %v4894_v20, %v8305_v5  ;;  %v402_v41 = vadd.f32 %v401_v19, %v385_v49  ;;  %v421_v9 = vrot.slane %v420_v22, 4  ;;  %v440_v11 = vrot.slane %v391_v3, 4 }
  0x46   : > { %v409_v50 = vadd.f32 %v408_v63, %v407_v21  ;;  %v415_v24 = vadd.f32 %v414_v10, %v387_v62  ;;  %v428_v25 = vadd.f32 %v427_v27, %v389_v6  ;;  %v434_v31 = vrot.slane %v433_v23, 4 }
  0x47   : > { %v403_v43 = vrot.slane %v402_v41, 2  ;;  %v422_v34 = vadd.f32 %v421_v9, %v420_v22  ;;  %v441_v53 = vadd.f32 %v440_v11, %v391_v3  ;;  %v446_v26 = vsel %vm241_vm0, %v392_v13, 0.0 }
  0x48   : > { %v410_v40 = vrot.slane %v409_v50, 2  ;;  %v416_v28 = vrot.slane %v415_v24, 2  ;;  %v429_v32 = vrot.slane %v428_v25, 2  ;;  %v435_v44 = vadd.f32 %v434_v31, %v433_v23 }
  0x49   : > { %v404_v30 = vadd.f32 %v403_v43, %v402_v41  ;;  %v423_v39 = vrot.slane %v422_v34, 2  ;;  %v442_v36 = vrot.slane %v441_v53, 2  ;;  %v447_v58 = vrot.slane %v446_v26, 4 }
  0x4a   : > { %v411_v59 = vadd.f32 %v410_v40, %v409_v50  ;;  %v417_v38 = vadd.f32 %v416_v28, %v415_v24  ;;  %v430_v45 = vadd.f32 %v429_v32, %v428_v25  ;;  %v436_v46 = vrot.slane %v435_v44, 2 }
  0x4b   : > { %v405_v54 = vrot.slane %v404_v30, 1  ;;  %v424_v56 = vadd.f32 %v423_v39, %v422_v34  ;;  %v443_v57 = vadd.f32 %v442_v36, %v441_v53  ;;  %v448_v0 = vadd.f32 %v447_v58, %v446_v26 }
  0x4c   : > { %v412_v47 = vrot.slane %v411_v59, 1  ;;  %v418_v55 = vrot.slane %v417_v38, 1  ;;  %v431_v61 = vrot.slane %v430_v45, 1  ;;  %v437_v33 = vadd.f32 %v436_v46, %v435_v44 }
  0x4d   : > { %v8306_v49 = vunpack.c.h.bf16 %v4882_v12  ;;  %v8307_v62 = vunpack.c.l.bf16 %v4888_v16  ;;  %v425_v6 = vrot.slane %v424_v56, 1  ;;  %v449_v8 = vrot.slane %v448_v0, 2 }
  0x4e   : > { %v8308_v3 = vunpack.c.h.bf16 %v4888_v16  ;;  %v406_v5 = vadd.f32 %v405_v54, %v404_v30  ;;  %v5066_v19 = vadd.f32 %v412_v47, %v411_v59  ;;  %v444_v21 = vrot.slane %v443_v57, 1 }
  0x4f   : > { %v398_v51 = vmul.f32 %v4976_v37, %v8306_v49  ;;  %v399_v29 = vmul.f32 %v4894_v20, %v8307_v62  ;;  %v419_v63 = vadd.f32 %v418_v55, %v417_v38  ;;  %v432_v12 = vadd.f32 %v431_v61, %v430_v45 }
  0x50   : > { %v400_v13 = vmul.f32 %v4976_v37, %v8308_v3  ;;  %v450_v10 = vadd.f32 %v449_v8, %v448_v0  ;;  %v453_v22 = vrot.slane %v393_v14, 4  ;;  %v438_v27 = vrot.slane %v437_v33, 1 }
  0x51   : > { %v459_v20 = vsel %vm241_vm0, %v394_v15, 0.0  ;;  %v466_v41 = vrot.slane %v395_v4, 4  ;;  %v472_v9 = vsel %vm241_vm0, %v396_v17, 0.0  ;;  %v426_v16 = vadd.f32 %v425_v6, %v424_v56 }
  0x52   : > { %v454_v23 = vadd.f32 %v453_v22, %v393_v14  ;;  %v460_v37 = vrot.slane %v459_v20, 4  ;;  %v473_v11 = vrot.slane %v472_v9, 4  ;;  %v479_v24 = vrot.slane %v5051_v18, 4 }
  0x53   : > { %v467_v50 = vadd.f32 %v466_v41, %v395_v4  ;;  %v485_v25 = vsel %vm241_vm0, %v398_v51, 0.0  ;;  %v492_v31 = vrot.slane %v399_v29, 4  ;;  %v451_v43 = vrot.slane %v450_v10, 1 }
  0x54   : > { %v455_v34 = vrot.slane %v454_v23, 2  ;;  %v461_v15 = vadd.f32 %v460_v37, %v459_v20  ;;  %v474_v53 = vadd.f32 %v473_v11, %v472_v9  ;;  %v480_v17 = vadd.f32 %v479_v24, %v5051_v18 }
  0x55   : > { %v468_v26 = vrot.slane %v467_v50, 2  ;;  %v486_v14 = vrot.slane %v485_v25, 4  ;;  %v493_v40 = vadd.f32 %v492_v31, %v399_v29  ;;  %v498_v44 = vsel %vm241_vm0, %v400_v13, 0.0 }
  0x56   : > { %v456_v28 = vadd.f32 %v455_v34, %v454_v23  ;;  %v462_v4 = vrot.slane %v461_v15, 2  ;;  %v475_v32 = vrot.slane %v474_v53, 2  ;;  %v481_v39 = vrot.slane %v480_v17, 2  ;;  %v5125_v34 = vld [vmem:[%s4850_s27 + $0x140] sm:$0xff] }
  0x57   : > { %v469_v30 = vadd.f32 %v468_v26, %v467_v50  ;;  %v487_v36 = vadd.f32 %v486_v14, %v485_v25  ;;  %v494_v58 = vrot.slane %v493_v40, 2  ;;  %v499_v46 = vrot.slane %v498_v44, 4  ;;  %v5133_v26 = vld [vmem:[%s4850_s27 + $0x210] sm:$0xff] }
  0x58   : > { %v457_v59 = vrot.slane %v456_v28, 1  ;;  %v463_v38 = vadd.f32 %v462_v4, %v461_v15  ;;  %v476_v45 = vadd.f32 %v475_v32, %v474_v53  ;;  %v482_v56 = vadd.f32 %v481_v39, %v480_v17  ;;  %v5130_v53 = vld [vmem:[%s4850_s27 + $0x1a8] sm:$0xff] }
  0x59   : > { %v470_v54 = vrot.slane %v469_v30, 1  ;;  %v488_v0 = vrot.slane %v487_v36, 2  ;;  %v495_v18 = vadd.f32 %v494_v58, %v493_v40  ;;  %v439_v47 = vadd.f32 %v438_v27, %v437_v33 }
  0x5a   : > { %v445_v55 = vadd.f32 %v444_v21, %v443_v57  ;;  %v464_v61 = vrot.slane %v463_v38, 1  ;;  %v500_v49 = vadd.f32 %v499_v46, %v498_v44  ;;  %v452_v51 = vadd.f32 %v451_v43, %v450_v10  ;;  %v5092_v10 = vld [vmem:[%s5084_s11] sm:$0xff] }
  0x5b   : > { %v458_v62 = vadd.f32 %v457_v59, %v456_v28  ;;  %v483_v29 = vrot.slane %v482_v56, 1  ;;  %v489_v6 = vadd.f32 %v488_v0, %v487_v36  ;;  %v471_v8 = vadd.f32 %v470_v54, %v469_v30  ;;  %v5144_v28 = vld [vmem:[%s4850_s27 + $0x278] sm:$0xff]  ;;  %v5152_v30 = vld [vmem:[%s4850_s27 + $0x2e0] sm:$0xff] }
  0x5c   : > { %v477_v3 = vrot.slane %v476_v45, 1  ;;  %v501_v13 = vrot.slane %v500_v49, 2  ;;  %v521_v33 = vsel %vm356_vm1, %v419_v63, %v406_v5  ;;  %v375_v57 = vsel %vm366_vm6, %v4999_v48, %v5025_v7  ;;  %v5100_v7 = vld [vmem:[%s4850_s27 + $0x8] sm:$0xff] }
  0x5d   : > { %v465_v21 = vadd.f32 %v464_v61, %v463_v38  ;;  %v496_v22 = vrot.slane %v495_v18, 1  ;;  %v522_v27 = vsel %vm358_vm2, %v432_v12, %v521_v33  ;;  %v490_v20 = vrot.slane %v489_v6, 1  ;;  %v5103_v12 = vld [vmem:[%s4850_s27 + $0x70] sm:$0xff] }
  0x5e   : > { %v502_v41 = vadd.f32 %v501_v13, %v500_v49  ;;  %v523_v9 = vsel %vm360_vm3, %v445_v55, %v522_v27  ;;  %v528_v23 = vsel %vm356_vm1, %v426_v16, %v5066_v19  ;;  %v484_v5 = vadd.f32 %v483_v29, %v482_v56  ;;  %v5111_v16 = vld [vmem:[%s4850_s27 + $0xd8] sm:$0xff] }
  0x5f   : > { %v524_v63 = vsel %vm362_vm4, %v458_v62, %v523_v9  ;;  %v529_v48 = vsel %vm358_vm2, %v439_v47, %v528_v23  ;;  %v5106_v37 = vunpack.c.h.bf16 %v4989_v2  ;;  %v478_v11 = vadd.f32 %v477_v3, %v476_v45 }
  0x60   : > { %v503_v50 = vrot.slane %v502_v41, 1  ;;  %v525_v24 = vsel %vm364_vm5, %v471_v8, %v524_v63  ;;  %v530_v19 = vsel %vm360_vm3, %v452_v51, %v529_v48  ;;  %v5115_v25 = vsel %vm368_vm7, %v5010_v60, %v375_v57 }
  0x61   : > { %v5119_v31 = vadd.f32 %v5022_v1, %v5092_v10  ;;  %v5121_v2 = vadd.f32 %v496_v22, %v495_v18  ;;  %v531_v43 = vsel %vm362_vm4, %v465_v21, %v530_v19  ;;  %v5127_v15 = vadd.f32 %v490_v20, %v489_v6 }
  0x62   : > { %v547_v60 = vunpack.c.l.bf16 %v5100_v7  ;;  %v548_v17 = vunpack.c.h.bf16 %v5100_v7  ;;  %v549_v1 = vunpack.c.l.bf16 %v5103_v12  ;;  %v5138_v14 = vadd.f32 %v503_v50, %v502_v41 }
  0x63   : > { %v5141_v40 = vsel %vm366_vm6, %v484_v5, %v525_v24  ;;  %v550_v4 = vunpack.c.h.bf16 %v5103_v12  ;;  %v8159_v32 = vunpack.c.l.bf16 %v5111_v16  ;;  %v5149_v44 = vsel %vm364_vm5, %v478_v11, %v531_v43 }
  0x64   : > { %v8158_v39 = vunpack.c.h.bf16 %v5111_v16  ;;  %v8157_v36 = vunpack.c.l.bf16 %v5125_v34  ;;  %v8156_v58 = vunpack.c.h.bf16 %v5125_v34  ;;  %v8155_v59 = vunpack.c.l.bf16 %v5130_v53 }
  0x65   : > { %v8154_v38 = vunpack.c.h.bf16 %v5130_v53  ;;  %v8153_v45 = vunpack.c.l.bf16 %v5133_v26  ;;  %v8151_v46 = vunpack.c.h.bf16 %v5133_v26  ;;  %v8150_v54 = vunpack.c.l.bf16 %v5144_v28 }
  0x66   : > { %v8152_v56 = vunpack.c.h.bf16 %v5144_v28  ;;  %v566_v0 = vmul.f32 %v4995_v35, %v547_v60  ;;  %v567_v18 = vmul.f32 %v4997_v42, %v548_v17  ;;  %v8161_v47 = vunpack.c.l.bf16 %v5152_v30 }
  0x67   : > { %v568_v55 = vmul.f32 %v4995_v35, %v549_v1  ;;  %v569_v61 = vmul.f32 %v4997_v42, %v550_v4  ;;  %v570_v49 = vmul.f32 %v4995_v35, %v8159_v32  ;;  %v8160_v51 = vunpack.c.h.bf16 %v5152_v30 }
  0x68   : > { %v571_v62 = vmul.f32 %v4997_v42, %v8158_v39  ;;  %v572_v29 = vmul.f32 %v4995_v35, %v8157_v36  ;;  %v573_v6 = vmul.f32 %v4997_v42, %v8156_v58  ;;  %v574_v8 = vmul.f32 %v4995_v35, %v8155_v59 }
  0x69   : > { %v575_v3 = vmul.f32 %v4997_v42, %v8154_v38  ;;  %v576_v13 = vmul.f32 %v4995_v35, %v8153_v45  ;;  %v577_v33 = vmul.f32 %v4997_v42, %v8151_v46  ;;  %v5204_v57 = vmul.f32 %v4995_v35, %v8150_v54 }
  0x6a   : > { %v579_v21 = vmul.f32 %v4997_v42, %v8152_v56  ;;  %v582_v22 = vrot.slane %v566_v0, 4  ;;  %v588_v27 = vsel %vm241_vm0, %v567_v18, 0.0  ;;  %v595_v41 = vrot.slane %v568_v55, 4 }
  0x6b   : > { %v589_v20 = vrot.slane %v588_v27, 4  ;;  %v601_v9 = vsel %vm241_vm0, %v569_v61, 0.0  ;;  %v608_v23 = vrot.slane %v570_v49, 4  ;;  %v614_v48 = vsel %vm241_vm0, %v571_v62, 0.0 }
  0x6c   : > { %v583_v5 = vadd.f32 %v582_v22, %v566_v0  ;;  %v602_v63 = vrot.slane %v601_v9, 4  ;;  %v621_v11 = vrot.slane %v572_v29, 4  ;;  %v596_v24 = vadd.f32 %v595_v41, %v568_v55 }
  0x6d   : > { %v590_v50 = vadd.f32 %v589_v20, %v588_v27  ;;  %v609_v19 = vadd.f32 %v608_v23, %v570_v49  ;;  %v615_v43 = vrot.slane %v614_v48, 4  ;;  %v627_v45 = vsel %vm241_vm0, %v573_v6, 0.0 }
  0x6e   : > { %v584_v54 = vrot.slane %v583_v5, 2  ;;  %v603_v46 = vadd.f32 %v602_v63, %v601_v9  ;;  %v622_v56 = vadd.f32 %v621_v11, %v572_v29  ;;  %v597_v38 = vrot.slane %v596_v24, 2 }
  0x6f   : > { %v591_v18 = vrot.slane %v590_v50, 2  ;;  %v610_v59 = vrot.slane %v609_v19, 2  ;;  %v616_v58 = vadd.f32 %v615_v43, %v614_v48  ;;  %v628_v22 = vrot.slane %v627_v45, 4 }
  0x70   : > { %v585_v61 = vadd.f32 %v584_v54, %v583_v5  ;;  %v604_v36 = vrot.slane %v603_v46, 2  ;;  %v623_v0 = vrot.slane %v622_v56, 2  ;;  %v598_v62 = vadd.f32 %v597_v38, %v596_v24 }
  0x71   : > { %v592_v39 = vadd.f32 %v591_v18, %v590_v50  ;;  %v611_v32 = vadd.f32 %v610_v59, %v609_v19  ;;  %v617_v27 = vrot.slane %v616_v58, 2  ;;  %v629_v41 = vadd.f32 %v628_v22, %v627_v45 }
  0x72   : > { %v586_v55 = vrot.slane %v585_v61, 1  ;;  %v605_v49 = vadd.f32 %v604_v36, %v603_v46  ;;  %v624_v20 = vadd.f32 %v623_v0, %v622_v56  ;;  %v599_v29 = vrot.slane %v598_v62, 1 }
  0x73   : > { %v593_v9 = vrot.slane %v592_v39, 1  ;;  %v612_v23 = vrot.slane %v611_v32, 1  ;;  %v618_v6 = vadd.f32 %v617_v27, %v616_v58  ;;  %v580_v63 = vmul.f32 %v4995_v35, %v8161_v47 }
  0x74   : > { %v606_v54 = vrot.slane %v605_v49, 1  ;;  %v625_v5 = vrot.slane %v624_v20, 1  ;;  %v630_v48 = vrot.slane %v629_v41, 2  ;;  %v581_v59 = vmul.f32 %v4997_v42, %v8160_v51 }
  0x75   : > { %v587_v38 = vadd.f32 %v586_v55, %v585_v61  ;;  %v5219_v11 = vadd.f32 %v593_v9, %v592_v39  ;;  %v600_v36 = vadd.f32 %v599_v29, %v598_v62  ;;  %v613_v45 = vadd.f32 %v612_v23, %v611_v32 }
  0x76   : > { %v619_v46 = vrot.slane %v618_v6, 1  ;;  %v631_v56 = vadd.f32 %v630_v48, %v629_v41  ;;  %v634_v50 = vrot.slane %v574_v8, 4  ;;  %v607_v58 = vadd.f32 %v606_v54, %v605_v49 }
  0x77   : > { %v640_v24 = vsel %vm241_vm0, %v575_v3, 0.0  ;;  %v647_v19 = vrot.slane %v576_v13, 4  ;;  %v653_v35 = vsel %vm241_vm0, %v577_v33, 0.0  ;;  %v626_v43 = vadd.f32 %v625_v5, %v624_v20 }
  0x78   : > { %v635_v18 = vadd.f32 %v634_v50, %v574_v8  ;;  %v641_v0 = vrot.slane %v640_v24, 4  ;;  %v654_v22 = vrot.slane %v653_v35, 4  ;;  %v660_v42 = vrot.slane %v5204_v57, 4 }
  0x79   : > { %v648_v27 = vadd.f32 %v647_v19, %v576_v13  ;;  %v666_v39 = vsel %vm241_vm0, %v579_v21, 0.0  ;;  %v673_v61 = vrot.slane %v580_v63, 4  ;;  %v632_v32 = vrot.slane %v631_v56, 1 }
  0x7a   : > { %v636_v62 = vrot.slane %v635_v18, 2  ;;  %v642_v55 = vadd.f32 %v641_v0, %v640_v24  ;;  %v655_v41 = vadd.f32 %v654_v22, %v653_v35  ;;  %v661_v3 = vadd.f32 %v660_v42, %v5204_v57 }
  0x7b   : > { %v649_v49 = vrot.slane %v648_v27, 2  ;;  %v667_v9 = vrot.slane %v666_v39, 4  ;;  %v674_v29 = vadd.f32 %v673_v61, %v580_v63  ;;  %v679_v23 = vsel %vm241_vm0, %v581_v59, 0.0 }
  0x7c   : > { %v637_v33 = vadd.f32 %v636_v62, %v635_v18  ;;  %v643_v20 = vrot.slane %v642_v55, 2  ;;  %v656_v8 = vrot.slane %v655_v41, 2  ;;  %v662_v54 = vrot.slane %v661_v3, 2 }
  0x7d   : > { %v650_v13 = vadd.f32 %v649_v49, %v648_v27  ;;  %v668_v5 = vadd.f32 %v667_v9, %v666_v39  ;;  %v675_v48 = vrot.slane %v674_v29, 2  ;;  %v680_v24 = vrot.slane %v679_v23, 4  ;;  %v5228_v49 = vld [vmem:[%s5084_s11 + $0x8] sm:$0xff] }
  0x7e   : > { %v638_v21 = vrot.slane %v637_v33, 1  ;;  %v644_v50 = vadd.f32 %v643_v20, %v642_v55  ;;  %v657_v19 = vadd.f32 %v656_v8, %v655_v41  ;;  %v663_v0 = vadd.f32 %v662_v54, %v661_v3 }
  0x7f   : > { %v651_v35 = vrot.slane %v650_v13, 1  ;;  %v669_v22 = vrot.slane %v668_v5, 2  ;;  %v676_v57 = vadd.f32 %v675_v48, %v674_v29  ;;  %v620_v42 = vadd.f32 %v619_v46, %v618_v6 }
  0x80   : > { %v633_v63 = vadd.f32 %v632_v32, %v631_v56  ;;  %v645_v18 = vrot.slane %v644_v50, 1  ;;  %v681_v61 = vadd.f32 %v680_v24, %v679_v23  ;;  %v639_v62 = vadd.f32 %v638_v21, %v637_v33 }
  0x81   : > { %v664_v51 = vrot.slane %v663_v0, 1  ;;  %v670_v59 = vadd.f32 %v669_v22, %v668_v5  ;;  %v677_v27 = vrot.slane %v676_v57, 1  ;;  %v652_v39 = vadd.f32 %v651_v35, %v650_v13 }
  0x82   : > { %v658_v9 = vrot.slane %v657_v19, 1  ;;  %v682_v47 = vrot.slane %v681_v61, 2  ;;  %v702_v55 = vsel %vm356_vm1, %v600_v36, %v587_v38  ;;  %v533_v41 = vsel %vm366_vm6, %v5127_v15, %v5149_v44 }
  0x83   : > { %v646_v3 = vadd.f32 %v645_v18, %v644_v50  ;;  %v665_v6 = vadd.f32 %v664_v51, %v663_v0  ;;  %v703_v46 = vsel %vm358_vm2, %v613_v45, %v702_v55  ;;  %v671_v56 = vrot.slane %v670_v59, 1 }
  0x84   : > { %v683_v32 = vadd.f32 %v682_v47, %v681_v61  ;;  %v704_v29 = vsel %vm360_vm3, %v626_v43, %v703_v46  ;;  %v709_v33 = vsel %vm356_vm1, %v607_v58, %v5219_v11  ;;  %v5240_v20 = vadd.f32 %v5115_v25, %v5228_v49 }
  0x85   : > { %v678_v38 = vadd.f32 %v677_v27, %v676_v57  ;;  %v705_v36 = vsel %vm362_vm4, %v639_v62, %v704_v29  ;;  %v710_v15 = vsel %vm358_vm2, %v620_v42, %v709_v33  ;;  %v659_v44 = vadd.f32 %v658_v9, %v657_v19 }
  0x86   : > { %v684_v51 = vrot.slane %v683_v32, 1  ;;  %v706_v45 = vsel %vm364_vm5, %v652_v39, %v705_v36  ;;  %v711_v47 = vsel %vm360_vm3, %v633_v63, %v710_v15  ;;  %v5249_v43 = vsel %vm368_vm7, %v5121_v2, %v5141_v40 }
  0x87   : > { %v5253_v25 = vsel %vm368_vm7, %v5138_v14, %v533_v41  ;;  %v707_v11 = vsel %vm366_vm6, %v665_v6, %v706_v45  ;;  %v712_v58 = vsel %vm362_vm4, %v646_v3, %v711_v47  ;;  %v5257_v8 = vadd.f32 %v671_v56, %v670_v59 }
  0x88   : > { %v723_v23 = vmul.f32 %v5008_v52, %v547_v60  ;;  %v724_v13 = vmul.f32 %v5106_v37, %v548_v17  ;;  %v725_v2 = vmul.f32 %v5008_v52, %v549_v1  ;;  %v5268_v14 = vadd.f32 %v684_v51, %v683_v32 }
  0x89   : > { %v5271_v40 = vsel %vm368_vm7, %v678_v38, %v707_v11  ;;  %v726_v54 = vmul.f32 %v5106_v37, %v550_v4  ;;  %v8309_v5 = vunpack.c.l.bf16 %v5111_v16  ;;  %v5280_v7 = vsel %vm364_vm5, %v659_v44, %v712_v58 }
  0x8a   : > { %v8310_v17 = vunpack.c.h.bf16 %v5111_v16  ;;  %v8311_v48 = vunpack.c.l.bf16 %v5125_v34  ;;  %v8312_v50 = vunpack.c.h.bf16 %v5125_v34  ;;  %v8313_v4 = vunpack.c.l.bf16 %v5130_v53 }
  0x8b   : > { %v727_v60 = vmul.f32 %v5008_v52, %v8309_v5  ;;  %v8314_v24 = vunpack.c.h.bf16 %v5130_v53  ;;  %v8315_v16 = vunpack.c.l.bf16 %v5133_v26  ;;  %v8316_v22 = vunpack.c.h.bf16 %v5133_v26 }
  0x8c   : > { %v728_v1 = vmul.f32 %v5106_v37, %v8310_v17  ;;  %v729_v21 = vmul.f32 %v5008_v52, %v8311_v48  ;;  %v730_v12 = vmul.f32 %v5106_v37, %v8312_v50  ;;  %v731_v19 = vmul.f32 %v5008_v52, %v8313_v4 }
  0x8d   : > { %v732_v35 = vmul.f32 %v5106_v37, %v8314_v24  ;;  %v733_v0 = vmul.f32 %v5008_v52, %v8315_v16  ;;  %v734_v57 = vmul.f32 %v5106_v37, %v8316_v22  ;;  %v8317_v34 = vunpack.c.l.bf16 %v5144_v28 }
  0x8e   : > { %v8318_v63 = vunpack.c.h.bf16 %v5144_v28  ;;  %v739_v53 = vrot.slane %v723_v23, 4  ;;  %v745_v61 = vsel %vm241_vm0, %v724_v13, 0.0  ;;  %v752_v59 = vrot.slane %v725_v2, 4 }
  0x8f   : > { %v5306_v42 = vmul.f32 %v5008_v52, %v8317_v34  ;;  %v746_v62 = vrot.slane %v745_v61, 4  ;;  %v758_v27 = vsel %vm241_vm0, %v726_v54, 0.0  ;;  %v765_v39 = vrot.slane %v727_v60, 4 }
  0x90   : > { %v736_v18 = vmul.f32 %v5106_v37, %v8318_v63  ;;  %v740_v26 = vadd.f32 %v739_v53, %v723_v23  ;;  %v759_v9 = vrot.slane %v758_v27, 4  ;;  %v771_v55 = vsel %vm241_vm0, %v728_v1, 0.0 }
  0x91   : > { %v778_v41 = vrot.slane %v729_v21, 4  ;;  %v747_v3 = vadd.f32 %v746_v62, %v745_v61  ;;  %v753_v6 = vadd.f32 %v752_v59, %v725_v2  ;;  %v766_v46 = vadd.f32 %v765_v39, %v727_v60 }
  0x92   : > { %v772_v56 = vrot.slane %v771_v55, 4  ;;  %v741_v28 = vrot.slane %v740_v26, 2  ;;  %v760_v32 = vadd.f32 %v759_v9, %v758_v27  ;;  %v784_v33 = vsel %vm241_vm0, %v730_v12, 0.0 }
  0x93   : > { %v779_v29 = vadd.f32 %v778_v41, %v729_v21  ;;  %v748_v38 = vrot.slane %v747_v3, 2  ;;  %v754_v36 = vrot.slane %v753_v6, 2  ;;  %v767_v15 = vrot.slane %v766_v46, 2 }
  0x94   : > { %v773_v44 = vadd.f32 %v772_v56, %v771_v55  ;;  %v742_v51 = vadd.f32 %v741_v28, %v740_v26  ;;  %v761_v45 = vrot.slane %v760_v32, 2  ;;  %v785_v11 = vrot.slane %v784_v33, 4 }
  0x95   : > { %v780_v47 = vrot.slane %v779_v29, 2  ;;  %v749_v58 = vadd.f32 %v748_v38, %v747_v3  ;;  %v755_v23 = vadd.f32 %v754_v36, %v753_v6  ;;  %v768_v13 = vadd.f32 %v767_v15, %v766_v46 }
  0x96   : > { %v774_v54 = vrot.slane %v773_v44, 2  ;;  %v743_v2 = vrot.slane %v742_v51, 1  ;;  %v762_v5 = vadd.f32 %v761_v45, %v760_v32  ;;  %v786_v17 = vadd.f32 %v785_v11, %v784_v33 }
  0x97   : > { %v781_v60 = vadd.f32 %v780_v47, %v779_v29  ;;  %v750_v1 = vrot.slane %v749_v58, 1  ;;  %v756_v48 = vrot.slane %v755_v23, 1  ;;  %v769_v21 = vrot.slane %v768_v13, 1 }
  0x98   : > { %v775_v50 = vadd.f32 %v774_v54, %v773_v44  ;;  %v8319_v12 = vunpack.c.l.bf16 %v5152_v30  ;;  %v763_v24 = vrot.slane %v762_v5, 1  ;;  %v787_v22 = vrot.slane %v786_v17, 2 }
  0x99   : > { %v782_v16 = vrot.slane %v781_v60, 1  ;;  %v8320_v34 = vunpack.c.h.bf16 %v5152_v30  ;;  %v744_v53 = vadd.f32 %v743_v2, %v742_v51  ;;  %v751_v61 = vadd.f32 %v750_v1, %v749_v58 }
  0x9a   : > { %v737_v4 = vmul.f32 %v5008_v52, %v8319_v12  ;;  %v757_v62 = vadd.f32 %v756_v48, %v755_v23  ;;  %v770_v59 = vadd.f32 %v769_v21, %v768_v13  ;;  %v776_v27 = vrot.slane %v775_v50, 1 }
  0x9b   : > { %v738_v63 = vmul.f32 %v5106_v37, %v8320_v34  ;;  %v788_v39 = vadd.f32 %v787_v22, %v786_v17  ;;  %v791_v26 = vrot.slane %v731_v19, 4  ;;  %v764_v9 = vadd.f32 %v763_v24, %v762_v5 }
  0x9c   : > { %v797_v55 = vsel %vm241_vm0, %v732_v35, 0.0  ;;  %v804_v41 = vrot.slane %v733_v0, 4  ;;  %v810_v52 = vsel %vm241_vm0, %v734_v57, 0.0  ;;  %v783_v3 = vadd.f32 %v782_v16, %v781_v60 }
  0x9d   : > { %v792_v6 = vadd.f32 %v791_v26, %v731_v19  ;;  %v798_v46 = vrot.slane %v797_v55, 4  ;;  %v811_v56 = vrot.slane %v810_v52, 4  ;;  %v817_v37 = vrot.slane %v5306_v42, 4 }
  0x9e   : > { %v805_v30 = vadd.f32 %v804_v41, %v733_v0  ;;  %v823_v28 = vsel %vm241_vm0, %v736_v18, 0.0  ;;  %v830_v32 = vrot.slane %v737_v4, 4  ;;  %v789_v29 = vrot.slane %v788_v39, 1 }
  0x9f   : > { %v793_v33 = vrot.slane %v792_v6, 2  ;;  %v799_v38 = vadd.f32 %v798_v46, %v797_v55  ;;  %v812_v36 = vadd.f32 %v811_v56, %v810_v52  ;;  %v818_v35 = vadd.f32 %v817_v37, %v5306_v42 }
  0xa0   : > { %v806_v15 = vrot.slane %v805_v30, 2  ;;  %v824_v44 = vrot.slane %v823_v28, 4  ;;  %v831_v51 = vadd.f32 %v830_v32, %v737_v4  ;;  %v836_v47 = vsel %vm241_vm0, %v738_v63, 0.0 }
  0xa1   : > { %v794_v57 = vadd.f32 %v793_v33, %v792_v6  ;;  %v800_v45 = vrot.slane %v799_v38, 2  ;;  %v813_v19 = vrot.slane %v812_v36, 2  ;;  %v819_v11 = vrot.slane %v818_v35, 2 }
  0xa2   : > { %v807_v0 = vadd.f32 %v806_v15, %v805_v30  ;;  %v825_v58 = vadd.f32 %v824_v44, %v823_v28  ;;  %v832_v23 = vrot.slane %v831_v51, 2  ;;  %v837_v2 = vrot.slane %v836_v47, 4  ;;  %v5370_v15 = vld [vmem:[%s4850_s27 + $0x1b0] sm:$0xff]  ;;  %v5374_v44 = vld [vmem:[%s4850_s27 + $0x218] sm:$0xff] }
  0xa3   : > { %v795_v18 = vrot.slane %v794_v57, 1  ;;  %v801_v13 = vadd.f32 %v800_v45, %v799_v38  ;;  %v814_v54 = vadd.f32 %v813_v19, %v812_v36  ;;  %v820_v60 = vadd.f32 %v819_v11, %v818_v35  ;;  %v5355_v38 = vld [vmem:[%s4850_s27 + $0xe0] sm:$0xff]  ;;  %v5389_v19 = vld [vmem:[%s4850_s27 + $0x2e8] sm:$0xff] }
  0xa4   : > { %v808_v5 = vrot.slane %v807_v0, 1  ;;  %v826_v17 = vrot.slane %v825_v58, 2  ;;  %v833_v1 = vadd.f32 %v832_v23, %v831_v51  ;;  %v777_v42 = vadd.f32 %v776_v27, %v775_v50  ;;  %v5386_v45 = vld [vmem:[%s4850_s27 + $0x280] sm:$0xff] }
  0xa5   : > { %v802_v48 = vrot.slane %v801_v13, 1  ;;  %v815_v21 = vrot.slane %v814_v54, 1  ;;  %v838_v12 = vadd.f32 %v837_v2, %v836_v47  ;;  %v790_v4 = vadd.f32 %v789_v29, %v788_v39  ;;  %v5339_v29 = vld [vmem:[%s4850_s27 + $0x10] sm:$0xff] }
  0xa6   : > { %v796_v24 = vadd.f32 %v795_v18, %v794_v57  ;;  %v821_v16 = vrot.slane %v820_v60, 1  ;;  %v827_v22 = vadd.f32 %v826_v17, %v825_v58  ;;  %v809_v34 = vadd.f32 %v808_v5, %v807_v0  ;;  %v4725_v17 = vld [vmem:[%s8142_s0 + $0x78] sm:$0xff] }
  0xa7   : > { %v834_v63 = vrot.slane %v833_v1, 1  ;;  %v839_v26 = vrot.slane %v838_v12, 2  ;;  %v859_v55 = vsel %vm356_vm1, %v757_v62, %v744_v53  ;;  %v803_v41 = vadd.f32 %v802_v48, %v801_v13 }
  0xa8   : > { %v822_v52 = vadd.f32 %v821_v16, %v820_v60  ;;  %v828_v6 = vrot.slane %v827_v22, 1  ;;  %v860_v46 = vsel %vm358_vm2, %v770_v59, %v859_v55  ;;  %v816_v50 = vadd.f32 %v815_v21, %v814_v54 }
  0xa9   : > { %v840_v27 = vadd.f32 %v839_v26, %v838_v12  ;;  %v861_v56 = vsel %vm360_vm3, %v783_v3, %v860_v46  ;;  %v866_v39 = vsel %vm356_vm1, %v764_v9, %v751_v61  ;;  %v714_v30 = vsel %vm366_vm6, %v5257_v8, %v5280_v7  ;;  %v5342_v61 = vld [vmem:[%s4850_s27 + $0x78] sm:$0xff] }
  0xaa   : > { %v829_v37 = vadd.f32 %v828_v6, %v827_v22  ;;  %v862_v53 = vsel %vm362_vm4, %v796_v24, %v861_v56  ;;  %v867_v62 = vsel %vm358_vm2, %v777_v42, %v866_v39  ;;  %v835_v28 = vadd.f32 %v834_v63, %v833_v1 }
  0xab   : > { %v841_v59 = vrot.slane %v840_v27, 1  ;;  %v863_v32 = vsel %vm364_vm5, %v809_v34, %v862_v53  ;;  %v868_v3 = vsel %vm360_vm3, %v790_v4, %v867_v62  ;;  %v5346_v8 = vadd.f32 %v5249_v43, %v5092_v10 }
  0xac   : > { %v5350_v7 = vadd.f32 %v5253_v25, %v5228_v49  ;;  %v864_v9 = vsel %vm366_vm6, %v822_v52, %v863_v32  ;;  %v869_v33 = vsel %vm362_vm4, %v803_v41, %v868_v3  ;;  %v5359_v36 = vsel %vm368_vm7, %v5268_v14, %v714_v30  ;;  %v5367_v25 = vld [vmem:[%s4850_s27 + $0x148] sm:$0xff] }
  0xad   : > { %v5363_v10 = vadd.f32 %v5271_v40, %v5119_v31  ;;  %v842_v43 = vadd.f32 %v841_v59, %v840_v27  ;;  %v870_v49 = vsel %vm364_vm5, %v816_v50, %v869_v33  ;;  %v885_v51 = vunpack.c.l.bf16 %v5339_v29  ;;  %v901_v31 = vld [vmem:[%s8142_s0 + $0x10] sm:$0xff] }
  0xae   : > { %v871_v35 = vsel %vm366_vm6, %v829_v37, %v870_v49  ;;  %v886_v14 = vunpack.c.h.bf16 %v5339_v29  ;;  %v887_v57 = vunpack.c.l.bf16 %v5342_v61  ;;  %v5383_v40 = vsel %vm368_vm7, %v835_v28, %v864_v9 }
  0xaf   : > { %v8174_v47 = vunpack.c.h.bf16 %v5342_v61  ;;  %v8173_v0 = vunpack.c.l.bf16 %v5355_v38  ;;  %v8169_v11 = vunpack.c.h.bf16 %v5355_v38  ;;  %v5395_v58 = vsel %vm368_vm7, %v842_v43, %v871_v35 }
  0xb0   : > { %v8168_v23 = vunpack.c.l.bf16 %v5367_v25  ;;  %v8167_v18 = vunpack.c.h.bf16 %v5367_v25  ;;  %v8166_v13 = vunpack.c.l.bf16 %v5370_v15  ;;  %v8165_v54 = vunpack.c.h.bf16 %v5370_v15 }
  0xb1   : > { %v8164_v2 = vunpack.c.l.bf16 %v5374_v44  ;;  %v5402_v5 = vunpack.c.l.bf16 %v901_v31  ;;  %v5404_v60 = vunpack.c.h.bf16 %v901_v31  ;;  %v8163_v1 = vunpack.c.h.bf16 %v5374_v44 }
  0xb2   : > { %v8162_v42 = vunpack.c.l.bf16 %v5386_v45  ;;  %v8172_v48 = vunpack.c.h.bf16 %v5386_v45  ;;  %v8171_v21 = vunpack.c.l.bf16 %v5389_v19  ;;  %v8170_v22 = vunpack.c.h.bf16 %v5389_v19 }
  0xb3   : > { %v904_v12 = vmul.f32 %v5402_v5, %v885_v51  ;;  %v905_v4 = vmul.f32 %v5404_v60, %v886_v14  ;;  %v906_v24 = vmul.f32 %v5402_v5, %v887_v57  ;;  %v907_v16 = vmul.f32 %v5404_v60, %v8174_v47 }
  0xb4   : > { %v908_v34 = vmul.f32 %v5402_v5, %v8173_v0  ;;  %v909_v63 = vmul.f32 %v5404_v60, %v8169_v11  ;;  %v5432_v26 = vunpack.c.l.bf16 %v4725_v17  ;;  %v910_v55 = vmul.f32 %v5402_v5, %v8168_v23 }
  0xb5   : > { %v911_v41 = vmul.f32 %v5404_v60, %v8167_v18  ;;  %v912_v52 = vmul.f32 %v5402_v5, %v8166_v13  ;;  %v5443_v6 = vunpack.c.h.bf16 %v4725_v17  ;;  %v913_v46 = vmul.f32 %v5404_v60, %v8165_v54 }
  0xb6   : > { %v5451_v50 = vmul.f32 %v5402_v5, %v8164_v2  ;;  %v915_v27 = vmul.f32 %v5404_v60, %v8163_v1  ;;  %v5459_v56 = vmul.f32 %v5402_v5, %v8162_v42  ;;  %v920_v39 = vrot.slane %v904_v12, 4 }
  0xb7   : > { %v926_v30 = vsel %vm241_vm0, %v905_v4, 0.0  ;;  %v933_v37 = vrot.slane %v906_v24, 4  ;;  %v939_v53 = vsel %vm241_vm0, %v907_v16, 0.0  ;;  %v946_v59 = vrot.slane %v908_v34, 4 }
  0xb8   : > { %v927_v62 = vrot.slane %v926_v30, 4  ;;  %v940_v28 = vrot.slane %v939_v53, 4  ;;  %v952_v32 = vsel %vm241_vm0, %v909_v63, 0.0  ;;  %v921_v3 = vadd.f32 %v920_v39, %v904_v12 }
  0xb9   : > { %v934_v9 = vadd.f32 %v933_v37, %v906_v24  ;;  %v953_v33 = vrot.slane %v952_v32, 4  ;;  %v959_v43 = vrot.slane %v910_v55, 4  ;;  %v947_v31 = vadd.f32 %v946_v59, %v908_v34 }
  0xba   : > { %v928_v49 = vadd.f32 %v927_v62, %v926_v30  ;;  %v941_v35 = vadd.f32 %v940_v28, %v939_v53  ;;  %v965_v17 = vsel %vm241_vm0, %v911_v41, 0.0  ;;  %v922_v42 = vrot.slane %v921_v3, 2 }
  0xbb   : > { %v935_v1 = vrot.slane %v934_v9, 2  ;;  %v954_v4 = vadd.f32 %v953_v33, %v952_v32  ;;  %v960_v2 = vadd.f32 %v959_v43, %v910_v55  ;;  %v948_v13 = vrot.slane %v947_v31, 2 }
  0xbc   : > { %v929_v54 = vrot.slane %v928_v49, 2  ;;  %v942_v16 = vrot.slane %v941_v35, 2  ;;  %v966_v18 = vrot.slane %v965_v17, 4  ;;  %v923_v23 = vadd.f32 %v922_v42, %v921_v3 }
  0xbd   : > { %v936_v11 = vadd.f32 %v935_v1, %v934_v9  ;;  %v955_v63 = vrot.slane %v954_v4, 2  ;;  %v961_v12 = vrot.slane %v960_v2, 2  ;;  %v949_v37 = vadd.f32 %v948_v13, %v947_v31 }
  0xbe   : > { %v930_v24 = vadd.f32 %v929_v54, %v928_v49  ;;  %v943_v39 = vadd.f32 %v942_v16, %v941_v35  ;;  %v967_v30 = vadd.f32 %v966_v18, %v965_v17  ;;  %v924_v53 = vrot.slane %v923_v23, 1 }
  0xbf   : > { %v937_v34 = vrot.slane %v936_v11, 1  ;;  %v956_v62 = vadd.f32 %v955_v63, %v954_v4  ;;  %v962_v41 = vadd.f32 %v961_v12, %v960_v2  ;;  %v950_v32 = vrot.slane %v949_v37, 1 }
  0xc0   : > { %v931_v28 = vrot.slane %v930_v24, 1  ;;  %v944_v59 = vrot.slane %v943_v39, 1  ;;  %v968_v55 = vrot.slane %v967_v30, 2  ;;  %v917_v33 = vmul.f32 %v5404_v60, %v8172_v48 }
  0xc1   : > { %v918_v1 = vmul.f32 %v5402_v5, %v8171_v21  ;;  %v919_v18 = vmul.f32 %v5404_v60, %v8170_v22  ;;  %v925_v13 = vadd.f32 %v924_v53, %v923_v23  ;;  %v938_v54 = vadd.f32 %v937_v34, %v936_v11 }
  0xc2   : > { %v957_v42 = vrot.slane %v956_v62, 1  ;;  %v963_v2 = vrot.slane %v962_v41, 1  ;;  %v969_v3 = vadd.f32 %v968_v55, %v967_v30  ;;  %v932_v9 = vadd.f32 %v931_v28, %v930_v24 }
  0xc3   : > { %v945_v43 = vadd.f32 %v944_v59, %v943_v39  ;;  %v972_v49 = vrot.slane %v912_v52, 4  ;;  %v978_v35 = vsel %vm241_vm0, %v913_v46, 0.0  ;;  %v951_v31 = vadd.f32 %v950_v32, %v949_v37 }
  0xc4   : > { %v979_v17 = vrot.slane %v978_v35, 4  ;;  %v985_v4 = vrot.slane %v5451_v50, 4  ;;  %v991_v5 = vsel %vm241_vm0, %v915_v27, 0.0  ;;  %v998_v60 = vrot.slane %v5459_v56, 4 }
  0xc5   : > { %v973_v16 = vadd.f32 %v972_v49, %v912_v52  ;;  %v992_v63 = vrot.slane %v991_v5, 4  ;;  %v1004_v11 = vsel %vm241_vm0, %v917_v33, 0.0  ;;  %v970_v23 = vrot.slane %v969_v3, 1 }
  0xc6   : > { %v980_v12 = vadd.f32 %v979_v17, %v978_v35  ;;  %v986_v24 = vadd.f32 %v985_v4, %v5451_v50  ;;  %v1005_v39 = vrot.slane %v1004_v11, 4  ;;  %v999_v46 = vadd.f32 %v998_v60, %v5459_v56 }
  0xc7   : > { %v974_v30 = vrot.slane %v973_v16, 2  ;;  %v993_v53 = vadd.f32 %v992_v63, %v991_v5  ;;  %v1011_v37 = vrot.slane %v918_v1, 4  ;;  %v1017_v52 = vsel %vm241_vm0, %v919_v18, 0.0 }
  0xc8   : > { %v981_v34 = vrot.slane %v980_v12, 2  ;;  %v987_v28 = vrot.slane %v986_v24, 2  ;;  %v1006_v59 = vadd.f32 %v1005_v39, %v1004_v11  ;;  %v1000_v55 = vrot.slane %v999_v46, 2 }
  0xc9   : > { %v975_v27 = vadd.f32 %v974_v30, %v973_v16  ;;  %v994_v32 = vrot.slane %v993_v53, 2  ;;  %v1012_v49 = vadd.f32 %v1011_v37, %v918_v1  ;;  %v1018_v17 = vrot.slane %v1017_v52, 4 }
  0xca   : > { %v982_v33 = vadd.f32 %v981_v34, %v980_v12  ;;  %v988_v22 = vadd.f32 %v987_v28, %v986_v24  ;;  %v1007_v35 = vrot.slane %v1006_v59, 2  ;;  %v1001_v21 = vadd.f32 %v1000_v55, %v999_v46 }
  0xcb   : > { %v976_v50 = vrot.slane %v975_v27, 1  ;;  %v995_v4 = vadd.f32 %v994_v32, %v993_v53  ;;  %v1013_v5 = vrot.slane %v1012_v49, 2  ;;  %v1019_v48 = vadd.f32 %v1018_v17, %v1017_v52 }
  0xcc   : > { %v983_v63 = vrot.slane %v982_v33, 1  ;;  %v989_v56 = vrot.slane %v988_v22, 1  ;;  %v1008_v60 = vadd.f32 %v1007_v35, %v1006_v59  ;;  %v958_v0 = vadd.f32 %v957_v42, %v956_v62 }
  0xcd   : > { %v964_v11 = vadd.f32 %v963_v2, %v962_v41  ;;  %v1002_v39 = vrot.slane %v1001_v21, 1  ;;  %v1014_v18 = vadd.f32 %v1013_v5, %v1012_v49  ;;  %v971_v16 = vadd.f32 %v970_v23, %v969_v3 }
  0xce   : > { %v977_v30 = vadd.f32 %v976_v50, %v975_v27  ;;  %v996_v47 = vrot.slane %v995_v4, 1  ;;  %v1020_v1 = vrot.slane %v1019_v48, 2  ;;  %v984_v12 = vadd.f32 %v983_v63, %v982_v33 }
  0xcf   : > { %v990_v24 = vadd.f32 %v989_v56, %v988_v22  ;;  %v1009_v37 = vrot.slane %v1008_v60, 1  ;;  %v1040_v34 = vsel %vm356_vm1, %v938_v54, %v925_v13  ;;  %v1015_v53 = vrot.slane %v1014_v18, 1 }
  0xd0   : > { %v1021_v46 = vadd.f32 %v1020_v1, %v1019_v48  ;;  %v1041_v28 = vsel %vm358_vm2, %v951_v31, %v1040_v34  ;;  %v1047_v59 = vsel %vm356_vm1, %v945_v43, %v932_v9  ;;  %v5487_v62 = vadd.f32 %v5359_v36, %v5240_v20 }
  0xd1   : > { %v1003_v41 = vadd.f32 %v1002_v39, %v1001_v21  ;;  %v1042_v42 = vsel %vm360_vm3, %v964_v11, %v1041_v28  ;;  %v1048_v2 = vsel %vm358_vm2, %v958_v0, %v1047_v59  ;;  %v997_v3 = vadd.f32 %v996_v47, %v995_v4 }
  0xd2   : > { %v1022_v22 = vrot.slane %v1021_v46, 1  ;;  %v1043_v23 = vsel %vm362_vm4, %v977_v30, %v1042_v42  ;;  %v1049_v13 = vsel %vm360_vm3, %v971_v16, %v1048_v2  ;;  %v5495_v48 = vadd.f32 %v5383_v40, %v5346_v8 }
  0xd3   : > { %v5499_v54 = vadd.f32 %v5395_v58, %v5350_v7  ;;  %v1044_v20 = vsel %vm364_vm5, %v990_v24, %v1043_v23  ;;  %v1050_v36 = vsel %vm362_vm4, %v984_v12, %v1049_v13  ;;  %v5503_v21 = vadd.f32 %v1009_v37, %v1008_v60 }
  0xd4   : > { %v5505_v47 = vadd.f32 %v1015_v53, %v1014_v18  ;;  %v1061_v0 = vmul.f32 %v5432_v26, %v885_v51  ;;  %v1062_v8 = vmul.f32 %v5443_v6, %v886_v14  ;;  %v5513_v40 = vadd.f32 %v1022_v22, %v1021_v46 }
  0xd5   : > { %v5516_v7 = vsel %vm366_vm6, %v1003_v41, %v1044_v20  ;;  %v1063_v58 = vmul.f32 %v5432_v26, %v887_v57  ;;  %v8321_v9 = vunpack.c.h.bf16 %v5342_v61  ;;  %v5525_v31 = vsel %vm364_vm5, %v997_v3, %v1050_v36 }
  0xd6   : > { %v8322_v29 = vunpack.c.l.bf16 %v5355_v38  ;;  %v8323_v14 = vunpack.c.h.bf16 %v5355_v38  ;;  %v8324_v27 = vunpack.c.l.bf16 %v5367_v25  ;;  %v8325_v57 = vunpack.c.h.bf16 %v5367_v25 }
  0xd7   : > { %v1064_v43 = vmul.f32 %v5443_v6, %v8321_v9  ;;  %v8326_v55 = vunpack.c.l.bf16 %v5370_v15  ;;  %v8327_v33 = vunpack.c.h.bf16 %v5370_v15  ;;  %v8328_v38 = vunpack.c.l.bf16 %v5374_v44 }
  0xd8   : > { %v1065_v51 = vmul.f32 %v5432_v26, %v8322_v29  ;;  %v1066_v52 = vmul.f32 %v5443_v6, %v8323_v14  ;;  %v1067_v32 = vmul.f32 %v5432_v26, %v8324_v27  ;;  %v1068_v61 = vmul.f32 %v5443_v6, %v8325_v57 }
  0xd9   : > { %v5542_v49 = vmul.f32 %v5432_v26, %v8326_v55  ;;  %v1070_v35 = vmul.f32 %v5443_v6, %v8327_v33  ;;  %v5550_v17 = vmul.f32 %v5432_v26, %v8328_v38  ;;  %v8329_v50 = vunpack.c.h.bf16 %v5374_v44 }
  0xda   : > { %v8330_v4 = vunpack.c.l.bf16 %v5386_v45  ;;  %v8331_v63 = vunpack.c.h.bf16 %v5386_v45  ;;  %v8332_v56 = vunpack.c.l.bf16 %v5389_v19  ;;  %v1077_v11 = vrot.slane %v1061_v0, 4 }
  0xdb   : > { %v1072_v25 = vmul.f32 %v5443_v6, %v8329_v50  ;;  %v1083_v39 = vsel %vm241_vm0, %v1062_v8, 0.0  ;;  %v1090_v44 = vrot.slane %v1063_v58, 4  ;;  %v1096_v18 = vsel %vm241_vm0, %v1064_v43, 0.0 }
  0xdc   : > { %v5558_v5 = vmul.f32 %v5432_v26, %v8330_v4  ;;  %v1074_v15 = vmul.f32 %v5443_v6, %v8331_v63  ;;  %v5566_v60 = vmul.f32 %v5432_v26, %v8332_v56  ;;  %v1084_v16 = vrot.slane %v1083_v39, 4 }
  0xdd   : > { %v1097_v30 = vrot.slane %v1096_v18, 4  ;;  %v1103_v1 = vrot.slane %v1065_v51, 4  ;;  %v1109_v12 = vsel %vm241_vm0, %v1066_v52, 0.0  ;;  %v1078_v24 = vadd.f32 %v1077_v11, %v1061_v0 }
  0xde   : > { %v1091_v45 = vadd.f32 %v1090_v44, %v1063_v58  ;;  %v1110_v37 = vrot.slane %v1109_v12, 4  ;;  %v1116_v34 = vrot.slane %v1067_v32, 4  ;;  %v1085_v53 = vadd.f32 %v1084_v16, %v1083_v39 }
  0xdf   : > { %v1098_v46 = vadd.f32 %v1097_v30, %v1096_v18  ;;  %v1104_v28 = vadd.f32 %v1103_v1, %v1065_v51  ;;  %v1122_v26 = vsel %vm241_vm0, %v1068_v61, 0.0  ;;  %v1079_v59 = vrot.slane %v1078_v24, 2 }
  0xe0   : > { %v1092_v41 = vrot.slane %v1091_v45, 2  ;;  %v1111_v42 = vadd.f32 %v1110_v37, %v1109_v12  ;;  %v1117_v2 = vadd.f32 %v1116_v34, %v1067_v32  ;;  %v1086_v3 = vrot.slane %v1085_v53, 2 }
  0xe1   : > { %v1099_v22 = vrot.slane %v1098_v46, 2  ;;  %v1105_v23 = vrot.slane %v1104_v28, 2  ;;  %v1123_v13 = vrot.slane %v1122_v26, 4  ;;  %v1080_v20 = vadd.f32 %v1079_v59, %v1078_v24 }
  0xe2   : > { %v1093_v36 = vadd.f32 %v1092_v41, %v1091_v45  ;;  %v1112_v8 = vrot.slane %v1111_v42, 2  ;;  %v1118_v0 = vrot.slane %v1117_v2, 2  ;;  %v1087_v58 = vadd.f32 %v1086_v3, %v1085_v53 }
  0xe3   : > { %v1100_v9 = vadd.f32 %v1099_v22, %v1098_v46  ;;  %v1106_v43 = vadd.f32 %v1105_v23, %v1104_v28  ;;  %v1124_v29 = vadd.f32 %v1123_v13, %v1122_v26  ;;  %v1081_v14 = vrot.slane %v1080_v20, 1 }
  0xe4   : > { %v1094_v51 = vrot.slane %v1093_v36, 1  ;;  %v1113_v52 = vadd.f32 %v1112_v8, %v1111_v42  ;;  %v1119_v27 = vadd.f32 %v1118_v0, %v1117_v2  ;;  %v1088_v57 = vrot.slane %v1087_v58, 1 }
  0xe5   : > { %v1101_v61 = vrot.slane %v1100_v9, 1  ;;  %v1107_v55 = vrot.slane %v1106_v43, 1  ;;  %v1125_v32 = vrot.slane %v1124_v29, 2  ;;  %v8333_v33 = vunpack.c.h.bf16 %v5389_v19 }
  0xe6   : > { %v1082_v50 = vadd.f32 %v1081_v14, %v1080_v20  ;;  %v1114_v4 = vrot.slane %v1113_v52, 1  ;;  %v1120_v63 = vrot.slane %v1119_v27, 1  ;;  %v1089_v56 = vadd.f32 %v1088_v57, %v1087_v58 }
  0xe7   : > { %v1076_v38 = vmul.f32 %v5443_v6, %v8333_v33  ;;  %v1095_v11 = vadd.f32 %v1094_v51, %v1093_v36  ;;  %v1102_v39 = vadd.f32 %v1101_v61, %v1100_v9  ;;  %v1126_v44 = vadd.f32 %v1125_v32, %v1124_v29 }
  0xe8   : > { %v1108_v18 = vadd.f32 %v1107_v55, %v1106_v43  ;;  %v1115_v16 = vadd.f32 %v1114_v4, %v1113_v52  ;;  %v1129_v30 = vrot.slane %v5542_v49, 4  ;;  %v1135_v1 = vsel %vm241_vm0, %v1070_v35, 0.0 }
  0xe9   : > { %v1121_v12 = vadd.f32 %v1120_v63, %v1119_v27  ;;  %v1136_v24 = vrot.slane %v1135_v1, 4  ;;  %v1142_v45 = vrot.slane %v5550_v17, 4  ;;  %v1148_v19 = vsel %vm241_vm0, %v1072_v25, 0.0 }
  0xea   : > { %v1130_v6 = vadd.f32 %v1129_v30, %v5542_v49  ;;  %v1149_v37 = vrot.slane %v1148_v19, 4  ;;  %v1155_v34 = vrot.slane %v5558_v5, 4  ;;  %v1161_v53 = vsel %vm241_vm0, %v1074_v15, 0.0 }
  0xeb   : > { %v1127_v46 = vrot.slane %v1126_v44, 1  ;;  %v1137_v28 = vadd.f32 %v1136_v24, %v1135_v1  ;;  %v1143_v26 = vadd.f32 %v1142_v45, %v5550_v17  ;;  %v1162_v59 = vrot.slane %v1161_v53, 4 }
  0xec   : > { %v1131_v41 = vrot.slane %v1130_v6, 2  ;;  %v1150_v35 = vadd.f32 %v1149_v37, %v1148_v19  ;;  %v1156_v42 = vadd.f32 %v1155_v34, %v5558_v5  ;;  %v1168_v2 = vrot.slane %v5566_v60, 4 }
  0xed   : > { %v1138_v3 = vrot.slane %v1137_v28, 2  ;;  %v1144_v25 = vrot.slane %v1143_v26, 2  ;;  %v1163_v22 = vadd.f32 %v1162_v59, %v1161_v53  ;;  %v1174_v49 = vsel %vm241_vm0, %v1076_v38, 0.0 }
  0xee   : > { %v1132_v23 = vadd.f32 %v1131_v41, %v1130_v6  ;;  %v1151_v13 = vrot.slane %v1150_v35, 2  ;;  %v1157_v20 = vrot.slane %v1156_v42, 2  ;;  %v1169_v15 = vadd.f32 %v1168_v2, %v5566_v60  ;;  %v5591_v6 = vld [vmem:[%s4850_s27 + $0x18] sm:$0xff] }
  0xef   : > { %v1139_v36 = vadd.f32 %v1138_v3, %v1137_v28  ;;  %v1145_v8 = vadd.f32 %v1144_v25, %v1143_v26  ;;  %v1164_v17 = vrot.slane %v1163_v22, 2  ;;  %v1175_v0 = vrot.slane %v1174_v49, 4  ;;  %v5618_v41 = vld [vmem:[%s4850_s27 + $0x1b8] sm:$0xff]  ;;  %v5630_v25 = vld [vmem:[%s4850_s27 + $0x220] sm:$0xff] }
  0xf0   : > { %v1133_v58 = vrot.slane %v1132_v23, 1  ;;  %v1152_v9 = vadd.f32 %v1151_v13, %v1150_v35  ;;  %v1158_v43 = vadd.f32 %v1157_v20, %v1156_v42  ;;  %v1170_v5 = vrot.slane %v1169_v15, 2  ;;  %v5640_v13 = vld [vmem:[%s4850_s27 + $0x2f0] sm:$0xff] }
  0xf1   : > { %v1140_v29 = vrot.slane %v1139_v36, 1  ;;  %v1146_v14 = vrot.slane %v1145_v8, 1  ;;  %v1165_v51 = vadd.f32 %v1164_v17, %v1163_v22  ;;  %v1176_v52 = vadd.f32 %v1175_v0, %v1174_v49  ;;  %v1239_v49 = vld [vmem:[%s8142_s0 + $0x18] sm:$0xff] }
  0xf2   : > { %v1128_v27 = vadd.f32 %v1127_v46, %v1126_v44  ;;  %v1153_v57 = vrot.slane %v1152_v9, 1  ;;  %v1159_v61 = vrot.slane %v1158_v43, 1  ;;  %v1171_v55 = vadd.f32 %v1170_v5, %v1169_v15 }
  0xf3   : > { %v1134_v32 = vadd.f32 %v1133_v58, %v1132_v23  ;;  %v1141_v33 = vadd.f32 %v1140_v29, %v1139_v36  ;;  %v1166_v60 = vrot.slane %v1165_v51, 1  ;;  %v1177_v38 = vrot.slane %v1176_v52, 2  ;;  %v5637_v23 = vld [vmem:[%s4850_s27 + $0x288] sm:$0xff]  ;;  %v4726_v29 = vld [vmem:[%s8142_s0 + $0x80] sm:$0xff] }
  0xf4   : > { %v1147_v4 = vadd.f32 %v1146_v14, %v1145_v8  ;;  %v1154_v63 = vadd.f32 %v1153_v57, %v1152_v9  ;;  %v1172_v30 = vrot.slane %v1171_v55, 1  ;;  %v1197_v1 = vsel %vm356_vm1, %v1095_v11, %v1082_v50 }
  0xf5   : > { %v1160_v24 = vadd.f32 %v1159_v61, %v1158_v43  ;;  %v1178_v45 = vadd.f32 %v1177_v38, %v1176_v52  ;;  %v1198_v19 = vsel %vm358_vm2, %v1108_v18, %v1197_v1  ;;  %v1204_v44 = vsel %vm356_vm1, %v1102_v39, %v1089_v56  ;;  %v5604_v39 = vld [vmem:[%s4850_s27 + $0x80] sm:$0xff] }
  0xf6   : > { %v1046_v37 = vsel %vm368_vm7, %v5505_v47, %v5516_v7  ;;  %v1167_v34 = vadd.f32 %v1166_v60, %v1165_v51  ;;  %v1199_v53 = vsel %vm360_vm3, %v1121_v12, %v1198_v19  ;;  %v1205_v50 = vsel %vm358_vm2, %v1115_v16, %v1204_v44  ;;  %v5609_v16 = vld [vmem:[%s4850_s27 + $0xe8] sm:$0xff]  ;;  %v5612_v12 = vld [vmem:[%s4850_s27 + $0x150] sm:$0xff] }
  0xf7   : > { %v1052_v11 = vsel %vm366_vm6, %v5503_v21, %v5525_v31  ;;  %v1179_v18 = vrot.slane %v1178_v45, 1  ;;  %v1200_v46 = vsel %vm362_vm4, %v1134_v32, %v1199_v53  ;;  %v1206_v56 = vsel %vm360_vm3, %v1128_v27, %v1205_v50 }
  0xf8   : > { %v1173_v28 = vadd.f32 %v1172_v30, %v1171_v55  ;;  %v1201_v47 = vsel %vm364_vm5, %v1147_v4, %v1200_v46  ;;  %v1207_v7 = vsel %vm362_vm4, %v1141_v33, %v1206_v56  ;;  %v1223_v21 = vunpack.c.l.bf16 %v5591_v6 }
  0xf9   : > { %v1180_v31 = vadd.f32 %v1179_v18, %v1178_v45  ;;  %v1202_v26 = vsel %vm366_vm6, %v1160_v24, %v1201_v47  ;;  %v1208_v59 = vsel %vm364_vm5, %v1154_v63, %v1207_v7  ;;  %v1224_v35 = vunpack.c.h.bf16 %v5591_v6 }
  0xfa   : > { %v5623_v42 = vsel %vm368_vm7, %v5513_v40, %v1052_v11  ;;  %v5626_v2 = vadd.f32 %v1046_v37, %v5363_v10  ;;  %v1209_v3 = vsel %vm366_vm6, %v1167_v34, %v1208_v59  ;;  %v1225_v22 = vunpack.c.l.bf16 %v5604_v39 }
  0xfb   : > { %v8187_v40 = vunpack.c.h.bf16 %v5604_v39  ;;  %v8186_v20 = vunpack.c.l.bf16 %v5609_v16  ;;  %v8182_v10 = vunpack.c.h.bf16 %v5609_v16  ;;  %v8181_v15 = vunpack.c.l.bf16 %v5612_v12 }
  0xfc   : > { %v5647_v36 = vsel %vm368_vm7, %v1173_v28, %v1202_v26  ;;  %v5650_v8 = vsel %vm368_vm7, %v1180_v31, %v1209_v3  ;;  %v8180_v17 = vunpack.c.h.bf16 %v5612_v12  ;;  %v8179_v0 = vunpack.c.l.bf16 %v5618_v41 }
  0xfd   : > { %v8178_v58 = vunpack.c.h.bf16 %v5618_v41  ;;  %v8177_v9 = vunpack.c.l.bf16 %v5630_v25  ;;  %v5656_v43 = vunpack.c.l.bf16 %v1239_v49  ;;  %v5658_v5 = vunpack.c.h.bf16 %v1239_v49 }
  0xfe   : > { %v8176_v14 = vunpack.c.h.bf16 %v5630_v25  ;;  %v8175_v51 = vunpack.c.l.bf16 %v5637_v23  ;;  %v8185_v52 = vunpack.c.h.bf16 %v5637_v23  ;;  %v8184_v27 = vunpack.c.l.bf16 %v5640_v13 }
  0xff   : > { %v1242_v57 = vmul.f32 %v5656_v43, %v1223_v21  ;;  %v1243_v61 = vmul.f32 %v5658_v5, %v1224_v35  ;;  %v1244_v55 = vmul.f32 %v5656_v43, %v1225_v22  ;;  %v1245_v32 = vmul.f32 %v5658_v5, %v8187_v40 }
 0x100   : > { %v8183_v33 = vunpack.c.h.bf16 %v5640_v13  ;;  %v1246_v60 = vmul.f32 %v5656_v43, %v8186_v20  ;;  %v1247_v38 = vmul.f32 %v5658_v5, %v8182_v10  ;;  %v5686_v4 = vunpack.c.l.bf16 %v4726_v29 }
 0x101   : > { %v1248_v63 = vmul.f32 %v5656_v43, %v8181_v15  ;;  %v1249_v30 = vmul.f32 %v5658_v5, %v8180_v17  ;;  %v1250_v1 = vmul.f32 %v5656_v43, %v8179_v0  ;;  %v5697_v24 = vunpack.c.h.bf16 %v4726_v29 }
 0x102   : > { %v1251_v45 = vmul.f32 %v5658_v5, %v8178_v58  ;;  %v5705_v19 = vmul.f32 %v5656_v43, %v8177_v9  ;;  %v1253_v44 = vmul.f32 %v5658_v5, %v8176_v14  ;;  %v5713_v37 = vmul.f32 %v5656_v43, %v8175_v51 }
 0x103   : > { %v1258_v34 = vrot.slane %v1242_v57, 4  ;;  %v1264_v53 = vsel %vm241_vm0, %v1243_v61, 0.0  ;;  %v1271_v50 = vrot.slane %v1244_v55, 4  ;;  %v1277_v11 = vsel %vm241_vm0, %v1245_v32, 0.0 }
 0x104   : > { %v1265_v18 = vrot.slane %v1264_v53, 4  ;;  %v1278_v46 = vrot.slane %v1277_v11, 4  ;;  %v1284_v56 = vrot.slane %v1246_v60, 4  ;;  %v1290_v28 = vsel %vm241_vm0, %v1247_v38, 0.0 }
 0x105   : > { %v1259_v47 = vadd.f32 %v1258_v34, %v1242_v57  ;;  %v1272_v7 = vadd.f32 %v1271_v50, %v1244_v55  ;;  %v1291_v31 = vrot.slane %v1290_v28, 4  ;;  %v1297_v26 = vrot.slane %v1248_v63, 4 }
 0x106   : > { %v1266_v59 = vadd.f32 %v1265_v18, %v1264_v53  ;;  %v1279_v3 = vadd.f32 %v1278_v46, %v1277_v11  ;;  %v1285_v49 = vadd.f32 %v1284_v56, %v1246_v60  ;;  %v1303_v29 = vsel %vm241_vm0, %v1249_v30, 0.0 }
 0x107   : > { %v1260_v51 = vrot.slane %v1259_v47, 2  ;;  %v1273_v14 = vrot.slane %v1272_v7, 2  ;;  %v1292_v61 = vadd.f32 %v1291_v31, %v1290_v28  ;;  %v1298_v9 = vadd.f32 %v1297_v26, %v1248_v63 }
 0x108   : > { %v1267_v58 = vrot.slane %v1266_v59, 2  ;;  %v1280_v32 = vrot.slane %v1279_v3, 2  ;;  %v1286_v0 = vrot.slane %v1285_v49, 2  ;;  %v1304_v17 = vrot.slane %v1303_v29, 4 }
 0x109   : > { %v1261_v15 = vadd.f32 %v1260_v51, %v1259_v47  ;;  %v1274_v10 = vadd.f32 %v1273_v14, %v1272_v7  ;;  %v1293_v38 = vrot.slane %v1292_v61, 2  ;;  %v1299_v57 = vrot.slane %v1298_v9, 2 }
 0x10a   : > { %v1268_v55 = vadd.f32 %v1267_v58, %v1266_v59  ;;  %v1281_v34 = vadd.f32 %v1280_v32, %v1279_v3  ;;  %v1287_v50 = vadd.f32 %v1286_v0, %v1285_v49  ;;  %v1305_v53 = vadd.f32 %v1304_v17, %v1303_v29 }
 0x10b   : > { %v1262_v11 = vrot.slane %v1261_v15, 1  ;;  %v1275_v60 = vrot.slane %v1274_v10, 1  ;;  %v1294_v18 = vadd.f32 %v1293_v38, %v1292_v61  ;;  %v1300_v30 = vadd.f32 %v1299_v57, %v1298_v9 }
 0x10c   : > { %v1269_v46 = vrot.slane %v1268_v55, 1  ;;  %v1282_v56 = vrot.slane %v1281_v34, 1  ;;  %v1288_v28 = vrot.slane %v1287_v50, 1  ;;  %v1306_v63 = vrot.slane %v1305_v53, 2 }
 0x10d   : > { %v1255_v31 = vmul.f32 %v5658_v5, %v8185_v52  ;;  %v1256_v14 = vmul.f32 %v5656_v43, %v8184_v27  ;;  %v1257_v17 = vmul.f32 %v5658_v5, %v8183_v33  ;;  %v1263_v0 = vadd.f32 %v1262_v11, %v1261_v15 }
 0x10e   : > { %v1276_v58 = vadd.f32 %v1275_v60, %v1274_v10  ;;  %v1295_v51 = vrot.slane %v1294_v18, 1  ;;  %v1301_v9 = vrot.slane %v1300_v30, 1  ;;  %v1307_v47 = vadd.f32 %v1306_v63, %v1305_v53 }
 0x10f   : > { %v1270_v7 = vadd.f32 %v1269_v46, %v1268_v55  ;;  %v1283_v26 = vadd.f32 %v1282_v56, %v1281_v34  ;;  %v1310_v59 = vrot.slane %v1250_v1, 4  ;;  %v1316_v3 = vsel %vm241_vm0, %v1251_v45, 0.0 }
 0x110   : > { %v1289_v49 = vadd.f32 %v1288_v28, %v1287_v50  ;;  %v1317_v29 = vrot.slane %v1316_v3, 4  ;;  %v1323_v61 = vrot.slane %v5705_v19, 4  ;;  %v1329_v43 = vsel %vm241_vm0, %v1253_v44, 0.0 }
 0x111   : > { %v1311_v32 = vadd.f32 %v1310_v59, %v1250_v1  ;;  %v1330_v38 = vrot.slane %v1329_v43, 4  ;;  %v1336_v5 = vrot.slane %v5713_v37, 4  ;;  %v1342_v10 = vsel %vm241_vm0, %v1255_v31, 0.0 }
 0x112   : > { %v1308_v15 = vrot.slane %v1307_v47, 1  ;;  %v1318_v57 = vadd.f32 %v1317_v29, %v1316_v3  ;;  %v1324_v55 = vadd.f32 %v1323_v61, %v5705_v19  ;;  %v1343_v34 = vrot.slane %v1342_v10, 4 }
 0x113   : > { %v1312_v53 = vrot.slane %v1311_v32, 2  ;;  %v1331_v11 = vadd.f32 %v1330_v38, %v1329_v43  ;;  %v1337_v45 = vadd.f32 %v1336_v5, %v5713_v37  ;;  %v1349_v50 = vrot.slane %v1256_v14, 4 }
 0x114   : > { %v1319_v60 = vrot.slane %v1318_v57, 2  ;;  %v1325_v46 = vrot.slane %v1324_v55, 2  ;;  %v1344_v56 = vadd.f32 %v1343_v34, %v1342_v10  ;;  %v1355_v1 = vsel %vm241_vm0, %v1257_v17, 0.0 }
 0x115   : > { %v1313_v44 = vadd.f32 %v1312_v53, %v1311_v32  ;;  %v1332_v28 = vrot.slane %v1331_v11, 2  ;;  %v1338_v63 = vrot.slane %v1337_v45, 2  ;;  %v1350_v59 = vadd.f32 %v1349_v50, %v1256_v14 }
 0x116   : > { %v1320_v31 = vadd.f32 %v1319_v60, %v1318_v57  ;;  %v1326_v33 = vadd.f32 %v1325_v46, %v1324_v55  ;;  %v1345_v3 = vrot.slane %v1344_v56, 2  ;;  %v1356_v29 = vrot.slane %v1355_v1, 4 }
 0x117   : > { %v1314_v19 = vrot.slane %v1313_v44, 1  ;;  %v1333_v61 = vadd.f32 %v1332_v28, %v1331_v11  ;;  %v1339_v27 = vadd.f32 %v1338_v63, %v1337_v45  ;;  %v1351_v43 = vrot.slane %v1350_v59, 2 }
 0x118   : > { %v1321_v38 = vrot.slane %v1320_v31, 1  ;;  %v1327_v37 = vrot.slane %v1326_v33, 1  ;;  %v1346_v5 = vadd.f32 %v1345_v3, %v1344_v56  ;;  %v1357_v52 = vadd.f32 %v1356_v29, %v1355_v1 }
 0x119   : > { %v1296_v20 = vadd.f32 %v1295_v51, %v1294_v18  ;;  %v1302_v10 = vadd.f32 %v1301_v9, %v1300_v30  ;;  %v1340_v34 = vrot.slane %v1339_v27, 1  ;;  %v1352_v17 = vadd.f32 %v1351_v43, %v1350_v59 }
 0x11a   : > { %v1309_v32 = vadd.f32 %v1308_v15, %v1307_v47  ;;  %v1315_v53 = vadd.f32 %v1314_v19, %v1313_v44  ;;  %v1334_v40 = vrot.slane %v1333_v61, 1  ;;  %v1358_v14 = vrot.slane %v1357_v52, 2 }
 0x11b   : > { %v1322_v57 = vadd.f32 %v1321_v38, %v1320_v31  ;;  %v1328_v55 = vadd.f32 %v1327_v37, %v1326_v33  ;;  %v1347_v50 = vrot.slane %v1346_v5, 1  ;;  %v1378_v60 = vsel %vm356_vm1, %v1276_v58, %v1263_v0 }
 0x11c   : > { %v1353_v11 = vrot.slane %v1352_v17, 1  ;;  %v1359_v45 = vadd.f32 %v1358_v14, %v1357_v52  ;;  %v1379_v46 = vsel %vm358_vm2, %v1289_v49, %v1378_v60  ;;  %v1385_v56 = vsel %vm356_vm1, %v1283_v26, %v1270_v7 }
 0x11d   : > { %v5741_v18 = vadd.f32 %v5623_v42, %v5487_v62  ;;  %v1341_v30 = vadd.f32 %v1340_v34, %v1339_v27  ;;  %v1380_v51 = vsel %vm360_vm3, %v1302_v10, %v1379_v46  ;;  %v1386_v9 = vsel %vm358_vm2, %v1296_v20, %v1385_v56 }
 0x11e   : > { %v1335_v47 = vadd.f32 %v1334_v40, %v1333_v61  ;;  %v1360_v33 = vrot.slane %v1359_v45, 1  ;;  %v1381_v15 = vsel %vm362_vm4, %v1315_v53, %v1380_v51  ;;  %v1387_v0 = vsel %vm360_vm3, %v1309_v32, %v1386_v9 }
 0x11f   : > { %v5749_v52 = vadd.f32 %v5647_v36, %v5495_v48  ;;  %v5753_v58 = vadd.f32 %v5650_v8, %v5499_v54  ;;  %v1382_v62 = vsel %vm364_vm5, %v1328_v55, %v1381_v15  ;;  %v1388_v42 = vsel %vm362_vm4, %v1322_v57, %v1387_v0 }
 0x120   : > { %v5757_v27 = vadd.f32 %v1347_v50, %v1346_v5  ;;  %v5759_v40 = vadd.f32 %v1353_v11, %v1352_v17  ;;  %v1399_v20 = vmul.f32 %v5686_v4, %v1223_v21  ;;  %v1400_v48 = vmul.f32 %v5697_v24, %v1224_v35 }
 0x121   : > { %v5767_v36 = vadd.f32 %v1360_v33, %v1359_v45  ;;  %v5770_v54 = vsel %vm366_vm6, %v1341_v30, %v1382_v62  ;;  %v1401_v8 = vmul.f32 %v5686_v4, %v1225_v22  ;;  %v8334_v7 = vunpack.c.h.bf16 %v5604_v39 }
 0x122   : > { %v5779_v49 = vsel %vm364_vm5, %v1335_v47, %v1388_v42  ;;  %v8335_v6 = vunpack.c.l.bf16 %v5609_v16  ;;  %v8336_v35 = vunpack.c.h.bf16 %v5609_v16  ;;  %v8337_v44 = vunpack.c.l.bf16 %v5612_v12 }
 0x123   : > { %v1402_v26 = vmul.f32 %v5697_v24, %v8334_v7  ;;  %v8338_v22 = vunpack.c.h.bf16 %v5612_v12  ;;  %v8339_v63 = vunpack.c.l.bf16 %v5618_v41  ;;  %v8340_v31 = vunpack.c.h.bf16 %v5618_v41 }
 0x124   : > { %v1403_v21 = vmul.f32 %v5686_v4, %v8335_v6  ;;  %v1404_v1 = vmul.f32 %v5697_v24, %v8336_v35  ;;  %v1405_v28 = vmul.f32 %v5686_v4, %v8337_v44  ;;  %v8341_v16 = vunpack.c.l.bf16 %v5630_v25 }
 0x125   : > { %v1406_v39 = vmul.f32 %v5697_v24, %v8338_v22  ;;  %v5796_v59 = vmul.f32 %v5686_v4, %v8339_v63  ;;  %v1408_v3 = vmul.f32 %v5697_v24, %v8340_v31  ;;  %v8342_v19 = vunpack.c.h.bf16 %v5630_v25 }
 0x126   : > { %v5804_v29 = vmul.f32 %v5686_v4, %v8341_v16  ;;  %v8343_v61 = vunpack.c.l.bf16 %v5637_v23  ;;  %v8344_v38 = vunpack.c.h.bf16 %v5637_v23  ;;  %v8345_v37 = vunpack.c.l.bf16 %v5640_v13 }
 0x127   : > { %v1410_v12 = vmul.f32 %v5697_v24, %v8342_v19  ;;  %v1415_v10 = vrot.slane %v1399_v20, 4  ;;  %v1421_v34 = vsel %vm241_vm0, %v1400_v48, 0.0  ;;  %v1428_v25 = vrot.slane %v1401_v8, 4 }
 0x128   : > { %v5812_v43 = vmul.f32 %v5686_v4, %v8343_v61  ;;  %v1412_v41 = vmul.f32 %v5697_v24, %v8344_v38  ;;  %v5820_v5 = vmul.f32 %v5686_v4, %v8345_v37  ;;  %v1434_v17 = vsel %vm241_vm0, %v1402_v26, 0.0 }
 0x129   : > { %v1422_v32 = vrot.slane %v1421_v34, 4  ;;  %v1435_v53 = vrot.slane %v1434_v17, 4  ;;  %v1441_v14 = vrot.slane %v1403_v21, 4  ;;  %v1447_v57 = vsel %vm241_vm0, %v1404_v1, 0.0 }
 0x12a   : > { %v1416_v55 = vadd.f32 %v1415_v10, %v1399_v20  ;;  %v1429_v23 = vadd.f32 %v1428_v25, %v1401_v8  ;;  %v1448_v50 = vrot.slane %v1447_v57, 4  ;;  %v1454_v60 = vrot.slane %v1405_v28, 4 }
 0x12b   : > { %v1423_v11 = vadd.f32 %v1422_v32, %v1421_v34  ;;  %v1436_v45 = vadd.f32 %v1435_v53, %v1434_v17  ;;  %v1442_v46 = vadd.f32 %v1441_v14, %v1403_v21  ;;  %v1460_v4 = vsel %vm241_vm0, %v1406_v39, 0.0 }
 0x12c   : > { %v1417_v56 = vrot.slane %v1416_v55, 2  ;;  %v1430_v30 = vrot.slane %v1429_v23, 2  ;;  %v1449_v51 = vadd.f32 %v1448_v50, %v1447_v57  ;;  %v1455_v9 = vadd.f32 %v1454_v60, %v1405_v28 }
 0x12d   : > { %v1424_v47 = vrot.slane %v1423_v11, 2  ;;  %v1437_v33 = vrot.slane %v1436_v45, 2  ;;  %v1443_v15 = vrot.slane %v1442_v46, 2  ;;  %v1461_v0 = vrot.slane %v1460_v4, 4 }
 0x12e   : > { %v1418_v62 = vadd.f32 %v1417_v56, %v1416_v55  ;;  %v1431_v42 = vadd.f32 %v1430_v30, %v1429_v23  ;;  %v1450_v48 = vrot.slane %v1449_v51, 2  ;;  %v1456_v20 = vrot.slane %v1455_v9, 2 }
 0x12f   : > { %v1425_v8 = vadd.f32 %v1424_v47, %v1423_v11  ;;  %v1438_v7 = vadd.f32 %v1437_v33, %v1436_v45  ;;  %v1444_v26 = vadd.f32 %v1443_v15, %v1442_v46  ;;  %v1462_v6 = vadd.f32 %v1461_v0, %v1460_v4 }
 0x130   : > { %v1419_v35 = vrot.slane %v1418_v62, 1  ;;  %v1432_v21 = vrot.slane %v1431_v42, 1  ;;  %v1451_v1 = vadd.f32 %v1450_v48, %v1449_v51  ;;  %v1457_v44 = vadd.f32 %v1456_v20, %v1455_v9 }
 0x131   : > { %v1426_v22 = vrot.slane %v1425_v8, 1  ;;  %v1439_v39 = vrot.slane %v1438_v7, 1  ;;  %v1445_v63 = vrot.slane %v1444_v26, 1  ;;  %v1463_v28 = vrot.slane %v1462_v6, 2 }
 0x132   : > { %v8346_v31 = vunpack.c.h.bf16 %v5640_v13  ;;  %v1420_v19 = vadd.f32 %v1419_v35, %v1418_v62  ;;  %v1452_v61 = vrot.slane %v1451_v1, 1  ;;  %v1458_v38 = vrot.slane %v1457_v44, 1 }
 0x133   : > { %v1427_v37 = vadd.f32 %v1426_v22, %v1425_v8  ;;  %v1433_v10 = vadd.f32 %v1432_v21, %v1431_v42  ;;  %v1440_v34 = vadd.f32 %v1439_v39, %v1438_v7  ;;  %v1464_v25 = vadd.f32 %v1463_v28, %v1462_v6 }
 0x134   : > { %v1414_v16 = vmul.f32 %v5697_v24, %v8346_v31  ;;  %v1446_v17 = vadd.f32 %v1445_v63, %v1444_v26  ;;  %v1453_v32 = vadd.f32 %v1452_v61, %v1451_v1  ;;  %v1467_v53 = vrot.slane %v5796_v59, 4 }
 0x135   : > { %v1473_v14 = vsel %vm241_vm0, %v1408_v3, 0.0  ;;  %v1459_v57 = vadd.f32 %v1458_v38, %v1457_v44  ;;  %v1480_v23 = vrot.slane %v5804_v29, 4  ;;  %v1486_v13 = vsel %vm241_vm0, %v1410_v12, 0.0 }
 0x136   : > { %v1474_v55 = vrot.slane %v1473_v14, 4  ;;  %v1468_v24 = vadd.f32 %v1467_v53, %v5796_v59  ;;  %v1487_v50 = vrot.slane %v1486_v13, 4  ;;  %v1493_v60 = vrot.slane %v5812_v43, 4 }
 0x137   : > { %v1499_v11 = vsel %vm241_vm0, %v1412_v41, 0.0  ;;  %v1465_v45 = vrot.slane %v1464_v25, 1  ;;  %v1481_v4 = vadd.f32 %v1480_v23, %v5804_v29  ;;  %v1506_v9 = vrot.slane %v5820_v5, 4 }
 0x138   : > { %v1475_v46 = vadd.f32 %v1474_v55, %v1473_v14  ;;  %v1500_v56 = vrot.slane %v1499_v11, 4  ;;  %v1469_v30 = vrot.slane %v1468_v24, 2  ;;  %v1488_v3 = vadd.f32 %v1487_v50, %v1486_v13 }
 0x139   : > { %v1494_v51 = vadd.f32 %v1493_v60, %v5812_v43  ;;  %v1482_v12 = vrot.slane %v1481_v4, 2  ;;  %v1512_v59 = vsel %vm241_vm0, %v1414_v16, 0.0  ;;  %v1507_v41 = vadd.f32 %v1506_v9, %v5820_v5 }
 0x13a   : > { %v1476_v47 = vrot.slane %v1475_v46, 2  ;;  %v1501_v33 = vadd.f32 %v1500_v56, %v1499_v11  ;;  %v1470_v15 = vadd.f32 %v1469_v30, %v1468_v24  ;;  %v1489_v0 = vrot.slane %v1488_v3, 2  ;;  %v5845_v24 = vld [vmem:[%s4850_s27 + $0x20] sm:$0xff] }
 0x13b   : > { %v1495_v62 = vrot.slane %v1494_v51, 2  ;;  %v1483_v48 = vadd.f32 %v1482_v12, %v1481_v4  ;;  %v1513_v20 = vrot.slane %v1512_v59, 4  ;;  %v1508_v43 = vrot.slane %v1507_v41, 2  ;;  %v5872_v30 = vld [vmem:[%s4850_s27 + $0x1c0] sm:$0xff]  ;;  %v5884_v12 = vld [vmem:[%s4850_s27 + $0x228] sm:$0xff] }
 0x13c   : > { %v1477_v42 = vadd.f32 %v1476_v47, %v1475_v46  ;;  %v1502_v29 = vrot.slane %v1501_v33, 2  ;;  %v1471_v8 = vrot.slane %v1470_v15, 1  ;;  %v1490_v7 = vadd.f32 %v1489_v0, %v1488_v3  ;;  %v5894_v0 = vld [vmem:[%s4850_s27 + $0x2f8] sm:$0xff] }
 0x13d   : > { %v1496_v26 = vadd.f32 %v1495_v62, %v1494_v51  ;;  %v1484_v35 = vrot.slane %v1483_v48, 1  ;;  %v1514_v1 = vadd.f32 %v1513_v20, %v1512_v59  ;;  %v1466_v44 = vadd.f32 %v1465_v45, %v1464_v25  ;;  %v1577_v59 = vld [vmem:[%s8142_s0 + $0x20] sm:$0xff] }
 0x13e   : > { %v1478_v6 = vrot.slane %v1477_v42, 1  ;;  %v1503_v21 = vadd.f32 %v1502_v29, %v1501_v33  ;;  %v1491_v22 = vrot.slane %v1490_v7, 1  ;;  %v1509_v63 = vadd.f32 %v1508_v43, %v1507_v41 }
 0x13f   : > { %v1497_v39 = vrot.slane %v1496_v26, 1  ;;  %v1472_v28 = vadd.f32 %v1471_v8, %v1470_v15  ;;  %v1515_v16 = vrot.slane %v1514_v1, 2  ;;  %v1485_v61 = vadd.f32 %v1484_v35, %v1483_v48  ;;  %v5891_v15 = vld [vmem:[%s4850_s27 + $0x290] sm:$0xff] }
 0x140   : > { %v1479_v31 = vadd.f32 %v1478_v6, %v1477_v42  ;;  %v1504_v5 = vrot.slane %v1503_v21, 1  ;;  %v1492_v38 = vadd.f32 %v1491_v22, %v1490_v7  ;;  %v1510_v53 = vrot.slane %v1509_v63, 1  ;;  %v4727_v6 = vld [vmem:[%s8142_s0 + $0x88] sm:$0xff] }
 0x141   : > { %v1535_v14 = vsel %vm356_vm1, %v1433_v10, %v1420_v19  ;;  %v1498_v55 = vadd.f32 %v1497_v39, %v1496_v26  ;;  %v1516_v23 = vadd.f32 %v1515_v16, %v1514_v1  ;;  %v1542_v25 = vsel %vm356_vm1, %v1440_v34, %v1427_v37  ;;  %v5858_v34 = vld [vmem:[%s4850_s27 + $0x88] sm:$0xff] }
 0x142   : > { %v1536_v13 = vsel %vm358_vm2, %v1446_v17, %v1535_v14  ;;  %v1384_v50 = vsel %vm368_vm7, %v5759_v40, %v5770_v54  ;;  %v1505_v60 = vadd.f32 %v1504_v5, %v1503_v21  ;;  %v1543_v19 = vsel %vm358_vm2, %v1453_v32, %v1542_v25  ;;  %v5863_v32 = vld [vmem:[%s4850_s27 + $0xf0] sm:$0xff] }
 0x143   : > { %v1537_v11 = vsel %vm360_vm3, %v1459_v57, %v1536_v13  ;;  %v1390_v10 = vsel %vm366_vm6, %v5757_v27, %v5779_v49  ;;  %v1517_v17 = vrot.slane %v1516_v23, 1  ;;  %v1544_v37 = vsel %vm360_vm3, %v1466_v44, %v1543_v19  ;;  %v5866_v57 = vld [vmem:[%s4850_s27 + $0x158] sm:$0xff] }
 0x144   : > { %v1538_v45 = vsel %vm362_vm4, %v1472_v28, %v1537_v11  ;;  %v1511_v46 = vadd.f32 %v1510_v53, %v1509_v63  ;;  %v1545_v54 = vsel %vm362_vm4, %v1479_v31, %v1544_v37  ;;  %v1561_v27 = vunpack.c.l.bf16 %v5845_v24 }
 0x145   : > { %v1539_v40 = vsel %vm364_vm5, %v1485_v61, %v1538_v45  ;;  %v1518_v49 = vadd.f32 %v1517_v17, %v1516_v23  ;;  %v1546_v56 = vsel %vm364_vm5, %v1492_v38, %v1545_v54  ;;  %v1562_v3 = vunpack.c.h.bf16 %v5845_v24 }
 0x146   : > { %v1540_v4 = vsel %vm366_vm6, %v1498_v55, %v1539_v40  ;;  %v5877_v51 = vsel %vm368_vm7, %v5767_v36, %v1390_v10  ;;  %v5880_v9 = vadd.f32 %v1384_v50, %v5626_v2  ;;  %v1547_v47 = vsel %vm366_vm6, %v1505_v60, %v1546_v56 }
 0x147   : > { %v1563_v33 = vunpack.c.l.bf16 %v5858_v34  ;;  %v8200_v36 = vunpack.c.h.bf16 %v5858_v34  ;;  %v8199_v62 = vunpack.c.l.bf16 %v5863_v32  ;;  %v8195_v2 = vunpack.c.h.bf16 %v5863_v32 }
 0x148   : > { %v8194_v41 = vunpack.c.l.bf16 %v5866_v57  ;;  %v5901_v42 = vsel %vm368_vm7, %v1511_v46, %v1540_v4  ;;  %v5904_v48 = vsel %vm368_vm7, %v1518_v49, %v1547_v47  ;;  %v8193_v29 = vunpack.c.h.bf16 %v5866_v57 }
 0x149   : > { %v8192_v20 = vunpack.c.l.bf16 %v5872_v30  ;;  %v8191_v8 = vunpack.c.h.bf16 %v5872_v30  ;;  %v8190_v7 = vunpack.c.l.bf16 %v5884_v12  ;;  %v5910_v26 = vunpack.c.l.bf16 %v1577_v59 }
 0x14a   : > { %v5912_v43 = vunpack.c.h.bf16 %v1577_v59  ;;  %v8189_v35 = vunpack.c.h.bf16 %v5884_v12  ;;  %v8188_v21 = vunpack.c.l.bf16 %v5891_v15  ;;  %v8198_v1 = vunpack.c.h.bf16 %v5891_v15 }
 0x14b   : > { %v8197_v44 = vunpack.c.l.bf16 %v5894_v0  ;;  %v1580_v22 = vmul.f32 %v5910_v26, %v1561_v27  ;;  %v1582_v63 = vmul.f32 %v5910_v26, %v1563_v33  ;;  %v8196_v31 = vunpack.c.h.bf16 %v5894_v0 }
 0x14c   : > { %v1581_v39 = vmul.f32 %v5912_v43, %v1562_v3  ;;  %v1583_v28 = vmul.f32 %v5912_v43, %v8200_v36  ;;  %v1584_v5 = vmul.f32 %v5910_v26, %v8199_v62  ;;  %v1585_v16 = vmul.f32 %v5912_v43, %v8195_v2 }
 0x14d   : > { %v5940_v61 = vunpack.c.l.bf16 %v4727_v6  ;;  %v1586_v38 = vmul.f32 %v5910_v26, %v8194_v41  ;;  %v1587_v53 = vmul.f32 %v5912_v43, %v8193_v29  ;;  %v1588_v14 = vmul.f32 %v5910_v26, %v8192_v20 }
 0x14e   : > { %v5951_v55 = vunpack.c.h.bf16 %v4727_v6  ;;  %v1589_v23 = vmul.f32 %v5912_v43, %v8191_v8  ;;  %v5959_v13 = vmul.f32 %v5910_v26, %v8190_v7  ;;  %v1591_v25 = vmul.f32 %v5912_v43, %v8189_v35 }
 0x14f   : > { %v5967_v50 = vmul.f32 %v5910_v26, %v8188_v21  ;;  %v1596_v60 = vrot.slane %v1580_v22, 4  ;;  %v1602_v11 = vsel %vm241_vm0, %v1581_v39, 0.0  ;;  %v1609_v19 = vrot.slane %v1582_v63, 4 }
 0x150   : > { %v1615_v10 = vsel %vm241_vm0, %v1583_v28, 0.0  ;;  %v1603_v17 = vrot.slane %v1602_v11, 4  ;;  %v1622_v37 = vrot.slane %v1584_v5, 4  ;;  %v1628_v46 = vsel %vm241_vm0, %v1585_v16, 0.0 }
 0x151   : > { %v1616_v45 = vrot.slane %v1615_v10, 4  ;;  %v1597_v40 = vadd.f32 %v1596_v60, %v1580_v22  ;;  %v1610_v54 = vadd.f32 %v1609_v19, %v1582_v63  ;;  %v1629_v49 = vrot.slane %v1628_v46, 4 }
 0x152   : > { %v1635_v4 = vrot.slane %v1586_v38, 4  ;;  %v1604_v56 = vadd.f32 %v1603_v17, %v1602_v11  ;;  %v1623_v59 = vadd.f32 %v1622_v37, %v1584_v5  ;;  %v1641_v6 = vsel %vm241_vm0, %v1587_v53, 0.0 }
 0x153   : > { %v1617_v47 = vadd.f32 %v1616_v45, %v1615_v10  ;;  %v1598_v21 = vrot.slane %v1597_v40, 2  ;;  %v1611_v35 = vrot.slane %v1610_v54, 2  ;;  %v1630_v39 = vadd.f32 %v1629_v49, %v1628_v46 }
 0x154   : > { %v1636_v7 = vadd.f32 %v1635_v4, %v1586_v38  ;;  %v1605_v8 = vrot.slane %v1604_v56, 2  ;;  %v1624_v20 = vrot.slane %v1623_v59, 2  ;;  %v1642_v29 = vrot.slane %v1641_v6, 4 }
 0x155   : > { %v1618_v28 = vrot.slane %v1617_v47, 2  ;;  %v1599_v41 = vadd.f32 %v1598_v21, %v1597_v40  ;;  %v1612_v2 = vadd.f32 %v1611_v35, %v1610_v54  ;;  %v1631_v16 = vrot.slane %v1630_v39, 2 }
 0x156   : > { %v1637_v22 = vrot.slane %v1636_v7, 2  ;;  %v1606_v63 = vadd.f32 %v1605_v8, %v1604_v56  ;;  %v1625_v19 = vadd.f32 %v1624_v20, %v1623_v59  ;;  %v1643_v11 = vadd.f32 %v1642_v29, %v1641_v6 }
 0x157   : > { %v1619_v60 = vadd.f32 %v1618_v28, %v1617_v47  ;;  %v1600_v10 = vrot.slane %v1599_v41, 1  ;;  %v1613_v5 = vrot.slane %v1612_v2, 1  ;;  %v1632_v17 = vadd.f32 %v1631_v16, %v1630_v39 }
 0x158   : > { %v1638_v53 = vadd.f32 %v1637_v22, %v1636_v7  ;;  %v1607_v45 = vrot.slane %v1606_v63, 1  ;;  %v1626_v46 = vrot.slane %v1625_v19, 1  ;;  %v1644_v38 = vrot.slane %v1643_v11, 2 }
 0x159   : > { %v1620_v37 = vrot.slane %v1619_v60, 1  ;;  %v1593_v49 = vmul.f32 %v5912_v43, %v8198_v1  ;;  %v1594_v35 = vmul.f32 %v5910_v26, %v8197_v44  ;;  %v1595_v29 = vmul.f32 %v5912_v43, %v8196_v31 }
 0x15a   : > { %v1601_v20 = vadd.f32 %v1600_v10, %v1599_v41  ;;  %v1614_v8 = vadd.f32 %v1613_v5, %v1612_v2  ;;  %v1633_v21 = vrot.slane %v1632_v17, 1  ;;  %v1639_v7 = vrot.slane %v1638_v53, 1 }
 0x15b   : > { %v1645_v40 = vadd.f32 %v1644_v38, %v1643_v11  ;;  %v1608_v54 = vadd.f32 %v1607_v45, %v1606_v63  ;;  %v1621_v4 = vadd.f32 %v1620_v37, %v1619_v60  ;;  %v1648_v56 = vrot.slane %v1588_v14, 4 }
 0x15c   : > { %v1654_v47 = vsel %vm241_vm0, %v1589_v23, 0.0  ;;  %v1627_v59 = vadd.f32 %v1626_v46, %v1625_v19  ;;  %v1661_v39 = vrot.slane %v5959_v13, 4  ;;  %v1667_v26 = vsel %vm241_vm0, %v1591_v25, 0.0 }
 0x15d   : > { %v1655_v6 = vrot.slane %v1654_v47, 4  ;;  %v1649_v28 = vadd.f32 %v1648_v56, %v1588_v14  ;;  %v1668_v16 = vrot.slane %v1667_v26, 4  ;;  %v1674_v43 = vrot.slane %v5967_v50, 4 }
 0x15e   : > { %v1680_v2 = vsel %vm241_vm0, %v1593_v49, 0.0  ;;  %v1646_v41 = vrot.slane %v1645_v40, 1  ;;  %v1662_v63 = vadd.f32 %v1661_v39, %v5959_v13  ;;  %v1687_v19 = vrot.slane %v1594_v35, 4 }
 0x15f   : > { %v1656_v22 = vadd.f32 %v1655_v6, %v1654_v47  ;;  %v1681_v60 = vrot.slane %v1680_v2, 4  ;;  %v1650_v11 = vrot.slane %v1649_v28, 2  ;;  %v1669_v10 = vadd.f32 %v1668_v16, %v1667_v26 }
 0x160   : > { %v1675_v23 = vadd.f32 %v1674_v43, %v5967_v50  ;;  %v1663_v45 = vrot.slane %v1662_v63, 2  ;;  %v1693_v14 = vsel %vm241_vm0, %v1595_v29, 0.0  ;;  %v1688_v56 = vadd.f32 %v1687_v19, %v1594_v35 }
 0x161   : > { %v1657_v5 = vrot.slane %v1656_v22, 2  ;;  %v1682_v37 = vadd.f32 %v1681_v60, %v1680_v2  ;;  %v1651_v25 = vadd.f32 %v1650_v11, %v1649_v28  ;;  %v1670_v46 = vrot.slane %v1669_v10, 2 }
 0x162   : > { %v1676_v38 = vrot.slane %v1675_v23, 2  ;;  %v1664_v31 = vadd.f32 %v1663_v45, %v1662_v63  ;;  %v1694_v6 = vrot.slane %v1693_v14, 4  ;;  %v1689_v26 = vrot.slane %v1688_v56, 2 }
 0x163   : > { %v1658_v49 = vadd.f32 %v1657_v5, %v1656_v22  ;;  %v1683_v47 = vrot.slane %v1682_v37, 2  ;;  %v1652_v13 = vrot.slane %v1651_v25, 1  ;;  %v1671_v39 = vadd.f32 %v1670_v46, %v1669_v10 }
 0x164   : > { %v1677_v44 = vadd.f32 %v1676_v38, %v1675_v23  ;;  %v1665_v50 = vrot.slane %v1664_v31, 1  ;;  %v1695_v1 = vadd.f32 %v1694_v6, %v1693_v14  ;;  %v1634_v62 = vadd.f32 %v1633_v21, %v1632_v17 }
 0x165   : > { %v1659_v16 = vrot.slane %v1658_v49, 1  ;;  %v1684_v43 = vadd.f32 %v1683_v47, %v1682_v37  ;;  %v1640_v2 = vadd.f32 %v1639_v7, %v1638_v53  ;;  %v1690_v29 = vadd.f32 %v1689_v26, %v1688_v56 }
 0x166   : > { %v1678_v60 = vrot.slane %v1677_v44, 1  ;;  %v1647_v28 = vadd.f32 %v1646_v41, %v1645_v40  ;;  %v1653_v11 = vadd.f32 %v1652_v13, %v1651_v25  ;;  %v1672_v36 = vrot.slane %v1671_v39, 1 }
 0x167   : > { %v1696_v35 = vrot.slane %v1695_v1, 2  ;;  %v1660_v22 = vadd.f32 %v1659_v16, %v1658_v49  ;;  %v1666_v63 = vadd.f32 %v1665_v50, %v1664_v31  ;;  %v1685_v19 = vrot.slane %v1684_v43, 1 }
 0x168   : > { %v1716_v5 = vsel %vm356_vm1, %v1614_v8, %v1601_v20  ;;  %v1691_v10 = vrot.slane %v1690_v29, 1  ;;  %v1723_v37 = vsel %vm356_vm1, %v1621_v4, %v1608_v54  ;;  %v5995_v17 = vadd.f32 %v5877_v51, %v5741_v18 }
 0x169   : > { %v1697_v23 = vadd.f32 %v1696_v35, %v1695_v1  ;;  %v1717_v45 = vsel %vm358_vm2, %v1627_v59, %v1716_v5  ;;  %v1679_v53 = vadd.f32 %v1678_v60, %v1677_v44  ;;  %v1724_v7 = vsel %vm358_vm2, %v1634_v62, %v1723_v37 }
 0x16a   : > { %v1718_v21 = vsel %vm360_vm3, %v1640_v2, %v1717_v45  ;;  %v1673_v40 = vadd.f32 %v1672_v36, %v1671_v39  ;;  %v1725_v20 = vsel %vm360_vm3, %v1647_v28, %v1724_v7  ;;  %v6003_v1 = vadd.f32 %v5901_v42, %v5749_v52 }
 0x16b   : > { %v1698_v31 = vrot.slane %v1697_v23, 1  ;;  %v1719_v41 = vsel %vm362_vm4, %v1653_v11, %v1718_v21  ;;  %v6007_v8 = vadd.f32 %v5904_v48, %v5753_v58  ;;  %v1726_v51 = vsel %vm362_vm4, %v1660_v22, %v1725_v20 }
 0x16c   : > { %v1720_v18 = vsel %vm364_vm5, %v1666_v63, %v1719_v41  ;;  %v6011_v44 = vadd.f32 %v1685_v19, %v1684_v43  ;;  %v6013_v36 = vadd.f32 %v1691_v10, %v1690_v29  ;;  %v1737_v62 = vmul.f32 %v5940_v61, %v1561_v27 }
 0x16d   : > { %v1738_v52 = vmul.f32 %v5951_v55, %v1562_v3  ;;  %v6021_v42 = vadd.f32 %v1698_v31, %v1697_v23  ;;  %v6024_v58 = vsel %vm366_vm6, %v1679_v53, %v1720_v18  ;;  %v1739_v48 = vmul.f32 %v5940_v61, %v1563_v33 }
 0x16e   : > { %v8347_v54 = vunpack.c.h.bf16 %v5858_v34  ;;  %v6033_v59 = vsel %vm364_vm5, %v1673_v40, %v1726_v51  ;;  %v8348_v24 = vunpack.c.l.bf16 %v5863_v32  ;;  %v8349_v3 = vunpack.c.h.bf16 %v5863_v32 }
 0x16f   : > { %v8350_v25 = vunpack.c.l.bf16 %v5866_v57  ;;  %v8351_v33 = vunpack.c.h.bf16 %v5866_v57  ;;  %v8352_v38 = vunpack.c.l.bf16 %v5872_v30  ;;  %v8353_v49 = vunpack.c.h.bf16 %v5872_v30 }
 0x170   : > { %v1740_v4 = vmul.f32 %v5951_v55, %v8347_v54  ;;  %v1741_v27 = vmul.f32 %v5940_v61, %v8348_v24  ;;  %v1742_v14 = vmul.f32 %v5951_v55, %v8349_v3  ;;  %v8354_v32 = vunpack.c.l.bf16 %v5884_v12 }
 0x171   : > { %v1743_v46 = vmul.f32 %v5940_v61, %v8350_v25  ;;  %v1744_v34 = vmul.f32 %v5951_v55, %v8351_v33  ;;  %v6050_v56 = vmul.f32 %v5940_v61, %v8352_v38  ;;  %v1746_v47 = vmul.f32 %v5951_v55, %v8353_v49 }
 0x172   : > { %v6058_v6 = vmul.f32 %v5940_v61, %v8354_v32  ;;  %v8355_v13 = vunpack.c.h.bf16 %v5884_v12  ;;  %v8356_v39 = vunpack.c.l.bf16 %v5891_v15  ;;  %v8357_v16 = vunpack.c.h.bf16 %v5891_v15 }
 0x173   : > { %v8358_v50 = vunpack.c.l.bf16 %v5894_v0  ;;  %v1753_v2 = vrot.slane %v1737_v62, 4  ;;  %v1759_v60 = vsel %vm241_vm0, %v1738_v52, 0.0  ;;  %v1766_v12 = vrot.slane %v1739_v48, 4 }
 0x174   : > { %v1748_v57 = vmul.f32 %v5951_v55, %v8355_v13  ;;  %v6066_v26 = vmul.f32 %v5940_v61, %v8356_v39  ;;  %v1750_v30 = vmul.f32 %v5951_v55, %v8357_v16  ;;  %v1772_v29 = vsel %vm241_vm0, %v1740_v4, 0.0 }
 0x175   : > { %v6074_v43 = vmul.f32 %v5940_v61, %v8358_v50  ;;  %v1760_v28 = vrot.slane %v1759_v60, 4  ;;  %v1773_v11 = vrot.slane %v1772_v29, 4  ;;  %v1779_v35 = vrot.slane %v1741_v27, 4 }
 0x176   : > { %v1785_v22 = vsel %vm241_vm0, %v1742_v14, 0.0  ;;  %v1754_v63 = vadd.f32 %v1753_v2, %v1737_v62  ;;  %v1767_v15 = vadd.f32 %v1766_v12, %v1739_v48  ;;  %v1792_v5 = vrot.slane %v1743_v46, 4 }
 0x177   : > { %v1786_v19 = vrot.slane %v1785_v22, 4  ;;  %v1761_v10 = vadd.f32 %v1760_v28, %v1759_v60  ;;  %v1774_v23 = vadd.f32 %v1773_v11, %v1772_v29  ;;  %v1780_v45 = vadd.f32 %v1779_v35, %v1741_v27 }
 0x178   : > { %v1798_v61 = vsel %vm241_vm0, %v1744_v34, 0.0  ;;  %v1755_v37 = vrot.slane %v1754_v63, 2  ;;  %v1768_v53 = vrot.slane %v1767_v15, 2  ;;  %v1793_v7 = vadd.f32 %v1792_v5, %v1743_v46 }
 0x179   : > { %v1787_v21 = vadd.f32 %v1786_v19, %v1785_v22  ;;  %v1762_v40 = vrot.slane %v1761_v10, 2  ;;  %v1775_v31 = vrot.slane %v1774_v23, 2  ;;  %v1781_v41 = vrot.slane %v1780_v45, 2 }
 0x17a   : > { %v1799_v20 = vrot.slane %v1798_v61, 4  ;;  %v1756_v18 = vadd.f32 %v1755_v37, %v1754_v63  ;;  %v1769_v51 = vadd.f32 %v1768_v53, %v1767_v15  ;;  %v1794_v62 = vrot.slane %v1793_v7, 2 }
 0x17b   : > { %v1788_v52 = vrot.slane %v1787_v21, 2  ;;  %v1763_v48 = vadd.f32 %v1762_v40, %v1761_v10  ;;  %v1776_v54 = vadd.f32 %v1775_v31, %v1774_v23  ;;  %v1782_v4 = vadd.f32 %v1781_v41, %v1780_v45 }
 0x17c   : > { %v1800_v24 = vadd.f32 %v1799_v20, %v1798_v61  ;;  %v1757_v3 = vrot.slane %v1756_v18, 1  ;;  %v1770_v27 = vrot.slane %v1769_v51, 1  ;;  %v1795_v25 = vadd.f32 %v1794_v62, %v1793_v7 }
 0x17d   : > { %v1789_v14 = vadd.f32 %v1788_v52, %v1787_v21  ;;  %v1764_v33 = vrot.slane %v1763_v48, 1  ;;  %v1777_v34 = vrot.slane %v1776_v54, 1  ;;  %v1783_v38 = vrot.slane %v1782_v4, 1 }
 0x17e   : > { %v1801_v46 = vrot.slane %v1800_v24, 2  ;;  %v8359_v49 = vunpack.c.h.bf16 %v5894_v0  ;;  %v1758_v13 = vadd.f32 %v1757_v3, %v1756_v18  ;;  %v1796_v16 = vrot.slane %v1795_v25, 1 }
 0x17f   : > { %v1790_v39 = vrot.slane %v1789_v14, 1  ;;  %v1765_v50 = vadd.f32 %v1764_v33, %v1763_v48  ;;  %v1771_v2 = vadd.f32 %v1770_v27, %v1769_v51  ;;  %v1778_v60 = vadd.f32 %v1777_v34, %v1776_v54 }
 0x180   : > { %v1752_v32 = vmul.f32 %v5951_v55, %v8359_v49  ;;  %v1802_v12 = vadd.f32 %v1801_v46, %v1800_v24  ;;  %v1784_v29 = vadd.f32 %v1783_v38, %v1782_v4  ;;  %v1805_v11 = vrot.slane %v6050_v56, 4 }
 0x181   : > { %v1791_v28 = vadd.f32 %v1790_v39, %v1789_v14  ;;  %v1811_v35 = vsel %vm241_vm0, %v1746_v47, 0.0  ;;  %v1797_v22 = vadd.f32 %v1796_v16, %v1795_v25  ;;  %v1818_v15 = vrot.slane %v6058_v6, 4 }
 0x182   : > { %v1812_v63 = vrot.slane %v1811_v35, 4  ;;  %v1824_v0 = vsel %vm241_vm0, %v1748_v57, 0.0  ;;  %v1806_v55 = vadd.f32 %v1805_v11, %v6050_v56  ;;  %v1831_v5 = vrot.slane %v6066_v26, 4 }
 0x183   : > { %v1825_v19 = vrot.slane %v1824_v0, 4  ;;  %v1837_v10 = vsel %vm241_vm0, %v1750_v30, 0.0  ;;  %v1803_v23 = vrot.slane %v1802_v12, 1  ;;  %v1819_v61 = vadd.f32 %v1818_v15, %v6058_v6 }
 0x184   : > { %v1813_v45 = vadd.f32 %v1812_v63, %v1811_v35  ;;  %v1838_v37 = vrot.slane %v1837_v10, 4  ;;  %v1807_v53 = vrot.slane %v1806_v55, 2  ;;  %v1832_v21 = vadd.f32 %v1831_v5, %v6066_v26 }
 0x185   : > { %v1826_v47 = vadd.f32 %v1825_v19, %v1824_v0  ;;  %v1844_v7 = vrot.slane %v6074_v43, 4  ;;  %v1820_v57 = vrot.slane %v1819_v61, 2  ;;  %v1850_v56 = vsel %vm241_vm0, %v1752_v32, 0.0 }
 0x186   : > { %v1814_v40 = vrot.slane %v1813_v45, 2  ;;  %v1839_v31 = vadd.f32 %v1838_v37, %v1837_v10  ;;  %v1808_v41 = vadd.f32 %v1807_v53, %v1806_v55  ;;  %v1833_v18 = vrot.slane %v1832_v21, 2  ;;  %v6099_v55 = vld [vmem:[%s4850_s27 + $0x28] sm:$0xff] }
 0x187   : > { %v1827_v20 = vrot.slane %v1826_v47, 2  ;;  %v1845_v30 = vadd.f32 %v1844_v7, %v6074_v43  ;;  %v1821_v52 = vadd.f32 %v1820_v57, %v1819_v61  ;;  %v1851_v62 = vrot.slane %v1850_v56, 4  ;;  %v6126_v53 = vld [vmem:[%s4850_s27 + $0x1c8] sm:$0xff]  ;;  %v6138_v57 = vld [vmem:[%s4850_s27 + $0x230] sm:$0xff] }
 0x188   : > { %v1815_v51 = vadd.f32 %v1814_v40, %v1813_v45  ;;  %v1840_v6 = vrot.slane %v1839_v31, 2  ;;  %v1809_v48 = vrot.slane %v1808_v41, 1  ;;  %v1834_v4 = vadd.f32 %v1833_v18, %v1832_v21 }
 0x189   : > { %v1828_v54 = vadd.f32 %v1827_v20, %v1826_v47  ;;  %v1846_v26 = vrot.slane %v1845_v30, 2  ;;  %v1822_v3 = vrot.slane %v1821_v52, 1  ;;  %v1852_v14 = vadd.f32 %v1851_v62, %v1850_v56  ;;  %v1915_v56 = vld [vmem:[%s8142_s0 + $0x28] sm:$0xff]  ;;  %v6148_v20 = vld [vmem:[%s4850_s27 + $0x300] sm:$0xff] }
 0x18a   : > { %v1816_v24 = vrot.slane %v1815_v51, 1  ;;  %v1841_v27 = vadd.f32 %v1840_v6, %v1839_v31  ;;  %v1804_v25 = vadd.f32 %v1803_v23, %v1802_v12  ;;  %v1835_v34 = vrot.slane %v1834_v4, 1 }
 0x18b   : > { %v1829_v33 = vrot.slane %v1828_v54, 1  ;;  %v1847_v38 = vadd.f32 %v1846_v26, %v1845_v30  ;;  %v1810_v46 = vadd.f32 %v1809_v48, %v1808_v41  ;;  %v1853_v32 = vrot.slane %v1852_v14, 2  ;;  %v6145_v41 = vld [vmem:[%s4850_s27 + $0x298] sm:$0xff] }
 0x18c   : > { %v1817_v49 = vadd.f32 %v1816_v24, %v1815_v51  ;;  %v1842_v43 = vrot.slane %v1841_v27, 1  ;;  %v1823_v39 = vadd.f32 %v1822_v3, %v1821_v52  ;;  %v1873_v35 = vsel %vm356_vm1, %v1771_v2, %v1758_v13  ;;  %v4728_v24 = vld [vmem:[%s8142_s0 + $0x90] sm:$0xff] }
 0x18d   : > { %v1830_v16 = vadd.f32 %v1829_v33, %v1828_v54  ;;  %v1848_v11 = vrot.slane %v1847_v38, 1  ;;  %v1836_v63 = vadd.f32 %v1835_v34, %v1834_v4  ;;  %v1854_v15 = vadd.f32 %v1853_v32, %v1852_v14 }
 0x18e   : > { %v1874_v0 = vsel %vm358_vm2, %v1784_v29, %v1873_v35  ;;  %v1880_v12 = vsel %vm356_vm1, %v1778_v60, %v1765_v50  ;;  %v1722_v19 = vsel %vm368_vm7, %v6013_v36, %v6024_v58  ;;  %v1843_v5 = vadd.f32 %v1842_v43, %v1841_v27  ;;  %v6112_v60 = vld [vmem:[%s4850_s27 + $0x90] sm:$0xff] }
 0x18f   : > { %v1875_v10 = vsel %vm360_vm3, %v1797_v22, %v1874_v0  ;;  %v1881_v13 = vsel %vm358_vm2, %v1791_v28, %v1880_v12  ;;  %v1728_v2 = vsel %vm366_vm6, %v6011_v44, %v6033_v59  ;;  %v1855_v29 = vrot.slane %v1854_v15, 1  ;;  %v6117_v28 = vld [vmem:[%s4850_s27 + $0xf8] sm:$0xff]  ;;  %v6120_v22 = vld [vmem:[%s4850_s27 + $0x160] sm:$0xff] }
 0x190   : > { %v1876_v23 = vsel %vm362_vm4, %v1810_v46, %v1875_v10  ;;  %v1882_v50 = vsel %vm360_vm3, %v1804_v25, %v1881_v13  ;;  %v1849_v45 = vadd.f32 %v1848_v11, %v1847_v38  ;;  %v1899_v44 = vunpack.c.l.bf16 %v6099_v55 }
 0x191   : > { %v1877_v36 = vsel %vm364_vm5, %v1823_v39, %v1876_v23  ;;  %v1883_v58 = vsel %vm362_vm4, %v1817_v49, %v1882_v50  ;;  %v1856_v59 = vadd.f32 %v1855_v29, %v1854_v15  ;;  %v1900_v47 = vunpack.c.h.bf16 %v6099_v55 }
 0x192   : > { %v1878_v61 = vsel %vm366_vm6, %v1836_v63, %v1877_v36  ;;  %v1884_v37 = vsel %vm364_vm5, %v1830_v16, %v1883_v58  ;;  %v6131_v21 = vsel %vm368_vm7, %v6021_v42, %v1728_v2  ;;  %v6134_v7 = vadd.f32 %v1722_v19, %v5880_v9 }
 0x193   : > { %v1885_v40 = vsel %vm366_vm6, %v1843_v5, %v1884_v37  ;;  %v1901_v31 = vunpack.c.l.bf16 %v6112_v60  ;;  %v8213_v42 = vunpack.c.h.bf16 %v6112_v60  ;;  %v8212_v18 = vunpack.c.l.bf16 %v6117_v28 }
 0x194   : > { %v8208_v9 = vunpack.c.h.bf16 %v6117_v28  ;;  %v8207_v30 = vunpack.c.l.bf16 %v6120_v22  ;;  %v6155_v51 = vsel %vm368_vm7, %v1849_v45, %v1878_v61  ;;  %v6158_v52 = vsel %vm368_vm7, %v1856_v59, %v1885_v40 }
 0x195   : > { %v8206_v6 = vunpack.c.h.bf16 %v6120_v22  ;;  %v8205_v62 = vunpack.c.l.bf16 %v6126_v53  ;;  %v8204_v48 = vunpack.c.h.bf16 %v6126_v53  ;;  %v8203_v54 = vunpack.c.l.bf16 %v6138_v57 }
 0x196   : > { %v6164_v4 = vunpack.c.l.bf16 %v1915_v56  ;;  %v6166_v26 = vunpack.c.h.bf16 %v1915_v56  ;;  %v8202_v3 = vunpack.c.h.bf16 %v6138_v57  ;;  %v8201_v27 = vunpack.c.l.bf16 %v6145_v41 }
 0x197   : > { %v8211_v14 = vunpack.c.h.bf16 %v6145_v41  ;;  %v8210_v25 = vunpack.c.l.bf16 %v6148_v20  ;;  %v8209_v49 = vunpack.c.h.bf16 %v6148_v20  ;;  %v6194_v39 = vunpack.c.l.bf16 %v4728_v24 }
 0x198   : > { %v1918_v33 = vmul.f32 %v6164_v4, %v1899_v44  ;;  %v1919_v34 = vmul.f32 %v6166_v26, %v1900_v47  ;;  %v1920_v38 = vmul.f32 %v6164_v4, %v1901_v31  ;;  %v1921_v46 = vmul.f32 %v6166_v26, %v8213_v42 }
 0x199   : > { %v1922_v43 = vmul.f32 %v6164_v4, %v8212_v18  ;;  %v1923_v32 = vmul.f32 %v6166_v26, %v8208_v9  ;;  %v1924_v16 = vmul.f32 %v6164_v4, %v8207_v30  ;;  %v1925_v11 = vmul.f32 %v6166_v26, %v8206_v6 }
 0x19a   : > { %v1926_v35 = vmul.f32 %v6164_v4, %v8205_v62  ;;  %v6205_v63 = vunpack.c.h.bf16 %v4728_v24  ;;  %v1927_v15 = vmul.f32 %v6166_v26, %v8204_v48  ;;  %v6213_v0 = vmul.f32 %v6164_v4, %v8203_v54 }
 0x19b   : > { %v1929_v12 = vmul.f32 %v6166_v26, %v8202_v3  ;;  %v6221_v19 = vmul.f32 %v6164_v4, %v8201_v27  ;;  %v1934_v5 = vrot.slane %v1918_v33, 4  ;;  %v1940_v10 = vsel %vm241_vm0, %v1919_v34, 0.0 }
 0x19c   : > { %v1947_v13 = vrot.slane %v1920_v38, 4  ;;  %v1953_v2 = vsel %vm241_vm0, %v1921_v46, 0.0  ;;  %v1941_v29 = vrot.slane %v1940_v10, 4  ;;  %v1960_v50 = vrot.slane %v1922_v43, 4 }
 0x19d   : > { %v1954_v23 = vrot.slane %v1953_v2, 4  ;;  %v1966_v45 = vsel %vm241_vm0, %v1923_v32, 0.0  ;;  %v1935_v36 = vadd.f32 %v1934_v5, %v1918_v33  ;;  %v1973_v61 = vrot.slane %v1924_v16, 4 }
 0x19e   : > { %v1948_v58 = vadd.f32 %v1947_v13, %v1920_v38  ;;  %v1967_v59 = vrot.slane %v1966_v45, 4  ;;  %v1942_v37 = vadd.f32 %v1941_v29, %v1940_v10  ;;  %v1961_v56 = vadd.f32 %v1960_v50, %v1922_v43 }
 0x19f   : > { %v1955_v40 = vadd.f32 %v1954_v23, %v1953_v2  ;;  %v1979_v24 = vsel %vm241_vm0, %v1925_v11, 0.0  ;;  %v1936_v27 = vrot.slane %v1935_v36, 2  ;;  %v1974_v54 = vadd.f32 %v1973_v61, %v1924_v16 }
 0x1a0   : > { %v1949_v3 = vrot.slane %v1948_v58, 2  ;;  %v1968_v34 = vadd.f32 %v1967_v59, %v1966_v45  ;;  %v1943_v48 = vrot.slane %v1942_v37, 2  ;;  %v1962_v62 = vrot.slane %v1961_v56, 2 }
 0x1a1   : > { %v1956_v46 = vrot.slane %v1955_v40, 2  ;;  %v1980_v6 = vrot.slane %v1979_v24, 4  ;;  %v1937_v30 = vadd.f32 %v1936_v27, %v1935_v36  ;;  %v1975_v33 = vrot.slane %v1974_v54, 2 }
 0x1a2   : > { %v1950_v9 = vadd.f32 %v1949_v3, %v1948_v58  ;;  %v1969_v32 = vrot.slane %v1968_v34, 2  ;;  %v1944_v38 = vadd.f32 %v1943_v48, %v1942_v37  ;;  %v1963_v13 = vadd.f32 %v1962_v62, %v1961_v56 }
 0x1a3   : > { %v1957_v5 = vadd.f32 %v1956_v46, %v1955_v40  ;;  %v1981_v10 = vadd.f32 %v1980_v6, %v1979_v24  ;;  %v1938_v2 = vrot.slane %v1937_v30, 1  ;;  %v1976_v11 = vadd.f32 %v1975_v33, %v1974_v54 }
 0x1a4   : > { %v1951_v43 = vrot.slane %v1950_v9, 1  ;;  %v1970_v29 = vadd.f32 %v1969_v32, %v1968_v34  ;;  %v1945_v23 = vrot.slane %v1944_v38, 1  ;;  %v1964_v45 = vrot.slane %v1963_v13, 1 }
 0x1a5   : > { %v1958_v50 = vrot.slane %v1957_v5, 1  ;;  %v1982_v16 = vrot.slane %v1981_v10, 2  ;;  %v1931_v59 = vmul.f32 %v6166_v26, %v8211_v14  ;;  %v1932_v3 = vmul.f32 %v6164_v4, %v8210_v25 }
 0x1a6   : > { %v1933_v6 = vmul.f32 %v6166_v26, %v8209_v49  ;;  %v1939_v62 = vadd.f32 %v1938_v2, %v1937_v30  ;;  %v1952_v48 = vadd.f32 %v1951_v43, %v1950_v9  ;;  %v1971_v27 = vrot.slane %v1970_v29, 1 }
 0x1a7   : > { %v1977_v54 = vrot.slane %v1976_v11, 1  ;;  %v1983_v36 = vadd.f32 %v1982_v16, %v1981_v10  ;;  %v1946_v58 = vadd.f32 %v1945_v23, %v1944_v38  ;;  %v1959_v61 = vadd.f32 %v1958_v50, %v1957_v5 }
 0x1a8   : > { %v1986_v37 = vrot.slane %v1926_v35, 4  ;;  %v1992_v40 = vsel %vm241_vm0, %v1927_v15, 0.0  ;;  %v1965_v56 = vadd.f32 %v1964_v45, %v1963_v13  ;;  %v1999_v34 = vrot.slane %v6213_v0, 4 }
 0x1a9   : > { %v1993_v24 = vrot.slane %v1992_v40, 4  ;;  %v2005_v4 = vsel %vm241_vm0, %v1929_v12, 0.0  ;;  %v2012_v26 = vrot.slane %v6221_v19, 4  ;;  %v2018_v9 = vsel %vm241_vm0, %v1931_v59, 0.0 }
 0x1aa   : > { %v1987_v46 = vadd.f32 %v1986_v37, %v1926_v35  ;;  %v2006_v32 = vrot.slane %v2005_v4, 4  ;;  %v1984_v30 = vrot.slane %v1983_v36, 1  ;;  %v2000_v38 = vadd.f32 %v1999_v34, %v6213_v0 }
 0x1ab   : > { %v1994_v33 = vadd.f32 %v1993_v24, %v1992_v40  ;;  %v2019_v5 = vrot.slane %v2018_v9, 4  ;;  %v2013_v15 = vadd.f32 %v2012_v26, %v6221_v19  ;;  %v2025_v13 = vrot.slane %v1932_v3, 4 }
 0x1ac   : > { %v1988_v10 = vrot.slane %v1987_v46, 2  ;;  %v2007_v2 = vadd.f32 %v2006_v32, %v2005_v4  ;;  %v2001_v23 = vrot.slane %v2000_v38, 2  ;;  %v2031_v35 = vsel %vm241_vm0, %v1933_v6, 0.0 }
 0x1ad   : > { %v1995_v43 = vrot.slane %v1994_v33, 2  ;;  %v2020_v50 = vadd.f32 %v2019_v5, %v2018_v9  ;;  %v2014_v16 = vrot.slane %v2013_v15, 2  ;;  %v2026_v37 = vadd.f32 %v2025_v13, %v1932_v3 }
 0x1ae   : > { %v1989_v12 = vadd.f32 %v1988_v10, %v1987_v46  ;;  %v2008_v45 = vrot.slane %v2007_v2, 2  ;;  %v2002_v49 = vadd.f32 %v2001_v23, %v2000_v38  ;;  %v2032_v24 = vrot.slane %v2031_v35, 4 }
 0x1af   : > { %v1996_v59 = vadd.f32 %v1995_v43, %v1994_v33  ;;  %v2021_v40 = vrot.slane %v2020_v50, 2  ;;  %v2015_v25 = vadd.f32 %v2014_v16, %v2013_v15  ;;  %v2027_v4 = vrot.slane %v2026_v37, 2 }
 0x1b0   : > { %v1990_v0 = vrot.slane %v1989_v12, 1  ;;  %v2009_v34 = vadd.f32 %v2008_v45, %v2007_v2  ;;  %v2003_v19 = vrot.slane %v2002_v49, 1  ;;  %v2033_v14 = vadd.f32 %v2032_v24, %v2031_v35 }
 0x1b1   : > { %v1997_v32 = vrot.slane %v1996_v59, 1  ;;  %v2022_v26 = vadd.f32 %v2021_v40, %v2020_v50  ;;  %v1972_v18 = vadd.f32 %v1971_v27, %v1970_v29  ;;  %v1978_v9 = vadd.f32 %v1977_v54, %v1976_v11 }
 0x1b2   : > { %v2016_v5 = vrot.slane %v2015_v25, 1  ;;  %v2028_v6 = vadd.f32 %v2027_v4, %v2026_v37  ;;  %v1985_v46 = vadd.f32 %v1984_v30, %v1983_v36  ;;  %v1991_v10 = vadd.f32 %v1990_v0, %v1989_v12 }
 0x1b3   : > { %v2010_v42 = vrot.slane %v2009_v34, 1  ;;  %v2034_v3 = vrot.slane %v2033_v14, 2  ;;  %v1998_v33 = vadd.f32 %v1997_v32, %v1996_v59  ;;  %v2004_v38 = vadd.f32 %v2003_v19, %v2002_v49 }
 0x1b4   : > { %v2023_v13 = vrot.slane %v2022_v26, 1  ;;  %v2054_v43 = vsel %vm356_vm1, %v1952_v48, %v1939_v62  ;;  %v2029_v2 = vrot.slane %v2028_v6, 1  ;;  %v2061_v50 = vsel %vm356_vm1, %v1959_v61, %v1946_v58 }
 0x1b5   : > { %v2035_v15 = vadd.f32 %v2034_v3, %v2033_v14  ;;  %v2055_v23 = vsel %vm358_vm2, %v1965_v56, %v2054_v43  ;;  %v6249_v29 = vadd.f32 %v6131_v21, %v5995_v17  ;;  %v2017_v11 = vadd.f32 %v2016_v5, %v2015_v25 }
 0x1b6   : > { %v2056_v27 = vsel %vm360_vm3, %v1978_v9, %v2055_v23  ;;  %v2062_v54 = vsel %vm358_vm2, %v1972_v18, %v2061_v50  ;;  %v2011_v36 = vadd.f32 %v2010_v42, %v2009_v34  ;;  %v6257_v14 = vadd.f32 %v6155_v51, %v6003_v1 }
 0x1b7   : > { %v2036_v49 = vrot.slane %v2035_v15, 1  ;;  %v2057_v30 = vsel %vm362_vm4, %v1991_v10, %v2056_v27  ;;  %v2063_v62 = vsel %vm360_vm3, %v1985_v46, %v2062_v54  ;;  %v6261_v48 = vadd.f32 %v6158_v52, %v6007_v8 }
 0x1b8   : > { %v2058_v17 = vsel %vm364_vm5, %v2004_v38, %v2057_v30  ;;  %v2064_v21 = vsel %vm362_vm4, %v1998_v33, %v2063_v62  ;;  %v6265_v25 = vadd.f32 %v2023_v13, %v2022_v26  ;;  %v6267_v42 = vadd.f32 %v2029_v2, %v2028_v6 }
 0x1b9   : > { %v2075_v18 = vmul.f32 %v6194_v39, %v1899_v44  ;;  %v2076_v1 = vmul.f32 %v6205_v63, %v1900_v47  ;;  %v6275_v51 = vadd.f32 %v2036_v49, %v2035_v15  ;;  %v6278_v8 = vsel %vm366_vm6, %v2017_v11, %v2058_v17 }
 0x1ba   : > { %v2077_v52 = vmul.f32 %v6194_v39, %v1901_v31  ;;  %v8360_v58 = vunpack.c.h.bf16 %v6112_v60  ;;  %v6287_v56 = vsel %vm364_vm5, %v2011_v36, %v2064_v21  ;;  %v8361_v55 = vunpack.c.l.bf16 %v6117_v28 }
 0x1bb   : > { %v8362_v47 = vunpack.c.h.bf16 %v6117_v28  ;;  %v8363_v12 = vunpack.c.l.bf16 %v6120_v22  ;;  %v8364_v31 = vunpack.c.h.bf16 %v6120_v22  ;;  %v8365_v16 = vunpack.c.l.bf16 %v6126_v53 }
 0x1bc   : > { %v2078_v61 = vmul.f32 %v6205_v63, %v8360_v58  ;;  %v2079_v44 = vmul.f32 %v6194_v39, %v8361_v55  ;;  %v8366_v59 = vunpack.c.h.bf16 %v6126_v53  ;;  %v8367_v28 = vunpack.c.l.bf16 %v6138_v57 }
 0x1bd   : > { %v2080_v35 = vmul.f32 %v6205_v63, %v8362_v47  ;;  %v2081_v45 = vmul.f32 %v6194_v39, %v8363_v12  ;;  %v2082_v60 = vmul.f32 %v6205_v63, %v8364_v31  ;;  %v6304_v37 = vmul.f32 %v6194_v39, %v8365_v16 }
 0x1be   : > { %v2084_v40 = vmul.f32 %v6205_v63, %v8366_v59  ;;  %v6312_v24 = vmul.f32 %v6194_v39, %v8367_v28  ;;  %v8368_v0 = vunpack.c.h.bf16 %v6138_v57  ;;  %v8369_v34 = vunpack.c.l.bf16 %v6145_v41 }
 0x1bf   : > { %v8370_v32 = vunpack.c.h.bf16 %v6145_v41  ;;  %v8371_v19 = vunpack.c.l.bf16 %v6148_v20  ;;  %v2091_v9 = vrot.slane %v2075_v18, 4  ;;  %v2097_v5 = vsel %vm241_vm0, %v2076_v1, 0.0 }
 0x1c0   : > { %v2086_v22 = vmul.f32 %v6205_v63, %v8368_v0  ;;  %v6320_v4 = vmul.f32 %v6194_v39, %v8369_v34  ;;  %v2104_v57 = vrot.slane %v2077_v52, 4  ;;  %v2110_v6 = vsel %vm241_vm0, %v2078_v61, 0.0 }
 0x1c1   : > { %v2088_v53 = vmul.f32 %v6205_v63, %v8370_v32  ;;  %v6328_v26 = vmul.f32 %v6194_v39, %v8371_v19  ;;  %v2098_v46 = vrot.slane %v2097_v5, 4  ;;  %v2111_v10 = vrot.slane %v2110_v6, 4 }
 0x1c2   : > { %v2117_v3 = vrot.slane %v2079_v44, 4  ;;  %v2123_v33 = vsel %vm241_vm0, %v2080_v35, 0.0  ;;  %v2092_v38 = vadd.f32 %v2091_v9, %v2075_v18  ;;  %v2105_v41 = vadd.f32 %v2104_v57, %v2077_v52 }
 0x1c3   : > { %v2124_v13 = vrot.slane %v2123_v33, 4  ;;  %v2130_v43 = vrot.slane %v2081_v45, 4  ;;  %v2099_v2 = vadd.f32 %v2098_v46, %v2097_v5  ;;  %v2112_v15 = vadd.f32 %v2111_v10, %v2110_v6 }
 0x1c4   : > { %v2118_v23 = vadd.f32 %v2117_v3, %v2079_v44  ;;  %v2136_v39 = vsel %vm241_vm0, %v2082_v60, 0.0  ;;  %v2093_v50 = vrot.slane %v2092_v38, 2  ;;  %v2106_v11 = vrot.slane %v2105_v41, 2 }
 0x1c5   : > { %v2125_v27 = vadd.f32 %v2124_v13, %v2123_v33  ;;  %v2131_v54 = vadd.f32 %v2130_v43, %v2081_v45  ;;  %v2100_v36 = vrot.slane %v2099_v2, 2  ;;  %v2113_v49 = vrot.slane %v2112_v15, 2 }
 0x1c6   : > { %v2119_v30 = vrot.slane %v2118_v23, 2  ;;  %v2137_v62 = vrot.slane %v2136_v39, 4  ;;  %v2094_v17 = vadd.f32 %v2093_v50, %v2092_v38  ;;  %v2107_v21 = vadd.f32 %v2106_v11, %v2105_v41 }
 0x1c7   : > { %v2126_v1 = vrot.slane %v2125_v27, 2  ;;  %v2132_v18 = vrot.slane %v2131_v54, 2  ;;  %v2101_v52 = vadd.f32 %v2100_v36, %v2099_v2  ;;  %v2114_v58 = vadd.f32 %v2113_v49, %v2112_v15 }
 0x1c8   : > { %v2120_v61 = vadd.f32 %v2119_v30, %v2118_v23  ;;  %v2138_v55 = vadd.f32 %v2137_v62, %v2136_v39  ;;  %v2095_v47 = vrot.slane %v2094_v17, 1  ;;  %v2108_v44 = vrot.slane %v2107_v21, 1 }
 0x1c9   : > { %v2127_v35 = vadd.f32 %v2126_v1, %v2125_v27  ;;  %v2133_v12 = vadd.f32 %v2132_v18, %v2131_v54  ;;  %v2102_v31 = vrot.slane %v2101_v52, 1  ;;  %v2115_v60 = vrot.slane %v2114_v58, 1 }
 0x1ca   : > { %v2121_v16 = vrot.slane %v2120_v61, 1  ;;  %v2139_v45 = vrot.slane %v2138_v55, 2  ;;  %v8372_v59 = vunpack.c.h.bf16 %v6148_v20  ;;  %v2096_v0 = vadd.f32 %v2095_v47, %v2094_v17 }
 0x1cb   : > { %v2128_v34 = vrot.slane %v2127_v35, 1  ;;  %v2134_v32 = vrot.slane %v2133_v12, 1  ;;  %v2103_v19 = vadd.f32 %v2102_v31, %v2101_v52  ;;  %v2109_v9 = vadd.f32 %v2108_v44, %v2107_v21 }
 0x1cc   : > { %v2090_v28 = vmul.f32 %v6205_v63, %v8372_v59  ;;  %v2116_v5 = vadd.f32 %v2115_v60, %v2114_v58  ;;  %v2140_v57 = vadd.f32 %v2139_v45, %v2138_v55  ;;  %v2122_v6 = vadd.f32 %v2121_v16, %v2120_v61 }
 0x1cd   : > { %v2129_v46 = vadd.f32 %v2128_v34, %v2127_v35  ;;  %v2143_v10 = vrot.slane %v6304_v37, 4  ;;  %v2149_v3 = vsel %vm241_vm0, %v2084_v40, 0.0  ;;  %v2135_v33 = vadd.f32 %v2134_v32, %v2133_v12 }
 0x1ce   : > { %v2150_v38 = vrot.slane %v2149_v3, 4  ;;  %v2156_v41 = vrot.slane %v6312_v24, 4  ;;  %v2162_v20 = vsel %vm241_vm0, %v2086_v22, 0.0  ;;  %v2169_v43 = vrot.slane %v6320_v4, 4 }
 0x1cf   : > { %v2144_v63 = vadd.f32 %v2143_v10, %v6304_v37  ;;  %v2163_v13 = vrot.slane %v2162_v20, 4  ;;  %v2175_v2 = vsel %vm241_vm0, %v2088_v53, 0.0  ;;  %v2141_v15 = vrot.slane %v2140_v57, 1 }
 0x1d0   : > { %v2151_v23 = vadd.f32 %v2150_v38, %v2149_v3  ;;  %v2157_v39 = vadd.f32 %v2156_v41, %v6312_v24  ;;  %v2176_v50 = vrot.slane %v2175_v2, 4  ;;  %v2170_v27 = vadd.f32 %v2169_v43, %v6320_v4 }
 0x1d1   : > { %v2145_v11 = vrot.slane %v2144_v63, 2  ;;  %v2164_v40 = vadd.f32 %v2163_v13, %v2162_v20  ;;  %v2182_v54 = vrot.slane %v6328_v26, 4  ;;  %v2188_v37 = vsel %vm241_vm0, %v2090_v28, 0.0 }
 0x1d2   : > { %v2152_v36 = vrot.slane %v2151_v23, 2  ;;  %v2158_v22 = vrot.slane %v2157_v39, 2  ;;  %v2177_v49 = vadd.f32 %v2176_v50, %v2175_v2  ;;  %v2171_v17 = vrot.slane %v2170_v27, 2 }
 0x1d3   : > { %v2146_v30 = vadd.f32 %v2145_v11, %v2144_v63  ;;  %v2165_v62 = vrot.slane %v2164_v40, 2  ;;  %v2183_v53 = vadd.f32 %v2182_v54, %v6328_v26  ;;  %v2189_v18 = vrot.slane %v2188_v37, 4  ;;  %v6353_v63 = vld [vmem:[%s4850_s27 + $0x30] sm:$0xff] }
 0x1d4   : > { %v2153_v21 = vadd.f32 %v2152_v36, %v2151_v23  ;;  %v2159_v1 = vadd.f32 %v2158_v22, %v2157_v39  ;;  %v2178_v24 = vrot.slane %v2177_v49, 2  ;;  %v2172_v61 = vadd.f32 %v2171_v17, %v2170_v27  ;;  %v6380_v11 = vld [vmem:[%s4850_s27 + $0x1d0] sm:$0xff]  ;;  %v6392_v22 = vld [vmem:[%s4850_s27 + $0x238] sm:$0xff] }
 0x1d5   : > { %v2147_v52 = vrot.slane %v2146_v30, 1  ;;  %v2166_v58 = vadd.f32 %v2165_v62, %v2164_v40  ;;  %v2184_v4 = vrot.slane %v2183_v53, 2  ;;  %v2190_v35 = vadd.f32 %v2189_v18, %v2188_v37  ;;  %v2253_v37 = vld [vmem:[%s8142_s0 + $0x30] sm:$0xff]  ;;  %v6402_v62 = vld [vmem:[%s4850_s27 + $0x308] sm:$0xff] }
 0x1d6   : > { %v2154_v55 = vrot.slane %v2153_v21, 1  ;;  %v2160_v47 = vrot.slane %v2159_v1, 1  ;;  %v2179_v44 = vadd.f32 %v2178_v24, %v2177_v49  ;;  %v2142_v12 = vadd.f32 %v2141_v15, %v2140_v57 }
 0x1d7   : > { %v2167_v31 = vrot.slane %v2166_v58, 1  ;;  %v2173_v60 = vrot.slane %v2172_v61, 1  ;;  %v2185_v16 = vadd.f32 %v2184_v4, %v2183_v53  ;;  %v2148_v45 = vadd.f32 %v2147_v52, %v2146_v30  ;;  %v6399_v30 = vld [vmem:[%s4850_s27 + $0x2a0] sm:$0xff] }
 0x1d8   : > { %v2155_v59 = vadd.f32 %v2154_v55, %v2153_v21  ;;  %v2180_v26 = vrot.slane %v2179_v44, 1  ;;  %v2191_v28 = vrot.slane %v2190_v35, 2  ;;  %v2161_v34 = vadd.f32 %v2160_v47, %v2159_v1  ;;  %v4729_v55 = vld [vmem:[%s8142_s0 + $0x98] sm:$0xff] }
 0x1d9   : > { %v2168_v32 = vadd.f32 %v2167_v31, %v2166_v58  ;;  %v2186_v10 = vrot.slane %v2185_v16, 1  ;;  %v2211_v3 = vsel %vm356_vm1, %v2109_v9, %v2096_v0  ;;  %v2174_v38 = vadd.f32 %v2173_v60, %v2172_v61 }
 0x1da   : > { %v2192_v41 = vadd.f32 %v2191_v28, %v2190_v35  ;;  %v2212_v20 = vsel %vm358_vm2, %v2122_v6, %v2211_v3  ;;  %v2218_v57 = vsel %vm356_vm1, %v2116_v5, %v2103_v19  ;;  %v2060_v13 = vsel %vm368_vm7, %v6267_v42, %v6278_v8  ;;  %v6366_v5 = vld [vmem:[%s4850_s27 + $0x98] sm:$0xff] }
 0x1db   : > { %v2181_v43 = vadd.f32 %v2180_v26, %v2179_v44  ;;  %v2213_v2 = vsel %vm360_vm3, %v2135_v33, %v2212_v20  ;;  %v2219_v0 = vsel %vm358_vm2, %v2129_v46, %v2218_v57  ;;  %v2066_v9 = vsel %vm366_vm6, %v6265_v25, %v6287_v56  ;;  %v6371_v46 = vld [vmem:[%s4850_s27 + $0x100] sm:$0xff]  ;;  %v6374_v33 = vld [vmem:[%s4850_s27 + $0x168] sm:$0xff] }
 0x1dc   : > { %v2193_v6 = vrot.slane %v2192_v41, 1  ;;  %v2214_v15 = vsel %vm362_vm4, %v2148_v45, %v2213_v2  ;;  %v2220_v19 = vsel %vm360_vm3, %v2142_v12, %v2219_v0  ;;  %v2187_v23 = vadd.f32 %v2186_v10, %v2185_v16 }
 0x1dd   : > { %v2215_v42 = vsel %vm364_vm5, %v2161_v34, %v2214_v15  ;;  %v2221_v8 = vsel %vm362_vm4, %v2155_v59, %v2220_v19  ;;  %v2237_v25 = vunpack.c.l.bf16 %v6353_v63  ;;  %v2238_v40 = vunpack.c.h.bf16 %v6353_v63 }
 0x1de   : > { %v2194_v56 = vadd.f32 %v2193_v6, %v2192_v41  ;;  %v2216_v39 = vsel %vm366_vm6, %v2174_v38, %v2215_v42  ;;  %v2222_v50 = vsel %vm364_vm5, %v2168_v32, %v2221_v8  ;;  %v6385_v27 = vsel %vm368_vm7, %v6275_v51, %v2066_v9 }
 0x1df   : > { %v6388_v54 = vadd.f32 %v2060_v13, %v6134_v7  ;;  %v2223_v36 = vsel %vm366_vm6, %v2181_v43, %v2222_v50  ;;  %v2239_v49 = vunpack.c.l.bf16 %v6366_v5  ;;  %v8226_v51 = vunpack.c.h.bf16 %v6366_v5 }
 0x1e0   : > { %v8225_v17 = vunpack.c.l.bf16 %v6371_v46  ;;  %v8221_v7 = vunpack.c.h.bf16 %v6371_v46  ;;  %v8220_v53 = vunpack.c.l.bf16 %v6374_v33  ;;  %v6409_v21 = vsel %vm368_vm7, %v2187_v23, %v2216_v39 }
 0x1e1   : > { %v6412_v1 = vsel %vm368_vm7, %v2194_v56, %v2223_v36  ;;  %v8219_v24 = vunpack.c.h.bf16 %v6374_v33  ;;  %v8218_v18 = vunpack.c.l.bf16 %v6380_v11  ;;  %v8217_v52 = vunpack.c.h.bf16 %v6380_v11 }
 0x1e2   : > { %v8216_v58 = vunpack.c.l.bf16 %v6392_v22  ;;  %v6418_v61 = vunpack.c.l.bf16 %v2253_v37  ;;  %v6420_v4 = vunpack.c.h.bf16 %v2253_v37  ;;  %v8215_v47 = vunpack.c.h.bf16 %v6392_v22 }
 0x1e3   : > { %v8214_v44 = vunpack.c.l.bf16 %v6399_v30  ;;  %v8224_v35 = vunpack.c.h.bf16 %v6399_v30  ;;  %v8223_v12 = vunpack.c.l.bf16 %v6402_v62  ;;  %v8222_v59 = vunpack.c.h.bf16 %v6402_v62 }
 0x1e4   : > { %v2256_v31 = vmul.f32 %v6418_v61, %v2237_v25  ;;  %v2257_v60 = vmul.f32 %v6420_v4, %v2238_v40  ;;  %v2258_v16 = vmul.f32 %v6418_v61, %v2239_v49  ;;  %v2259_v45 = vmul.f32 %v6420_v4, %v8226_v51 }
 0x1e5   : > { %v2260_v26 = vmul.f32 %v6418_v61, %v8225_v17  ;;  %v2261_v28 = vmul.f32 %v6420_v4, %v8221_v7  ;;  %v6448_v34 = vunpack.c.l.bf16 %v4729_v55  ;;  %v2262_v32 = vmul.f32 %v6418_v61, %v8220_v53 }
 0x1e6   : > { %v2263_v10 = vmul.f32 %v6420_v4, %v8219_v24  ;;  %v2264_v3 = vmul.f32 %v6418_v61, %v8218_v18  ;;  %v6459_v38 = vunpack.c.h.bf16 %v4729_v55  ;;  %v2265_v41 = vmul.f32 %v6420_v4, %v8217_v52 }
 0x1e7   : > { %v6467_v20 = vmul.f32 %v6418_v61, %v8216_v58  ;;  %v2267_v57 = vmul.f32 %v6420_v4, %v8215_v47  ;;  %v6475_v13 = vmul.f32 %v6418_v61, %v8214_v44  ;;  %v2272_v43 = vrot.slane %v2256_v31, 4 }
 0x1e8   : > { %v2278_v2 = vsel %vm241_vm0, %v2257_v60, 0.0  ;;  %v2285_v0 = vrot.slane %v2258_v16, 4  ;;  %v2291_v9 = vsel %vm241_vm0, %v2259_v45, 0.0  ;;  %v2298_v19 = vrot.slane %v2260_v26, 4 }
 0x1e9   : > { %v2279_v6 = vrot.slane %v2278_v2, 4  ;;  %v2292_v15 = vrot.slane %v2291_v9, 4  ;;  %v2304_v23 = vsel %vm241_vm0, %v2261_v28, 0.0  ;;  %v2273_v42 = vadd.f32 %v2272_v43, %v2256_v31 }
 0x1ea   : > { %v2286_v8 = vadd.f32 %v2285_v0, %v2258_v16  ;;  %v2305_v56 = vrot.slane %v2304_v23, 4  ;;  %v2311_v39 = vrot.slane %v2262_v32, 4  ;;  %v2299_v37 = vadd.f32 %v2298_v19, %v2260_v26 }
 0x1eb   : > { %v2280_v50 = vadd.f32 %v2279_v6, %v2278_v2  ;;  %v2293_v36 = vadd.f32 %v2292_v15, %v2291_v9  ;;  %v2317_v55 = vsel %vm241_vm0, %v2263_v10, 0.0  ;;  %v2274_v44 = vrot.slane %v2273_v42, 2 }
 0x1ec   : > { %v2287_v47 = vrot.slane %v2286_v8, 2  ;;  %v2306_v60 = vadd.f32 %v2305_v56, %v2304_v23  ;;  %v2312_v58 = vadd.f32 %v2311_v39, %v2262_v32  ;;  %v2300_v18 = vrot.slane %v2299_v37, 2 }
 0x1ed   : > { %v2281_v52 = vrot.slane %v2280_v50, 2  ;;  %v2294_v45 = vrot.slane %v2293_v36, 2  ;;  %v2318_v24 = vrot.slane %v2317_v55, 4  ;;  %v2275_v53 = vadd.f32 %v2274_v44, %v2273_v42 }
 0x1ee   : > { %v2288_v7 = vadd.f32 %v2287_v47, %v2286_v8  ;;  %v2307_v28 = vrot.slane %v2306_v60, 2  ;;  %v2313_v31 = vrot.slane %v2312_v58, 2  ;;  %v2301_v0 = vadd.f32 %v2300_v18, %v2299_v37 }
 0x1ef   : > { %v2282_v16 = vadd.f32 %v2281_v52, %v2280_v50  ;;  %v2295_v43 = vadd.f32 %v2294_v45, %v2293_v36  ;;  %v2319_v2 = vadd.f32 %v2318_v24, %v2317_v55  ;;  %v2276_v9 = vrot.slane %v2275_v53, 1 }
 0x1f0   : > { %v2289_v26 = vrot.slane %v2288_v7, 1  ;;  %v2308_v6 = vadd.f32 %v2307_v28, %v2306_v60  ;;  %v2314_v10 = vadd.f32 %v2313_v31, %v2312_v58  ;;  %v2302_v23 = vrot.slane %v2301_v0, 1 }
 0x1f1   : > { %v2283_v15 = vrot.slane %v2282_v16, 1  ;;  %v2296_v19 = vrot.slane %v2295_v43, 1  ;;  %v2320_v32 = vrot.slane %v2319_v2, 2  ;;  %v2269_v56 = vmul.f32 %v6420_v4, %v8224_v35 }
 0x1f2   : > { %v2270_v47 = vmul.f32 %v6418_v61, %v8223_v12  ;;  %v2271_v24 = vmul.f32 %v6420_v4, %v8222_v59  ;;  %v2277_v18 = vadd.f32 %v2276_v9, %v2275_v53  ;;  %v2290_v52 = vadd.f32 %v2289_v26, %v2288_v7 }
 0x1f3   : > { %v2309_v44 = vrot.slane %v2308_v6, 1  ;;  %v2315_v58 = vrot.slane %v2314_v10, 1  ;;  %v2321_v42 = vadd.f32 %v2320_v32, %v2319_v2  ;;  %v2284_v8 = vadd.f32 %v2283_v15, %v2282_v16 }
 0x1f4   : > { %v2297_v39 = vadd.f32 %v2296_v19, %v2295_v43  ;;  %v2324_v50 = vrot.slane %v2264_v3, 4  ;;  %v2330_v36 = vsel %vm241_vm0, %v2265_v41, 0.0  ;;  %v2303_v37 = vadd.f32 %v2302_v23, %v2301_v0 }
 0x1f5   : > { %v2331_v55 = vrot.slane %v2330_v36, 4  ;;  %v2337_v60 = vrot.slane %v6467_v20, 4  ;;  %v2343_v61 = vsel %vm241_vm0, %v2267_v57, 0.0  ;;  %v2350_v4 = vrot.slane %v6475_v13, 4 }
 0x1f6   : > { %v2325_v45 = vadd.f32 %v2324_v50, %v2264_v3  ;;  %v2344_v28 = vrot.slane %v2343_v61, 4  ;;  %v2356_v7 = vsel %vm241_vm0, %v2269_v56, 0.0  ;;  %v2322_v53 = vrot.slane %v2321_v42, 1 }
 0x1f7   : > { %v2332_v31 = vadd.f32 %v2331_v55, %v2330_v36  ;;  %v2338_v16 = vadd.f32 %v2337_v60, %v6467_v20  ;;  %v2357_v43 = vrot.slane %v2356_v7, 4  ;;  %v2351_v41 = vadd.f32 %v2350_v4, %v6475_v13 }
 0x1f8   : > { %v2326_v2 = vrot.slane %v2325_v45, 2  ;;  %v2345_v9 = vadd.f32 %v2344_v28, %v2343_v61  ;;  %v2363_v0 = vrot.slane %v2270_v47, 4  ;;  %v2369_v3 = vsel %vm241_vm0, %v2271_v24, 0.0 }
 0x1f9   : > { %v2333_v26 = vrot.slane %v2332_v31, 2  ;;  %v2339_v15 = vrot.slane %v2338_v16, 2  ;;  %v2358_v19 = vadd.f32 %v2357_v43, %v2356_v7  ;;  %v2352_v32 = vrot.slane %v2351_v41, 2 }
 0x1fa   : > { %v2327_v57 = vadd.f32 %v2326_v2, %v2325_v45  ;;  %v2346_v23 = vrot.slane %v2345_v9, 2  ;;  %v2364_v50 = vadd.f32 %v2363_v0, %v2270_v47  ;;  %v2370_v55 = vrot.slane %v2369_v3, 4 }
 0x1fb   : > { %v2334_v56 = vadd.f32 %v2333_v26, %v2332_v31  ;;  %v2340_v59 = vadd.f32 %v2339_v15, %v2338_v16  ;;  %v2359_v36 = vrot.slane %v2358_v19, 2  ;;  %v2353_v12 = vadd.f32 %v2352_v32, %v2351_v41 }
 0x1fc   : > { %v2328_v20 = vrot.slane %v2327_v57, 1  ;;  %v2347_v60 = vadd.f32 %v2346_v23, %v2345_v9  ;;  %v2365_v61 = vrot.slane %v2364_v50, 2  ;;  %v2371_v35 = vadd.f32 %v2370_v55, %v2369_v3 }
 0x1fd   : > { %v2335_v28 = vrot.slane %v2334_v56, 1  ;;  %v2341_v13 = vrot.slane %v2340_v59, 1  ;;  %v2360_v4 = vadd.f32 %v2359_v36, %v2358_v19  ;;  %v2310_v17 = vadd.f32 %v2309_v44, %v2308_v6 }
 0x1fe   : > { %v2316_v7 = vadd.f32 %v2315_v58, %v2314_v10  ;;  %v2354_v43 = vrot.slane %v2353_v12, 1  ;;  %v2366_v24 = vadd.f32 %v2365_v61, %v2364_v50  ;;  %v2323_v45 = vadd.f32 %v2322_v53, %v2321_v42 }
 0x1ff   : > { %v2329_v2 = vadd.f32 %v2328_v20, %v2327_v57  ;;  %v2348_v51 = vrot.slane %v2347_v60, 1  ;;  %v2372_v47 = vrot.slane %v2371_v35, 2  ;;  %v2336_v31 = vadd.f32 %v2335_v28, %v2334_v56 }
 0x200   : > { %v2342_v16 = vadd.f32 %v2341_v13, %v2340_v59  ;;  %v2361_v0 = vrot.slane %v2360_v4, 1  ;;  %v2392_v26 = vsel %vm356_vm1, %v2290_v52, %v2277_v18  ;;  %v2367_v9 = vrot.slane %v2366_v24, 1 }
 0x201   : > { %v2373_v41 = vadd.f32 %v2372_v47, %v2371_v35  ;;  %v2393_v15 = vsel %vm358_vm2, %v2303_v37, %v2392_v26  ;;  %v2399_v19 = vsel %vm356_vm1, %v2297_v39, %v2284_v8  ;;  %v6503_v6 = vadd.f32 %v6385_v27, %v6249_v29 }
 0x202   : > { %v2355_v10 = vadd.f32 %v2354_v43, %v2353_v12  ;;  %v2394_v44 = vsel %vm360_vm3, %v2316_v7, %v2393_v15  ;;  %v2400_v58 = vsel %vm358_vm2, %v2310_v17, %v2399_v19  ;;  %v2349_v42 = vadd.f32 %v2348_v51, %v2347_v60 }
 0x203   : > { %v2374_v59 = vrot.slane %v2373_v41, 1  ;;  %v2395_v53 = vsel %vm362_vm4, %v2329_v2, %v2394_v44  ;;  %v2401_v18 = vsel %vm360_vm3, %v2323_v45, %v2400_v58  ;;  %v6511_v35 = vadd.f32 %v6409_v21, %v6257_v14 }
 0x204   : > { %v6515_v52 = vadd.f32 %v6412_v1, %v6261_v48  ;;  %v2396_v29 = vsel %vm364_vm5, %v2342_v16, %v2395_v53  ;;  %v2402_v27 = vsel %vm362_vm4, %v2336_v31, %v2401_v18  ;;  %v6519_v12 = vadd.f32 %v2361_v0, %v2360_v4 }
 0x205   : > { %v6521_v51 = vadd.f32 %v2367_v9, %v2366_v24  ;;  %v2413_v17 = vmul.f32 %v6448_v34, %v2237_v25  ;;  %v2414_v14 = vmul.f32 %v6459_v38, %v2238_v40  ;;  %v6529_v21 = vadd.f32 %v2374_v59, %v2373_v41 }
 0x206   : > { %v6532_v48 = vsel %vm366_vm6, %v2355_v10, %v2396_v29  ;;  %v2415_v1 = vmul.f32 %v6448_v34, %v2239_v49  ;;  %v8373_v8 = vunpack.c.h.bf16 %v6366_v5  ;;  %v6541_v37 = vsel %vm364_vm5, %v2349_v42, %v2402_v27 }
 0x207   : > { %v8374_v63 = vunpack.c.l.bf16 %v6371_v46  ;;  %v8375_v40 = vunpack.c.h.bf16 %v6371_v46  ;;  %v8376_v57 = vunpack.c.l.bf16 %v6374_v33  ;;  %v8377_v49 = vunpack.c.h.bf16 %v6374_v33 }
 0x208   : > { %v2416_v39 = vmul.f32 %v6459_v38, %v8373_v8  ;;  %v8378_v32 = vunpack.c.l.bf16 %v6380_v11  ;;  %v8379_v56 = vunpack.c.h.bf16 %v6380_v11  ;;  %v8380_v46 = vunpack.c.l.bf16 %v6392_v22 }
 0x209   : > { %v2417_v25 = vmul.f32 %v6448_v34, %v8374_v63  ;;  %v2418_v3 = vmul.f32 %v6459_v38, %v8375_v40  ;;  %v2419_v23 = vmul.f32 %v6448_v34, %v8376_v57  ;;  %v2420_v5 = vmul.f32 %v6459_v38, %v8377_v49 }
 0x20a   : > { %v6558_v50 = vmul.f32 %v6448_v34, %v8378_v32  ;;  %v2422_v36 = vmul.f32 %v6459_v38, %v8379_v56  ;;  %v6566_v55 = vmul.f32 %v6448_v34, %v8380_v46  ;;  %v8381_v20 = vunpack.c.h.bf16 %v6392_v22 }
 0x20b   : > { %v8382_v60 = vunpack.c.l.bf16 %v6399_v30  ;;  %v8383_v28 = vunpack.c.h.bf16 %v6399_v30  ;;  %v8384_v13 = vunpack.c.l.bf16 %v6402_v62  ;;  %v2429_v7 = vrot.slane %v2413_v17, 4 }
 0x20c   : > { %v2424_v33 = vmul.f32 %v6459_v38, %v8381_v20  ;;  %v2435_v43 = vsel %vm241_vm0, %v2414_v14, 0.0  ;;  %v2442_v22 = vrot.slane %v2415_v1, 4  ;;  %v2448_v24 = vsel %vm241_vm0, %v2416_v39, 0.0 }
 0x20d   : > { %v6574_v61 = vmul.f32 %v6448_v34, %v8382_v60  ;;  %v2426_v11 = vmul.f32 %v6459_v38, %v8383_v28  ;;  %v6582_v4 = vmul.f32 %v6448_v34, %v8384_v13  ;;  %v2436_v45 = vrot.slane %v2435_v43, 4 }
 0x20e   : > { %v2449_v2 = vrot.slane %v2448_v24, 4  ;;  %v2455_v47 = vrot.slane %v2417_v25, 4  ;;  %v2461_v31 = vsel %vm241_vm0, %v2418_v3, 0.0  ;;  %v2430_v16 = vadd.f32 %v2429_v7, %v2413_v17 }
 0x20f   : > { %v2443_v30 = vadd.f32 %v2442_v22, %v2415_v1  ;;  %v2462_v0 = vrot.slane %v2461_v31, 4  ;;  %v2468_v26 = vrot.slane %v2419_v23, 4  ;;  %v2437_v9 = vadd.f32 %v2436_v45, %v2435_v43 }
 0x210   : > { %v2450_v41 = vadd.f32 %v2449_v2, %v2448_v24  ;;  %v2456_v15 = vadd.f32 %v2455_v47, %v2417_v25  ;;  %v2474_v34 = vsel %vm241_vm0, %v2420_v5, 0.0  ;;  %v2431_v19 = vrot.slane %v2430_v16, 2 }
 0x211   : > { %v2444_v10 = vrot.slane %v2443_v30, 2  ;;  %v2463_v44 = vadd.f32 %v2462_v0, %v2461_v31  ;;  %v2469_v58 = vadd.f32 %v2468_v26, %v2419_v23  ;;  %v2438_v42 = vrot.slane %v2437_v9, 2 }
 0x212   : > { %v2451_v59 = vrot.slane %v2450_v41, 2  ;;  %v2457_v53 = vrot.slane %v2456_v15, 2  ;;  %v2475_v18 = vrot.slane %v2474_v34, 4  ;;  %v2432_v29 = vadd.f32 %v2431_v19, %v2430_v16 }
 0x213   : > { %v2445_v27 = vadd.f32 %v2444_v10, %v2443_v30  ;;  %v2464_v14 = vrot.slane %v2463_v44, 2  ;;  %v2470_v17 = vrot.slane %v2469_v58, 2  ;;  %v2439_v1 = vadd.f32 %v2438_v42, %v2437_v9 }
 0x214   : > { %v2452_v8 = vadd.f32 %v2451_v59, %v2450_v41  ;;  %v2458_v39 = vadd.f32 %v2457_v53, %v2456_v15  ;;  %v2476_v63 = vadd.f32 %v2475_v18, %v2474_v34  ;;  %v2433_v40 = vrot.slane %v2432_v29, 1 }
 0x215   : > { %v2446_v25 = vrot.slane %v2445_v27, 1  ;;  %v2465_v3 = vadd.f32 %v2464_v14, %v2463_v44  ;;  %v2471_v57 = vadd.f32 %v2470_v17, %v2469_v58  ;;  %v2440_v49 = vrot.slane %v2439_v1, 1 }
 0x216   : > { %v2453_v5 = vrot.slane %v2452_v8, 1  ;;  %v2459_v32 = vrot.slane %v2458_v39, 1  ;;  %v2477_v23 = vrot.slane %v2476_v63, 2  ;;  %v8385_v56 = vunpack.c.h.bf16 %v6402_v62 }
 0x217   : > { %v2434_v20 = vadd.f32 %v2433_v40, %v2432_v29  ;;  %v2466_v60 = vrot.slane %v2465_v3, 1  ;;  %v2472_v28 = vrot.slane %v2471_v57, 1  ;;  %v2441_v13 = vadd.f32 %v2440_v49, %v2439_v1 }
 0x218   : > { %v2428_v46 = vmul.f32 %v6459_v38, %v8385_v56  ;;  %v2447_v7 = vadd.f32 %v2446_v25, %v2445_v27  ;;  %v2454_v43 = vadd.f32 %v2453_v5, %v2452_v8  ;;  %v2478_v22 = vadd.f32 %v2477_v23, %v2476_v63 }
 0x219   : > { %v2460_v24 = vadd.f32 %v2459_v32, %v2458_v39  ;;  %v2467_v45 = vadd.f32 %v2466_v60, %v2465_v3  ;;  %v2481_v2 = vrot.slane %v6558_v50, 4  ;;  %v2487_v47 = vsel %vm241_vm0, %v2422_v36, 0.0 }
 0x21a   : > { %v2473_v31 = vadd.f32 %v2472_v28, %v2471_v57  ;;  %v2488_v16 = vrot.slane %v2487_v47, 4  ;;  %v2494_v30 = vrot.slane %v6566_v55, 4  ;;  %v2500_v62 = vsel %vm241_vm0, %v2424_v33, 0.0 }
 0x21b   : > { %v2482_v38 = vadd.f32 %v2481_v2, %v6558_v50  ;;  %v2501_v0 = vrot.slane %v2500_v62, 4  ;;  %v2507_v26 = vrot.slane %v6574_v61, 4  ;;  %v2513_v9 = vsel %vm241_vm0, %v2426_v11, 0.0 }
 0x21c   : > { %v2479_v41 = vrot.slane %v2478_v22, 1  ;;  %v2489_v15 = vadd.f32 %v2488_v16, %v2487_v47  ;;  %v2495_v34 = vadd.f32 %v2494_v30, %v6566_v55  ;;  %v2514_v19 = vrot.slane %v2513_v9, 4 }
 0x21d   : > { %v2483_v10 = vrot.slane %v2482_v38, 2  ;;  %v2502_v36 = vadd.f32 %v2501_v0, %v2500_v62  ;;  %v2508_v44 = vadd.f32 %v2507_v26, %v6574_v61  ;;  %v2520_v58 = vrot.slane %v6582_v4, 4 }
 0x21e   : > { %v2490_v42 = vrot.slane %v2489_v15, 2  ;;  %v2496_v33 = vrot.slane %v2495_v34, 2  ;;  %v2515_v59 = vadd.f32 %v2514_v19, %v2513_v9  ;;  %v2526_v50 = vsel %vm241_vm0, %v2428_v46, 0.0 }
 0x21f   : > { %v2484_v53 = vadd.f32 %v2483_v10, %v2482_v38  ;;  %v2503_v18 = vrot.slane %v2502_v36, 2  ;;  %v2509_v29 = vrot.slane %v2508_v44, 2  ;;  %v2521_v11 = vadd.f32 %v2520_v58, %v6582_v4  ;;  %v6607_v38 = vld [vmem:[%s4850_s27 + $0x38] sm:$0xff] }
 0x220   : > { %v2491_v27 = vadd.f32 %v2490_v42, %v2489_v15  ;;  %v2497_v14 = vadd.f32 %v2496_v33, %v2495_v34  ;;  %v2516_v55 = vrot.slane %v2515_v59, 2  ;;  %v2527_v17 = vrot.slane %v2526_v50, 4  ;;  %v6634_v10 = vld [vmem:[%s4850_s27 + $0x1d8] sm:$0xff]  ;;  %v6646_v33 = vld [vmem:[%s4850_s27 + $0x240] sm:$0xff] }
 0x221   : > { %v2485_v1 = vrot.slane %v2484_v53, 1  ;;  %v2504_v8 = vadd.f32 %v2503_v18, %v2502_v36  ;;  %v2510_v39 = vadd.f32 %v2509_v29, %v2508_v44  ;;  %v2522_v61 = vrot.slane %v2521_v11, 2  ;;  %v6656_v18 = vld [vmem:[%s4850_s27 + $0x310] sm:$0xff] }
 0x222   : > { %v2492_v63 = vrot.slane %v2491_v27, 1  ;;  %v2498_v40 = vrot.slane %v2497_v14, 1  ;;  %v2517_v25 = vadd.f32 %v2516_v55, %v2515_v59  ;;  %v2528_v3 = vadd.f32 %v2527_v17, %v2526_v50  ;;  %v2591_v50 = vld [vmem:[%s8142_s0 + $0x38] sm:$0xff] }
 0x223   : > { %v2480_v57 = vadd.f32 %v2479_v41, %v2478_v22  ;;  %v2505_v49 = vrot.slane %v2504_v8, 1  ;;  %v2511_v5 = vrot.slane %v2510_v39, 1  ;;  %v2523_v32 = vadd.f32 %v2522_v61, %v2521_v11 }
 0x224   : > { %v2486_v23 = vadd.f32 %v2485_v1, %v2484_v53  ;;  %v2493_v56 = vadd.f32 %v2492_v63, %v2491_v27  ;;  %v2518_v4 = vrot.slane %v2517_v25, 1  ;;  %v2529_v46 = vrot.slane %v2528_v3, 2  ;;  %v6653_v53 = vld [vmem:[%s4850_s27 + $0x2a8] sm:$0xff]  ;;  %v4730_v63 = vld [vmem:[%s8142_s0 + $0xa0] sm:$0xff] }
 0x225   : > { %v2499_v60 = vadd.f32 %v2498_v40, %v2497_v14  ;;  %v2506_v28 = vadd.f32 %v2505_v49, %v2504_v8  ;;  %v2524_v2 = vrot.slane %v2523_v32, 1  ;;  %v2549_v47 = vsel %vm356_vm1, %v2447_v7, %v2434_v20 }
 0x226   : > { %v2512_v16 = vadd.f32 %v2511_v5, %v2510_v39  ;;  %v2530_v30 = vadd.f32 %v2529_v46, %v2528_v3  ;;  %v2550_v62 = vsel %vm358_vm2, %v2460_v24, %v2549_v47  ;;  %v2556_v22 = vsel %vm356_vm1, %v2454_v43, %v2441_v13  ;;  %v6620_v43 = vld [vmem:[%s4850_s27 + $0xa0] sm:$0xff] }
 0x227   : > { %v2398_v0 = vsel %vm368_vm7, %v6521_v51, %v6532_v48  ;;  %v2519_v26 = vadd.f32 %v2518_v4, %v2517_v25  ;;  %v2551_v9 = vsel %vm360_vm3, %v2473_v31, %v2550_v62  ;;  %v2557_v20 = vsel %vm358_vm2, %v2467_v45, %v2556_v22  ;;  %v6625_v45 = vld [vmem:[%s4850_s27 + $0x108] sm:$0xff]  ;;  %v6628_v31 = vld [vmem:[%s4850_s27 + $0x170] sm:$0xff] }
 0x228   : > { %v2404_v7 = vsel %vm366_vm6, %v6519_v12, %v6541_v37  ;;  %v2531_v24 = vrot.slane %v2530_v30, 1  ;;  %v2552_v41 = vsel %vm362_vm4, %v2486_v23, %v2551_v9  ;;  %v2558_v13 = vsel %vm360_vm3, %v2480_v57, %v2557_v20 }
 0x229   : > { %v2525_v15 = vadd.f32 %v2524_v2, %v2523_v32  ;;  %v2553_v51 = vsel %vm364_vm5, %v2499_v60, %v2552_v41  ;;  %v2559_v48 = vsel %vm362_vm4, %v2493_v56, %v2558_v13  ;;  %v2575_v12 = vunpack.c.l.bf16 %v6607_v38 }
 0x22a   : > { %v2532_v37 = vadd.f32 %v2531_v24, %v2530_v30  ;;  %v2554_v34 = vsel %vm366_vm6, %v2512_v16, %v2553_v51  ;;  %v2560_v19 = vsel %vm364_vm5, %v2506_v28, %v2559_v48  ;;  %v2576_v36 = vunpack.c.h.bf16 %v6607_v38 }
 0x22b   : > { %v6639_v44 = vsel %vm368_vm7, %v6529_v21, %v2404_v7  ;;  %v6642_v58 = vadd.f32 %v2398_v0, %v6388_v54  ;;  %v2561_v42 = vsel %vm366_vm6, %v2519_v26, %v2560_v19  ;;  %v2577_v59 = vunpack.c.l.bf16 %v6620_v43 }
 0x22c   : > { %v8239_v21 = vunpack.c.h.bf16 %v6620_v43  ;;  %v8238_v29 = vunpack.c.l.bf16 %v6625_v45  ;;  %v8234_v54 = vunpack.c.h.bf16 %v6625_v45  ;;  %v8233_v11 = vunpack.c.l.bf16 %v6628_v31 }
 0x22d   : > { %v6663_v27 = vsel %vm368_vm7, %v2525_v15, %v2554_v34  ;;  %v6666_v14 = vsel %vm368_vm7, %v2532_v37, %v2561_v42  ;;  %v8232_v55 = vunpack.c.h.bf16 %v6628_v31  ;;  %v8231_v17 = vunpack.c.l.bf16 %v6634_v10 }
 0x22e   : > { %v8230_v1 = vunpack.c.h.bf16 %v6634_v10  ;;  %v8229_v8 = vunpack.c.l.bf16 %v6646_v33  ;;  %v6672_v39 = vunpack.c.l.bf16 %v2591_v50  ;;  %v6674_v61 = vunpack.c.h.bf16 %v2591_v50 }
 0x22f   : > { %v8228_v40 = vunpack.c.h.bf16 %v6646_v33  ;;  %v8227_v25 = vunpack.c.l.bf16 %v6653_v53  ;;  %v8237_v3 = vunpack.c.h.bf16 %v6653_v53  ;;  %v8236_v57 = vunpack.c.l.bf16 %v6656_v18 }
 0x230   : > { %v2594_v49 = vmul.f32 %v6672_v39, %v2575_v12  ;;  %v2595_v5 = vmul.f32 %v6674_v61, %v2576_v36  ;;  %v2596_v32 = vmul.f32 %v6672_v39, %v2577_v59  ;;  %v2597_v23 = vmul.f32 %v6674_v61, %v8239_v21 }
 0x231   : > { %v8235_v56 = vunpack.c.h.bf16 %v6656_v18  ;;  %v2598_v4 = vmul.f32 %v6672_v39, %v8238_v29  ;;  %v2599_v46 = vmul.f32 %v6674_v61, %v8234_v54  ;;  %v6702_v60 = vunpack.c.l.bf16 %v4730_v63 }
 0x232   : > { %v2600_v28 = vmul.f32 %v6672_v39, %v8233_v11  ;;  %v2601_v2 = vmul.f32 %v6674_v61, %v8232_v55  ;;  %v2602_v47 = vmul.f32 %v6672_v39, %v8231_v17  ;;  %v6713_v16 = vunpack.c.h.bf16 %v4730_v63 }
 0x233   : > { %v2603_v30 = vmul.f32 %v6674_v61, %v8230_v1  ;;  %v6721_v62 = vmul.f32 %v6672_v39, %v8229_v8  ;;  %v2605_v22 = vmul.f32 %v6674_v61, %v8228_v40  ;;  %v6729_v0 = vmul.f32 %v6672_v39, %v8227_v25 }
 0x234   : > { %v2610_v26 = vrot.slane %v2594_v49, 4  ;;  %v2616_v9 = vsel %vm241_vm0, %v2595_v5, 0.0  ;;  %v2623_v20 = vrot.slane %v2596_v32, 4  ;;  %v2629_v7 = vsel %vm241_vm0, %v2597_v23, 0.0 }
 0x235   : > { %v2617_v24 = vrot.slane %v2616_v9, 4  ;;  %v2630_v41 = vrot.slane %v2629_v7, 4  ;;  %v2636_v13 = vrot.slane %v2598_v4, 4  ;;  %v2642_v15 = vsel %vm241_vm0, %v2599_v46, 0.0 }
 0x236   : > { %v2611_v51 = vadd.f32 %v2610_v26, %v2594_v49  ;;  %v2624_v48 = vadd.f32 %v2623_v20, %v2596_v32  ;;  %v2643_v37 = vrot.slane %v2642_v15, 4  ;;  %v2649_v34 = vrot.slane %v2600_v28, 4 }
 0x237   : > { %v2618_v19 = vadd.f32 %v2617_v24, %v2616_v9  ;;  %v2631_v42 = vadd.f32 %v2630_v41, %v2629_v7  ;;  %v2637_v50 = vadd.f32 %v2636_v13, %v2598_v4  ;;  %v2655_v63 = vsel %vm241_vm0, %v2601_v2, 0.0 }
 0x238   : > { %v2612_v25 = vrot.slane %v2611_v51, 2  ;;  %v2625_v40 = vrot.slane %v2624_v48, 2  ;;  %v2644_v5 = vadd.f32 %v2643_v37, %v2642_v15  ;;  %v2650_v8 = vadd.f32 %v2649_v34, %v2600_v28 }
 0x239   : > { %v2619_v1 = vrot.slane %v2618_v19, 2  ;;  %v2632_v23 = vrot.slane %v2631_v42, 2  ;;  %v2638_v17 = vrot.slane %v2637_v50, 2  ;;  %v2656_v55 = vrot.slane %v2655_v63, 4 }
 0x23a   : > { %v2613_v11 = vadd.f32 %v2612_v25, %v2611_v51  ;;  %v2626_v54 = vadd.f32 %v2625_v40, %v2624_v48  ;;  %v2645_v46 = vrot.slane %v2644_v5, 2  ;;  %v2651_v49 = vrot.slane %v2650_v8, 2 }
 0x23b   : > { %v2620_v32 = vadd.f32 %v2619_v1, %v2618_v19  ;;  %v2633_v26 = vadd.f32 %v2632_v23, %v2631_v42  ;;  %v2639_v20 = vadd.f32 %v2638_v17, %v2637_v50  ;;  %v2657_v9 = vadd.f32 %v2656_v55, %v2655_v63 }
 0x23c   : > { %v2614_v7 = vrot.slane %v2613_v11, 1  ;;  %v2627_v4 = vrot.slane %v2626_v54, 1  ;;  %v2646_v24 = vadd.f32 %v2645_v46, %v2644_v5  ;;  %v2652_v2 = vadd.f32 %v2651_v49, %v2650_v8 }
 0x23d   : > { %v2621_v41 = vrot.slane %v2620_v32, 1  ;;  %v2634_v13 = vrot.slane %v2633_v26, 1  ;;  %v2640_v15 = vrot.slane %v2639_v20, 1  ;;  %v2658_v28 = vrot.slane %v2657_v9, 2 }
 0x23e   : > { %v2607_v37 = vmul.f32 %v6674_v61, %v8237_v3  ;;  %v2608_v40 = vmul.f32 %v6672_v39, %v8236_v57  ;;  %v2609_v55 = vmul.f32 %v6674_v61, %v8235_v56  ;;  %v2615_v17 = vadd.f32 %v2614_v7, %v2613_v11 }
 0x23f   : > { %v2628_v1 = vadd.f32 %v2627_v4, %v2626_v54  ;;  %v2647_v25 = vrot.slane %v2646_v24, 1  ;;  %v2653_v8 = vrot.slane %v2652_v2, 1  ;;  %v2659_v51 = vadd.f32 %v2658_v28, %v2657_v9 }
 0x240   : > { %v2622_v48 = vadd.f32 %v2621_v41, %v2620_v32  ;;  %v2635_v34 = vadd.f32 %v2634_v13, %v2633_v26  ;;  %v2662_v19 = vrot.slane %v2602_v47, 4  ;;  %v2668_v42 = vsel %vm241_vm0, %v2603_v30, 0.0 }
 0x241   : > { %v2641_v50 = vadd.f32 %v2640_v15, %v2639_v20  ;;  %v2669_v63 = vrot.slane %v2668_v42, 4  ;;  %v2675_v5 = vrot.slane %v6721_v62, 4  ;;  %v2681_v39 = vsel %vm241_vm0, %v2605_v22, 0.0 }
 0x242   : > { %v2663_v23 = vadd.f32 %v2662_v19, %v2602_v47  ;;  %v2682_v46 = vrot.slane %v2681_v39, 4  ;;  %v2688_v61 = vrot.slane %v6729_v0, 4  ;;  %v2694_v54 = vsel %vm241_vm0, %v2607_v37, 0.0 }
 0x243   : > { %v2660_v11 = vrot.slane %v2659_v51, 1  ;;  %v2670_v49 = vadd.f32 %v2669_v63, %v2668_v42  ;;  %v2676_v32 = vadd.f32 %v2675_v5, %v6721_v62  ;;  %v2695_v26 = vrot.slane %v2694_v54, 4 }
 0x244   : > { %v2664_v9 = vrot.slane %v2663_v23, 2  ;;  %v2683_v7 = vadd.f32 %v2682_v46, %v2681_v39  ;;  %v2689_v30 = vadd.f32 %v2688_v61, %v6729_v0  ;;  %v2701_v20 = vrot.slane %v2608_v40, 4 }
 0x245   : > { %v2671_v4 = vrot.slane %v2670_v49, 2  ;;  %v2677_v41 = vrot.slane %v2676_v32, 2  ;;  %v2696_v13 = vadd.f32 %v2695_v26, %v2694_v54  ;;  %v2707_v47 = vsel %vm241_vm0, %v2609_v55, 0.0 }
 0x246   : > { %v2665_v22 = vadd.f32 %v2664_v9, %v2663_v23  ;;  %v2684_v15 = vrot.slane %v2683_v7, 2  ;;  %v2690_v28 = vrot.slane %v2689_v30, 2  ;;  %v2702_v19 = vadd.f32 %v2701_v20, %v2608_v40 }
 0x247   : > { %v2672_v37 = vadd.f32 %v2671_v4, %v2670_v49  ;;  %v2678_v56 = vadd.f32 %v2677_v41, %v2676_v32  ;;  %v2697_v42 = vrot.slane %v2696_v13, 2  ;;  %v2708_v63 = vrot.slane %v2707_v47, 4 }
 0x248   : > { %v2666_v62 = vrot.slane %v2665_v22, 1  ;;  %v2685_v5 = vadd.f32 %v2684_v15, %v2683_v7  ;;  %v2691_v57 = vadd.f32 %v2690_v28, %v2689_v30  ;;  %v2703_v39 = vrot.slane %v2702_v19, 2 }
 0x249   : > { %v2673_v46 = vrot.slane %v2672_v37, 1  ;;  %v2679_v0 = vrot.slane %v2678_v56, 1  ;;  %v2698_v61 = vadd.f32 %v2697_v42, %v2696_v13  ;;  %v2709_v3 = vadd.f32 %v2708_v63, %v2707_v47 }
 0x24a   : > { %v2648_v29 = vadd.f32 %v2647_v25, %v2646_v24  ;;  %v2654_v54 = vadd.f32 %v2653_v8, %v2652_v2  ;;  %v2692_v26 = vrot.slane %v2691_v57, 1  ;;  %v2704_v55 = vadd.f32 %v2703_v39, %v2702_v19 }
 0x24b   : > { %v2661_v23 = vadd.f32 %v2660_v11, %v2659_v51  ;;  %v2667_v9 = vadd.f32 %v2666_v62, %v2665_v22  ;;  %v2686_v21 = vrot.slane %v2685_v5, 1  ;;  %v2710_v40 = vrot.slane %v2709_v3, 2 }
 0x24c   : > { %v2674_v49 = vadd.f32 %v2673_v46, %v2672_v37  ;;  %v2680_v32 = vadd.f32 %v2679_v0, %v2678_v56  ;;  %v2699_v20 = vrot.slane %v2698_v61, 1  ;;  %v2730_v4 = vsel %vm356_vm1, %v2628_v1, %v2615_v17 }
 0x24d   : > { %v2705_v7 = vrot.slane %v2704_v55, 1  ;;  %v2711_v30 = vadd.f32 %v2710_v40, %v2709_v3  ;;  %v2731_v41 = vsel %vm358_vm2, %v2641_v50, %v2730_v4  ;;  %v2737_v13 = vsel %vm356_vm1, %v2635_v34, %v2622_v48 }
 0x24e   : > { %v6757_v24 = vadd.f32 %v6639_v44, %v6503_v6  ;;  %v2693_v2 = vadd.f32 %v2692_v26, %v2691_v57  ;;  %v2732_v25 = vsel %vm360_vm3, %v2654_v54, %v2731_v41  ;;  %v2738_v8 = vsel %vm358_vm2, %v2648_v29, %v2737_v13 }
 0x24f   : > { %v2687_v51 = vadd.f32 %v2686_v21, %v2685_v5  ;;  %v2712_v56 = vrot.slane %v2711_v30, 1  ;;  %v2733_v11 = vsel %vm362_vm4, %v2667_v9, %v2732_v25  ;;  %v2739_v17 = vsel %vm360_vm3, %v2661_v23, %v2738_v8 }
 0x250   : > { %v6765_v3 = vadd.f32 %v6663_v27, %v6511_v35  ;;  %v6769_v1 = vadd.f32 %v6666_v14, %v6515_v52  ;;  %v2734_v6 = vsel %vm364_vm5, %v2680_v32, %v2733_v11  ;;  %v2740_v44 = vsel %vm362_vm4, %v2674_v49, %v2739_v17 }
 0x251   : > { %v6773_v57 = vadd.f32 %v2699_v20, %v2698_v61  ;;  %v6775_v21 = vadd.f32 %v2705_v7, %v2704_v55  ;;  %v2751_v29 = vmul.f32 %v6702_v60, %v2575_v12  ;;  %v2752_v35 = vmul.f32 %v6713_v16, %v2576_v36 }
 0x252   : > { %v6783_v27 = vadd.f32 %v2712_v56, %v2711_v30  ;;  %v6786_v52 = vsel %vm366_vm6, %v2693_v2, %v2734_v6  ;;  %v2753_v14 = vmul.f32 %v6702_v60, %v2577_v59  ;;  %v8386_v48 = vunpack.c.h.bf16 %v6620_v43 }
 0x253   : > { %v6795_v50 = vsel %vm364_vm5, %v2687_v51, %v2740_v44  ;;  %v8387_v38 = vunpack.c.l.bf16 %v6625_v45  ;;  %v8388_v36 = vunpack.c.h.bf16 %v6625_v45  ;;  %v8389_v22 = vunpack.c.l.bf16 %v6628_v31 }
 0x254   : > { %v2754_v34 = vmul.f32 %v6713_v16, %v8386_v48  ;;  %v8390_v59 = vunpack.c.h.bf16 %v6628_v31  ;;  %v8391_v28 = vunpack.c.l.bf16 %v6634_v10  ;;  %v8392_v37 = vunpack.c.h.bf16 %v6634_v10 }
 0x255   : > { %v2755_v12 = vmul.f32 %v6702_v60, %v8387_v38  ;;  %v2756_v47 = vmul.f32 %v6713_v16, %v8388_v36  ;;  %v2757_v15 = vmul.f32 %v6702_v60, %v8389_v22  ;;  %v8393_v45 = vunpack.c.l.bf16 %v6646_v33 }
 0x256   : > { %v2758_v43 = vmul.f32 %v6713_v16, %v8390_v59  ;;  %v6812_v19 = vmul.f32 %v6702_v60, %v8391_v28  ;;  %v2760_v42 = vmul.f32 %v6713_v16, %v8392_v37  ;;  %v8394_v62 = vunpack.c.h.bf16 %v6646_v33 }
 0x257   : > { %v6820_v63 = vmul.f32 %v6702_v60, %v8393_v45  ;;  %v8395_v5 = vunpack.c.l.bf16 %v6653_v53  ;;  %v8396_v46 = vunpack.c.h.bf16 %v6653_v53  ;;  %v8397_v0 = vunpack.c.l.bf16 %v6656_v18 }
 0x258   : > { %v2762_v31 = vmul.f32 %v6713_v16, %v8394_v62  ;;  %v2767_v54 = vrot.slane %v2751_v29, 4  ;;  %v2773_v26 = vsel %vm241_vm0, %v2752_v35, 0.0  ;;  %v2780_v33 = vrot.slane %v2753_v14, 4 }
 0x259   : > { %v6828_v39 = vmul.f32 %v6702_v60, %v8395_v5  ;;  %v2764_v10 = vmul.f32 %v6713_v16, %v8396_v46  ;;  %v6836_v61 = vmul.f32 %v6702_v60, %v8397_v0  ;;  %v2786_v55 = vsel %vm241_vm0, %v2754_v34, 0.0 }
 0x25a   : > { %v2774_v23 = vrot.slane %v2773_v26, 4  ;;  %v2787_v9 = vrot.slane %v2786_v55, 4  ;;  %v2793_v40 = vrot.slane %v2755_v12, 4  ;;  %v2799_v49 = vsel %vm241_vm0, %v2756_v47, 0.0 }
 0x25b   : > { %v2768_v32 = vadd.f32 %v2767_v54, %v2751_v29  ;;  %v2781_v53 = vadd.f32 %v2780_v33, %v2753_v14  ;;  %v2800_v20 = vrot.slane %v2799_v49, 4  ;;  %v2806_v4 = vrot.slane %v2757_v15, 4 }
 0x25c   : > { %v2775_v7 = vadd.f32 %v2774_v23, %v2773_v26  ;;  %v2788_v30 = vadd.f32 %v2787_v9, %v2786_v55  ;;  %v2794_v41 = vadd.f32 %v2793_v40, %v2755_v12  ;;  %v2812_v60 = vsel %vm241_vm0, %v2758_v43, 0.0 }
 0x25d   : > { %v2769_v13 = vrot.slane %v2768_v32, 2  ;;  %v2782_v2 = vrot.slane %v2781_v53, 2  ;;  %v2801_v25 = vadd.f32 %v2800_v20, %v2799_v49  ;;  %v2807_v8 = vadd.f32 %v2806_v4, %v2757_v15 }
 0x25e   : > { %v2776_v51 = vrot.slane %v2775_v7, 2  ;;  %v2789_v56 = vrot.slane %v2788_v30, 2  ;;  %v2795_v11 = vrot.slane %v2794_v41, 2  ;;  %v2813_v17 = vrot.slane %v2812_v60, 4 }
 0x25f   : > { %v2770_v6 = vadd.f32 %v2769_v13, %v2768_v32  ;;  %v2783_v44 = vadd.f32 %v2782_v2, %v2781_v53  ;;  %v2802_v35 = vrot.slane %v2801_v25, 2  ;;  %v2808_v29 = vrot.slane %v2807_v8, 2 }
 0x260   : > { %v2777_v14 = vadd.f32 %v2776_v51, %v2775_v7  ;;  %v2790_v48 = vadd.f32 %v2789_v56, %v2788_v30  ;;  %v2796_v34 = vadd.f32 %v2795_v11, %v2794_v41  ;;  %v2814_v38 = vadd.f32 %v2813_v17, %v2812_v60 }
 0x261   : > { %v2771_v36 = vrot.slane %v2770_v6, 1  ;;  %v2784_v12 = vrot.slane %v2783_v44, 1  ;;  %v2803_v47 = vadd.f32 %v2802_v35, %v2801_v25  ;;  %v2809_v22 = vadd.f32 %v2808_v29, %v2807_v8 }
 0x262   : > { %v2778_v59 = vrot.slane %v2777_v14, 1  ;;  %v2791_v43 = vrot.slane %v2790_v48, 1  ;;  %v2797_v28 = vrot.slane %v2796_v34, 1  ;;  %v2815_v15 = vrot.slane %v2814_v38, 2 }
 0x263   : > { %v8398_v37 = vunpack.c.h.bf16 %v6656_v18  ;;  %v2772_v62 = vadd.f32 %v2771_v36, %v2770_v6  ;;  %v2804_v5 = vrot.slane %v2803_v47, 1  ;;  %v2810_v46 = vrot.slane %v2809_v22, 1 }
 0x264   : > { %v2779_v0 = vadd.f32 %v2778_v59, %v2777_v14  ;;  %v2785_v54 = vadd.f32 %v2784_v12, %v2783_v44  ;;  %v2792_v26 = vadd.f32 %v2791_v43, %v2790_v48  ;;  %v2816_v33 = vadd.f32 %v2815_v15, %v2814_v38 }
 0x265   : > { %v2766_v45 = vmul.f32 %v6713_v16, %v8398_v37  ;;  %v2798_v55 = vadd.f32 %v2797_v28, %v2796_v34  ;;  %v2805_v23 = vadd.f32 %v2804_v5, %v2803_v47  ;;  %v2819_v9 = vrot.slane %v6812_v19, 4 }
 0x266   : > { %v2825_v40 = vsel %vm241_vm0, %v2760_v42, 0.0  ;;  %v2811_v49 = vadd.f32 %v2810_v46, %v2809_v22  ;;  %v2832_v53 = vrot.slane %v6820_v63, 4  ;;  %v2838_v18 = vsel %vm241_vm0, %v2762_v31, 0.0 }
 0x267   : > { %v2826_v32 = vrot.slane %v2825_v40, 4  ;;  %v2820_v16 = vadd.f32 %v2819_v9, %v6812_v19  ;;  %v2839_v20 = vrot.slane %v2838_v18, 4  ;;  %v2845_v4 = vrot.slane %v6828_v39, 4 }
 0x268   : > { %v2851_v7 = vsel %vm241_vm0, %v2764_v10, 0.0  ;;  %v2817_v30 = vrot.slane %v2816_v33, 1  ;;  %v2833_v60 = vadd.f32 %v2832_v53, %v6820_v63  ;;  %v2858_v8 = vrot.slane %v6836_v61, 4 }
 0x269   : > { %v2827_v41 = vadd.f32 %v2826_v32, %v2825_v40  ;;  %v2852_v13 = vrot.slane %v2851_v7, 4  ;;  %v2821_v2 = vrot.slane %v2820_v16, 2  ;;  %v2840_v42 = vadd.f32 %v2839_v20, %v2838_v18 }
 0x26a   : > { %v2846_v25 = vadd.f32 %v2845_v4, %v6828_v39  ;;  %v2834_v31 = vrot.slane %v2833_v60, 2  ;;  %v2864_v19 = vsel %vm241_vm0, %v2766_v45, 0.0  ;;  %v2859_v10 = vadd.f32 %v2858_v8, %v6836_v61 }
 0x26b   : > { %v2828_v51 = vrot.slane %v2827_v41, 2  ;;  %v2853_v56 = vadd.f32 %v2852_v13, %v2851_v7  ;;  %v2822_v11 = vadd.f32 %v2821_v2, %v2820_v16  ;;  %v2841_v17 = vrot.slane %v2840_v42, 2  ;;  %v6861_v16 = vld [vmem:[%s4850_s27 + $0x40] sm:$0xff] }
 0x26c   : > { %v2847_v6 = vrot.slane %v2846_v25, 2  ;;  %v2835_v35 = vadd.f32 %v2834_v31, %v2833_v60  ;;  %v2865_v29 = vrot.slane %v2864_v19, 4  ;;  %v2860_v39 = vrot.slane %v2859_v10, 2  ;;  %v6888_v2 = vld [vmem:[%s4850_s27 + $0x1e0] sm:$0xff]  ;;  %v6900_v31 = vld [vmem:[%s4850_s27 + $0x248] sm:$0xff] }
 0x26d   : > { %v2829_v44 = vadd.f32 %v2828_v51, %v2827_v41  ;;  %v2854_v63 = vrot.slane %v2853_v56, 2  ;;  %v2823_v14 = vrot.slane %v2822_v11, 1  ;;  %v2842_v48 = vadd.f32 %v2841_v17, %v2840_v42  ;;  %v6910_v17 = vld [vmem:[%s4850_s27 + $0x318] sm:$0xff] }
 0x26e   : > { %v2848_v34 = vadd.f32 %v2847_v6, %v2846_v25  ;;  %v2836_v36 = vrot.slane %v2835_v35, 1  ;;  %v2866_v47 = vadd.f32 %v2865_v29, %v2864_v19  ;;  %v2818_v22 = vadd.f32 %v2817_v30, %v2816_v33  ;;  %v2929_v19 = vld [vmem:[%s8142_s0 + $0x40] sm:$0xff] }
 0x26f   : > { %v2830_v38 = vrot.slane %v2829_v44, 1  ;;  %v2855_v12 = vadd.f32 %v2854_v63, %v2853_v56  ;;  %v2843_v59 = vrot.slane %v2842_v48, 1  ;;  %v2861_v28 = vadd.f32 %v2860_v39, %v2859_v10 }
 0x270   : > { %v2849_v43 = vrot.slane %v2848_v34, 1  ;;  %v2824_v15 = vadd.f32 %v2823_v14, %v2822_v11  ;;  %v2867_v45 = vrot.slane %v2866_v47, 2  ;;  %v2837_v5 = vadd.f32 %v2836_v36, %v2835_v35  ;;  %v6907_v11 = vld [vmem:[%s4850_s27 + $0x2b0] sm:$0xff] }
 0x271   : > { %v2831_v37 = vadd.f32 %v2830_v38, %v2829_v44  ;;  %v2856_v61 = vrot.slane %v2855_v12, 1  ;;  %v2844_v46 = vadd.f32 %v2843_v59, %v2842_v48  ;;  %v2862_v9 = vrot.slane %v2861_v28, 1  ;;  %v4731_v38 = vld [vmem:[%s8142_s0 + $0xa8] sm:$0xff] }
 0x272   : > { %v2887_v40 = vsel %vm356_vm1, %v2785_v54, %v2772_v62  ;;  %v2850_v32 = vadd.f32 %v2849_v43, %v2848_v34  ;;  %v2868_v53 = vadd.f32 %v2867_v45, %v2866_v47  ;;  %v2894_v33 = vsel %vm356_vm1, %v2792_v26, %v2779_v0  ;;  %v6874_v26 = vld [vmem:[%s4850_s27 + $0xa8] sm:$0xff] }
 0x273   : > { %v2888_v18 = vsel %vm358_vm2, %v2798_v55, %v2887_v40  ;;  %v2736_v20 = vsel %vm368_vm7, %v6775_v21, %v6786_v52  ;;  %v2857_v4 = vadd.f32 %v2856_v61, %v2855_v12  ;;  %v2895_v62 = vsel %vm358_vm2, %v2805_v23, %v2894_v33  ;;  %v6879_v23 = vld [vmem:[%s4850_s27 + $0x110] sm:$0xff] }
 0x274   : > { %v2889_v7 = vsel %vm360_vm3, %v2811_v49, %v2888_v18  ;;  %v2742_v54 = vsel %vm366_vm6, %v6773_v57, %v6795_v50  ;;  %v2869_v55 = vrot.slane %v2868_v53, 1  ;;  %v2896_v0 = vsel %vm360_vm3, %v2818_v22, %v2895_v62  ;;  %v6882_v49 = vld [vmem:[%s4850_s27 + $0x178] sm:$0xff] }
 0x275   : > { %v2890_v30 = vsel %vm362_vm4, %v2824_v15, %v2889_v7  ;;  %v2863_v41 = vadd.f32 %v2862_v9, %v2861_v28  ;;  %v2897_v52 = vsel %vm362_vm4, %v2831_v37, %v2896_v0  ;;  %v2913_v57 = vunpack.c.l.bf16 %v6861_v16 }
 0x276   : > { %v2891_v21 = vsel %vm364_vm5, %v2837_v5, %v2890_v30  ;;  %v2870_v50 = vadd.f32 %v2869_v55, %v2868_v53  ;;  %v2898_v13 = vsel %vm364_vm5, %v2844_v46, %v2897_v52  ;;  %v2914_v42 = vunpack.c.h.bf16 %v6861_v16 }
 0x277   : > { %v2892_v60 = vsel %vm366_vm6, %v2850_v32, %v2891_v21  ;;  %v6893_v25 = vsel %vm368_vm7, %v6783_v27, %v2742_v54  ;;  %v6896_v8 = vadd.f32 %v2736_v20, %v6642_v58  ;;  %v2899_v51 = vsel %vm366_vm6, %v2857_v4, %v2898_v13 }
 0x278   : > { %v2915_v56 = vunpack.c.l.bf16 %v6874_v26  ;;  %v8252_v27 = vunpack.c.h.bf16 %v6874_v26  ;;  %v8251_v6 = vunpack.c.l.bf16 %v6879_v23  ;;  %v8247_v58 = vunpack.c.h.bf16 %v6879_v23 }
 0x279   : > { %v8246_v10 = vunpack.c.l.bf16 %v6882_v49  ;;  %v6917_v44 = vsel %vm368_vm7, %v2863_v41, %v2892_v60  ;;  %v6920_v35 = vsel %vm368_vm7, %v2870_v50, %v2899_v51  ;;  %v8245_v63 = vunpack.c.h.bf16 %v6882_v49 }
 0x27a   : > { %v8244_v29 = vunpack.c.l.bf16 %v6888_v2  ;;  %v8243_v14 = vunpack.c.h.bf16 %v6888_v2  ;;  %v8242_v48 = vunpack.c.l.bf16 %v6900_v31  ;;  %v6926_v34 = vunpack.c.l.bf16 %v2929_v19 }
 0x27b   : > { %v6928_v39 = vunpack.c.h.bf16 %v2929_v19  ;;  %v8241_v36 = vunpack.c.h.bf16 %v6900_v31  ;;  %v8240_v12 = vunpack.c.l.bf16 %v6907_v11  ;;  %v8250_v47 = vunpack.c.h.bf16 %v6907_v11 }
 0x27c   : > { %v8249_v22 = vunpack.c.l.bf16 %v6910_v17  ;;  %v2932_v59 = vmul.f32 %v6926_v34, %v2913_v57  ;;  %v2934_v28 = vmul.f32 %v6926_v34, %v2915_v56  ;;  %v8248_v37 = vunpack.c.h.bf16 %v6910_v17 }
 0x27d   : > { %v2933_v43 = vmul.f32 %v6928_v39, %v2914_v42  ;;  %v2935_v15 = vmul.f32 %v6928_v39, %v8252_v27  ;;  %v2936_v61 = vmul.f32 %v6926_v34, %v8251_v6  ;;  %v2937_v45 = vmul.f32 %v6928_v39, %v8247_v58 }
 0x27e   : > { %v6956_v5 = vunpack.c.l.bf16 %v4731_v38  ;;  %v2938_v46 = vmul.f32 %v6926_v34, %v8246_v10  ;;  %v2939_v9 = vmul.f32 %v6928_v39, %v8245_v63  ;;  %v2940_v40 = vmul.f32 %v6926_v34, %v8244_v29 }
 0x27f   : > { %v6967_v32 = vunpack.c.h.bf16 %v4731_v38  ;;  %v2941_v53 = vmul.f32 %v6928_v39, %v8243_v14  ;;  %v6975_v18 = vmul.f32 %v6926_v34, %v8242_v48  ;;  %v2943_v33 = vmul.f32 %v6928_v39, %v8241_v36 }
 0x280   : > { %v6983_v20 = vmul.f32 %v6926_v34, %v8240_v12  ;;  %v2948_v4 = vrot.slane %v2932_v59, 4  ;;  %v2954_v7 = vsel %vm241_vm0, %v2933_v43, 0.0  ;;  %v2961_v62 = vrot.slane %v2934_v28, 4 }
 0x281   : > { %v2967_v54 = vsel %vm241_vm0, %v2935_v15, 0.0  ;;  %v2955_v55 = vrot.slane %v2954_v7, 4  ;;  %v2974_v0 = vrot.slane %v2936_v61, 4  ;;  %v2980_v41 = vsel %vm241_vm0, %v2937_v45, 0.0 }
 0x282   : > { %v2968_v30 = vrot.slane %v2967_v54, 4  ;;  %v2949_v21 = vadd.f32 %v2948_v4, %v2932_v59  ;;  %v2962_v52 = vadd.f32 %v2961_v62, %v2934_v28  ;;  %v2981_v50 = vrot.slane %v2980_v41, 4 }
 0x283   : > { %v2987_v60 = vrot.slane %v2938_v46, 4  ;;  %v2956_v13 = vadd.f32 %v2955_v55, %v2954_v7  ;;  %v2975_v19 = vadd.f32 %v2974_v0, %v2936_v61  ;;  %v2993_v38 = vsel %vm241_vm0, %v2939_v9, 0.0 }
 0x284   : > { %v2969_v51 = vadd.f32 %v2968_v30, %v2967_v54  ;;  %v2950_v12 = vrot.slane %v2949_v21, 2  ;;  %v2963_v36 = vrot.slane %v2962_v52, 2  ;;  %v2982_v43 = vadd.f32 %v2981_v50, %v2980_v41 }
 0x285   : > { %v2988_v48 = vadd.f32 %v2987_v60, %v2938_v46  ;;  %v2957_v14 = vrot.slane %v2956_v13, 2  ;;  %v2976_v29 = vrot.slane %v2975_v19, 2  ;;  %v2994_v63 = vrot.slane %v2993_v38, 4 }
 0x286   : > { %v2970_v15 = vrot.slane %v2969_v51, 2  ;;  %v2951_v10 = vadd.f32 %v2950_v12, %v2949_v21  ;;  %v2964_v58 = vadd.f32 %v2963_v36, %v2962_v52  ;;  %v2983_v45 = vrot.slane %v2982_v43, 2 }
 0x287   : > { %v2989_v59 = vrot.slane %v2988_v48, 2  ;;  %v2958_v28 = vadd.f32 %v2957_v14, %v2956_v13  ;;  %v2977_v62 = vadd.f32 %v2976_v29, %v2975_v19  ;;  %v2995_v7 = vadd.f32 %v2994_v63, %v2993_v38 }
 0x288   : > { %v2971_v4 = vadd.f32 %v2970_v15, %v2969_v51  ;;  %v2952_v54 = vrot.slane %v2951_v10, 1  ;;  %v2965_v61 = vrot.slane %v2964_v58, 1  ;;  %v2984_v55 = vadd.f32 %v2983_v45, %v2982_v43 }
 0x289   : > { %v2990_v9 = vadd.f32 %v2989_v59, %v2988_v48  ;;  %v2959_v30 = vrot.slane %v2958_v28, 1  ;;  %v2978_v41 = vrot.slane %v2977_v62, 1  ;;  %v2996_v46 = vrot.slane %v2995_v7, 2 }
 0x28a   : > { %v2972_v0 = vrot.slane %v2971_v4, 1  ;;  %v2945_v50 = vmul.f32 %v6928_v39, %v8250_v47  ;;  %v2946_v36 = vmul.f32 %v6926_v34, %v8249_v22  ;;  %v2947_v63 = vmul.f32 %v6928_v39, %v8248_v37 }
 0x28b   : > { %v2953_v29 = vadd.f32 %v2952_v54, %v2951_v10  ;;  %v2966_v14 = vadd.f32 %v2965_v61, %v2964_v58  ;;  %v2985_v12 = vrot.slane %v2984_v55, 1  ;;  %v2991_v48 = vrot.slane %v2990_v9, 1 }
 0x28c   : > { %v2997_v21 = vadd.f32 %v2996_v46, %v2995_v7  ;;  %v2960_v52 = vadd.f32 %v2959_v30, %v2958_v28  ;;  %v2973_v60 = vadd.f32 %v2972_v0, %v2971_v4  ;;  %v3000_v13 = vrot.slane %v2940_v40, 4 }
 0x28d   : > { %v3006_v51 = vsel %vm241_vm0, %v2941_v53, 0.0  ;;  %v2979_v19 = vadd.f32 %v2978_v41, %v2977_v62  ;;  %v3013_v43 = vrot.slane %v6975_v18, 4  ;;  %v3019_v34 = vsel %vm241_vm0, %v2943_v33, 0.0 }
 0x28e   : > { %v3007_v38 = vrot.slane %v3006_v51, 4  ;;  %v3001_v15 = vadd.f32 %v3000_v13, %v2940_v40  ;;  %v3020_v45 = vrot.slane %v3019_v34, 4  ;;  %v3026_v39 = vrot.slane %v6983_v20, 4 }
 0x28f   : > { %v3032_v58 = vsel %vm241_vm0, %v2945_v50, 0.0  ;;  %v2998_v10 = vrot.slane %v2997_v21, 1  ;;  %v3014_v28 = vadd.f32 %v3013_v43, %v6975_v18  ;;  %v3039_v62 = vrot.slane %v2946_v36, 4 }
 0x290   : > { %v3008_v59 = vadd.f32 %v3007_v38, %v3006_v51  ;;  %v3033_v4 = vrot.slane %v3032_v58, 4  ;;  %v3002_v7 = vrot.slane %v3001_v15, 2  ;;  %v3021_v54 = vadd.f32 %v3020_v45, %v3019_v34 }
 0x291   : > { %v3027_v53 = vadd.f32 %v3026_v39, %v6983_v20  ;;  %v3015_v30 = vrot.slane %v3014_v28, 2  ;;  %v3045_v40 = vsel %vm241_vm0, %v2947_v63, 0.0  ;;  %v3040_v13 = vadd.f32 %v3039_v62, %v2946_v36 }
 0x292   : > { %v3009_v61 = vrot.slane %v3008_v59, 2  ;;  %v3034_v0 = vadd.f32 %v3033_v4, %v3032_v58  ;;  %v3003_v33 = vadd.f32 %v3002_v7, %v3001_v15  ;;  %v3022_v41 = vrot.slane %v3021_v54, 2 }
 0x293   : > { %v3028_v46 = vrot.slane %v3027_v53, 2  ;;  %v3016_v37 = vadd.f32 %v3015_v30, %v3014_v28  ;;  %v3046_v38 = vrot.slane %v3045_v40, 4  ;;  %v3041_v34 = vrot.slane %v3040_v13, 2 }
 0x294   : > { %v3010_v50 = vadd.f32 %v3009_v61, %v3008_v59  ;;  %v3035_v51 = vrot.slane %v3034_v0, 2  ;;  %v3004_v18 = vrot.slane %v3003_v33, 1  ;;  %v3023_v43 = vadd.f32 %v3022_v41, %v3021_v54 }
 0x295   : > { %v3029_v22 = vadd.f32 %v3028_v46, %v3027_v53  ;;  %v3017_v20 = vrot.slane %v3016_v37, 1  ;;  %v3047_v47 = vadd.f32 %v3046_v38, %v3045_v40  ;;  %v2986_v6 = vadd.f32 %v2985_v12, %v2984_v55 }
 0x296   : > { %v3011_v45 = vrot.slane %v3010_v50, 1  ;;  %v3036_v39 = vadd.f32 %v3035_v51, %v3034_v0  ;;  %v2992_v58 = vadd.f32 %v2991_v48, %v2990_v9  ;;  %v3042_v63 = vadd.f32 %v3041_v34, %v3040_v13 }
 0x297   : > { %v3030_v4 = vrot.slane %v3029_v22, 1  ;;  %v2999_v15 = vadd.f32 %v2998_v10, %v2997_v21  ;;  %v3005_v7 = vadd.f32 %v3004_v18, %v3003_v33  ;;  %v3024_v27 = vrot.slane %v3023_v43, 1 }
 0x298   : > { %v3048_v36 = vrot.slane %v3047_v47, 2  ;;  %v3012_v59 = vadd.f32 %v3011_v45, %v3010_v50  ;;  %v3018_v28 = vadd.f32 %v3017_v20, %v3016_v37  ;;  %v3037_v62 = vrot.slane %v3036_v39, 1 }
 0x299   : > { %v3068_v61 = vsel %vm356_vm1, %v2966_v14, %v2953_v29  ;;  %v3043_v54 = vrot.slane %v3042_v63, 1  ;;  %v3075_v0 = vsel %vm356_vm1, %v2973_v60, %v2960_v52  ;;  %v7011_v55 = vadd.f32 %v6893_v25, %v6757_v24 }
 0x29a   : > { %v3049_v53 = vadd.f32 %v3048_v36, %v3047_v47  ;;  %v3069_v30 = vsel %vm358_vm2, %v2979_v19, %v3068_v61  ;;  %v3031_v9 = vadd.f32 %v3030_v4, %v3029_v22  ;;  %v3076_v48 = vsel %vm358_vm2, %v2986_v6, %v3075_v0 }
 0x29b   : > { %v3070_v12 = vsel %vm360_vm3, %v2992_v58, %v3069_v30  ;;  %v3025_v21 = vadd.f32 %v3024_v27, %v3023_v43  ;;  %v3077_v29 = vsel %vm360_vm3, %v2999_v15, %v3076_v48  ;;  %v7019_v47 = vadd.f32 %v6917_v44, %v6765_v3 }
 0x29c   : > { %v3050_v37 = vrot.slane %v3049_v53, 1  ;;  %v3071_v10 = vsel %vm362_vm4, %v3005_v7, %v3070_v12  ;;  %v7023_v14 = vadd.f32 %v6920_v35, %v6769_v1  ;;  %v3078_v25 = vsel %vm362_vm4, %v3012_v59, %v3077_v29 }
 0x29d   : > { %v3072_v24 = vsel %vm364_vm5, %v3018_v28, %v3071_v10  ;;  %v7027_v22 = vadd.f32 %v3037_v62, %v3036_v39  ;;  %v7029_v27 = vadd.f32 %v3043_v54, %v3042_v63  ;;  %v3089_v6 = vmul.f32 %v6956_v5, %v2913_v57 }
 0x29e   : > { %v3090_v3 = vmul.f32 %v6967_v32, %v2914_v42  ;;  %v7037_v44 = vadd.f32 %v3050_v37, %v3049_v53  ;;  %v7040_v1 = vsel %vm366_vm6, %v3031_v9, %v3072_v24  ;;  %v3091_v35 = vmul.f32 %v6956_v5, %v2915_v56 }
 0x29f   : > { %v8399_v52 = vunpack.c.h.bf16 %v6874_v26  ;;  %v7049_v19 = vsel %vm364_vm5, %v3025_v21, %v3078_v25  ;;  %v8400_v16 = vunpack.c.l.bf16 %v6879_v23  ;;  %v8401_v42 = vunpack.c.h.bf16 %v6879_v23 }
 0x2a0   : > { %v8402_v33 = vunpack.c.l.bf16 %v6882_v49  ;;  %v8403_v56 = vunpack.c.h.bf16 %v6882_v49  ;;  %v8404_v46 = vunpack.c.l.bf16 %v6888_v2  ;;  %v8405_v50 = vunpack.c.h.bf16 %v6888_v2 }
 0x2a1   : > { %v3092_v60 = vmul.f32 %v6967_v32, %v8399_v52  ;;  %v3093_v57 = vmul.f32 %v6956_v5, %v8400_v16  ;;  %v3094_v40 = vmul.f32 %v6967_v32, %v8401_v42  ;;  %v8406_v23 = vunpack.c.l.bf16 %v6900_v31 }
 0x2a2   : > { %v3095_v41 = vmul.f32 %v6956_v5, %v8402_v33  ;;  %v3096_v26 = vmul.f32 %v6967_v32, %v8403_v56  ;;  %v7066_v13 = vmul.f32 %v6956_v5, %v8404_v46  ;;  %v3098_v51 = vmul.f32 %v6967_v32, %v8405_v50 }
 0x2a3   : > { %v7074_v38 = vmul.f32 %v6956_v5, %v8406_v23  ;;  %v8407_v18 = vunpack.c.h.bf16 %v6900_v31  ;;  %v8408_v43 = vunpack.c.l.bf16 %v6907_v11  ;;  %v8409_v45 = vunpack.c.h.bf16 %v6907_v11 }
 0x2a4   : > { %v8410_v20 = vunpack.c.l.bf16 %v6910_v17  ;;  %v3105_v58 = vrot.slane %v3089_v6, 4  ;;  %v3111_v4 = vsel %vm241_vm0, %v3090_v3, 0.0  ;;  %v3118_v31 = vrot.slane %v3091_v35, 4 }
 0x2a5   : > { %v3100_v49 = vmul.f32 %v6967_v32, %v8407_v18  ;;  %v7082_v34 = vmul.f32 %v6956_v5, %v8408_v43  ;;  %v3102_v2 = vmul.f32 %v6967_v32, %v8409_v45  ;;  %v3124_v63 = vsel %vm241_vm0, %v3092_v60, 0.0 }
 0x2a6   : > { %v7090_v39 = vmul.f32 %v6956_v5, %v8410_v20  ;;  %v3112_v15 = vrot.slane %v3111_v4, 4  ;;  %v3125_v7 = vrot.slane %v3124_v63, 4  ;;  %v3131_v36 = vrot.slane %v3093_v57, 4 }
 0x2a7   : > { %v3137_v59 = vsel %vm241_vm0, %v3094_v40, 0.0  ;;  %v3106_v28 = vadd.f32 %v3105_v58, %v3089_v6  ;;  %v3119_v11 = vadd.f32 %v3118_v31, %v3091_v35  ;;  %v3144_v61 = vrot.slane %v3095_v41, 4 }
 0x2a8   : > { %v3138_v62 = vrot.slane %v3137_v59, 4  ;;  %v3113_v54 = vadd.f32 %v3112_v15, %v3111_v4  ;;  %v3126_v53 = vadd.f32 %v3125_v7, %v3124_v63  ;;  %v3132_v30 = vadd.f32 %v3131_v36, %v3093_v57 }
 0x2a9   : > { %v3150_v5 = vsel %vm241_vm0, %v3096_v26, 0.0  ;;  %v3107_v0 = vrot.slane %v3106_v28, 2  ;;  %v3120_v9 = vrot.slane %v3119_v11, 2  ;;  %v3145_v48 = vadd.f32 %v3144_v61, %v3095_v41 }
 0x2aa   : > { %v3139_v12 = vadd.f32 %v3138_v62, %v3137_v59  ;;  %v3114_v21 = vrot.slane %v3113_v54, 2  ;;  %v3127_v37 = vrot.slane %v3126_v53, 2  ;;  %v3133_v10 = vrot.slane %v3132_v30, 2 }
 0x2ab   : > { %v3151_v29 = vrot.slane %v3150_v5, 4  ;;  %v3108_v24 = vadd.f32 %v3107_v0, %v3106_v28  ;;  %v3121_v25 = vadd.f32 %v3120_v9, %v3119_v11  ;;  %v3146_v6 = vrot.slane %v3145_v48, 2 }
 0x2ac   : > { %v3140_v3 = vrot.slane %v3139_v12, 2  ;;  %v3115_v35 = vadd.f32 %v3114_v21, %v3113_v54  ;;  %v3128_v52 = vadd.f32 %v3127_v37, %v3126_v53  ;;  %v3134_v60 = vadd.f32 %v3133_v10, %v3132_v30 }
 0x2ad   : > { %v3152_v16 = vadd.f32 %v3151_v29, %v3150_v5  ;;  %v3109_v42 = vrot.slane %v3108_v24, 1  ;;  %v3122_v57 = vrot.slane %v3121_v25, 1  ;;  %v3147_v33 = vadd.f32 %v3146_v6, %v3145_v48 }
 0x2ae   : > { %v3141_v40 = vadd.f32 %v3140_v3, %v3139_v12  ;;  %v3116_v56 = vrot.slane %v3115_v35, 1  ;;  %v3129_v26 = vrot.slane %v3128_v52, 1  ;;  %v3135_v46 = vrot.slane %v3134_v60, 1 }
 0x2af   : > { %v3153_v41 = vrot.slane %v3152_v16, 2  ;;  %v8411_v50 = vunpack.c.h.bf16 %v6910_v17  ;;  %v3110_v18 = vadd.f32 %v3109_v42, %v3108_v24  ;;  %v3148_v45 = vrot.slane %v3147_v33, 1 }
 0x2b0   : > { %v3142_v43 = vrot.slane %v3141_v40, 1  ;;  %v3117_v20 = vadd.f32 %v3116_v56, %v3115_v35  ;;  %v3123_v58 = vadd.f32 %v3122_v57, %v3121_v25  ;;  %v3130_v4 = vadd.f32 %v3129_v26, %v3128_v52 }
 0x2b1   : > { %v3104_v23 = vmul.f32 %v6967_v32, %v8411_v50  ;;  %v3154_v31 = vadd.f32 %v3153_v41, %v3152_v16  ;;  %v3136_v63 = vadd.f32 %v3135_v46, %v3134_v60  ;;  %v3157_v7 = vrot.slane %v7066_v13, 4 }
 0x2b2   : > { %v3143_v15 = vadd.f32 %v3142_v43, %v3141_v40  ;;  %v3163_v36 = vsel %vm241_vm0, %v3098_v51, 0.0  ;;  %v3149_v59 = vadd.f32 %v3148_v45, %v3147_v33  ;;  %v3170_v11 = vrot.slane %v7074_v38, 4 }
 0x2b3   : > { %v3164_v28 = vrot.slane %v3163_v36, 4  ;;  %v3176_v17 = vsel %vm241_vm0, %v3100_v49, 0.0  ;;  %v3158_v32 = vadd.f32 %v3157_v7, %v7066_v13  ;;  %v3183_v61 = vrot.slane %v7082_v34, 4 }
 0x2b4   : > { %v3177_v62 = vrot.slane %v3176_v17, 4  ;;  %v3189_v54 = vsel %vm241_vm0, %v3102_v2, 0.0  ;;  %v3155_v53 = vrot.slane %v3154_v31, 1  ;;  %v3171_v5 = vadd.f32 %v3170_v11, %v7074_v38 }
 0x2b5   : > { %v3165_v30 = vadd.f32 %v3164_v28, %v3163_v36  ;;  %v3190_v0 = vrot.slane %v3189_v54, 4  ;;  %v3159_v9 = vrot.slane %v3158_v32, 2  ;;  %v3184_v12 = vadd.f32 %v3183_v61, %v7082_v34 }
 0x2b6   : > { %v3178_v51 = vadd.f32 %v3177_v62, %v3176_v17  ;;  %v3196_v48 = vrot.slane %v7090_v39, 4  ;;  %v3172_v49 = vrot.slane %v3171_v5, 2  ;;  %v3202_v13 = vsel %vm241_vm0, %v3104_v23, 0.0 }
 0x2b7   : > { %v3166_v21 = vrot.slane %v3165_v30, 2  ;;  %v3191_v37 = vadd.f32 %v3190_v0, %v3189_v54  ;;  %v3160_v10 = vadd.f32 %v3159_v9, %v3158_v32  ;;  %v3185_v24 = vrot.slane %v3184_v12, 2  ;;  %v7115_v32 = vld [vmem:[%s4850_s27 + $0x48] sm:$0xff] }
 0x2b8   : > { %v3179_v29 = vrot.slane %v3178_v51, 2  ;;  %v3197_v2 = vadd.f32 %v3196_v48, %v7090_v39  ;;  %v3173_v3 = vadd.f32 %v3172_v49, %v3171_v5  ;;  %v3203_v6 = vrot.slane %v3202_v13, 4  ;;  %v7142_v9 = vld [vmem:[%s4850_s27 + $0x1e8] sm:$0xff]  ;;  %v7154_v49 = vld [vmem:[%s4850_s27 + $0x250] sm:$0xff] }
 0x2b9   : > { %v3167_v25 = vadd.f32 %v3166_v21, %v3165_v30  ;;  %v3192_v38 = vrot.slane %v3191_v37, 2  ;;  %v3161_v35 = vrot.slane %v3160_v10, 1  ;;  %v3186_v60 = vadd.f32 %v3185_v24, %v3184_v12 }
 0x2ba   : > { %v3180_v52 = vadd.f32 %v3179_v29, %v3178_v51  ;;  %v3198_v34 = vrot.slane %v3197_v2, 2  ;;  %v3174_v42 = vrot.slane %v3173_v3, 1  ;;  %v3204_v40 = vadd.f32 %v3203_v6, %v3202_v13  ;;  %v3267_v13 = vld [vmem:[%s8142_s0 + $0x48] sm:$0xff]  ;;  %v7164_v29 = vld [vmem:[%s4850_s27 + $0x320] sm:$0xff] }
 0x2bb   : > { %v3168_v16 = vrot.slane %v3167_v25, 1  ;;  %v3193_v57 = vadd.f32 %v3192_v38, %v3191_v37  ;;  %v3156_v33 = vadd.f32 %v3155_v53, %v3154_v31  ;;  %v3187_v26 = vrot.slane %v3186_v60, 1 }
 0x2bc   : > { %v3181_v56 = vrot.slane %v3180_v52, 1  ;;  %v3199_v46 = vadd.f32 %v3198_v34, %v3197_v2  ;;  %v3162_v41 = vadd.f32 %v3161_v35, %v3160_v10  ;;  %v3205_v23 = vrot.slane %v3204_v40, 2  ;;  %v7161_v10 = vld [vmem:[%s4850_s27 + $0x2b8] sm:$0xff] }
 0x2bd   : > { %v3169_v50 = vadd.f32 %v3168_v16, %v3167_v25  ;;  %v3194_v39 = vrot.slane %v3193_v57, 1  ;;  %v3175_v43 = vadd.f32 %v3174_v42, %v3173_v3  ;;  %v3225_v36 = vsel %vm356_vm1, %v3123_v58, %v3110_v18  ;;  %v4732_v16 = vld [vmem:[%s8142_s0 + $0xb0] sm:$0xff] }
 0x2be   : > { %v3182_v45 = vadd.f32 %v3181_v56, %v3180_v52  ;;  %v3200_v7 = vrot.slane %v3199_v46, 1  ;;  %v3188_v28 = vadd.f32 %v3187_v26, %v3186_v60  ;;  %v3206_v11 = vadd.f32 %v3205_v23, %v3204_v40 }
 0x2bf   : > { %v3226_v17 = vsel %vm358_vm2, %v3136_v63, %v3225_v36  ;;  %v3232_v31 = vsel %vm356_vm1, %v3130_v4, %v3117_v20  ;;  %v3074_v62 = vsel %vm368_vm7, %v7029_v27, %v7040_v1  ;;  %v3195_v61 = vadd.f32 %v3194_v39, %v3193_v57  ;;  %v7128_v4 = vld [vmem:[%s4850_s27 + $0xb0] sm:$0xff] }
 0x2c0   : > { %v3227_v54 = vsel %vm360_vm3, %v3149_v59, %v3226_v17  ;;  %v3233_v18 = vsel %vm358_vm2, %v3143_v15, %v3232_v31  ;;  %v3080_v58 = vsel %vm366_vm6, %v7027_v22, %v7049_v19  ;;  %v3207_v63 = vrot.slane %v3206_v11, 1  ;;  %v7133_v15 = vld [vmem:[%s4850_s27 + $0x118] sm:$0xff]  ;;  %v7136_v59 = vld [vmem:[%s4850_s27 + $0x180] sm:$0xff] }
 0x2c1   : > { %v3228_v53 = vsel %vm362_vm4, %v3162_v41, %v3227_v54  ;;  %v3234_v20 = vsel %vm360_vm3, %v3156_v33, %v3233_v18  ;;  %v3201_v30 = vadd.f32 %v3200_v7, %v3199_v46  ;;  %v3251_v22 = vunpack.c.l.bf16 %v7115_v32 }
 0x2c2   : > { %v3229_v27 = vsel %vm364_vm5, %v3175_v43, %v3228_v53  ;;  %v3235_v1 = vsel %vm362_vm4, %v3169_v50, %v3234_v20  ;;  %v3208_v19 = vadd.f32 %v3207_v63, %v3206_v11  ;;  %v3252_v51 = vunpack.c.h.bf16 %v7115_v32 }
 0x2c3   : > { %v3230_v5 = vsel %vm366_vm6, %v3188_v28, %v3229_v27  ;;  %v3236_v0 = vsel %vm364_vm5, %v3182_v45, %v3235_v1  ;;  %v7147_v12 = vsel %vm368_vm7, %v7037_v44, %v3080_v58  ;;  %v7150_v48 = vadd.f32 %v3074_v62, %v6896_v8 }
 0x2c4   : > { %v3237_v21 = vsel %vm366_vm6, %v3195_v61, %v3236_v0  ;;  %v3253_v37 = vunpack.c.l.bf16 %v7128_v4  ;;  %v8265_v44 = vunpack.c.h.bf16 %v7128_v4  ;;  %v8264_v24 = vunpack.c.l.bf16 %v7133_v15 }
 0x2c5   : > { %v8260_v8 = vunpack.c.h.bf16 %v7133_v15  ;;  %v8259_v2 = vunpack.c.l.bf16 %v7136_v59  ;;  %v7171_v25 = vsel %vm368_vm7, %v3201_v30, %v3230_v5  ;;  %v7174_v3 = vsel %vm368_vm7, %v3208_v19, %v3237_v21 }
 0x2c6   : > { %v8258_v38 = vunpack.c.h.bf16 %v7136_v59  ;;  %v8257_v6 = vunpack.c.l.bf16 %v7142_v9  ;;  %v8256_v35 = vunpack.c.h.bf16 %v7142_v9  ;;  %v8255_v52 = vunpack.c.l.bf16 %v7154_v49 }
 0x2c7   : > { %v7180_v60 = vunpack.c.l.bf16 %v3267_v13  ;;  %v7182_v34 = vunpack.c.h.bf16 %v3267_v13  ;;  %v8254_v42 = vunpack.c.h.bf16 %v7154_v49  ;;  %v8253_v57 = vunpack.c.l.bf16 %v7161_v10 }
 0x2c8   : > { %v8263_v40 = vunpack.c.h.bf16 %v7161_v10  ;;  %v8262_v33 = vunpack.c.l.bf16 %v7164_v29  ;;  %v8261_v50 = vunpack.c.h.bf16 %v7164_v29  ;;  %v7210_v43 = vunpack.c.l.bf16 %v4732_v16 }
 0x2c9   : > { %v3270_v56 = vmul.f32 %v7180_v60, %v3251_v22  ;;  %v3271_v26 = vmul.f32 %v7182_v34, %v3252_v51  ;;  %v3272_v46 = vmul.f32 %v7180_v60, %v3253_v37  ;;  %v3273_v41 = vmul.f32 %v7182_v34, %v8265_v44 }
 0x2ca   : > { %v3274_v39 = vmul.f32 %v7180_v60, %v8264_v24  ;;  %v3275_v23 = vmul.f32 %v7182_v34, %v8260_v8  ;;  %v3276_v45 = vmul.f32 %v7180_v60, %v8259_v2  ;;  %v3277_v7 = vmul.f32 %v7182_v34, %v8258_v38 }
 0x2cb   : > { %v3278_v36 = vmul.f32 %v7180_v60, %v8257_v6  ;;  %v7221_v28 = vunpack.c.h.bf16 %v4732_v16  ;;  %v3279_v11 = vmul.f32 %v7182_v34, %v8256_v35  ;;  %v7229_v17 = vmul.f32 %v7180_v60, %v8255_v52 }
 0x2cc   : > { %v3281_v31 = vmul.f32 %v7182_v34, %v8254_v42  ;;  %v7237_v62 = vmul.f32 %v7180_v60, %v8253_v57  ;;  %v3286_v61 = vrot.slane %v3270_v56, 4  ;;  %v3292_v54 = vsel %vm241_vm0, %v3271_v26, 0.0 }
 0x2cd   : > { %v3299_v18 = vrot.slane %v3272_v46, 4  ;;  %v3305_v58 = vsel %vm241_vm0, %v3273_v41, 0.0  ;;  %v3293_v63 = vrot.slane %v3292_v54, 4  ;;  %v3312_v20 = vrot.slane %v3274_v39, 4 }
 0x2ce   : > { %v3306_v53 = vrot.slane %v3305_v58, 4  ;;  %v3318_v30 = vsel %vm241_vm0, %v3275_v23, 0.0  ;;  %v3287_v27 = vadd.f32 %v3286_v61, %v3270_v56  ;;  %v3325_v5 = vrot.slane %v3276_v45, 4 }
 0x2cf   : > { %v3300_v1 = vadd.f32 %v3299_v18, %v3272_v46  ;;  %v3319_v19 = vrot.slane %v3318_v30, 4  ;;  %v3294_v0 = vadd.f32 %v3293_v63, %v3292_v54  ;;  %v3313_v13 = vadd.f32 %v3312_v20, %v3274_v39 }
 0x2d0   : > { %v3307_v21 = vadd.f32 %v3306_v53, %v3305_v58  ;;  %v3331_v16 = vsel %vm241_vm0, %v3277_v7, 0.0  ;;  %v3288_v57 = vrot.slane %v3287_v27, 2  ;;  %v3326_v52 = vadd.f32 %v3325_v5, %v3276_v45 }
 0x2d1   : > { %v3301_v42 = vrot.slane %v3300_v1, 2  ;;  %v3320_v26 = vadd.f32 %v3319_v19, %v3318_v30  ;;  %v3295_v35 = vrot.slane %v3294_v0, 2  ;;  %v3314_v6 = vrot.slane %v3313_v13, 2 }
 0x2d2   : > { %v3308_v41 = vrot.slane %v3307_v21, 2  ;;  %v3332_v38 = vrot.slane %v3331_v16, 4  ;;  %v3289_v2 = vadd.f32 %v3288_v57, %v3287_v27  ;;  %v3327_v56 = vrot.slane %v3326_v52, 2 }
 0x2d3   : > { %v3302_v8 = vadd.f32 %v3301_v42, %v3300_v1  ;;  %v3321_v23 = vrot.slane %v3320_v26, 2  ;;  %v3296_v46 = vadd.f32 %v3295_v35, %v3294_v0  ;;  %v3315_v18 = vadd.f32 %v3314_v6, %v3313_v13 }
 0x2d4   : > { %v3309_v61 = vadd.f32 %v3308_v41, %v3307_v21  ;;  %v3333_v54 = vadd.f32 %v3332_v38, %v3331_v16  ;;  %v3290_v58 = vrot.slane %v3289_v2, 1  ;;  %v3328_v7 = vadd.f32 %v3327_v56, %v3326_v52 }
 0x2d5   : > { %v3303_v39 = vrot.slane %v3302_v8, 1  ;;  %v3322_v63 = vadd.f32 %v3321_v23, %v3320_v26  ;;  %v3297_v53 = vrot.slane %v3296_v46, 1  ;;  %v3316_v30 = vrot.slane %v3315_v18, 1 }
 0x2d6   : > { %v3310_v20 = vrot.slane %v3309_v61, 1  ;;  %v3334_v45 = vrot.slane %v3333_v54, 2  ;;  %v3283_v19 = vmul.f32 %v7182_v34, %v8263_v40  ;;  %v3284_v42 = vmul.f32 %v7180_v60, %v8262_v33 }
 0x2d7   : > { %v3285_v38 = vmul.f32 %v7182_v34, %v8261_v50  ;;  %v3291_v6 = vadd.f32 %v3290_v58, %v3289_v2  ;;  %v3304_v35 = vadd.f32 %v3303_v39, %v3302_v8  ;;  %v3323_v57 = vrot.slane %v3322_v63, 1 }
 0x2d8   : > { %v3329_v52 = vrot.slane %v3328_v7, 1  ;;  %v3335_v27 = vadd.f32 %v3334_v45, %v3333_v54  ;;  %v3298_v1 = vadd.f32 %v3297_v53, %v3296_v46  ;;  %v3311_v5 = vadd.f32 %v3310_v20, %v3309_v61 }
 0x2d9   : > { %v3338_v0 = vrot.slane %v3278_v36, 4  ;;  %v3344_v21 = vsel %vm241_vm0, %v3279_v11, 0.0  ;;  %v3317_v13 = vadd.f32 %v3316_v30, %v3315_v18  ;;  %v3351_v26 = vrot.slane %v7229_v17, 4 }
 0x2da   : > { %v3345_v16 = vrot.slane %v3344_v21, 4  ;;  %v3357_v60 = vsel %vm241_vm0, %v3281_v31, 0.0  ;;  %v3364_v34 = vrot.slane %v7237_v62, 4  ;;  %v3370_v8 = vsel %vm241_vm0, %v3283_v19, 0.0 }
 0x2db   : > { %v3339_v41 = vadd.f32 %v3338_v0, %v3278_v36  ;;  %v3358_v23 = vrot.slane %v3357_v60, 4  ;;  %v3336_v2 = vrot.slane %v3335_v27, 1  ;;  %v3352_v46 = vadd.f32 %v3351_v26, %v7229_v17 }
 0x2dc   : > { %v3346_v56 = vadd.f32 %v3345_v16, %v3344_v21  ;;  %v3371_v61 = vrot.slane %v3370_v8, 4  ;;  %v3365_v11 = vadd.f32 %v3364_v34, %v7237_v62  ;;  %v3377_v18 = vrot.slane %v3284_v42, 4 }
 0x2dd   : > { %v3340_v54 = vrot.slane %v3339_v41, 2  ;;  %v3359_v58 = vadd.f32 %v3358_v23, %v3357_v60  ;;  %v3353_v53 = vrot.slane %v3352_v46, 2  ;;  %v3383_v36 = vsel %vm241_vm0, %v3285_v38, 0.0 }
 0x2de   : > { %v3347_v39 = vrot.slane %v3346_v56, 2  ;;  %v3372_v20 = vadd.f32 %v3371_v61, %v3370_v8  ;;  %v3366_v45 = vrot.slane %v3365_v11, 2  ;;  %v3378_v0 = vadd.f32 %v3377_v18, %v3284_v42 }
 0x2df   : > { %v3341_v31 = vadd.f32 %v3340_v54, %v3339_v41  ;;  %v3360_v30 = vrot.slane %v3359_v58, 2  ;;  %v3354_v50 = vadd.f32 %v3353_v53, %v3352_v46  ;;  %v3384_v16 = vrot.slane %v3383_v36, 4 }
 0x2e0   : > { %v3348_v19 = vadd.f32 %v3347_v39, %v3346_v56  ;;  %v3373_v21 = vrot.slane %v3372_v20, 2  ;;  %v3367_v33 = vadd.f32 %v3366_v45, %v3365_v11  ;;  %v3379_v60 = vrot.slane %v3378_v0, 2 }
 0x2e1   : > { %v3342_v17 = vrot.slane %v3341_v31, 1  ;;  %v3361_v26 = vadd.f32 %v3360_v30, %v3359_v58  ;;  %v3355_v62 = vrot.slane %v3354_v50, 1  ;;  %v3385_v40 = vadd.f32 %v3384_v16, %v3383_v36 }
 0x2e2   : > { %v3349_v23 = vrot.slane %v3348_v19, 1  ;;  %v3374_v34 = vadd.f32 %v3373_v21, %v3372_v20  ;;  %v3324_v24 = vadd.f32 %v3323_v57, %v3322_v63  ;;  %v3330_v8 = vadd.f32 %v3329_v52, %v3328_v7 }
 0x2e3   : > { %v3368_v61 = vrot.slane %v3367_v33, 1  ;;  %v3380_v38 = vadd.f32 %v3379_v60, %v3378_v0  ;;  %v3337_v41 = vadd.f32 %v3336_v2, %v3335_v27  ;;  %v3343_v54 = vadd.f32 %v3342_v17, %v3341_v31 }
 0x2e4   : > { %v3362_v44 = vrot.slane %v3361_v26, 1  ;;  %v3386_v42 = vrot.slane %v3385_v40, 2  ;;  %v3350_v56 = vadd.f32 %v3349_v23, %v3348_v19  ;;  %v3356_v46 = vadd.f32 %v3355_v62, %v3354_v50 }
 0x2e5   : > { %v3375_v18 = vrot.slane %v3374_v34, 1  ;;  %v3406_v39 = vsel %vm356_vm1, %v3304_v35, %v3291_v6  ;;  %v3381_v58 = vrot.slane %v3380_v38, 1  ;;  %v3413_v20 = vsel %vm356_vm1, %v3311_v5, %v3298_v1 }
 0x2e6   : > { %v3387_v11 = vadd.f32 %v3386_v42, %v3385_v40  ;;  %v3407_v53 = vsel %vm358_vm2, %v3317_v13, %v3406_v39  ;;  %v7265_v63 = vadd.f32 %v7147_v12, %v7011_v55  ;;  %v3369_v7 = vadd.f32 %v3368_v61, %v3367_v33 }
 0x2e7   : > { %v3408_v57 = vsel %vm360_vm3, %v3330_v8, %v3407_v53  ;;  %v3414_v52 = vsel %vm358_vm2, %v3324_v24, %v3413_v20  ;;  %v3363_v27 = vadd.f32 %v3362_v44, %v3361_v26  ;;  %v7273_v40 = vadd.f32 %v7171_v25, %v7019_v47 }
 0x2e8   : > { %v3388_v50 = vrot.slane %v3387_v11, 1  ;;  %v3409_v2 = vsel %vm362_vm4, %v3343_v54, %v3408_v57  ;;  %v3415_v6 = vsel %vm360_vm3, %v3337_v41, %v3414_v52  ;;  %v7277_v35 = vadd.f32 %v7174_v3, %v7023_v14 }
 0x2e9   : > { %v3410_v55 = vsel %vm364_vm5, %v3356_v46, %v3409_v2  ;;  %v3416_v12 = vsel %vm362_vm4, %v3350_v56, %v3415_v6  ;;  %v7281_v33 = vadd.f32 %v3375_v18, %v3374_v34  ;;  %v7283_v44 = vadd.f32 %v3381_v58, %v3380_v38 }
 0x2ea   : > { %v3427_v24 = vmul.f32 %v7210_v43, %v3251_v22  ;;  %v3428_v47 = vmul.f32 %v7221_v28, %v3252_v51  ;;  %v7291_v25 = vadd.f32 %v3388_v50, %v3387_v11  ;;  %v7294_v14 = vsel %vm366_vm6, %v3369_v7, %v3410_v55 }
 0x2eb   : > { %v3429_v3 = vmul.f32 %v7210_v43, %v3253_v37  ;;  %v8412_v1 = vunpack.c.h.bf16 %v7128_v4  ;;  %v7303_v13 = vsel %vm364_vm5, %v3363_v27, %v3416_v12  ;;  %v8413_v32 = vunpack.c.l.bf16 %v7133_v15 }
 0x2ec   : > { %v8414_v51 = vunpack.c.h.bf16 %v7133_v15  ;;  %v8415_v31 = vunpack.c.l.bf16 %v7136_v59  ;;  %v8416_v37 = vunpack.c.h.bf16 %v7136_v59  ;;  %v8417_v45 = vunpack.c.l.bf16 %v7142_v9 }
 0x2ed   : > { %v3430_v5 = vmul.f32 %v7221_v28, %v8412_v1  ;;  %v3431_v22 = vmul.f32 %v7210_v43, %v8413_v32  ;;  %v8418_v19 = vunpack.c.h.bf16 %v7142_v9  ;;  %v8419_v15 = vunpack.c.l.bf16 %v7154_v49 }
 0x2ee   : > { %v3432_v36 = vmul.f32 %v7221_v28, %v8414_v51  ;;  %v3433_v30 = vmul.f32 %v7210_v43, %v8415_v31  ;;  %v3434_v4 = vmul.f32 %v7221_v28, %v8416_v37  ;;  %v7320_v0 = vmul.f32 %v7210_v43, %v8417_v45 }
 0x2ef   : > { %v3436_v21 = vmul.f32 %v7221_v28, %v8418_v19  ;;  %v7328_v16 = vmul.f32 %v7210_v43, %v8419_v15  ;;  %v8420_v17 = vunpack.c.h.bf16 %v7154_v49  ;;  %v8421_v26 = vunpack.c.l.bf16 %v7161_v10 }
 0x2f0   : > { %v8422_v23 = vunpack.c.h.bf16 %v7161_v10  ;;  %v8423_v62 = vunpack.c.l.bf16 %v7164_v29  ;;  %v3443_v8 = vrot.slane %v3427_v24, 4  ;;  %v3449_v61 = vsel %vm241_vm0, %v3428_v47, 0.0 }
 0x2f1   : > { %v3438_v59 = vmul.f32 %v7221_v28, %v8420_v17  ;;  %v7336_v60 = vmul.f32 %v7210_v43, %v8421_v26  ;;  %v3456_v49 = vrot.slane %v3429_v3, 4  ;;  %v3462_v38 = vsel %vm241_vm0, %v3430_v5, 0.0 }
 0x2f2   : > { %v3440_v9 = vmul.f32 %v7221_v28, %v8422_v23  ;;  %v7344_v34 = vmul.f32 %v7210_v43, %v8423_v62  ;;  %v3450_v41 = vrot.slane %v3449_v61, 4  ;;  %v3463_v54 = vrot.slane %v3462_v38, 4 }
 0x2f3   : > { %v3469_v42 = vrot.slane %v3431_v22, 4  ;;  %v3475_v56 = vsel %vm241_vm0, %v3432_v36, 0.0  ;;  %v3444_v46 = vadd.f32 %v3443_v8, %v3427_v24  ;;  %v3457_v10 = vadd.f32 %v3456_v49, %v3429_v3 }
 0x2f4   : > { %v3476_v18 = vrot.slane %v3475_v56, 4  ;;  %v3482_v39 = vrot.slane %v3433_v30, 4  ;;  %v3451_v58 = vadd.f32 %v3450_v41, %v3449_v61  ;;  %v3464_v11 = vadd.f32 %v3463_v54, %v3462_v38 }
 0x2f5   : > { %v3470_v53 = vadd.f32 %v3469_v42, %v3431_v22  ;;  %v3488_v43 = vsel %vm241_vm0, %v3434_v4, 0.0  ;;  %v3445_v20 = vrot.slane %v3444_v46, 2  ;;  %v3458_v7 = vrot.slane %v3457_v10, 2 }
 0x2f6   : > { %v3477_v57 = vadd.f32 %v3476_v18, %v3475_v56  ;;  %v3483_v52 = vadd.f32 %v3482_v39, %v3433_v30  ;;  %v3452_v27 = vrot.slane %v3451_v58, 2  ;;  %v3465_v50 = vrot.slane %v3464_v11, 2 }
 0x2f7   : > { %v3471_v2 = vrot.slane %v3470_v53, 2  ;;  %v3489_v6 = vrot.slane %v3488_v43, 4  ;;  %v3446_v55 = vadd.f32 %v3445_v20, %v3444_v46  ;;  %v3459_v12 = vadd.f32 %v3458_v7, %v3457_v10 }
 0x2f8   : > { %v3478_v47 = vrot.slane %v3477_v57, 2  ;;  %v3484_v24 = vrot.slane %v3483_v52, 2  ;;  %v3453_v3 = vadd.f32 %v3452_v27, %v3451_v58  ;;  %v3466_v1 = vadd.f32 %v3465_v50, %v3464_v11 }
 0x2f9   : > { %v3472_v5 = vadd.f32 %v3471_v2, %v3470_v53  ;;  %v3490_v32 = vadd.f32 %v3489_v6, %v3488_v43  ;;  %v3447_v51 = vrot.slane %v3446_v55, 1  ;;  %v3460_v22 = vrot.slane %v3459_v12, 1 }
 0x2fa   : > { %v3479_v36 = vadd.f32 %v3478_v47, %v3477_v57  ;;  %v3485_v31 = vadd.f32 %v3484_v24, %v3483_v52  ;;  %v3454_v37 = vrot.slane %v3453_v3, 1  ;;  %v3467_v4 = vrot.slane %v3466_v1, 1 }
 0x2fb   : > { %v3473_v45 = vrot.slane %v3472_v5, 1  ;;  %v3491_v30 = vrot.slane %v3490_v32, 2  ;;  %v8424_v19 = vunpack.c.h.bf16 %v7164_v29  ;;  %v3448_v17 = vadd.f32 %v3447_v51, %v3446_v55 }
 0x2fc   : > { %v3480_v26 = vrot.slane %v3479_v36, 1  ;;  %v3486_v23 = vrot.slane %v3485_v31, 1  ;;  %v3455_v62 = vadd.f32 %v3454_v37, %v3453_v3  ;;  %v3461_v8 = vadd.f32 %v3460_v22, %v3459_v12 }
 0x2fd   : > { %v3442_v15 = vmul.f32 %v7221_v28, %v8424_v19  ;;  %v3468_v61 = vadd.f32 %v3467_v4, %v3466_v1  ;;  %v3492_v49 = vadd.f32 %v3491_v30, %v3490_v32  ;;  %v3474_v38 = vadd.f32 %v3473_v45, %v3472_v5 }
 0x2fe   : > { %v3481_v41 = vadd.f32 %v3480_v26, %v3479_v36  ;;  %v3495_v54 = vrot.slane %v7320_v0, 4  ;;  %v3501_v42 = vsel %vm241_vm0, %v3436_v21, 0.0  ;;  %v3487_v56 = vadd.f32 %v3486_v23, %v3485_v31 }
 0x2ff   : > { %v3502_v46 = vrot.slane %v3501_v42, 4  ;;  %v3508_v10 = vrot.slane %v7328_v16, 4  ;;  %v3514_v29 = vsel %vm241_vm0, %v3438_v59, 0.0  ;;  %v3521_v39 = vrot.slane %v7336_v60, 4 }
 0x300   : > { %v3496_v28 = vadd.f32 %v3495_v54, %v7320_v0  ;;  %v3515_v18 = vrot.slane %v3514_v29, 4  ;;  %v3527_v58 = vsel %vm241_vm0, %v3440_v9, 0.0  ;;  %v3493_v11 = vrot.slane %v3492_v49, 1 }
 0x301   : > { %v3503_v53 = vadd.f32 %v3502_v46, %v3501_v42  ;;  %v3509_v43 = vadd.f32 %v3508_v10, %v7328_v16  ;;  %v3528_v20 = vrot.slane %v3527_v58, 4  ;;  %v3522_v57 = vadd.f32 %v3521_v39, %v7336_v60 }
 0x302   : > { %v3497_v7 = vrot.slane %v3496_v28, 2  ;;  %v3516_v21 = vadd.f32 %v3515_v18, %v3514_v29  ;;  %v3534_v52 = vrot.slane %v7344_v34, 4  ;;  %v3540_v0 = vsel %vm241_vm0, %v3442_v15, 0.0 }
 0x303   : > { %v3504_v27 = vrot.slane %v3503_v53, 2  ;;  %v3510_v59 = vrot.slane %v3509_v43, 2  ;;  %v3529_v50 = vadd.f32 %v3528_v20, %v3527_v58  ;;  %v3523_v55 = vrot.slane %v3522_v57, 2 }
 0x304   : > { %v3498_v2 = vadd.f32 %v3497_v7, %v3496_v28  ;;  %v3517_v6 = vrot.slane %v3516_v21, 2  ;;  %v3535_v9 = vadd.f32 %v3534_v52, %v7344_v34  ;;  %v3541_v24 = vrot.slane %v3540_v0, 4  ;;  %v7369_v28 = vld [vmem:[%s4850_s27 + $0x50] sm:$0xff] }
 0x305   : > { %v3505_v12 = vadd.f32 %v3504_v27, %v3503_v53  ;;  %v3511_v47 = vadd.f32 %v3510_v59, %v3509_v43  ;;  %v3530_v16 = vrot.slane %v3529_v50, 2  ;;  %v3524_v5 = vadd.f32 %v3523_v55, %v3522_v57  ;;  %v7396_v7 = vld [vmem:[%s4850_s27 + $0x1f0] sm:$0xff]  ;;  %v7408_v59 = vld [vmem:[%s4850_s27 + $0x258] sm:$0xff] }
 0x306   : > { %v3499_v3 = vrot.slane %v3498_v2, 1  ;;  %v3518_v1 = vadd.f32 %v3517_v6, %v3516_v21  ;;  %v3536_v60 = vrot.slane %v3535_v9, 2  ;;  %v3542_v36 = vadd.f32 %v3541_v24, %v3540_v0  ;;  %v3605_v0 = vld [vmem:[%s8142_s0 + $0x50] sm:$0xff]  ;;  %v7418_v6 = vld [vmem:[%s4850_s27 + $0x328] sm:$0xff] }
 0x307   : > { %v3506_v32 = vrot.slane %v3505_v12, 1  ;;  %v3512_v51 = vrot.slane %v3511_v47, 1  ;;  %v3531_v22 = vadd.f32 %v3530_v16, %v3529_v50  ;;  %v3494_v31 = vadd.f32 %v3493_v11, %v3492_v49 }
 0x308   : > { %v3519_v37 = vrot.slane %v3518_v1, 1  ;;  %v3525_v4 = vrot.slane %v3524_v5, 1  ;;  %v3537_v45 = vadd.f32 %v3536_v60, %v3535_v9  ;;  %v3500_v30 = vadd.f32 %v3499_v3, %v3498_v2  ;;  %v7415_v2 = vld [vmem:[%s4850_s27 + $0x2c0] sm:$0xff] }
 0x309   : > { %v3507_v19 = vadd.f32 %v3506_v32, %v3505_v12  ;;  %v3532_v34 = vrot.slane %v3531_v22, 1  ;;  %v3543_v15 = vrot.slane %v3542_v36, 2  ;;  %v3513_v26 = vadd.f32 %v3512_v51, %v3511_v47  ;;  %v4733_v32 = vld [vmem:[%s8142_s0 + $0xb8] sm:$0xff] }
 0x30a   : > { %v3520_v23 = vadd.f32 %v3519_v37, %v3518_v1  ;;  %v3538_v54 = vrot.slane %v3537_v45, 1  ;;  %v3563_v42 = vsel %vm356_vm1, %v3461_v8, %v3448_v17  ;;  %v3526_v46 = vadd.f32 %v3525_v4, %v3524_v5 }
 0x30b   : > { %v3544_v10 = vadd.f32 %v3543_v15, %v3542_v36  ;;  %v3564_v29 = vsel %vm358_vm2, %v3474_v38, %v3563_v42  ;;  %v3570_v49 = vsel %vm356_vm1, %v3468_v61, %v3455_v62  ;;  %v3412_v18 = vsel %vm368_vm7, %v7283_v44, %v7294_v14  ;;  %v7382_v61 = vld [vmem:[%s4850_s27 + $0xb8] sm:$0xff] }
 0x30c   : > { %v3533_v39 = vadd.f32 %v3532_v34, %v3531_v22  ;;  %v3565_v58 = vsel %vm360_vm3, %v3487_v56, %v3564_v29  ;;  %v3571_v17 = vsel %vm358_vm2, %v3481_v41, %v3570_v49  ;;  %v3418_v8 = vsel %vm366_vm6, %v7281_v33, %v7303_v13  ;;  %v7387_v41 = vld [vmem:[%s4850_s27 + $0x120] sm:$0xff]  ;;  %v7390_v56 = vld [vmem:[%s4850_s27 + $0x188] sm:$0xff] }
 0x30d   : > { %v3545_v38 = vrot.slane %v3544_v10, 1  ;;  %v3566_v11 = vsel %vm362_vm4, %v3500_v30, %v3565_v58  ;;  %v3572_v62 = vsel %vm360_vm3, %v3494_v31, %v3571_v17  ;;  %v3539_v53 = vadd.f32 %v3538_v54, %v3537_v45 }
 0x30e   : > { %v3567_v44 = vsel %vm364_vm5, %v3513_v26, %v3566_v11  ;;  %v3573_v14 = vsel %vm362_vm4, %v3507_v19, %v3572_v62  ;;  %v3589_v33 = vunpack.c.l.bf16 %v7369_v28  ;;  %v3590_v21 = vunpack.c.h.bf16 %v7369_v28 }
 0x30f   : > { %v3546_v13 = vadd.f32 %v3545_v38, %v3544_v10  ;;  %v3568_v43 = vsel %vm366_vm6, %v3526_v46, %v3567_v44  ;;  %v3574_v20 = vsel %vm364_vm5, %v3520_v23, %v3573_v14  ;;  %v7401_v57 = vsel %vm368_vm7, %v7291_v25, %v3418_v8 }
 0x310   : > { %v7404_v52 = vadd.f32 %v3412_v18, %v7150_v48  ;;  %v3575_v27 = vsel %vm366_vm6, %v3533_v39, %v3574_v20  ;;  %v3591_v50 = vunpack.c.l.bf16 %v7382_v61  ;;  %v8278_v25 = vunpack.c.h.bf16 %v7382_v61 }
 0x311   : > { %v8277_v55 = vunpack.c.l.bf16 %v7387_v41  ;;  %v8273_v48 = vunpack.c.h.bf16 %v7387_v41  ;;  %v8272_v9 = vunpack.c.l.bf16 %v7390_v56  ;;  %v7425_v12 = vsel %vm368_vm7, %v3539_v53, %v3568_v43 }
 0x312   : > { %v7428_v47 = vsel %vm368_vm7, %v3546_v13, %v3575_v27  ;;  %v8271_v16 = vunpack.c.h.bf16 %v7390_v56  ;;  %v8270_v24 = vunpack.c.l.bf16 %v7396_v7  ;;  %v8269_v3 = vunpack.c.h.bf16 %v7396_v7 }
 0x313   : > { %v8268_v1 = vunpack.c.l.bf16 %v7408_v59  ;;  %v7434_v5 = vunpack.c.l.bf16 %v3605_v0  ;;  %v7436_v60 = vunpack.c.h.bf16 %v3605_v0  ;;  %v8267_v51 = vunpack.c.h.bf16 %v7408_v59 }
 0x314   : > { %v8266_v22 = vunpack.c.l.bf16 %v7415_v2  ;;  %v8276_v36 = vunpack.c.h.bf16 %v7415_v2  ;;  %v8275_v31 = vunpack.c.l.bf16 %v7418_v6  ;;  %v8274_v19 = vunpack.c.h.bf16 %v7418_v6 }
 0x315   : > { %v3608_v37 = vmul.f32 %v7434_v5, %v3589_v33  ;;  %v3609_v4 = vmul.f32 %v7436_v60, %v3590_v21  ;;  %v3610_v45 = vmul.f32 %v7434_v5, %v3591_v50  ;;  %v3611_v30 = vmul.f32 %v7436_v60, %v8278_v25 }
 0x316   : > { %v3612_v34 = vmul.f32 %v7434_v5, %v8277_v55  ;;  %v3613_v15 = vmul.f32 %v7436_v60, %v8273_v48  ;;  %v7464_v26 = vunpack.c.l.bf16 %v4733_v32  ;;  %v3614_v23 = vmul.f32 %v7434_v5, %v8272_v9 }
 0x317   : > { %v3615_v54 = vmul.f32 %v7436_v60, %v8271_v16  ;;  %v3616_v42 = vmul.f32 %v7434_v5, %v8270_v24  ;;  %v7475_v46 = vunpack.c.h.bf16 %v4733_v32  ;;  %v3617_v10 = vmul.f32 %v7436_v60, %v8269_v3 }
 0x318   : > { %v7483_v29 = vmul.f32 %v7434_v5, %v8268_v1  ;;  %v3619_v49 = vmul.f32 %v7436_v60, %v8267_v51  ;;  %v7491_v18 = vmul.f32 %v7434_v5, %v8266_v22  ;;  %v3624_v39 = vrot.slane %v3608_v37, 4 }
 0x319   : > { %v3630_v58 = vsel %vm241_vm0, %v3609_v4, 0.0  ;;  %v3637_v17 = vrot.slane %v3610_v45, 4  ;;  %v3643_v8 = vsel %vm241_vm0, %v3611_v30, 0.0  ;;  %v3650_v62 = vrot.slane %v3612_v34, 4 }
 0x31a   : > { %v3631_v38 = vrot.slane %v3630_v58, 4  ;;  %v3644_v11 = vrot.slane %v3643_v8, 4  ;;  %v3656_v53 = vsel %vm241_vm0, %v3613_v15, 0.0  ;;  %v3625_v44 = vadd.f32 %v3624_v39, %v3608_v37 }
 0x31b   : > { %v3638_v14 = vadd.f32 %v3637_v17, %v3610_v45  ;;  %v3657_v13 = vrot.slane %v3656_v53, 4  ;;  %v3663_v43 = vrot.slane %v3614_v23, 4  ;;  %v3651_v0 = vadd.f32 %v3650_v62, %v3612_v34 }
 0x31c   : > { %v3632_v20 = vadd.f32 %v3631_v38, %v3630_v58  ;;  %v3645_v27 = vadd.f32 %v3644_v11, %v3643_v8  ;;  %v3669_v32 = vsel %vm241_vm0, %v3615_v54, 0.0  ;;  %v3626_v22 = vrot.slane %v3625_v44, 2 }
 0x31d   : > { %v3639_v51 = vrot.slane %v3638_v14, 2  ;;  %v3658_v4 = vadd.f32 %v3657_v13, %v3656_v53  ;;  %v3664_v1 = vadd.f32 %v3663_v43, %v3614_v23  ;;  %v3652_v24 = vrot.slane %v3651_v0, 2 }
 0x31e   : > { %v3633_v3 = vrot.slane %v3632_v20, 2  ;;  %v3646_v30 = vrot.slane %v3645_v27, 2  ;;  %v3670_v16 = vrot.slane %v3669_v32, 4  ;;  %v3627_v9 = vadd.f32 %v3626_v22, %v3625_v44 }
 0x31f   : > { %v3640_v48 = vadd.f32 %v3639_v51, %v3638_v14  ;;  %v3659_v15 = vrot.slane %v3658_v4, 2  ;;  %v3665_v37 = vrot.slane %v3664_v1, 2  ;;  %v3653_v17 = vadd.f32 %v3652_v24, %v3651_v0 }
 0x320   : > { %v3634_v45 = vadd.f32 %v3633_v3, %v3632_v20  ;;  %v3647_v39 = vadd.f32 %v3646_v30, %v3645_v27  ;;  %v3671_v58 = vadd.f32 %v3670_v16, %v3669_v32  ;;  %v3628_v8 = vrot.slane %v3627_v9, 1 }
 0x321   : > { %v3641_v34 = vrot.slane %v3640_v48, 1  ;;  %v3660_v38 = vadd.f32 %v3659_v15, %v3658_v4  ;;  %v3666_v54 = vadd.f32 %v3665_v37, %v3664_v1  ;;  %v3654_v53 = vrot.slane %v3653_v17, 1 }
 0x322   : > { %v3635_v11 = vrot.slane %v3634_v45, 1  ;;  %v3648_v62 = vrot.slane %v3647_v39, 1  ;;  %v3672_v23 = vrot.slane %v3671_v58, 2  ;;  %v3621_v13 = vmul.f32 %v7436_v60, %v8276_v36 }
 0x323   : > { %v3622_v51 = vmul.f32 %v7434_v5, %v8275_v31  ;;  %v3623_v16 = vmul.f32 %v7436_v60, %v8274_v19  ;;  %v3629_v24 = vadd.f32 %v3628_v8, %v3627_v9  ;;  %v3642_v3 = vadd.f32 %v3641_v34, %v3640_v48 }
 0x324   : > { %v3661_v22 = vrot.slane %v3660_v38, 1  ;;  %v3667_v1 = vrot.slane %v3666_v54, 1  ;;  %v3673_v44 = vadd.f32 %v3672_v23, %v3671_v58  ;;  %v3636_v14 = vadd.f32 %v3635_v11, %v3634_v45 }
 0x325   : > { %v3649_v43 = vadd.f32 %v3648_v62, %v3647_v39  ;;  %v3676_v20 = vrot.slane %v3616_v42, 4  ;;  %v3682_v27 = vsel %vm241_vm0, %v3617_v10, 0.0  ;;  %v3655_v0 = vadd.f32 %v3654_v53, %v3653_v17 }
 0x326   : > { %v3683_v32 = vrot.slane %v3682_v27, 4  ;;  %v3689_v4 = vrot.slane %v7483_v29, 4  ;;  %v3695_v5 = vsel %vm241_vm0, %v3619_v49, 0.0  ;;  %v3702_v60 = vrot.slane %v7491_v18, 4 }
 0x327   : > { %v3677_v30 = vadd.f32 %v3676_v20, %v3616_v42  ;;  %v3696_v15 = vrot.slane %v3695_v5, 4  ;;  %v3708_v48 = vsel %vm241_vm0, %v3621_v13, 0.0  ;;  %v3674_v9 = vrot.slane %v3673_v44, 1 }
 0x328   : > { %v3684_v37 = vadd.f32 %v3683_v32, %v3682_v27  ;;  %v3690_v45 = vadd.f32 %v3689_v4, %v7483_v29  ;;  %v3709_v39 = vrot.slane %v3708_v48, 4  ;;  %v3703_v10 = vadd.f32 %v3702_v60, %v7491_v18 }
 0x329   : > { %v3678_v58 = vrot.slane %v3677_v30, 2  ;;  %v3697_v8 = vadd.f32 %v3696_v15, %v3695_v5  ;;  %v3715_v17 = vrot.slane %v3622_v51, 4  ;;  %v3721_v42 = vsel %vm241_vm0, %v3623_v16, 0.0 }
 0x32a   : > { %v3685_v34 = vrot.slane %v3684_v37, 2  ;;  %v3691_v11 = vrot.slane %v3690_v45, 2  ;;  %v3710_v62 = vadd.f32 %v3709_v39, %v3708_v48  ;;  %v3704_v23 = vrot.slane %v3703_v10, 2 }
 0x32b   : > { %v3679_v49 = vadd.f32 %v3678_v58, %v3677_v30  ;;  %v3698_v53 = vrot.slane %v3697_v8, 2  ;;  %v3716_v20 = vadd.f32 %v3715_v17, %v3622_v51  ;;  %v3722_v32 = vrot.slane %v3721_v42, 4 }
 0x32c   : > { %v3686_v13 = vadd.f32 %v3685_v34, %v3684_v37  ;;  %v3692_v19 = vadd.f32 %v3691_v11, %v3690_v45  ;;  %v3711_v27 = vrot.slane %v3710_v62, 2  ;;  %v3705_v31 = vadd.f32 %v3704_v23, %v3703_v10 }
 0x32d   : > { %v3680_v29 = vrot.slane %v3679_v49, 1  ;;  %v3699_v4 = vadd.f32 %v3698_v53, %v3697_v8  ;;  %v3717_v5 = vrot.slane %v3716_v20, 2  ;;  %v3723_v36 = vadd.f32 %v3722_v32, %v3721_v42 }
 0x32e   : > { %v3687_v15 = vrot.slane %v3686_v13, 1  ;;  %v3693_v18 = vrot.slane %v3692_v19, 1  ;;  %v3712_v60 = vadd.f32 %v3711_v27, %v3710_v62  ;;  %v3662_v55 = vadd.f32 %v3661_v22, %v3660_v38 }
 0x32f   : > { %v3668_v48 = vadd.f32 %v3667_v1, %v3666_v54  ;;  %v3706_v39 = vrot.slane %v3705_v31, 1  ;;  %v3718_v16 = vadd.f32 %v3717_v5, %v3716_v20  ;;  %v3675_v30 = vadd.f32 %v3674_v9, %v3673_v44 }
 0x330   : > { %v3681_v58 = vadd.f32 %v3680_v29, %v3679_v49  ;;  %v3700_v25 = vrot.slane %v3699_v4, 1  ;;  %v3724_v51 = vrot.slane %v3723_v36, 2  ;;  %v3688_v37 = vadd.f32 %v3687_v15, %v3686_v13 }
 0x331   : > { %v3694_v45 = vadd.f32 %v3693_v18, %v3692_v19  ;;  %v3713_v17 = vrot.slane %v3712_v60, 1  ;;  %v3744_v34 = vsel %vm356_vm1, %v3642_v3, %v3629_v24  ;;  %v3719_v8 = vrot.slane %v3718_v16, 1 }
 0x332   : > { %v3725_v10 = vadd.f32 %v3724_v51, %v3723_v36  ;;  %v3745_v11 = vsel %vm358_vm2, %v3655_v0, %v3744_v34  ;;  %v3751_v62 = vsel %vm356_vm1, %v3649_v43, %v3636_v14  ;;  %v7519_v38 = vadd.f32 %v7401_v57, %v7265_v63 }
 0x333   : > { %v3707_v54 = vadd.f32 %v3706_v39, %v3705_v31  ;;  %v3746_v22 = vsel %vm360_vm3, %v3668_v48, %v3745_v11  ;;  %v3752_v1 = vsel %vm358_vm2, %v3662_v55, %v3751_v62  ;;  %v3701_v44 = vadd.f32 %v3700_v25, %v3699_v4 }
 0x334   : > { %v3726_v19 = vrot.slane %v3725_v10, 1  ;;  %v3747_v9 = vsel %vm362_vm4, %v3681_v58, %v3746_v22  ;;  %v3753_v24 = vsel %vm360_vm3, %v3675_v30, %v3752_v1  ;;  %v7527_v36 = vadd.f32 %v7425_v12, %v7273_v40 }
 0x335   : > { %v7531_v3 = vadd.f32 %v7428_v47, %v7277_v35  ;;  %v3748_v63 = vsel %vm364_vm5, %v3694_v45, %v3747_v9  ;;  %v3754_v57 = vsel %vm362_vm4, %v3688_v37, %v3753_v24  ;;  %v7535_v31 = vadd.f32 %v3713_v17, %v3712_v60 }
 0x336   : > { %v7537_v25 = vadd.f32 %v3719_v8, %v3718_v16  ;;  %v3765_v55 = vmul.f32 %v7464_v26, %v3589_v33  ;;  %v3766_v40 = vmul.f32 %v7475_v46, %v3590_v21  ;;  %v7545_v12 = vadd.f32 %v3726_v19, %v3725_v10 }
 0x337   : > { %v7548_v35 = vsel %vm366_vm6, %v3707_v54, %v3748_v63  ;;  %v3767_v47 = vmul.f32 %v7464_v26, %v3591_v50  ;;  %v8425_v14 = vunpack.c.h.bf16 %v7382_v61  ;;  %v7557_v0 = vsel %vm364_vm5, %v3701_v44, %v3754_v57 }
 0x338   : > { %v8426_v28 = vunpack.c.l.bf16 %v7387_v41  ;;  %v8427_v21 = vunpack.c.h.bf16 %v7387_v41  ;;  %v8428_v49 = vunpack.c.l.bf16 %v7390_v56  ;;  %v8429_v50 = vunpack.c.h.bf16 %v7390_v56 }
 0x339   : > { %v3768_v43 = vmul.f32 %v7475_v46, %v8425_v14  ;;  %v8430_v23 = vunpack.c.l.bf16 %v7396_v7  ;;  %v8431_v13 = vunpack.c.h.bf16 %v7396_v7  ;;  %v8432_v41 = vunpack.c.l.bf16 %v7408_v59 }
 0x33a   : > { %v3769_v33 = vmul.f32 %v7464_v26, %v8426_v28  ;;  %v3770_v42 = vmul.f32 %v7475_v46, %v8427_v21  ;;  %v3771_v53 = vmul.f32 %v7464_v26, %v8428_v49  ;;  %v3772_v61 = vmul.f32 %v7475_v46, %v8429_v50 }
 0x33b   : > { %v7574_v20 = vmul.f32 %v7464_v26, %v8430_v23  ;;  %v3774_v27 = vmul.f32 %v7475_v46, %v8431_v13  ;;  %v7582_v32 = vmul.f32 %v7464_v26, %v8432_v41  ;;  %v8433_v29 = vunpack.c.h.bf16 %v7408_v59 }
 0x33c   : > { %v8434_v4 = vunpack.c.l.bf16 %v7415_v2  ;;  %v8435_v15 = vunpack.c.h.bf16 %v7415_v2  ;;  %v8436_v18 = vunpack.c.l.bf16 %v7418_v6  ;;  %v3781_v48 = vrot.slane %v3765_v55, 4 }
 0x33d   : > { %v3776_v56 = vmul.f32 %v7475_v46, %v8433_v29  ;;  %v3787_v39 = vsel %vm241_vm0, %v3766_v40, 0.0  ;;  %v3794_v59 = vrot.slane %v3767_v47, 4  ;;  %v3800_v16 = vsel %vm241_vm0, %v3768_v43, 0.0 }
 0x33e   : > { %v7590_v5 = vmul.f32 %v7464_v26, %v8434_v4  ;;  %v3778_v7 = vmul.f32 %v7475_v46, %v8435_v15  ;;  %v7598_v60 = vmul.f32 %v7464_v26, %v8436_v18  ;;  %v3788_v30 = vrot.slane %v3787_v39, 4 }
 0x33f   : > { %v3801_v58 = vrot.slane %v3800_v16, 4  ;;  %v3807_v51 = vrot.slane %v3769_v33, 4  ;;  %v3813_v37 = vsel %vm241_vm0, %v3770_v42, 0.0  ;;  %v3782_v45 = vadd.f32 %v3781_v48, %v3765_v55 }
 0x340   : > { %v3795_v2 = vadd.f32 %v3794_v59, %v3767_v47  ;;  %v3814_v17 = vrot.slane %v3813_v37, 4  ;;  %v3820_v34 = vrot.slane %v3771_v53, 4  ;;  %v3789_v8 = vadd.f32 %v3788_v30, %v3787_v39 }
 0x341   : > { %v3802_v10 = vadd.f32 %v3801_v58, %v3800_v16  ;;  %v3808_v11 = vadd.f32 %v3807_v51, %v3769_v33  ;;  %v3826_v26 = vsel %vm241_vm0, %v3772_v61, 0.0  ;;  %v3783_v62 = vrot.slane %v3782_v45, 2 }
 0x342   : > { %v3796_v54 = vrot.slane %v3795_v2, 2  ;;  %v3815_v22 = vadd.f32 %v3814_v17, %v3813_v37  ;;  %v3821_v1 = vadd.f32 %v3820_v34, %v3771_v53  ;;  %v3790_v44 = vrot.slane %v3789_v8, 2 }
 0x343   : > { %v3803_v19 = vrot.slane %v3802_v10, 2  ;;  %v3809_v9 = vrot.slane %v3808_v11, 2  ;;  %v3827_v24 = vrot.slane %v3826_v26, 4  ;;  %v3784_v63 = vadd.f32 %v3783_v62, %v3782_v45 }
 0x344   : > { %v3797_v57 = vadd.f32 %v3796_v54, %v3795_v2  ;;  %v3816_v40 = vrot.slane %v3815_v22, 2  ;;  %v3822_v55 = vrot.slane %v3821_v1, 2  ;;  %v3791_v47 = vadd.f32 %v3790_v44, %v3789_v8 }
 0x345   : > { %v3804_v14 = vadd.f32 %v3803_v19, %v3802_v10  ;;  %v3810_v43 = vadd.f32 %v3809_v9, %v3808_v11  ;;  %v3828_v28 = vadd.f32 %v3827_v24, %v3826_v26  ;;  %v3785_v21 = vrot.slane %v3784_v63, 1 }
 0x346   : > { %v3798_v33 = vrot.slane %v3797_v57, 1  ;;  %v3817_v42 = vadd.f32 %v3816_v40, %v3815_v22  ;;  %v3823_v49 = vadd.f32 %v3822_v55, %v3821_v1  ;;  %v3792_v50 = vrot.slane %v3791_v47, 1 }
 0x347   : > { %v3805_v61 = vrot.slane %v3804_v14, 1  ;;  %v3811_v23 = vrot.slane %v3810_v43, 1  ;;  %v3829_v53 = vrot.slane %v3828_v28, 2  ;;  %v8437_v13 = vunpack.c.h.bf16 %v7418_v6 }
 0x348   : > { %v3786_v29 = vadd.f32 %v3785_v21, %v3784_v63  ;;  %v3818_v4 = vrot.slane %v3817_v42, 1  ;;  %v3824_v15 = vrot.slane %v3823_v49, 1  ;;  %v3793_v18 = vadd.f32 %v3792_v50, %v3791_v47 }
 0x349   : > { %v3780_v41 = vmul.f32 %v7475_v46, %v8437_v13  ;;  %v3799_v48 = vadd.f32 %v3798_v33, %v3797_v57  ;;  %v3806_v39 = vadd.f32 %v3805_v61, %v3804_v14  ;;  %v3830_v59 = vadd.f32 %v3829_v53, %v3828_v28 }
 0x34a   : > { %v3812_v16 = vadd.f32 %v3811_v23, %v3810_v43  ;;  %v3819_v30 = vadd.f32 %v3818_v4, %v3817_v42  ;;  %v3833_v58 = vrot.slane %v7574_v20, 4  ;;  %v3839_v51 = vsel %vm241_vm0, %v3774_v27, 0.0 }
 0x34b   : > { %v3825_v37 = vadd.f32 %v3824_v15, %v3823_v49  ;;  %v3840_v45 = vrot.slane %v3839_v51, 4  ;;  %v3846_v2 = vrot.slane %v7582_v32, 4  ;;  %v3852_v6 = vsel %vm241_vm0, %v3776_v56, 0.0 }
 0x34c   : > { %v3834_v46 = vadd.f32 %v3833_v58, %v7574_v20  ;;  %v3853_v17 = vrot.slane %v3852_v6, 4  ;;  %v3859_v34 = vrot.slane %v7590_v5, 4  ;;  %v3865_v8 = vsel %vm241_vm0, %v3778_v7, 0.0 }
 0x34d   : > { %v3831_v10 = vrot.slane %v3830_v59, 1  ;;  %v3841_v11 = vadd.f32 %v3840_v45, %v3839_v51  ;;  %v3847_v26 = vadd.f32 %v3846_v2, %v7582_v32  ;;  %v3866_v62 = vrot.slane %v3865_v8, 4 }
 0x34e   : > { %v3835_v54 = vrot.slane %v3834_v46, 2  ;;  %v3854_v27 = vadd.f32 %v3853_v17, %v3852_v6  ;;  %v3860_v22 = vadd.f32 %v3859_v34, %v7590_v5  ;;  %v3872_v1 = vrot.slane %v7598_v60, 4 }
 0x34f   : > { %v3842_v44 = vrot.slane %v3841_v11, 2  ;;  %v3848_v56 = vrot.slane %v3847_v26, 2  ;;  %v3867_v19 = vadd.f32 %v3866_v62, %v3865_v8  ;;  %v3878_v20 = vsel %vm241_vm0, %v3780_v41, 0.0 }
 0x350   : > { %v3836_v9 = vadd.f32 %v3835_v54, %v3834_v46  ;;  %v3855_v24 = vrot.slane %v3854_v27, 2  ;;  %v3861_v63 = vrot.slane %v3860_v22, 2  ;;  %v3873_v7 = vadd.f32 %v3872_v1, %v7598_v60  ;;  %v7623_v46 = vld [vmem:[%s4850_s27 + $0x58] sm:$0xff] }
 0x351   : > { %v3843_v57 = vadd.f32 %v3842_v44, %v3841_v11  ;;  %v3849_v40 = vadd.f32 %v3848_v56, %v3847_v26  ;;  %v3868_v32 = vrot.slane %v3867_v19, 2  ;;  %v3879_v55 = vrot.slane %v3878_v20, 4  ;;  %v7650_v54 = vld [vmem:[%s4850_s27 + $0x1f8] sm:$0xff]  ;;  %v7662_v56 = vld [vmem:[%s4850_s27 + $0x260] sm:$0xff] }
 0x352   : > { %v3837_v47 = vrot.slane %v3836_v9, 1  ;;  %v3856_v14 = vadd.f32 %v3855_v24, %v3854_v27  ;;  %v3862_v43 = vadd.f32 %v3861_v63, %v3860_v22  ;;  %v3874_v5 = vrot.slane %v3873_v7, 2  ;;  %v7672_v24 = vld [vmem:[%s4850_s27 + $0x330] sm:$0xff] }
 0x353   : > { %v3844_v28 = vrot.slane %v3843_v57, 1  ;;  %v3850_v21 = vrot.slane %v3849_v40, 1  ;;  %v3869_v33 = vadd.f32 %v3868_v32, %v3867_v19  ;;  %v3880_v42 = vadd.f32 %v3879_v55, %v3878_v20  ;;  %v3943_v20 = vld [vmem:[%s8142_s0 + $0x58] sm:$0xff] }
 0x354   : > { %v3832_v49 = vadd.f32 %v3831_v10, %v3830_v59  ;;  %v3857_v50 = vrot.slane %v3856_v14, 1  ;;  %v3863_v61 = vrot.slane %v3862_v43, 1  ;;  %v3875_v23 = vadd.f32 %v3874_v5, %v3873_v7 }
 0x355   : > { %v3838_v53 = vadd.f32 %v3837_v47, %v3836_v9  ;;  %v3845_v13 = vadd.f32 %v3844_v28, %v3843_v57  ;;  %v3870_v60 = vrot.slane %v3869_v33, 1  ;;  %v3881_v41 = vrot.slane %v3880_v42, 2  ;;  %v7669_v9 = vld [vmem:[%s4850_s27 + $0x2c8] sm:$0xff] }
 0x356   : > { %v3851_v4 = vadd.f32 %v3850_v21, %v3849_v40  ;;  %v3858_v15 = vadd.f32 %v3857_v50, %v3856_v14  ;;  %v3876_v58 = vrot.slane %v3875_v23, 1  ;;  %v3901_v51 = vsel %vm356_vm1, %v3799_v48, %v3786_v29 }
 0x357   : > { %v3864_v45 = vadd.f32 %v3863_v61, %v3862_v43  ;;  %v3882_v2 = vadd.f32 %v3881_v41, %v3880_v42  ;;  %v3902_v6 = vsel %vm358_vm2, %v3812_v16, %v3901_v51  ;;  %v3908_v59 = vsel %vm356_vm1, %v3806_v39, %v3793_v18  ;;  %v7636_v39 = vld [vmem:[%s4850_s27 + $0xc0] sm:$0xff] }
 0x358   : > { %v3750_v17 = vsel %vm368_vm7, %v7537_v25, %v7548_v35  ;;  %v3871_v34 = vadd.f32 %v3870_v60, %v3869_v33  ;;  %v3903_v8 = vsel %vm360_vm3, %v3825_v37, %v3902_v6  ;;  %v3909_v29 = vsel %vm358_vm2, %v3819_v30, %v3908_v59  ;;  %v7641_v30 = vld [vmem:[%s4850_s27 + $0x128] sm:$0xff]  ;;  %v7644_v37 = vld [vmem:[%s4850_s27 + $0x190] sm:$0xff] }
 0x359   : > { %v3756_v48 = vsel %vm366_vm6, %v7535_v31, %v7557_v0  ;;  %v3883_v16 = vrot.slane %v3882_v2, 1  ;;  %v3904_v10 = vsel %vm362_vm4, %v3838_v53, %v3903_v8  ;;  %v3910_v18 = vsel %vm360_vm3, %v3832_v49, %v3909_v29 }
 0x35a   : > { %v3877_v11 = vadd.f32 %v3876_v58, %v3875_v23  ;;  %v3905_v25 = vsel %vm364_vm5, %v3851_v4, %v3904_v10  ;;  %v3911_v35 = vsel %vm362_vm4, %v3845_v13, %v3910_v18  ;;  %v3927_v31 = vunpack.c.l.bf16 %v7623_v46 }
 0x35b   : > { %v3884_v0 = vadd.f32 %v3883_v16, %v3882_v2  ;;  %v3906_v26 = vsel %vm366_vm6, %v3864_v45, %v3905_v25  ;;  %v3912_v62 = vsel %vm364_vm5, %v3858_v15, %v3911_v35  ;;  %v3928_v27 = vunpack.c.h.bf16 %v7623_v46 }
 0x35c   : > { %v7655_v22 = vsel %vm368_vm7, %v7545_v12, %v3756_v48  ;;  %v7658_v1 = vadd.f32 %v3750_v17, %v7404_v52  ;;  %v3913_v44 = vsel %vm366_vm6, %v3871_v34, %v3912_v62  ;;  %v3929_v19 = vunpack.c.l.bf16 %v7636_v39 }
 0x35d   : > { %v3930_v12 = vunpack.c.h.bf16 %v7636_v39  ;;  %v3931_v63 = vunpack.c.l.bf16 %v7641_v30  ;;  %v3932_v52 = vunpack.c.h.bf16 %v7641_v30  ;;  %v3933_v7 = vunpack.c.l.bf16 %v7644_v37 }
 0x35e   : > { %v7679_v57 = vsel %vm368_vm7, %v3877_v11, %v3906_v26  ;;  %v7682_v40 = vsel %vm368_vm7, %v3884_v0, %v3913_v44  ;;  %v8287_v32 = vunpack.c.h.bf16 %v7644_v37  ;;  %v8285_v55 = vunpack.c.l.bf16 %v7650_v54 }
 0x35f   : > { %v8284_v47 = vunpack.c.h.bf16 %v7650_v54  ;;  %v8283_v14 = vunpack.c.l.bf16 %v7662_v56  ;;  %v3944_v43 = vunpack.c.l.bf16 %v3943_v20  ;;  %v3945_v5 = vunpack.c.h.bf16 %v3943_v20 }
 0x360   : > { %v8282_v28 = vunpack.c.h.bf16 %v7662_v56  ;;  %v8281_v21 = vunpack.c.l.bf16 %v7669_v9  ;;  %v8280_v33 = vunpack.c.h.bf16 %v7669_v9  ;;  %v8279_v42 = vunpack.c.l.bf16 %v7672_v24 }
 0x361   : > { %v3946_v49 = vmul.f32 %v3944_v43, %v3927_v31  ;;  %v3947_v50 = vmul.f32 %v3945_v5, %v3928_v27  ;;  %v3948_v61 = vmul.f32 %v3944_v43, %v3929_v19  ;;  %v3949_v23 = vmul.f32 %v3945_v5, %v3930_v12 }
 0x362   : > { %v8286_v53 = vunpack.c.h.bf16 %v7672_v24  ;;  %v3950_v13 = vmul.f32 %v3944_v43, %v3931_v63  ;;  %v3951_v60 = vmul.f32 %v3945_v5, %v3932_v52  ;;  %v3952_v41 = vmul.f32 %v3944_v43, %v3933_v7 }
 0x363   : > { %v3953_v4 = vmul.f32 %v3945_v5, %v8287_v32  ;;  %v7711_v15 = vmul.f32 %v3944_v43, %v8285_v55  ;;  %v3955_v58 = vmul.f32 %v3945_v5, %v8284_v47  ;;  %v7717_v51 = vmul.f32 %v3944_v43, %v8283_v14 }
 0x364   : > { %v3957_v45 = vmul.f32 %v3945_v5, %v8282_v28  ;;  %v7723_v2 = vmul.f32 %v3944_v43, %v8281_v21  ;;  %v3959_v6 = vmul.f32 %v3945_v5, %v8280_v33  ;;  %v7729_v59 = vmul.f32 %v3944_v43, %v8279_v42 }
 0x365   : > { %v3962_v17 = vrot.slane %v3946_v49, 4  ;;  %v3968_v34 = vsel %vm241_vm0, %v3947_v50, 0.0  ;;  %v3975_v8 = vrot.slane %v3948_v61, 4  ;;  %v3981_v29 = vsel %vm241_vm0, %v3949_v23, 0.0 }
 0x366   : > { %v3969_v48 = vrot.slane %v3968_v34, 4  ;;  %v3982_v16 = vrot.slane %v3981_v29, 4  ;;  %v3988_v10 = vrot.slane %v3950_v13, 4  ;;  %v3994_v18 = vsel %vm241_vm0, %v3951_v60, 0.0 }
 0x367   : > { %v3963_v11 = vadd.f32 %v3962_v17, %v3946_v49  ;;  %v3976_v25 = vadd.f32 %v3975_v8, %v3948_v61  ;;  %v3995_v35 = vrot.slane %v3994_v18, 4  ;;  %v4001_v0 = vrot.slane %v3952_v41, 4 }
 0x368   : > { %v3970_v26 = vadd.f32 %v3969_v48, %v3968_v34  ;;  %v3983_v62 = vadd.f32 %v3982_v16, %v3981_v29  ;;  %v3989_v44 = vadd.f32 %v3988_v10, %v3950_v13  ;;  %v4007_v20 = vsel %vm241_vm0, %v3953_v4, 0.0 }
 0x369   : > { %v3964_v43 = vrot.slane %v3963_v11, 2  ;;  %v3977_v42 = vrot.slane %v3976_v25, 2  ;;  %v3996_v50 = vadd.f32 %v3995_v35, %v3994_v18  ;;  %v4002_v33 = vadd.f32 %v4001_v0, %v3952_v41 }
 0x36a   : > { %v3971_v21 = vrot.slane %v3970_v26, 2  ;;  %v3984_v23 = vrot.slane %v3983_v62, 2  ;;  %v3990_v28 = vrot.slane %v3989_v44, 2  ;;  %v4008_v14 = vrot.slane %v4007_v20, 4 }
 0x36b   : > { %v3965_v47 = vadd.f32 %v3964_v43, %v3963_v11  ;;  %v3978_v55 = vadd.f32 %v3977_v42, %v3976_v25  ;;  %v3997_v60 = vrot.slane %v3996_v50, 2  ;;  %v4003_v49 = vrot.slane %v4002_v33, 2 }
 0x36c   : > { %v3972_v61 = vadd.f32 %v3971_v21, %v3970_v26  ;;  %v3985_v17 = vadd.f32 %v3984_v23, %v3983_v62  ;;  %v3991_v8 = vadd.f32 %v3990_v28, %v3989_v44  ;;  %v4009_v34 = vadd.f32 %v4008_v14, %v4007_v20 }
 0x36d   : > { %v3966_v29 = vrot.slane %v3965_v47, 1  ;;  %v3979_v13 = vrot.slane %v3978_v55, 1  ;;  %v3998_v48 = vadd.f32 %v3997_v60, %v3996_v50  ;;  %v4004_v4 = vadd.f32 %v4003_v49, %v4002_v33 }
 0x36e   : > { %v3973_v16 = vrot.slane %v3972_v61, 1  ;;  %v3986_v10 = vrot.slane %v3985_v17, 1  ;;  %v3992_v18 = vrot.slane %v3991_v8, 1  ;;  %v4010_v41 = vrot.slane %v4009_v34, 2 }
 0x36f   : > { %v3961_v35 = vmul.f32 %v3945_v5, %v8286_v53  ;;  %v3967_v0 = vadd.f32 %v3966_v29, %v3965_v47  ;;  %v3999_v11 = vrot.slane %v3998_v48, 1  ;;  %v4005_v42 = vrot.slane %v4004_v4, 1 }
 0x370   : > { %v3974_v25 = vadd.f32 %v3973_v16, %v3972_v61  ;;  %v3980_v43 = vadd.f32 %v3979_v13, %v3978_v55  ;;  %v3987_v21 = vadd.f32 %v3986_v10, %v3985_v17  ;;  %v4011_v26 = vadd.f32 %v4010_v41, %v4009_v34 }
 0x371   : > { %v3993_v28 = vadd.f32 %v3992_v18, %v3991_v8  ;;  %v4000_v14 = vadd.f32 %v3999_v11, %v3998_v48  ;;  %v4014_v62 = vrot.slane %v7711_v15, 4  ;;  %v4020_v33 = vsel %vm241_vm0, %v3955_v58, 0.0 }
 0x372   : > { %v4006_v44 = vadd.f32 %v4005_v42, %v4004_v4  ;;  %v4021_v20 = vrot.slane %v4020_v33, 4  ;;  %v4027_v50 = vrot.slane %v7717_v51, 4  ;;  %v4033_v23 = vsel %vm241_vm0, %v3957_v45, 0.0 }
 0x373   : > { %v4015_v47 = vadd.f32 %v4014_v62, %v7711_v15  ;;  %v4034_v5 = vrot.slane %v4033_v23, 4  ;;  %v4040_v60 = vrot.slane %v7723_v2, 4  ;;  %v4046_v55 = vsel %vm241_vm0, %v3959_v6, 0.0 }
 0x374   : > { %v4012_v49 = vrot.slane %v4011_v26, 1  ;;  %v4022_v61 = vadd.f32 %v4021_v20, %v4020_v33  ;;  %v4028_v17 = vadd.f32 %v4027_v50, %v7717_v51  ;;  %v4047_v8 = vrot.slane %v4046_v55, 4 }
 0x375   : > { %v4016_v34 = vrot.slane %v4015_v47, 2  ;;  %v4035_v58 = vadd.f32 %v4034_v5, %v4033_v23  ;;  %v4041_v29 = vadd.f32 %v4040_v60, %v7723_v2  ;;  %v4053_v13 = vrot.slane %v7729_v59, 4 }
 0x376   : > { %v4023_v48 = vrot.slane %v4022_v61, 2  ;;  %v4029_v45 = vrot.slane %v4028_v17, 2  ;;  %v4048_v4 = vadd.f32 %v4047_v8, %v4046_v55  ;;  %v4059_v15 = vsel %vm241_vm0, %v3961_v35, 0.0 }
 0x377   : > { %v4017_v16 = vadd.f32 %v4016_v34, %v4015_v47  ;;  %v4036_v10 = vrot.slane %v4035_v58, 2  ;;  %v4042_v18 = vrot.slane %v4041_v29, 2  ;;  %v4054_v6 = vadd.f32 %v4053_v13, %v7729_v59 }
 0x378   : > { %v4024_v41 = vadd.f32 %v4023_v48, %v4022_v61  ;;  %v4030_v11 = vadd.f32 %v4029_v45, %v4028_v17  ;;  %v4049_v51 = vrot.slane %v4048_v4, 2  ;;  %v4060_v42 = vrot.slane %v4059_v15, 4  ;;  %v4734_v61 = vld [vmem:[%s8142_s0 + $0xc0] sm:$0xff] }
 0x379   : > { %v4018_v62 = vrot.slane %v4017_v16, 1  ;;  %v4037_v33 = vadd.f32 %v4036_v10, %v4035_v58  ;;  %v4043_v20 = vadd.f32 %v4042_v18, %v4041_v29  ;;  %v4055_v2 = vrot.slane %v4054_v6, 2 }
 0x37a   : > { %v4025_v50 = vrot.slane %v4024_v41, 1  ;;  %v4031_v23 = vrot.slane %v4030_v11, 1  ;;  %v4050_v5 = vadd.f32 %v4049_v51, %v4048_v4  ;;  %v4061_v60 = vadd.f32 %v4060_v42, %v4059_v15 }
 0x37b   : > { %v4013_v55 = vadd.f32 %v4012_v49, %v4011_v26  ;;  %v4038_v8 = vrot.slane %v4037_v33, 1  ;;  %v4044_v35 = vrot.slane %v4043_v20, 1  ;;  %v4056_v47 = vadd.f32 %v4055_v2, %v4054_v6 }
 0x37c   : > { %v4019_v34 = vadd.f32 %v4018_v62, %v4017_v16  ;;  %v4026_v53 = vadd.f32 %v4025_v50, %v4024_v41  ;;  %v4032_v32 = vadd.f32 %v4031_v23, %v4030_v11  ;;  %v4062_v59 = vrot.slane %v4061_v60, 2 }
 0x37d   : > { %v4039_v17 = vadd.f32 %v4038_v8, %v4037_v33  ;;  %v4051_v58 = vrot.slane %v4050_v5, 1  ;;  %v4057_v29 = vrot.slane %v4056_v47, 1  ;;  %v4082_v13 = vsel %vm356_vm1, %v3980_v43, %v3967_v0 }
 0x37e   : > { %v4045_v48 = vadd.f32 %v4044_v35, %v4043_v20  ;;  %v4063_v45 = vadd.f32 %v4062_v59, %v4061_v60  ;;  %v4083_v26 = vsel %vm358_vm2, %v3993_v28, %v4082_v13  ;;  %v4089_v49 = vsel %vm356_vm1, %v3987_v21, %v3974_v25 }
 0x37f   : > { %v4084_v4 = vsel %vm360_vm3, %v4006_v44, %v4083_v26  ;;  %v4090_v15 = vsel %vm358_vm2, %v4000_v14, %v4089_v49  ;;  %v7757_v16 = vunpack.c.l.bf16 %v4734_v61  ;;  %v7759_v10 = vunpack.c.h.bf16 %v4734_v61 }
 0x380   : > { %v4058_v18 = vadd.f32 %v4057_v29, %v4056_v47  ;;  %v4064_v6 = vrot.slane %v4063_v45, 1  ;;  %v4085_v41 = vsel %vm362_vm4, %v4019_v34, %v4084_v4  ;;  %v4091_v0 = vsel %vm360_vm3, %v4013_v55, %v4090_v15 }
 0x381   : > { %v7765_v43 = vadd.f32 %v7655_v22, %v7519_v38  ;;  %v4052_v28 = vadd.f32 %v4051_v58, %v4050_v5  ;;  %v4086_v25 = vsel %vm364_vm5, %v4032_v32, %v4085_v41  ;;  %v4092_v21 = vsel %vm362_vm4, %v4026_v53, %v4091_v0 }
 0x382   : > { %v7771_v14 = vadd.f32 %v7679_v57, %v7527_v36  ;;  %v7775_v44 = vadd.f32 %v7682_v40, %v7531_v3  ;;  %v4087_v11 = vsel %vm366_vm6, %v4045_v48, %v4086_v25  ;;  %v4093_v51 = vsel %vm364_vm5, %v4039_v17, %v4092_v21 }
 0x383   : > { %v4103_v38 = vmul.f32 %v7757_v16, %v3927_v31  ;;  %v4104_v22 = vmul.f32 %v7759_v10, %v3928_v27  ;;  %v4105_v36 = vmul.f32 %v7757_v16, %v3929_v19  ;;  %v4106_v3 = vmul.f32 %v7759_v10, %v3930_v12 }
 0x384   : > { %8438 = vst [vmem:[#allocation3_spill] sm:$0xff] %v7775_v44  ;;  %v7791_v57 = vadd.f32 %v4064_v6, %v4063_v45  ;;  %v7794_v40 = vsel %vm368_vm7, %v4058_v18, %v4087_v11  ;;  %v4107_v31 = vmul.f32 %v7757_v16, %v3931_v63  ;;  %v4108_v46 = vmul.f32 %v7759_v10, %v3932_v52 }
 0x385   : > { %v7803_v27 = vsel %vm366_vm6, %v4052_v28, %v4093_v51  ;;  %v4109_v39 = vmul.f32 %v7757_v16, %v3933_v7  ;;  %v8439_v19 = vunpack.c.h.bf16 %v7644_v37  ;;  %v8440_v32 = vunpack.c.l.bf16 %v7650_v54 }
 0x386   : > { %v8441_v63 = vunpack.c.h.bf16 %v7650_v54  ;;  %v8442_v52 = vunpack.c.l.bf16 %v7662_v56  ;;  %v8443_v62 = vunpack.c.h.bf16 %v7662_v56  ;;  %v8444_v37 = vunpack.c.l.bf16 %v7669_v9 }
 0x387   : > { %v4110_v12 = vmul.f32 %v7759_v10, %v8439_v19  ;;  %v4111_v53 = vmul.f32 %v7757_v16, %v8440_v32  ;;  %v4119_v20 = vrot.slane %v4103_v38, 4  ;;  %v4125_v2 = vsel %vm241_vm0, %v4104_v22, 0.0 }
 0x388   : > { %v4112_v30 = vmul.f32 %v7759_v10, %v8441_v63  ;;  %v7820_v42 = vmul.f32 %v7757_v16, %v8442_v52  ;;  %v4114_v7 = vmul.f32 %v7759_v10, %v8443_v62  ;;  %v7828_v33 = vmul.f32 %v7757_v16, %v8444_v37 }
 0x389   : > { %v4132_v54 = vrot.slane %v4105_v36, 4  ;;  %v4138_v50 = vsel %vm241_vm0, %v4106_v3, 0.0  ;;  %v4126_v23 = vrot.slane %v4125_v2, 4  ;;  %v4145_v60 = vrot.slane %v4107_v31, 4 }
 0x38a   : > { %v4139_v5 = vrot.slane %v4138_v50, 4  ;;  %v4151_v55 = vsel %vm241_vm0, %v4108_v46, 0.0  ;;  %v4120_v8 = vadd.f32 %v4119_v20, %v4103_v38  ;;  %v4158_v47 = vrot.slane %v4109_v39, 4 }
 0x38b   : > { %v4133_v56 = vadd.f32 %v4132_v54, %v4105_v36  ;;  %v4152_v35 = vrot.slane %v4151_v55, 4  ;;  %v4127_v34 = vadd.f32 %v4126_v23, %v4125_v2  ;;  %v4146_v61 = vadd.f32 %v4145_v60, %v4107_v31 }
 0x38c   : > { %v4140_v59 = vadd.f32 %v4139_v5, %v4138_v50  ;;  %v4164_v17 = vsel %vm241_vm0, %v4110_v12, 0.0  ;;  %v4121_v58 = vrot.slane %v4120_v8, 2  ;;  %v4159_v48 = vadd.f32 %v4158_v47, %v4109_v39 }
 0x38d   : > { %v4134_v29 = vrot.slane %v4133_v56, 2  ;;  %v4153_v13 = vadd.f32 %v4152_v35, %v4151_v55  ;;  %v4128_v45 = vrot.slane %v4127_v34, 2  ;;  %v4147_v49 = vrot.slane %v4146_v61, 2 }
 0x38e   : > { %v4141_v26 = vrot.slane %v4140_v59, 2  ;;  %v4165_v4 = vrot.slane %v4164_v17, 4  ;;  %v4122_v15 = vadd.f32 %v4121_v58, %v4120_v8  ;;  %v4160_v41 = vrot.slane %v4159_v48, 2 }
 0x38f   : > { %v4135_v18 = vadd.f32 %v4134_v29, %v4133_v56  ;;  %v4154_v6 = vrot.slane %v4153_v13, 2  ;;  %v4129_v0 = vadd.f32 %v4128_v45, %v4127_v34  ;;  %v4148_v25 = vadd.f32 %v4147_v49, %v4146_v61 }
 0x390   : > { %v4142_v28 = vadd.f32 %v4141_v26, %v4140_v59  ;;  %v4166_v21 = vadd.f32 %v4165_v4, %v4164_v17  ;;  %v4123_v11 = vrot.slane %v4122_v15, 1  ;;  %v4161_v22 = vadd.f32 %v4160_v41, %v4159_v48 }
 0x391   : > { %v4136_v51 = vrot.slane %v4135_v18, 1  ;;  %v4155_v38 = vadd.f32 %v4154_v6, %v4153_v13  ;;  %v4130_v36 = vrot.slane %v4129_v0, 1  ;;  %v4149_v31 = vrot.slane %v4148_v25, 1 }
 0x392   : > { %v4143_v3 = vrot.slane %v4142_v28, 1  ;;  %v4167_v46 = vrot.slane %v4166_v21, 2  ;;  %v8445_v39 = vunpack.c.h.bf16 %v7669_v9  ;;  %v8446_v12 = vunpack.c.l.bf16 %v7672_v24 }
 0x393   : > { %v8447_v63 = vunpack.c.h.bf16 %v7672_v24  ;;  %v4124_v62 = vadd.f32 %v4123_v11, %v4122_v15  ;;  %v4137_v37 = vadd.f32 %v4136_v51, %v4135_v18  ;;  %v4156_v20 = vrot.slane %v4155_v38, 1 }
 0x394   : > { %v4116_v19 = vmul.f32 %v7759_v10, %v8445_v39  ;;  %v4117_v32 = vmul.f32 %v7757_v16, %v8446_v12  ;;  %v4162_v2 = vrot.slane %v4161_v22, 1  ;;  %v4168_v54 = vadd.f32 %v4167_v46, %v4166_v21 }
 0x395   : > { %v4118_v52 = vmul.f32 %v7759_v10, %v8447_v63  ;;  %v4131_v50 = vadd.f32 %v4130_v36, %v4129_v0  ;;  %v4144_v23 = vadd.f32 %v4143_v3, %v4142_v28  ;;  %v4171_v5 = vrot.slane %v4111_v53, 4 }
 0x396   : > { %v4177_v9 = vsel %vm241_vm0, %v4112_v30, 0.0  ;;  %v4150_v60 = vadd.f32 %v4149_v31, %v4148_v25  ;;  %v4184_v8 = vrot.slane %v7820_v42, 4  ;;  %v4190_v16 = vsel %vm241_vm0, %v4114_v7, 0.0 }
 0x397   : > { %v4178_v55 = vrot.slane %v4177_v9, 4  ;;  %v4172_v56 = vadd.f32 %v4171_v5, %v4111_v53  ;;  %v4191_v24 = vrot.slane %v4190_v16, 4  ;;  %v4197_v10 = vrot.slane %v7828_v33, 4 }
 0x398   : > { %v4203_v35 = vsel %vm241_vm0, %v4116_v19, 0.0  ;;  %v4169_v47 = vrot.slane %v4168_v54, 1  ;;  %v4185_v59 = vadd.f32 %v4184_v8, %v7820_v42  ;;  %v4210_v29 = vrot.slane %v4117_v32, 4 }
 0x399   : > { %v4179_v34 = vadd.f32 %v4178_v55, %v4177_v9  ;;  %v4204_v61 = vrot.slane %v4203_v35, 4  ;;  %v4173_v17 = vrot.slane %v4172_v56, 2  ;;  %v4192_v58 = vadd.f32 %v4191_v24, %v4190_v16 }
 0x39a   : > { %v4198_v30 = vadd.f32 %v4197_v10, %v7828_v33  ;;  %v4186_v48 = vrot.slane %v4185_v59, 2  ;;  %v4216_v53 = vsel %vm241_vm0, %v4118_v52, 0.0  ;;  %v4211_v4 = vadd.f32 %v4210_v29, %v4117_v32  ;;  %v7891_v29 = vld [vmem:[%s4850_s27 + $0x268] sm:$0x33] }
 0x39b   : > { %v4180_v13 = vrot.slane %v4179_v34, 2  ;;  %v4205_v45 = vadd.f32 %v4204_v61, %v4203_v35  ;;  %v4174_v7 = vadd.f32 %v4173_v17, %v4172_v56  ;;  %v4193_v26 = vrot.slane %v4192_v58, 2  ;;  %v7873_v35 = vld [vmem:[%s4850_s27 + $0x198] sm:$0x33]  ;;  %v7885_v17 = vld [vmem:[%s4850_s27 + $0x200] sm:$0x33] }
 0x39c   : > { %v4199_v49 = vrot.slane %v4198_v30, 2  ;;  %v4187_v18 = vadd.f32 %v4186_v48, %v4185_v59  ;;  %v4217_v41 = vrot.slane %v4216_v53, 4  ;;  %v4212_v25 = vrot.slane %v4211_v4, 2 }
 0x39d   : > { %v4181_v15 = vadd.f32 %v4180_v13, %v4179_v34  ;;  %v4206_v6 = vrot.slane %v4205_v45, 2  ;;  %v4175_v42 = vrot.slane %v4174_v7, 1  ;;  %v4194_v0 = vadd.f32 %v4193_v26, %v4192_v58 }
 0x39e   : > { %v4200_v28 = vadd.f32 %v4199_v49, %v4198_v30  ;;  %v4188_v33 = vrot.slane %v4187_v18, 1  ;;  %v4218_v51 = vadd.f32 %v4217_v41, %v4216_v53  ;;  %v4157_v36 = vadd.f32 %v4156_v20, %v4155_v38  ;;  %v7905_v53 = vld [vmem:[%s4850_s27 + $0x2d0] sm:$0x33] }
 0x39f   : > { %v4182_v21 = vrot.slane %v4181_v15, 1  ;;  %v4207_v11 = vadd.f32 %v4206_v6, %v4205_v45  ;;  %v4163_v3 = vadd.f32 %v4162_v2, %v4161_v22  ;;  %v4195_v31 = vrot.slane %v4194_v0, 1  ;;  %v7855_v22 = vld [vmem:[%s4850_s27 + $0x60] sm:$0x33] }
 0x3a0   : > { %v4213_v46 = vadd.f32 %v4212_v25, %v4211_v4  ;;  %v4170_v39 = vadd.f32 %v4169_v47, %v4168_v54  ;;  %v4176_v19 = vadd.f32 %v4175_v42, %v4174_v7  ;;  %v4201_v12 = vrot.slane %v4200_v28, 1  ;;  %v7908_v7 = vld [vmem:[%s4850_s27 + $0x338] sm:$0x33]  ;;  %v4735_v25 = vld [vmem:[%s8142_s0 + $0xc8] sm:$0x33] }
 0x3a1   : > { %v4219_v32 = vrot.slane %v4218_v51, 2  ;;  %v4183_v63 = vadd.f32 %v4182_v21, %v4181_v15  ;;  %v4189_v52 = vadd.f32 %v4188_v33, %v4187_v18  ;;  %v4208_v5 = vrot.slane %v4207_v11, 1 }
 0x3a2   : > { %v4239_v9 = vsel %vm356_vm1, %v4137_v37, %v4124_v62  ;;  %v4196_v55 = vadd.f32 %v4195_v31, %v4194_v0  ;;  %v4246_v38 = vsel %vm356_vm1, %v4144_v23, %v4131_v50  ;;  %v4095_v20 = vsel %vm368_vm7, %v7791_v57, %v7803_v27  ;;  %v7865_v50 = vld [vmem:[%s4850_s27 + $0xc8] sm:$0x33]  ;;  %v7868_v23 = vld [vmem:[%s4850_s27 + $0x130] sm:$0x33] }
 0x3a3   : > { %v4220_v8 = vadd.f32 %v4219_v32, %v4218_v51  ;;  %v4240_v16 = vsel %vm358_vm2, %v4150_v60, %v4239_v9  ;;  %v4214_v2 = vrot.slane %v4213_v46, 1  ;;  %v4247_v56 = vsel %vm358_vm2, %v4157_v36, %v4246_v38 }
 0x3a4   : > { %v4241_v54 = vsel %vm360_vm3, %v4163_v3, %v4240_v16  ;;  %v4202_v62 = vadd.f32 %v4201_v12, %v4200_v28  ;;  %v4248_v24 = vsel %vm360_vm3, %v4170_v39, %v4247_v56  ;;  %v4209_v10 = vadd.f32 %v4208_v5, %v4207_v11 }
 0x3a5   : > { %v4221_v37 = vrot.slane %v4220_v8, 1  ;;  %v4242_v60 = vsel %vm362_vm4, %v4176_v19, %v4241_v54  ;;  %v4249_v27 = vsel %vm362_vm4, %v4183_v63, %v4248_v24  ;;  %v8299_v47 = vunpack.c.l.bf16 %v7855_v22 }
 0x3a6   : > { %v4243_v57 = vsel %vm364_vm5, %v4189_v52, %v4242_v60  ;;  %v7878_v34 = vadd.f32 %v7794_v40, %v7658_v1  ;;  %v7881_v59 = vadd.f32 %v4095_v20, %v7765_v43  ;;  %v4250_v61 = vsel %vm364_vm5, %v4196_v55, %v4249_v27  ;;  %v4281_v43 = vld [vmem:[%s8142_s0 + $0x60] sm:$0x33] }
 0x3a7   : > { %v8298_v58 = vunpack.c.h.bf16 %v7855_v22  ;;  %v7888_v30 = vadd.f32 %v4214_v2, %v4213_v46  ;;  %v8297_v13 = vunpack.c.l.bf16 %v7865_v50  ;;  %v8296_v48 = vunpack.c.h.bf16 %v7865_v50 }
 0x3a8   : > { %v8295_v1 = vunpack.c.l.bf16 %v7868_v23  ;;  %v7899_v40 = vadd.f32 %v4221_v37, %v4220_v8  ;;  %v7902_v45 = vsel %vm366_vm6, %v4202_v62, %v4243_v57  ;;  %v8294_v26 = vunpack.c.h.bf16 %v7868_v23 }
 0x3a9   : > { %v8293_v49 = vunpack.c.l.bf16 %v7873_v35  ;;  %v7913_v4 = vsel %vm366_vm6, %v4209_v10, %v4250_v61  ;;  %v8292_v15 = vunpack.c.h.bf16 %v7873_v35  ;;  %v8291_v18 = vunpack.c.l.bf16 %v7885_v17 }
 0x3aa   : > { %v8290_v6 = vunpack.c.h.bf16 %v7885_v17  ;;  %v8289_v41 = vunpack.c.l.bf16 %v7891_v29  ;;  %v8288_v42 = vunpack.c.h.bf16 %v7891_v29  ;;  %v7920_v0 = vunpack.c.l.bf16 %v4281_v43 }
 0x3ab   : > { %v7922_v28 = vunpack.c.h.bf16 %v4281_v43  ;;  %v8303_v21 = vunpack.c.l.bf16 %v7905_v53  ;;  %v8302_v33 = vunpack.c.h.bf16 %v7905_v53  ;;  %v8301_v11 = vunpack.c.l.bf16 %v7908_v7 }
 0x3ac   : > { %v8300_v51 = vunpack.c.h.bf16 %v7908_v7  ;;  %v4284_v36 = vmul.f32 %v7920_v0, %v8299_v47  ;;  %v4286_v31 = vmul.f32 %v7920_v0, %v8297_v13  ;;  %v7943_v39 = vunpack.c.l.bf16 %v4735_v25 }
 0x3ad   : > { %v4285_v3 = vmul.f32 %v7922_v28, %v8298_v58  ;;  %v4287_v46 = vmul.f32 %v7922_v28, %v8296_v48  ;;  %v7945_v19 = vunpack.c.h.bf16 %v4735_v25  ;;  %v4288_v12 = vmul.f32 %v7920_v0, %v8295_v1 }
 0x3ae   : > { %v4289_v32 = vmul.f32 %v7922_v28, %v8294_v26  ;;  %v4290_v63 = vmul.f32 %v7920_v0, %v8293_v49  ;;  %v4291_v52 = vmul.f32 %v7922_v28, %v8292_v15  ;;  %v4292_v5 = vmul.f32 %v7920_v0, %v8291_v18 }
 0x3af   : > { %v4293_v9 = vmul.f32 %v7922_v28, %v8290_v6  ;;  %v4294_v55 = vmul.f32 %v7920_v0, %v8289_v41  ;;  %v4295_v8 = vmul.f32 %v7922_v28, %v8288_v42  ;;  %v4301_v16 = vsel %vm4300_vm8, %v4284_v36, 0.0 }
 0x3b0   : > { %v4309_v38 = vsel %vm4308_vm9, %v4285_v3, 0.0  ;;  %v4316_v20 = vsel %vm4300_vm8, %v4286_v31, 0.0  ;;  %v4323_v2 = vsel %vm4308_vm9, %v4287_v46, 0.0  ;;  %v4302_v54 = vrot.slane %v4301_v16, 4 }
 0x3b1   : > { %v4310_v56 = vrot.slane %v4309_v38, 4  ;;  %v4317_v62 = vrot.slane %v4316_v20, 4  ;;  %v4324_v37 = vrot.slane %v4323_v2, 4  ;;  %v4330_v60 = vsel %vm4300_vm8, %v4288_v12, 0.0 }
 0x3b2   : > { %v4337_v24 = vsel %vm4308_vm9, %v4289_v32, 0.0  ;;  %v4344_v10 = vsel %vm4300_vm8, %v4290_v63, 0.0  ;;  %v4351_v57 = vsel %vm4308_vm9, %v4291_v52, 0.0  ;;  %v4303_v27 = vadd.f32 %v4302_v54, %v4301_v16 }
 0x3b3   : > { %v4311_v61 = vadd.f32 %v4310_v56, %v4309_v38  ;;  %v4318_v43 = vadd.f32 %v4317_v62, %v4316_v20  ;;  %v4325_v25 = vadd.f32 %v4324_v37, %v4323_v2  ;;  %v4331_v36 = vrot.slane %v4330_v60, 4 }
 0x3b4   : > { %v4338_v3 = vrot.slane %v4337_v24, 4  ;;  %v4345_v31 = vrot.slane %v4344_v10, 4  ;;  %v4352_v46 = vrot.slane %v4351_v57, 4  ;;  %v4304_v42 = vrot.slane %v4303_v27, 2 }
 0x3b5   : > { %v4312_v41 = vrot.slane %v4311_v61, 2  ;;  %v4319_v6 = vrot.slane %v4318_v43, 2  ;;  %v4326_v18 = vrot.slane %v4325_v25, 2  ;;  %v4332_v15 = vadd.f32 %v4331_v36, %v4330_v60 }
 0x3b6   : > { %v4339_v12 = vadd.f32 %v4338_v3, %v4337_v24  ;;  %v4346_v49 = vadd.f32 %v4345_v31, %v4344_v10  ;;  %v4353_v32 = vadd.f32 %v4352_v46, %v4351_v57  ;;  %v4305_v26 = vadd.f32 %v4304_v42, %v4303_v27 }
 0x3b7   : > { %v4313_v63 = vadd.f32 %v4312_v41, %v4311_v61  ;;  %v4320_v1 = vadd.f32 %v4319_v6, %v4318_v43  ;;  %v4327_v52 = vadd.f32 %v4326_v18, %v4325_v25  ;;  %v4333_v16 = vrot.slane %v4332_v15, 2 }
 0x3b8   : > { %v4340_v38 = vrot.slane %v4339_v12, 2  ;;  %v4347_v20 = vrot.slane %v4346_v49, 2  ;;  %v4354_v2 = vrot.slane %v4353_v32, 2  ;;  %v4306_v54 = vrot.slane %v4305_v26, 1 }
 0x3b9   : > { %v4314_v56 = vrot.slane %v4313_v63, 1  ;;  %v4321_v62 = vrot.slane %v4320_v1, 1  ;;  %v4328_v37 = vrot.slane %v4327_v52, 1  ;;  %v4334_v48 = vadd.f32 %v4333_v16, %v4332_v15 }
 0x3ba   : > { %v4341_v13 = vadd.f32 %v4340_v38, %v4339_v12  ;;  %v4348_v58 = vadd.f32 %v4347_v20, %v4346_v49  ;;  %v4355_v47 = vadd.f32 %v4354_v2, %v4353_v32  ;;  %v4296_v60 = vmul.f32 %v7920_v0, %v8303_v21 }
 0x3bb   : > { %v4297_v18 = vmul.f32 %v7922_v28, %v8302_v33  ;;  %v4298_v6 = vmul.f32 %v7920_v0, %v8301_v11  ;;  %v4299_v41 = vmul.f32 %v7922_v28, %v8300_v51  ;;  %v7991_v15 = vadd.f32 %v4306_v54, %v4305_v26 }
 0x3bc   : > { %v7993_v49 = vadd.f32 %v4314_v56, %v4313_v63  ;;  %v4322_v42 = vadd.f32 %v4321_v62, %v4320_v1  ;;  %v4329_v24 = vadd.f32 %v4328_v37, %v4327_v52  ;;  %v4358_v10 = vsel %vm4300_vm8, %v4292_v5, 0.0 }
 0x3bd   : > { %v4365_v57 = vsel %vm4308_vm9, %v4293_v9, 0.0  ;;  %v4372_v27 = vsel %vm4300_vm8, %v4294_v55, 0.0  ;;  %v4379_v61 = vsel %vm4308_vm9, %v4295_v8, 0.0  ;;  %v4335_v43 = vrot.slane %v4334_v48, 1 }
 0x3be   : > { %v4342_v0 = vrot.slane %v4341_v13, 1  ;;  %v4349_v25 = vrot.slane %v4348_v58, 1  ;;  %v4356_v36 = vrot.slane %v4355_v47, 1  ;;  %v4359_v3 = vrot.slane %v4358_v10, 4 }
 0x3bf   : > { %v4366_v28 = vrot.slane %v4365_v57, 4  ;;  %v4373_v26 = vrot.slane %v4372_v27, 4  ;;  %v4380_v31 = vrot.slane %v4379_v61, 4  ;;  %v4386_v46 = vsel %vm4300_vm8, %v4296_v60, 0.0 }
 0x3c0   : > { %v4393_v1 = vsel %vm4308_vm9, %v4297_v18, 0.0  ;;  %v4400_v5 = vsel %vm4300_vm8, %v4298_v6, 0.0  ;;  %v4407_v9 = vsel %vm4308_vm9, %v4299_v41, 0.0  ;;  %v4360_v12 = vadd.f32 %v4359_v3, %v4358_v10 }
 0x3c1   : > { %v4367_v55 = vadd.f32 %v4366_v28, %v4365_v57  ;;  %v4374_v32 = vadd.f32 %v4373_v26, %v4372_v27  ;;  %v4381_v8 = vadd.f32 %v4380_v31, %v4379_v61  ;;  %v4387_v63 = vrot.slane %v4386_v46, 4 }
 0x3c2   : > { %v4394_v52 = vrot.slane %v4393_v1, 4  ;;  %v4401_v16 = vrot.slane %v4400_v5, 4  ;;  %v4408_v38 = vrot.slane %v4407_v9, 4  ;;  %v4361_v20 = vrot.slane %v4360_v12, 2 }
 0x3c3   : > { %v4368_v2 = vrot.slane %v4367_v55, 2  ;;  %v4375_v54 = vrot.slane %v4374_v32, 2  ;;  %v4382_v56 = vrot.slane %v4381_v8, 2  ;;  %v4388_v62 = vadd.f32 %v4387_v63, %v4386_v46 }
 0x3c4   : > { %v4395_v37 = vadd.f32 %v4394_v52, %v4393_v1  ;;  %v4402_v60 = vadd.f32 %v4401_v16, %v4400_v5  ;;  %v4409_v18 = vadd.f32 %v4408_v38, %v4407_v9  ;;  %v4362_v51 = vadd.f32 %v4361_v20, %v4360_v12 }
 0x3c5   : > { %v4369_v6 = vadd.f32 %v4368_v2, %v4367_v55  ;;  %v4376_v11 = vadd.f32 %v4375_v54, %v4374_v32  ;;  %v4383_v41 = vadd.f32 %v4382_v56, %v4381_v8  ;;  %v4389_v10 = vrot.slane %v4388_v62, 2 }
 0x3c6   : > { %v4396_v57 = vrot.slane %v4395_v37, 2  ;;  %v4403_v27 = vrot.slane %v4402_v60, 2  ;;  %v4410_v61 = vrot.slane %v4409_v18, 2  ;;  %v4363_v3 = vrot.slane %v4362_v51, 1 }
 0x3c7   : > { %v4370_v28 = vrot.slane %v4369_v6, 1  ;;  %v4377_v26 = vrot.slane %v4376_v11, 1  ;;  %v4384_v31 = vrot.slane %v4383_v41, 1  ;;  %v4390_v33 = vadd.f32 %v4389_v10, %v4388_v62 }
 0x3c8   : > { %v4397_v21 = vadd.f32 %v4396_v57, %v4395_v37  ;;  %v4404_v44 = vadd.f32 %v4403_v27, %v4402_v60  ;;  %v4411_v46 = vadd.f32 %v4410_v61, %v4409_v18  ;;  %v4336_v1 = vadd.f32 %v4335_v43, %v4334_v48 }
 0x3c9   : > { %v4343_v5 = vadd.f32 %v4342_v0, %v4341_v13  ;;  %v4350_v9 = vadd.f32 %v4349_v25, %v4348_v58  ;;  %v4357_v12 = vadd.f32 %v4356_v36, %v4355_v47  ;;  %v4391_v55 = vrot.slane %v4390_v33, 1 }
 0x3ca   : > { %v4398_v32 = vrot.slane %v4397_v21, 1  ;;  %v4405_v8 = vrot.slane %v4404_v44, 1  ;;  %v4412_v63 = vrot.slane %v4411_v46, 1  ;;  %v4364_v52 = vadd.f32 %v4363_v3, %v4362_v51 }
 0x3cb   : > { %v4371_v16 = vadd.f32 %v4370_v28, %v4369_v6  ;;  %v4430_v38 = vsel %vm356_vm1, %v4322_v42, %v7991_v15  ;;  %v4437_v20 = vsel %vm356_vm1, %v4329_v24, %v7993_v49  ;;  %v4378_v2 = vadd.f32 %v4377_v26, %v4376_v11 }
 0x3cc   : > { %v4385_v54 = vadd.f32 %v4384_v31, %v4383_v41  ;;  %v8448_v48 = vunpack.c.l.bf16 %v7855_v22  ;;  %v8449_v47 = vunpack.c.h.bf16 %v7855_v22  ;;  %v4392_v43 = vadd.f32 %v4391_v55, %v4390_v33 }
 0x3cd   : > { %v4399_v51 = vadd.f32 %v4398_v32, %v4397_v21  ;;  %v4431_v0 = vsel %vm358_vm2, %v4336_v1, %v4430_v38  ;;  %v4438_v15 = vsel %vm358_vm2, %v4343_v5, %v4437_v20  ;;  %v4406_v42 = vadd.f32 %v4405_v8, %v4404_v44 }
 0x3ce   : > { %v4451_v58 = vmul.f32 %v7943_v39, %v8448_v48  ;;  %v4452_v13 = vmul.f32 %v7945_v19, %v8449_v47  ;;  %v4413_v25 = vadd.f32 %v4412_v63, %v4411_v46  ;;  %v4432_v49 = vsel %vm360_vm3, %v4350_v9, %v4431_v0 }
 0x3cf   : > { %v4439_v11 = vsel %vm360_vm3, %v4357_v12, %v4438_v15  ;;  %v4433_v24 = vsel %vm362_vm4, %v4364_v52, %v4432_v49  ;;  %v8450_v22 = vunpack.c.l.bf16 %v7865_v50  ;;  %v8451_v21 = vunpack.c.h.bf16 %v7865_v50 }
 0x3d0   : > { %v4440_v36 = vsel %vm362_vm4, %v4371_v16, %v4439_v11  ;;  %v4434_v44 = vsel %vm364_vm5, %v4378_v2, %v4433_v24  ;;  %v8452_v37 = vunpack.c.l.bf16 %v7868_v23  ;;  %v8453_v18 = vunpack.c.h.bf16 %v7868_v23 }
 0x3d1   : > { %v4453_v33 = vmul.f32 %v7943_v39, %v8450_v22  ;;  %v4454_v56 = vmul.f32 %v7945_v19, %v8451_v21  ;;  %v4441_v62 = vsel %vm364_vm5, %v4385_v54, %v4440_v36  ;;  %v4435_v41 = vsel %vm366_vm6, %v4392_v43, %v4434_v44 }
 0x3d2   : > { %v4455_v60 = vmul.f32 %v7943_v39, %v8452_v37  ;;  %v4456_v6 = vmul.f32 %v7945_v19, %v8453_v18  ;;  %v4442_v10 = vsel %vm366_vm6, %v4399_v51, %v4441_v62  ;;  %v8454_v50 = vunpack.c.l.bf16 %v7873_v35 }
 0x3d3   : > { %v8455_v27 = vunpack.c.h.bf16 %v7873_v35  ;;  %v4436_v3 = vsel %vm368_vm7, %v4406_v42, %v4435_v41  ;;  %v4443_v28 = vsel %vm368_vm7, %v4413_v25, %v4442_v10  ;;  %v8456_v23 = vunpack.c.l.bf16 %v7885_v17 }
 0x3d4   : > { %v4457_v57 = vmul.f32 %v7943_v39, %v8454_v50  ;;  %v8457_v31 = vunpack.c.h.bf16 %v7885_v17  ;;  %v4446_v1 = vadd.f32 %v4436_v3, %v7878_v34  ;;  %v4447_v5 = vadd.f32 %v4443_v28, %v7881_v59 }
 0x3d5   : > { %v4458_v61 = vmul.f32 %v7945_v19, %v8455_v27  ;;  %v4459_v26 = vmul.f32 %v7943_v39, %v8456_v23  ;;  %v8458_v35 = vunpack.c.l.bf16 %v7891_v29  ;;  %v8459_v12 = vunpack.c.h.bf16 %v7891_v29 }
 0x3d6   : > { %v4460_v46 = vmul.f32 %v7945_v19, %v8457_v31  ;;  %v4467_v32 = vsel %vm4300_vm8, %v4451_v58, 0.0  ;;  %v4474_v8 = vsel %vm4308_vm9, %v4452_v13, 0.0  ;;  %v4481_v17 = vsel %vm4300_vm8, %v4453_v33, 0.0  ;;  %4613 = vst [vmem:[%s8062_s22] sm:$0xff] %v4446_v1  ;;  %4614 = vst.msk [vmem:[%s8062_s22 + $0x8] sm:$0xff] %vm241_vm0, %v4447_v5 }
 0x3d7   : > { %v4461_v9 = vmul.f32 %v7943_v39, %v8458_v35  ;;  %v4462_v55 = vmul.f32 %v7945_v19, %v8459_v12  ;;  %v4488_v63 = vsel %vm4308_vm9, %v4454_v56, 0.0  ;;  %v4468_v52 = vrot.slane %v4467_v32, 4 }
 0x3d8   : > { %v4475_v34 = vrot.slane %v4474_v8, 4  ;;  %v4482_v16 = vrot.slane %v4481_v17, 4  ;;  %v4489_v59 = vrot.slane %v4488_v63, 4  ;;  %v4495_v29 = vsel %vm4300_vm8, %v4455_v60, 0.0 }
 0x3d9   : > { %v4502_v38 = vsel %vm4308_vm9, %v4456_v6, 0.0  ;;  %v4509_v20 = vsel %vm4300_vm8, %v4457_v57, 0.0  ;;  %v4516_v2 = vsel %vm4308_vm9, %v4458_v61, 0.0  ;;  %v4469_v54 = vadd.f32 %v4468_v52, %v4467_v32 }
 0x3da   : > { %v4476_v48 = vadd.f32 %v4475_v34, %v4474_v8  ;;  %v4483_v58 = vadd.f32 %v4482_v16, %v4481_v17  ;;  %v4490_v47 = vadd.f32 %v4489_v59, %v4488_v63  ;;  %v4496_v13 = vrot.slane %v4495_v29, 4 }
 0x3db   : > { %v4503_v43 = vrot.slane %v4502_v38, 4  ;;  %v4510_v51 = vrot.slane %v4509_v20, 4  ;;  %v4517_v0 = vrot.slane %v4516_v2, 4  ;;  %v4470_v15 = vrot.slane %v4469_v54, 2 }
 0x3dc   : > { %v4477_v42 = vrot.slane %v4476_v48, 2  ;;  %v4484_v25 = vrot.slane %v4483_v58, 2  ;;  %v4491_v49 = vrot.slane %v4490_v47, 2  ;;  %v4497_v11 = vadd.f32 %v4496_v13, %v4495_v29 }
 0x3dd   : > { %v4504_v24 = vadd.f32 %v4503_v43, %v4502_v38  ;;  %v4511_v36 = vadd.f32 %v4510_v51, %v4509_v20  ;;  %v4518_v22 = vadd.f32 %v4517_v0, %v4516_v2  ;;  %v4471_v33 = vadd.f32 %v4470_v15, %v4469_v54 }
 0x3de   : > { %v4478_v21 = vadd.f32 %v4477_v42, %v4476_v48  ;;  %v4485_v56 = vadd.f32 %v4484_v25, %v4483_v58  ;;  %v4492_v44 = vadd.f32 %v4491_v49, %v4490_v47  ;;  %v4498_v62 = vrot.slane %v4497_v11, 2 }
 0x3df   : > { %v4505_v37 = vrot.slane %v4504_v24, 2  ;;  %v4512_v60 = vrot.slane %v4511_v36, 2  ;;  %v4519_v18 = vrot.slane %v4518_v22, 2  ;;  %v4472_v6 = vrot.slane %v4471_v33, 1 }
 0x3e0   : > { %v4479_v41 = vrot.slane %v4478_v21, 1  ;;  %v4486_v10 = vrot.slane %v4485_v56, 1  ;;  %v4493_v50 = vrot.slane %v4492_v44, 1  ;;  %v4499_v57 = vadd.f32 %v4498_v62, %v4497_v11 }
 0x3e1   : > { %v4506_v27 = vadd.f32 %v4505_v37, %v4504_v24  ;;  %v4513_v61 = vadd.f32 %v4512_v60, %v4511_v36  ;;  %v4520_v3 = vadd.f32 %v4519_v18, %v4518_v22  ;;  %v8460_v28 = vunpack.c.l.bf16 %v7905_v53 }
 0x3e2   : > { %v8461_v31 = vunpack.c.h.bf16 %v7905_v53  ;;  %v8462_v5 = vunpack.c.l.bf16 %v7908_v7  ;;  %v8463_v12 = vunpack.c.h.bf16 %v7908_v7  ;;  %v8083_v8 = vadd.f32 %v4472_v6, %v4471_v33 }
 0x3e3   : > { %v4463_v23 = vmul.f32 %v7943_v39, %v8460_v28  ;;  %v8085_v17 = vadd.f32 %v4479_v41, %v4478_v21  ;;  %v4487_v63 = vadd.f32 %v4486_v10, %v4485_v56  ;;  %v4494_v52 = vadd.f32 %v4493_v50, %v4492_v44 }
 0x3e4   : > { %v4464_v1 = vmul.f32 %v7945_v19, %v8461_v31  ;;  %v4465_v35 = vmul.f32 %v7943_v39, %v8462_v5  ;;  %v4466_v32 = vmul.f32 %v7945_v19, %v8463_v12  ;;  %v4523_v34 = vsel %vm4300_vm8, %v4459_v26, 0.0 }
 0x3e5   : > { %v4530_v53 = vsel %vm4308_vm9, %v4460_v46, 0.0  ;;  %v4537_v16 = vsel %vm4300_vm8, %v4461_v9, 0.0  ;;  %v4544_v59 = vsel %vm4308_vm9, %v4462_v55, 0.0  ;;  %v4500_v29 = vrot.slane %v4499_v57, 1 }
 0x3e6   : > { %v4507_v39 = vrot.slane %v4506_v27, 1  ;;  %v4514_v38 = vrot.slane %v4513_v61, 1  ;;  %v4521_v7 = vrot.slane %v4520_v3, 1  ;;  %v4524_v20 = vrot.slane %v4523_v34, 4 }
 0x3e7   : > { %v4531_v19 = vrot.slane %v4530_v53, 4  ;;  %v4538_v2 = vrot.slane %v4537_v16, 4  ;;  %v4545_v54 = vrot.slane %v4544_v59, 4  ;;  %v4551_v48 = vsel %vm4300_vm8, %v4463_v23, 0.0 }
 0x3e8   : > { %v4558_v58 = vsel %vm4308_vm9, %v4464_v1, 0.0  ;;  %v4565_v26 = vsel %vm4300_vm8, %v4465_v35, 0.0  ;;  %v4572_v46 = vsel %vm4308_vm9, %v4466_v32, 0.0  ;;  %v4525_v47 = vadd.f32 %v4524_v20, %v4523_v34 }
 0x3e9   : > { %v4532_v9 = vadd.f32 %v4531_v19, %v4530_v53  ;;  %v4539_v13 = vadd.f32 %v4538_v2, %v4537_v16  ;;  %v4546_v55 = vadd.f32 %v4545_v54, %v4544_v59  ;;  %v4552_v43 = vrot.slane %v4551_v48, 4 }
 0x3ea   : > { %v4559_v51 = vrot.slane %v4558_v58, 4  ;;  %v4566_v0 = vrot.slane %v4565_v26, 4  ;;  %v4573_v15 = vrot.slane %v4572_v46, 4  ;;  %v4526_v42 = vrot.slane %v4525_v47, 2 }
 0x3eb   : > { %v4533_v25 = vrot.slane %v4532_v9, 2  ;;  %v4540_v49 = vrot.slane %v4539_v13, 2  ;;  %v4547_v11 = vrot.slane %v4546_v55, 2  ;;  %v4553_v24 = vadd.f32 %v4552_v43, %v4551_v48 }
 0x3ec   : > { %v4560_v36 = vadd.f32 %v4559_v51, %v4558_v58  ;;  %v4567_v22 = vadd.f32 %v4566_v0, %v4565_v26  ;;  %v4574_v33 = vadd.f32 %v4573_v15, %v4572_v46  ;;  %v4527_v21 = vadd.f32 %v4526_v42, %v4525_v47  ;;  %v4640_v51 = vld [vmem:[%s8062_s22] sm:$0xff] (%p4839_p4)  ;;  %v4642_v0 = vld [vmem:[%s8062_s22 + $0x8] sm:$0xff] (%p4839_p4) }
 0x3ed   : > { %v4534_v56 = vadd.f32 %v4533_v25, %v4532_v9  ;;  %v4541_v44 = vadd.f32 %v4540_v49, %v4539_v13  ;;  %v4548_v62 = vadd.f32 %v4547_v11, %v4546_v55  ;;  %v4554_v37 = vrot.slane %v4553_v24, 2  ;;  %4641 = vst [vmem:[%s4627_s26] sm:$0xff] (%p4839_p4), %v4640_v51  ;;  %4643 = vst [vmem:[%s4627_s26 + $0x8] sm:$0xff] (%p4839_p4), %v4642_v0 }
 0x3ee   : > { %v4561_v60 = vrot.slane %v4560_v36, 2  ;;  %v4568_v18 = vrot.slane %v4567_v22, 2  ;;  %v4575_v6 = vrot.slane %v4574_v33, 2  ;;  %v4528_v41 = vrot.slane %v4527_v21, 1 }
 0x3ef   : > { %v4535_v10 = vrot.slane %v4534_v56, 1  ;;  %v4542_v50 = vrot.slane %v4541_v44, 1  ;;  %v4549_v28 = vrot.slane %v4548_v62, 1  ;;  %v4555_v23 = vadd.f32 %v4554_v37, %v4553_v24 }
 0x3f0   : > { %v4562_v31 = vadd.f32 %v4561_v60, %v4560_v36  ;;  %v4569_v1 = vadd.f32 %v4568_v18, %v4567_v22  ;;  %v4576_v5 = vadd.f32 %v4575_v6, %v4574_v33  ;;  %v4501_v35 = vadd.f32 %v4500_v29, %v4499_v57 }
 0x3f1   : > { %v4508_v12 = vadd.f32 %v4507_v39, %v4506_v27  ;;  %v4515_v32 = vadd.f32 %v4514_v38, %v4513_v61  ;;  %v4522_v34 = vadd.f32 %v4521_v7, %v4520_v3  ;;  %v4556_v53 = vrot.slane %v4555_v23, 1 }
 0x3f2   : > { %v4563_v16 = vrot.slane %v4562_v31, 1  ;;  %v4570_v59 = vrot.slane %v4569_v1, 1  ;;  %v4577_v20 = vrot.slane %v4576_v5, 1  ;;  %v4529_v19 = vadd.f32 %v4528_v41, %v4527_v21 }
 0x3f3   : > { %v4536_v2 = vadd.f32 %v4535_v10, %v4534_v56  ;;  %v4595_v54 = vsel %vm356_vm1, %v4487_v63, %v8083_v8  ;;  %v4602_v48 = vsel %vm356_vm1, %v4494_v52, %v8085_v17  ;;  %v4245_v58 = vsel %vm368_vm7, %v7888_v30, %v7902_v45  ;;  %v8464_v52 = vld [vmem:[#allocation3_spill] sm:$0xff] }
 0x3f4   : > { %v4252_v57 = vsel %vm368_vm7, %v7899_v40, %v7913_v4  ;;  %v4543_v27 = vadd.f32 %v4542_v50, %v4541_v44  ;;  %v4550_v61 = vadd.f32 %v4549_v28, %v4548_v62  ;;  %v4557_v3 = vadd.f32 %v4556_v53, %v4555_v23 }
 0x3f5   : > { %v4564_v29 = vadd.f32 %v4563_v16, %v4562_v31  ;;  %v4596_v39 = vsel %vm358_vm2, %v4501_v35, %v4595_v54  ;;  %v4603_v38 = vsel %vm358_vm2, %v4508_v12, %v4602_v48  ;;  %v4571_v8 = vadd.f32 %v4570_v59, %v4569_v1 }
 0x3f6   : > { %v4578_v63 = vadd.f32 %v4577_v20, %v4576_v5  ;;  %v4597_v17 = vsel %vm360_vm3, %v4515_v32, %v4596_v39  ;;  %v4604_v30 = vsel %vm360_vm3, %v4522_v34, %v4603_v38  ;;  %v4255_v45 = vadd.f32 %v4245_v58, %v7771_v14 }
 0x3f7   : > { %v4256_v40 = vadd.f32 %v4252_v57, %v8464_v52  ;;  %v4598_v4 = vsel %vm362_vm4, %v4529_v19, %v4597_v17  ;;  %v4605_v7 = vsel %vm362_vm4, %v4536_v2, %v4604_v30  ;;  %4624 = sbr.rel (!%p4839_p4) target bundleno = 1030 (0x406), region = 36 }
 0x3f8   : > { %v4599_v26 = vsel %vm364_vm5, %v4543_v27, %v4598_v4  ;;  %v4606_v46 = vsel %vm364_vm5, %v4550_v61, %v4605_v7 }
 0x3f9   : > { %v4600_v47 = vsel %vm366_vm6, %v4557_v3, %v4599_v26  ;;  %v4607_v9 = vsel %vm366_vm6, %v4564_v29, %v4606_v46 }
 0x3fa   : > { %v4601_v13 = vsel %vm368_vm7, %v4571_v8, %v4600_v47  ;;  %v4608_v55 = vsel %vm368_vm7, %v4578_v63, %v4607_v9 }
 0x3fb   : > { %v4611_v43 = vadd.f32 %v4601_v13, %v4255_v45  ;;  %v4612_v14 = vadd.f32 %v4608_v55, %v4256_v40 }
 0x3fd   : > { %4736 = vst [vmem:[%s8062_s22 + $0x10] sm:$0xff] %v4611_v43  ;;  %4737 = vst.msk [vmem:[%s8062_s22 + $0x18] sm:$0xff] %vm241_vm0, %v4612_v14 }
 0x404   : > { %v4644_v15 = vld [vmem:[%s8062_s22 + $0x10] sm:$0xff]  ;;  %v4646_v42 = vld [vmem:[%s8062_s22 + $0x18] sm:$0xff] }
 0x405   : > { %4645 = vst [vmem:[%s4627_s26 + $0x20] sm:$0xff] %v4644_v15  ;;  %4647 = vst [vmem:[%s4627_s26 + $0x28] sm:$0xff] %v4646_v42 }
 0x406 PF: > { %p10_p9 = scmp.ge.s32.totalorder %s4829_s16, 4   ;;  %s8465_s12 = smov %s4788_s13 }
 0x407   : > { %s8466_s13 = smov %s4837_s19  ;;  %s8467_s14 = smov %s4829_s16 }
 0x408   :  { %12 = sbr.rel (!%p10_p9) target bundleno = 2 (0x2), region = 90 }

</bundles_post_ra>
